<compile_context>
chip_gen: v7x
topology: tpu7x:2x2x1
jax: 0.10.0
libtpu: 0.0.40
codegen_flags: <defaults>
</compile_context>

<pallas_src>
import functools

import jax
import jax.numpy as jnp
import numpy as np
from jax.experimental import pallas as pl
from jax.experimental.pallas import tpu as pltpu

# Channel widths of the small synthetic UNet(6, 1)
C_IN, C1, C2, CB, C_OUT = 6, 8, 16, 32, 1
TEMB_DIM = 16

# (name, Cin, Cout) for every 3x3 conv, in forward order.
LAYERS = (
    ("e1a", C_IN, C1), ("e1b", C1, C1),
    ("e2a", C1, C2), ("e2b", C2, C2),
    ("ba", C2, CB), ("bb", CB, CB),
    ("d2a", CB + C2, C2), ("d2b", C2, C2),
    ("d1a", C2 + C1, C1), ("d1b", C1, C1),
)


# ----------------------------------------------------------------------------
# 0/1 gather matrices for pool-downsample / nearest-upsample (numpy, trace time;
# exact in bf16).  Orientation matches [C, H*W] activations: act @ mat.
# ----------------------------------------------------------------------------
def _pool_select_t(h, w):
    """[h*w, (h//2)*(w//2)]: column (py, px) selects flat source (2py, 2px)."""
    ho, wo = h // 2, w // 2
    m = np.zeros((h * w, ho * wo), np.float32)
    for py in range(ho):
        for px in range(wo):
            m[(2 * py) * w + 2 * px, py * wo + px] = 1.0
    return m


def _up_select_t(h, w):
    """[(h//2)*(w//2), h*w]: column (y, x) selects coarse source (y//2, x//2)."""
    ho, wo = h // 2, w // 2
    m = np.zeros((ho * wo, h * w), np.float32)
    for y in range(h):
        for x in range(w):
            m[(y // 2) * wo + (x // 2), y * w + x] = 1.0
    return m


def _time_embed(t, params):
    half = TEMB_DIM // 2
    freqs = jnp.exp(-jnp.arange(half, dtype=jnp.float32)
                    * (jnp.log(10000.0) / (half - 1)))
    args = t.astype(jnp.float32)[:, None] * freqs[None, :]
    emb = jnp.concatenate([jnp.sin(args), jnp.cos(args)], axis=-1)      # [N, 16]
    return jnp.dot(emb, params["temb_w"],
                   precision=jax.lax.Precision.HIGHEST) + params["temb_b"]   # [N, CB]


# ----------------------------------------------------------------------------
# Fully fused UNet kernel: 10 x (3x3 conv) + pools + upsamples + skips +
# time embedding + final 1x1 conv, one sample per grid step, all in VMEM.
# Activation layout: [C, H*W] (spatial on the lane axis).
# ----------------------------------------------------------------------------
def _unet_kernel(x_ref, temb_ref,
                 we1a, be1a, we1b, be1b, we2a, be2a, we2b, be2b,
                 wba, bba, wbb, bbb,
                 wd2a, bd2a, wd2b, bd2b, wd1a, bd1a, wd1b, bd1b,
                 wout, bout,
                 dn1, dn2, up2, up1,
                 o_ref,
                 pad1, pad2, pad3, *, H, W):
    H2, W2, H4, W4 = H // 2, W // 2, H // 4, W // 4
    HW, HW2, HW4 = H * W, H2 * W2, H4 * W4

    # Zero only the halo lane strips of each padded scratch (interiors are fully
    # overwritten before every read).  No program_id guard: under "parallel"
    # megacore sharding each TensorCore owns its own scratch.
    for pad, w_, hw_ in ((pad1, W, HW), (pad2, W2, HW2), (pad3, W4, HW4)):
        c_ = pad.shape[0]
        halo = jnp.zeros((c_, w_ + 1), jnp.float32)
        pad[:, 0:w_ + 1] = halo
        pad[:, w_ + 1 + hw_:2 * w_ + 2 + hw_] = halo

    # Column masks for horizontal-wrap positions of the flat [C, H*W] layout
    # (vertical out-of-bounds reads land in the zero halo and need no mask).
    def col_masks(w_, hw_):
        col = jax.lax.broadcasted_iota(jnp.int32, (1, hw_), 1) % w_
        m_left = (col != 0).astype(jnp.float32)          # valid when reading x-1
        m_right = (col != w_ - 1).astype(jnp.float32)    # valid when reading x+1
        return m_left, m_right

    lvl1 = (W, HW) + col_masks(W, HW)
    lvl2 = (W2, HW2) + col_masks(W2, HW2)
    lvl3 = (W4, HW4) + col_masks(W4, HW4)

    def conv3x3(pad, x_val, w9_ref, b_ref, lvl, cin, cout):
        # x_val: [cin, hw] f32.  Stage into the zero-halo scratch, read once, then
        # 9 tap-accumulated bf16 MXU matmuls with f32 accumulation.
        w_, hw_, m_left, m_right = lvl
        pad[0:cin, w_ + 1:w_ + 1 + hw_] = x_val
        xv = pad[0:cin, :]                               # [cin, hw + 2w + 2]
        acc = jnp.zeros((cout, hw_), jnp.float32)
        for kh in range(3):
            for kw in range(3):
                dy, dx = kh - 1, kw - 1
                off = (w_ + 1) + dy * w_ + dx
                win = xv[:, off:off + hw_]               # shifted window [cin, hw]
                if dx == 1:
                    win = win * m_right
                elif dx == -1:
                    win = win * m_left
                acc = acc + jnp.dot(w9_ref[kh * 3 + kw], win.astype(jnp.bfloat16),
                                    preferred_element_type=jnp.float32)
        return jnp.maximum(acc + b_ref[...], 0.0)        # bias + ReLU, f32

    def maxpool2(pad, x_val, dn_ref, lvl, c):
        # 2x2/stride-2 max; the (even, even) gather rides the idle MXU (0/1 matrix).
        w_, hw_ = lvl[0], lvl[1]
        base = w_ + 1
        pad[0:c, base:base + hw_] = x_val
        xv = pad[0:c, :]
        m = jnp.maximum(
            jnp.maximum(xv[:, base:base + hw_], xv[:, base + 1:base + 1 + hw_]),
            jnp.maximum(xv[:, base + w_:base + w_ + hw_],
                        xv[:, base + w_ + 1:base + w_ + 1 + hw_]))
        return jnp.dot(m.astype(jnp.bfloat16), dn_ref[...],
                       preferred_element_type=jnp.float32)              # [c, hw/4]

    def upsample2(x_val, up_ref):
        return jnp.dot(x_val.astype(jnp.bfloat16), up_ref[...],
                       preferred_element_type=jnp.float32)

    x = x_ref[0].astype(jnp.float32)                     # [C_IN, HW]

    # ---- Encoder ----
    e1 = conv3x3(pad1, x, we1a, be1a, lvl1, C_IN, C1)
    e1 = conv3x3(pad1, e1, we1b, be1b, lvl1, C1, C1)
    p1 = maxpool2(pad1, e1, dn1, lvl1, C1)               # [C1, HW2]

    e2 = conv3x3(pad2, p1, we2a, be2a, lvl2, C1, C2)
    e2 = conv3x3(pad2, e2, we2b, be2b, lvl2, C2, C2)
    p2 = maxpool2(pad2, e2, dn2, lvl2, C2)               # [C2, HW4]

    # ---- Bottleneck (+ timestep embedding) ----
    bt = conv3x3(pad3, p2, wba, bba, lvl3, C2, CB)
    bt = bt + temb_ref[0]                                # [CB, 1] bcast over lanes
    bt = conv3x3(pad3, bt, wbb, bbb, lvl3, CB, CB)

    # ---- Decoder (nearest upsample + cheap sublane-axis skip concat) ----
    u2 = jnp.concatenate([upsample2(bt, up2), e2], axis=0)      # [CB+C2, HW2]
    d2 = conv3x3(pad2, u2, wd2a, bd2a, lvl2, CB + C2, C2)
    d2 = conv3x3(pad2, d2, wd2b, bd2b, lvl2, C2, C2)

    u1 = jnp.concatenate([upsample2(d2, up1), e1], axis=0)      # [C2+C1, HW]
    d1 = conv3x3(pad1, u1, wd1a, bd1a, lvl1, C2 + C1, C1)
    d1 = conv3x3(pad1, d1, wd1b, bd1b, lvl1, C1, C1)

    # ---- Final 1x1 conv (C1 -> 1): single [1, C1] @ [C1, HW]; lane-dense store.
    out = jnp.dot(wout[...], d1.astype(jnp.bfloat16),
                  preferred_element_type=jnp.float32) + bout[...]       # [1, HW]
    o_ref[0] = out


def unet_forward_pallas(params, x_nchw, t):
    N, cin, H, W = x_nchw.shape
    assert cin == C_IN and H % 4 == 0 and W % 4 == 0
    H2, W2, H4, W4 = H // 2, W // 2, H // 4, W // 4
    HW, HW2, HW4 = H * W, H2 * W2, H4 * W4

    # Channels-first flat layout (N, C, H*W): a free reshape from NCHW, and the
    # per-sample DMA tile is lane-dense (H*W on the 128-lane axis).
    x_flat = x_nchw.reshape(N, C_IN, HW).astype(jnp.bfloat16)
    temb = _time_embed(t, params).astype(jnp.float32).reshape(N, CB, 1)

    inputs = [x_flat, temb]
    in_specs = [
        pl.BlockSpec((1, C_IN, HW), lambda n: (n, 0, 0)),
        pl.BlockSpec((1, CB, 1), lambda n: (n, 0, 0)),
    ]

    def add_param(arr, dtype):
        arr = jnp.asarray(arr, dtype)
        inputs.append(arr)
        if arr.ndim == 2:
            imap = lambda n: (0, 0)
        else:
            imap = lambda n: (0, 0, 0)
        in_specs.append(pl.BlockSpec(arr.shape, imap))

    # Conv weights pre-transposed to [9, Cout, Cin] (tap-major) for the
    # spatial-on-lanes layout; biases as [Cout, 1] for lane broadcast.
    for name, ci, co in LAYERS:
        add_param(params[name + "_w"].transpose(0, 1, 3, 2).reshape(9, co, ci),
                  jnp.bfloat16)
        add_param(params[name + "_b"].reshape(co, 1), jnp.float32)
    add_param(params["out_w"].reshape(C1, C_OUT).T, jnp.bfloat16)       # [1, C1]
    add_param(params["out_b"].reshape(C_OUT, 1), jnp.float32)           # [1, 1]

    # 0/1 gather matrices, bf16 (exact).  TODO(synk): O((H*W)^2) footprint; swap
    # for strided gathers at large spatial sizes.
    add_param(_pool_select_t(H, W), jnp.bfloat16)       # dn1: [HW,  HW2]
    add_param(_pool_select_t(H2, W2), jnp.bfloat16)     # dn2: [HW2, HW4]
    add_param(_up_select_t(H2, W2), jnp.bfloat16)       # up2: [HW4, HW2]
    add_param(_up_select_t(H, W), jnp.bfloat16)         # up1: [HW2, HW]

    out = pl.pallas_call(
        functools.partial(_unet_kernel, H=H, W=W),
        out_shape=jax.ShapeDtypeStruct((N, C_OUT, HW), jnp.float32),
        grid=(N,),
        in_specs=in_specs,
        out_specs=pl.BlockSpec((1, C_OUT, HW), lambda n: (n, 0, 0)),
        scratch_shapes=[
            # Zero-halo padded activation scratch, one per UNet level, sized for the
            # widest conv input at that level.
            pltpu.VMEM((C2 + C1, HW + 2 * W + 2), jnp.float32),
            pltpu.VMEM((CB + C2, HW2 + 2 * W2 + 2), jnp.float32),
            pltpu.VMEM((CB, HW4 + 2 * W4 + 2), jnp.float32),
        ],
        # One sample per grid step; "parallel" keeps both v7x TensorCores busy for
        # N >= 2.  Total VMEM use is a few hundred KiB -> no vmem_limit override.
        compiler_params=pltpu.CompilerParams(dimension_semantics=("parallel",)),
    )(*inputs)
    return out.reshape(N, C_OUT, H, W)


# ----------------------------------------------------------------------------
# Pure-JAX reference (layer-by-layer lax.conv, matching bf16-in / f32-acc numerics)
# ----------------------------------------------------------------------------
def _conv2d_ref(x, w, b, relu):
    xq = x.astype(jnp.bfloat16).astype(jnp.float32)
    wq = w.astype(jnp.bfloat16).astype(jnp.float32)
    y = jax.lax.conv_general_dilated(
        xq, wq, window_strides=(1, 1), padding="SAME",
        dimension_numbers=("NHWC", "HWIO", "NHWC"),
        precision=jax.lax.Precision.HIGHEST)
    y = y + b[None, None, None, :].astype(jnp.float32)
    return jnp.maximum(y, 0.0) if relu else y


def _maxpool2_ref(x):
    N, H, W, C = x.shape
    return x.reshape(N, H // 2, 2, W // 2, 2, C).max(axis=(2, 4))


def _upsample2_ref(x):
    return jnp.repeat(jnp.repeat(x, 2, axis=1), 2, axis=2)


def unet_forward_ref(params, x_nchw, t):
    p = params
    x = jnp.transpose(x_nchw, (0, 2, 3, 1)).astype(jnp.float32)
    e1 = _conv2d_ref(x, p["e1a_w"], p["e1a_b"], True)
    e1 = _conv2d_ref(e1, p["e1b_w"], p["e1b_b"], True)
    e2 = _conv2d_ref(_maxpool2_ref(e1), p["e2a_w"], p["e2a_b"], True)
    e2 = _conv2d_ref(e2, p["e2b_w"], p["e2b_b"], True)
    bt = _conv2d_ref(_maxpool2_ref(e2), p["ba_w"], p["ba_b"], True)
    bt = bt + _time_embed(t, p)[:, None, None, :]
    bt = _conv2d_ref(bt, p["bb_w"], p["bb_b"], True)
    u2 = jnp.concatenate([_upsample2_ref(bt), e2], axis=-1)
    d2 = _conv2d_ref(u2, p["d2a_w"], p["d2a_b"], True)
    d2 = _conv2d_ref(d2, p["d2b_w"], p["d2b_b"], True)
    u1 = jnp.concatenate([_upsample2_ref(d2), e1], axis=-1)
    d1 = _conv2d_ref(u1, p["d1a_w"], p["d1a_b"], True)
    d1 = _conv2d_ref(d1, p["d1b_w"], p["d1b_b"], True)
    out = _conv2d_ref(d1, p["out_w"], p["out_b"], False)
    return jnp.transpose(out, (0, 3, 1, 2))


# ----------------------------------------------------------------------------
# Parameters + Trainer-equivalent wrapper (forward pass only)
# ----------------------------------------------------------------------------
def init_params(key):
    shapes = {}
    for name, ci, co in LAYERS:
        shapes[name + "_w"] = (3, 3, ci, co)
        shapes[name + "_b"] = (co,)
    shapes["out_w"] = (1, 1, C1, C_OUT)
    shapes["out_b"] = (C_OUT,)
    shapes["temb_w"] = (TEMB_DIM, CB)
    shapes["temb_b"] = (CB,)

    params = {}
    keys = jax.random.split(key, len(shapes))
    for (name, shp), k in zip(shapes.items(), keys):
        if name.endswith("_b"):
            params[name] = 0.05 * jax.random.normal(k, shp, jnp.float32)
        else:
            fan_in = float(np.prod(shp[:-1]))
            params[name] = (jax.random.normal(k, shp, jnp.float32)
                            * np.sqrt(2.0 / fan_in))
    return params


class Trainer:
    """Forward-pass-only equivalent of the PyTorch Trainer (UNet(6, 1))."""

    def __init__(self, key):
        self.params = init_params(key)
        self._fwd = jax.jit(unet_forward_pallas)

    def forward(self, x_nchw, target=None):
        # PyTorch: result = self.net(input, torch.full((B,), 0))
        t = jnp.zeros((x_nchw.shape[0],), jnp.int32)
        pre = self._fwd(self.params, x_nchw, t)
        self.pre = pre
        self.data = {"HR": x_nchw, "SR": jnp.array(0), "LF": pre, "MF": pre}
        return self.pre


if __name__ == "__main__":
    key = jax.random.PRNGKey(0)
    k_param, k_x = jax.random.split(key)

    N, H, W = 2, 16, 16
    x = jax.random.normal(k_x, (N, C_IN, H, W), jnp.float32)

    trainer = Trainer(k_param)
    out = jax.block_until_ready(trainer.forward(x))

    assert out.shape == (N, 1, H, W), out.shape
    assert bool(jnp.all(jnp.isfinite(out)))

    # Cross-check the single fused Pallas kernel against a layer-by-layer lax.conv
    # UNet with matching bf16-input / f32-accumulation numerics.
    t = jnp.zeros((N,), jnp.int32)
    ref = jax.block_until_ready(unet_forward_ref(trainer.params, x, t))
    max_diff = float(jnp.max(jnp.abs(out - ref)))
    assert max_diff < 1e-2, f"mismatch vs reference: {max_diff}"

    print("KERNEL_OK")
</pallas_src>

<mosaic_0001>
module attributes {stable_mosaic.version = 11 : i64} {
  func.func @_unet_kernel(%arg0: i32, %arg1: memref<1x6x256xbf16, #tpu.memory_space<vmem>>, %arg2: memref<1x32x1xf32, #tpu.memory_space<vmem>>, %arg3: memref<9x8x6xbf16, #tpu.memory_space<vmem>>, %arg4: memref<8x1xf32, #tpu.memory_space<vmem>>, %arg5: memref<9x8x8xbf16, #tpu.memory_space<vmem>>, %arg6: memref<8x1xf32, #tpu.memory_space<vmem>>, %arg7: memref<9x16x8xbf16, #tpu.memory_space<vmem>>, %arg8: memref<16x1xf32, #tpu.memory_space<vmem>>, %arg9: memref<9x16x16xbf16, #tpu.memory_space<vmem>>, %arg10: memref<16x1xf32, #tpu.memory_space<vmem>>, %arg11: memref<9x32x16xbf16, #tpu.memory_space<vmem>>, %arg12: memref<32x1xf32, #tpu.memory_space<vmem>>, %arg13: memref<9x32x32xbf16, #tpu.memory_space<vmem>>, %arg14: memref<32x1xf32, #tpu.memory_space<vmem>>, %arg15: memref<9x16x48xbf16, #tpu.memory_space<vmem>>, %arg16: memref<16x1xf32, #tpu.memory_space<vmem>>, %arg17: memref<9x16x16xbf16, #tpu.memory_space<vmem>>, %arg18: memref<16x1xf32, #tpu.memory_space<vmem>>, %arg19: memref<9x8x24xbf16, #tpu.memory_space<vmem>>, %arg20: memref<8x1xf32, #tpu.memory_space<vmem>>, %arg21: memref<9x8x8xbf16, #tpu.memory_space<vmem>>, %arg22: memref<8x1xf32, #tpu.memory_space<vmem>>, %arg23: memref<1x8xbf16, #tpu.memory_space<vmem>>, %arg24: memref<1x1xf32, #tpu.memory_space<vmem>>, %arg25: memref<256x64xbf16, #tpu.memory_space<vmem>>, %arg26: memref<64x16xbf16, #tpu.memory_space<vmem>>, %arg27: memref<16x64xbf16, #tpu.memory_space<vmem>>, %arg28: memref<64x256xbf16, #tpu.memory_space<vmem>>, %arg29: memref<1x1x256xf32, #tpu.memory_space<vmem>>, %arg30: memref<24x290xf32, #tpu.memory_space<vmem>>, %arg31: memref<48x82xf32, #tpu.memory_space<vmem>>, %arg32: memref<32x26xf32, #tpu.memory_space<vmem>>) attributes {dimension_semantics = [#tpu.dimension_semantics<parallel>], iteration_bounds = array<i64: 2>, scalar_prefetch = 0 : i64, scratch_operands = 3 : i64, tpu.core_type = #tpu.core_type<tc>, window_params = [{transform_indices = @transform_0, window_bounds = array<i64: 1, 6, 256>}, {transform_indices = @transform_1, window_bounds = array<i64: 1, 32, 1>}, {pipeline_mode = #tpu.pipeline_mode<synchronous>, transform_indices = @transform_2, window_bounds = array<i64: 9, 8, 6>}, {pipeline_mode = #tpu.pipeline_mode<synchronous>, transform_indices = @transform_3, window_bounds = array<i64: 8, 1>}, {pipeline_mode = #tpu.pipeline_mode<synchronous>, transform_indices = @transform_4, window_bounds = array<i64: 9, 8, 8>}, {pipeline_mode = #tpu.pipeline_mode<synchronous>, transform_indices = @transform_5, window_bounds = array<i64: 8, 1>}, {pipeline_mode = #tpu.pipeline_mode<synchronous>, transform_indices = @transform_6, window_bounds = array<i64: 9, 16, 8>}, {pipeline_mode = #tpu.pipeline_mode<synchronous>, transform_indices = @transform_7, window_bounds = array<i64: 16, 1>}, {pipeline_mode = #tpu.pipeline_mode<synchronous>, transform_indices = @transform_8, window_bounds = array<i64: 9, 16, 16>}, {pipeline_mode = #tpu.pipeline_mode<synchronous>, transform_indices = @transform_9, window_bounds = array<i64: 16, 1>}, {pipeline_mode = #tpu.pipeline_mode<synchronous>, transform_indices = @transform_10, window_bounds = array<i64: 9, 32, 16>}, {pipeline_mode = #tpu.pipeline_mode<synchronous>, transform_indices = @transform_11, window_bounds = array<i64: 32, 1>}, {pipeline_mode = #tpu.pipeline_mode<synchronous>, transform_indices = @transform_12, window_bounds = array<i64: 9, 32, 32>}, {pipeline_mode = #tpu.pipeline_mode<synchronous>, transform_indices = @transform_13, window_bounds = array<i64: 32, 1>}, {pipeline_mode = #tpu.pipeline_mode<synchronous>, transform_indices = @transform_14, window_bounds = array<i64: 9, 16, 48>}, {pipeline_mode = #tpu.pipeline_mode<synchronous>, transform_indices = @transform_15, window_bounds = array<i64: 16, 1>}, {pipeline_mode = #tpu.pipeline_mode<synchronous>, transform_indices = @transform_16, window_bounds = array<i64: 9, 16, 16>}, {pipeline_mode = #tpu.pipeline_mode<synchronous>, transform_indices = @transform_17, window_bounds = array<i64: 16, 1>}, {pipeline_mode = #tpu.pipeline_mode<synchronous>, transform_indices = @transform_18, window_bounds = array<i64: 9, 8, 24>}, {pipeline_mode = #tpu.pipeline_mode<synchronous>, transform_indices = @transform_19, window_bounds = array<i64: 8, 1>}, {pipeline_mode = #tpu.pipeline_mode<synchronous>, transform_indices = @transform_20, window_bounds = array<i64: 9, 8, 8>}, {pipeline_mode = #tpu.pipeline_mode<synchronous>, transform_indices = @transform_21, window_bounds = array<i64: 8, 1>}, {pipeline_mode = #tpu.pipeline_mode<synchronous>, transform_indices = @transform_22, window_bounds = array<i64: 1, 8>}, {pipeline_mode = #tpu.pipeline_mode<synchronous>, transform_indices = @transform_23, window_bounds = array<i64: 1, 1>}, {pipeline_mode = #tpu.pipeline_mode<synchronous>, transform_indices = @transform_24, window_bounds = array<i64: 256, 64>}, {pipeline_mode = #tpu.pipeline_mode<synchronous>, transform_indices = @transform_25, window_bounds = array<i64: 64, 16>}, {pipeline_mode = #tpu.pipeline_mode<synchronous>, transform_indices = @transform_26, window_bounds = array<i64: 16, 64>}, {pipeline_mode = #tpu.pipeline_mode<synchronous>, transform_indices = @transform_27, window_bounds = array<i64: 64, 256>}, {transform_indices = @transform_28, window_bounds = array<i64: 1, 1, 256>}]} {
    %cst = arith.constant 0.000000e+00 : f32
    %0 = vector.broadcast %cst : f32 to vector<24x17xf32>
    %c0 = arith.constant 0 : index
    %c0_0 = arith.constant 0 : index
    %1 = vector.load %arg30[%c0, %c0_0] : memref<24x290xf32, #tpu.memory_space<vmem>>, vector<24x17xf32>
    tpu.vector_store %arg30[%c0, %c0_0], %0 {strides = array<i32>} : memref<24x290xf32, #tpu.memory_space<vmem>>, vector<24x17xf32>,
    %c0_1 = arith.constant 0 : index
    %c273 = arith.constant 273 : index
    %2 = vector.load %arg30[%c0_1, %c273] : memref<24x290xf32, #tpu.memory_space<vmem>>, vector<24x17xf32>
    tpu.vector_store %arg30[%c0_1, %c273], %0 {strides = array<i32>} : memref<24x290xf32, #tpu.memory_space<vmem>>, vector<24x17xf32>,
    %cst_2 = arith.constant 0.000000e+00 : f32
    %3 = vector.broadcast %cst_2 : f32 to vector<48x9xf32>
    %c0_3 = arith.constant 0 : index
    %c0_4 = arith.constant 0 : index
    %4 = vector.load %arg31[%c0_3, %c0_4] : memref<48x82xf32, #tpu.memory_space<vmem>>, vector<48x9xf32>
    tpu.vector_store %arg31[%c0_3, %c0_4], %3 {strides = array<i32>} : memref<48x82xf32, #tpu.memory_space<vmem>>, vector<48x9xf32>,
    %c0_5 = arith.constant 0 : index
    %c73 = arith.constant 73 : index
    %5 = vector.load %arg31[%c0_5, %c73] : memref<48x82xf32, #tpu.memory_space<vmem>>, vector<48x9xf32>
    tpu.vector_store %arg31[%c0_5, %c73], %3 {strides = array<i32>} : memref<48x82xf32, #tpu.memory_space<vmem>>, vector<48x9xf32>,
    %cst_6 = arith.constant 0.000000e+00 : f32
    %6 = vector.broadcast %cst_6 : f32 to vector<32x5xf32>
    %c0_7 = arith.constant 0 : index
    %c0_8 = arith.constant 0 : index
    %7 = vector.load %arg32[%c0_7, %c0_8] : memref<32x26xf32, #tpu.memory_space<vmem>>, vector<32x5xf32>
    tpu.vector_store %arg32[%c0_7, %c0_8], %6 {strides = array<i32>} : memref<32x26xf32, #tpu.memory_space<vmem>>, vector<32x5xf32>,
    %c0_9 = arith.constant 0 : index
    %c21 = arith.constant 21 : index
    %8 = vector.load %arg32[%c0_9, %c21] : memref<32x26xf32, #tpu.memory_space<vmem>>, vector<32x5xf32>
    tpu.vector_store %arg32[%c0_9, %c21], %6 {strides = array<i32>} : memref<32x26xf32, #tpu.memory_space<vmem>>, vector<32x5xf32>,
    %9 = tpu.iota {dimensions = array<i32: 1>} : vector<1x256xi32>
    %c16_i32 = arith.constant 16 : i32
    %c0_i32 = arith.constant 0 : i32
    %10 = arith.cmpi eq, %c16_i32, %c0_i32 : i32
    %c1_i32 = arith.constant 1 : i32
    %11 = arith.select %10, %c1_i32, %c16_i32 : i32
    %12 = vector.broadcast %11 : i32 to vector<1x256xi32>
    %13 = arith.remsi %9, %12 : vector<1x256xi32>
    %c0_i32_10 = arith.constant 0 : i32
    %14 = vector.broadcast %c0_i32_10 : i32 to vector<1x256xi32>
    %15 = arith.cmpi ne, %13, %14 : vector<1x256xi32>
    %c0_i32_11 = arith.constant 0 : i32
    %16 = vector.broadcast %c0_i32_11 : i32 to vector<1x256xi32>
    %17 = arith.cmpi slt, %13, %16 : vector<1x256xi32>
    %c0_i32_12 = arith.constant 0 : i32
    %18 = arith.cmpi slt, %11, %c0_i32_12 : i32
    %19 = vector.broadcast %18 : i1 to vector<1x256xi1>
    %20 = vector.broadcast %19 : vector<1x256xi1> to vector<1x256xi1>
    %21 = arith.xori %17, %20 : vector<1x256xi1>
    %22 = arith.andi %21, %15 : vector<1x256xi1>
    %23 = vector.broadcast %11 : i32 to vector<1x256xi32>
    %24 = arith.addi %13, %23 : vector<1x256xi32>
    %25 = arith.select %22, %24, %13 : vector<1x256xi1>, vector<1x256xi32>
    %c0_i32_13 = arith.constant 0 : i32
    %26 = vector.broadcast %c0_i32_13 : i32 to vector<1x256xi32>
    %27 = arith.cmpi ne, %25, %26 : vector<1x256xi32>
    %28 = arith.extui %27 : vector<1x256xi1> to vector<1x256xi32>
    %29 = arith.sitofp %28 : vector<1x256xi32> to vector<1x256xf32>
    %c15_i32 = arith.constant 15 : i32
    %30 = vector.broadcast %c15_i32 : i32 to vector<1x256xi32>
    %31 = arith.cmpi ne, %25, %30 : vector<1x256xi32>
    %32 = arith.extui %31 : vector<1x256xi1> to vector<1x256xi32>
    %33 = arith.sitofp %32 : vector<1x256xi32> to vector<1x256xf32>
    %34 = tpu.iota {dimensions = array<i32: 1>} : vector<1x64xi32>
    %c8_i32 = arith.constant 8 : i32
    %c0_i32_14 = arith.constant 0 : i32
    %35 = arith.cmpi eq, %c8_i32, %c0_i32_14 : i32
    %c1_i32_15 = arith.constant 1 : i32
    %36 = arith.select %35, %c1_i32_15, %c8_i32 : i32
    %37 = vector.broadcast %36 : i32 to vector<1x64xi32>
    %38 = arith.remsi %34, %37 : vector<1x64xi32>
    %c0_i32_16 = arith.constant 0 : i32
    %39 = vector.broadcast %c0_i32_16 : i32 to vector<1x64xi32>
    %40 = arith.cmpi ne, %38, %39 : vector<1x64xi32>
    %c0_i32_17 = arith.constant 0 : i32
    %41 = vector.broadcast %c0_i32_17 : i32 to vector<1x64xi32>
    %42 = arith.cmpi slt, %38, %41 : vector<1x64xi32>
    %c0_i32_18 = arith.constant 0 : i32
    %43 = arith.cmpi slt, %36, %c0_i32_18 : i32
    %44 = vector.broadcast %43 : i1 to vector<1x64xi1>
    %45 = vector.broadcast %44 : vector<1x64xi1> to vector<1x64xi1>
    %46 = arith.xori %42, %45 : vector<1x64xi1>
    %47 = arith.andi %46, %40 : vector<1x64xi1>
    %48 = vector.broadcast %36 : i32 to vector<1x64xi32>
    %49 = arith.addi %38, %48 : vector<1x64xi32>
    %50 = arith.select %47, %49, %38 : vector<1x64xi1>, vector<1x64xi32>
    %c0_i32_19 = arith.constant 0 : i32
    %51 = vector.broadcast %c0_i32_19 : i32 to vector<1x64xi32>
    %52 = arith.cmpi ne, %50, %51 : vector<1x64xi32>
    %53 = arith.extui %52 : vector<1x64xi1> to vector<1x64xi32>
    %54 = arith.sitofp %53 : vector<1x64xi32> to vector<1x64xf32>
    %c7_i32 = arith.constant 7 : i32
    %55 = vector.broadcast %c7_i32 : i32 to vector<1x64xi32>
    %56 = arith.cmpi ne, %50, %55 : vector<1x64xi32>
    %57 = arith.extui %56 : vector<1x64xi1> to vector<1x64xi32>
    %58 = arith.sitofp %57 : vector<1x64xi32> to vector<1x64xf32>
    %59 = tpu.iota {dimensions = array<i32: 1>} : vector<1x16xi32>
    %c4_i32 = arith.constant 4 : i32
    %c0_i32_20 = arith.constant 0 : i32
    %60 = arith.cmpi eq, %c4_i32, %c0_i32_20 : i32
    %c1_i32_21 = arith.constant 1 : i32
    %61 = arith.select %60, %c1_i32_21, %c4_i32 : i32
    %62 = vector.broadcast %61 : i32 to vector<1x16xi32>
    %63 = arith.remsi %59, %62 : vector<1x16xi32>
    %c0_i32_22 = arith.constant 0 : i32
    %64 = vector.broadcast %c0_i32_22 : i32 to vector<1x16xi32>
    %65 = arith.cmpi ne, %63, %64 : vector<1x16xi32>
    %c0_i32_23 = arith.constant 0 : i32
    %66 = vector.broadcast %c0_i32_23 : i32 to vector<1x16xi32>
    %67 = arith.cmpi slt, %63, %66 : vector<1x16xi32>
    %c0_i32_24 = arith.constant 0 : i32
    %68 = arith.cmpi slt, %61, %c0_i32_24 : i32
    %69 = vector.broadcast %68 : i1 to vector<1x16xi1>
    %70 = vector.broadcast %69 : vector<1x16xi1> to vector<1x16xi1>
    %71 = arith.xori %67, %70 : vector<1x16xi1>
    %72 = arith.andi %71, %65 : vector<1x16xi1>
    %73 = vector.broadcast %61 : i32 to vector<1x16xi32>
    %74 = arith.addi %63, %73 : vector<1x16xi32>
    %75 = arith.select %72, %74, %63 : vector<1x16xi1>, vector<1x16xi32>
    %c0_i32_25 = arith.constant 0 : i32
    %76 = vector.broadcast %c0_i32_25 : i32 to vector<1x16xi32>
    %77 = arith.cmpi ne, %75, %76 : vector<1x16xi32>
    %78 = arith.extui %77 : vector<1x16xi1> to vector<1x16xi32>
    %79 = arith.sitofp %78 : vector<1x16xi32> to vector<1x16xf32>
    %c3_i32 = arith.constant 3 : i32
    %80 = vector.broadcast %c3_i32 : i32 to vector<1x16xi32>
    %81 = arith.cmpi ne, %75, %80 : vector<1x16xi32>
    %82 = arith.extui %81 : vector<1x16xi1> to vector<1x16xi32>
    %83 = arith.sitofp %82 : vector<1x16xi32> to vector<1x16xf32>
    %c0_26 = arith.constant 0 : index
    %c0_27 = arith.constant 0 : index
    %c0_28 = arith.constant 0 : index
    %84 = vector.load %arg1[%c0_26, %c0_27, %c0_28] : memref<1x6x256xbf16, #tpu.memory_space<vmem>>, vector<1x6x256xbf16>
    %85 = vector.shape_cast %84 : vector<1x6x256xbf16> to vector<6x256xbf16>
    %86 = arith.extf %85 : vector<6x256xbf16> to vector<6x256xf32>
    %c0_29 = arith.constant 0 : index
    %c17 = arith.constant 17 : index
    %87 = vector.load %arg30[%c0_29, %c17] : memref<24x290xf32, #tpu.memory_space<vmem>>, vector<6x256xf32>
    tpu.vector_store %arg30[%c0_29, %c17], %86 {strides = array<i32>} : memref<24x290xf32, #tpu.memory_space<vmem>>, vector<6x256xf32>,
    %c0_30 = arith.constant 0 : index
    %c0_31 = arith.constant 0 : index
    %88 = vector.load %arg30[%c0_30, %c0_31] : memref<24x290xf32, #tpu.memory_space<vmem>>, vector<6x290xf32>
    %cst_32 = arith.constant 0.000000e+00 : f32
    %89 = vector.broadcast %cst_32 : f32 to vector<8x256xf32>
    %90 = vector.extract_strided_slice %88 {offsets = [0, 0], sizes = [6, 256], strides = [1, 1]} : vector<6x290xf32> to vector<6x256xf32>
    %91 = vector.broadcast %29 : vector<1x256xf32> to vector<6x256xf32>
    %92 = arith.mulf %90, %91 : vector<6x256xf32>
    %c0_33 = arith.constant 0 : index
    %c0_34 = arith.constant 0 : index
    %c0_35 = arith.constant 0 : index
    %93 = vector.load %arg3[%c0_33, %c0_34, %c0_35] : memref<9x8x6xbf16, #tpu.memory_space<vmem>>, vector<1x8x6xbf16>
    %94 = vector.shape_cast %93 : vector<1x8x6xbf16> to vector<8x6xbf16>
    %95 = arith.truncf %92 : vector<6x256xf32> to vector<6x256xbf16>
    %cst_36 = arith.constant dense<0.000000e+00> : vector<8x256xf32>
    %96 = tpu.matmul %94, %95, %cst_36 {dimension_numbers = #tpu.dot_dimension_numbers<[1], [0], [0], [1], [0, 0, 1, 1], [], []>} : vector<8x6xbf16>, vector<6x256xbf16>, vector<8x256xf32> -> vector<8x256xf32>
    %97 = arith.addf %89, %96 : vector<8x256xf32>
    %98 = vector.extract_strided_slice %88 {offsets = [0, 1], sizes = [6, 256], strides = [1, 1]} : vector<6x290xf32> to vector<6x256xf32>
    %c1 = arith.constant 1 : index
    %c0_37 = arith.constant 0 : index
    %c0_38 = arith.constant 0 : index
    %99 = vector.load %arg3[%c1, %c0_37, %c0_38] : memref<9x8x6xbf16, #tpu.memory_space<vmem>>, vector<1x8x6xbf16>
    %100 = vector.shape_cast %99 : vector<1x8x6xbf16> to vector<8x6xbf16>
    %101 = arith.truncf %98 : vector<6x256xf32> to vector<6x256xbf16>
    %cst_39 = arith.constant dense<0.000000e+00> : vector<8x256xf32>
    %102 = tpu.matmul %100, %101, %cst_39 {dimension_numbers = #tpu.dot_dimension_numbers<[1], [0], [0], [1], [0, 0, 1, 1], [], []>} : vector<8x6xbf16>, vector<6x256xbf16>, vector<8x256xf32> -> vector<8x256xf32>
    %103 = arith.addf %97, %102 : vector<8x256xf32>
    %104 = vector.extract_strided_slice %88 {offsets = [0, 2], sizes = [6, 256], strides = [1, 1]} : vector<6x290xf32> to vector<6x256xf32>
    %105 = vector.broadcast %33 : vector<1x256xf32> to vector<6x256xf32>
    %106 = arith.mulf %104, %105 : vector<6x256xf32>
    %c2 = arith.constant 2 : index
    %c0_40 = arith.constant 0 : index
    %c0_41 = arith.constant 0 : index
    %107 = vector.load %arg3[%c2, %c0_40, %c0_41] : memref<9x8x6xbf16, #tpu.memory_space<vmem>>, vector<1x8x6xbf16>
    %108 = vector.shape_cast %107 : vector<1x8x6xbf16> to vector<8x6xbf16>
    %109 = arith.truncf %106 : vector<6x256xf32> to vector<6x256xbf16>
    %cst_42 = arith.constant dense<0.000000e+00> : vector<8x256xf32>
    %110 = tpu.matmul %108, %109, %cst_42 {dimension_numbers = #tpu.dot_dimension_numbers<[1], [0], [0], [1], [0, 0, 1, 1], [], []>} : vector<8x6xbf16>, vector<6x256xbf16>, vector<8x256xf32> -> vector<8x256xf32>
    %111 = arith.addf %103, %110 : vector<8x256xf32>
    %112 = vector.extract_strided_slice %88 {offsets = [0, 16], sizes = [6, 256], strides = [1, 1]} : vector<6x290xf32> to vector<6x256xf32>
    %113 = vector.broadcast %29 : vector<1x256xf32> to vector<6x256xf32>
    %114 = arith.mulf %112, %113 : vector<6x256xf32>
    %c3 = arith.constant 3 : index
    %c0_43 = arith.constant 0 : index
    %c0_44 = arith.constant 0 : index
    %115 = vector.load %arg3[%c3, %c0_43, %c0_44] : memref<9x8x6xbf16, #tpu.memory_space<vmem>>, vector<1x8x6xbf16>
    %116 = vector.shape_cast %115 : vector<1x8x6xbf16> to vector<8x6xbf16>
    %117 = arith.truncf %114 : vector<6x256xf32> to vector<6x256xbf16>
    %cst_45 = arith.constant dense<0.000000e+00> : vector<8x256xf32>
    %118 = tpu.matmul %116, %117, %cst_45 {dimension_numbers = #tpu.dot_dimension_numbers<[1], [0], [0], [1], [0, 0, 1, 1], [], []>} : vector<8x6xbf16>, vector<6x256xbf16>, vector<8x256xf32> -> vector<8x256xf32>
    %119 = arith.addf %111, %118 : vector<8x256xf32>
    %120 = vector.extract_strided_slice %88 {offsets = [0, 17], sizes = [6, 256], strides = [1, 1]} : vector<6x290xf32> to vector<6x256xf32>
    %c4 = arith.constant 4 : index
    %c0_46 = arith.constant 0 : index
    %c0_47 = arith.constant 0 : index
    %121 = vector.load %arg3[%c4, %c0_46, %c0_47] : memref<9x8x6xbf16, #tpu.memory_space<vmem>>, vector<1x8x6xbf16>
    %122 = vector.shape_cast %121 : vector<1x8x6xbf16> to vector<8x6xbf16>
    %123 = arith.truncf %120 : vector<6x256xf32> to vector<6x256xbf16>
    %cst_48 = arith.constant dense<0.000000e+00> : vector<8x256xf32>
    %124 = tpu.matmul %122, %123, %cst_48 {dimension_numbers = #tpu.dot_dimension_numbers<[1], [0], [0], [1], [0, 0, 1, 1], [], []>} : vector<8x6xbf16>, vector<6x256xbf16>, vector<8x256xf32> -> vector<8x256xf32>
    %125 = arith.addf %119, %124 : vector<8x256xf32>
    %126 = vector.extract_strided_slice %88 {offsets = [0, 18], sizes = [6, 256], strides = [1, 1]} : vector<6x290xf32> to vector<6x256xf32>
    %127 = vector.broadcast %33 : vector<1x256xf32> to vector<6x256xf32>
    %128 = arith.mulf %126, %127 : vector<6x256xf32>
    %c5 = arith.constant 5 : index
    %c0_49 = arith.constant 0 : index
    %c0_50 = arith.constant 0 : index
    %129 = vector.load %arg3[%c5, %c0_49, %c0_50] : memref<9x8x6xbf16, #tpu.memory_space<vmem>>, vector<1x8x6xbf16>
    %130 = vector.shape_cast %129 : vector<1x8x6xbf16> to vector<8x6xbf16>
    %131 = arith.truncf %128 : vector<6x256xf32> to vector<6x256xbf16>
    %cst_51 = arith.constant dense<0.000000e+00> : vector<8x256xf32>
    %132 = tpu.matmul %130, %131, %cst_51 {dimension_numbers = #tpu.dot_dimension_numbers<[1], [0], [0], [1], [0, 0, 1, 1], [], []>} : vector<8x6xbf16>, vector<6x256xbf16>, vector<8x256xf32> -> vector<8x256xf32>
    %133 = arith.addf %125, %132 : vector<8x256xf32>
    %134 = vector.extract_strided_slice %88 {offsets = [0, 32], sizes = [6, 256], strides = [1, 1]} : vector<6x290xf32> to vector<6x256xf32>
    %135 = vector.broadcast %29 : vector<1x256xf32> to vector<6x256xf32>
    %136 = arith.mulf %134, %135 : vector<6x256xf32>
    %c6 = arith.constant 6 : index
    %c0_52 = arith.constant 0 : index
    %c0_53 = arith.constant 0 : index
    %137 = vector.load %arg3[%c6, %c0_52, %c0_53] : memref<9x8x6xbf16, #tpu.memory_space<vmem>>, vector<1x8x6xbf16>
    %138 = vector.shape_cast %137 : vector<1x8x6xbf16> to vector<8x6xbf16>
    %139 = arith.truncf %136 : vector<6x256xf32> to vector<6x256xbf16>
    %cst_54 = arith.constant dense<0.000000e+00> : vector<8x256xf32>
    %140 = tpu.matmul %138, %139, %cst_54 {dimension_numbers = #tpu.dot_dimension_numbers<[1], [0], [0], [1], [0, 0, 1, 1], [], []>} : vector<8x6xbf16>, vector<6x256xbf16>, vector<8x256xf32> -> vector<8x256xf32>
    %141 = arith.addf %133, %140 : vector<8x256xf32>
    %142 = vector.extract_strided_slice %88 {offsets = [0, 33], sizes = [6, 256], strides = [1, 1]} : vector<6x290xf32> to vector<6x256xf32>
    %c7 = arith.constant 7 : index
    %c0_55 = arith.constant 0 : index
    %c0_56 = arith.constant 0 : index
    %143 = vector.load %arg3[%c7, %c0_55, %c0_56] : memref<9x8x6xbf16, #tpu.memory_space<vmem>>, vector<1x8x6xbf16>
    %144 = vector.shape_cast %143 : vector<1x8x6xbf16> to vector<8x6xbf16>
    %145 = arith.truncf %142 : vector<6x256xf32> to vector<6x256xbf16>
    %cst_57 = arith.constant dense<0.000000e+00> : vector<8x256xf32>
    %146 = tpu.matmul %144, %145, %cst_57 {dimension_numbers = #tpu.dot_dimension_numbers<[1], [0], [0], [1], [0, 0, 1, 1], [], []>} : vector<8x6xbf16>, vector<6x256xbf16>, vector<8x256xf32> -> vector<8x256xf32>
    %147 = arith.addf %141, %146 : vector<8x256xf32>
    %148 = vector.extract_strided_slice %88 {offsets = [0, 34], sizes = [6, 256], strides = [1, 1]} : vector<6x290xf32> to vector<6x256xf32>
    %149 = vector.broadcast %33 : vector<1x256xf32> to vector<6x256xf32>
    %150 = arith.mulf %148, %149 : vector<6x256xf32>
    %c8 = arith.constant 8 : index
    %c0_58 = arith.constant 0 : index
    %c0_59 = arith.constant 0 : index
    %151 = vector.load %arg3[%c8, %c0_58, %c0_59] : memref<9x8x6xbf16, #tpu.memory_space<vmem>>, vector<1x8x6xbf16>
    %152 = vector.shape_cast %151 : vector<1x8x6xbf16> to vector<8x6xbf16>
    %153 = arith.truncf %150 : vector<6x256xf32> to vector<6x256xbf16>
    %cst_60 = arith.constant dense<0.000000e+00> : vector<8x256xf32>
    %154 = tpu.matmul %152, %153, %cst_60 {dimension_numbers = #tpu.dot_dimension_numbers<[1], [0], [0], [1], [0, 0, 1, 1], [], []>} : vector<8x6xbf16>, vector<6x256xbf16>, vector<8x256xf32> -> vector<8x256xf32>
    %155 = arith.addf %147, %154 : vector<8x256xf32>
    %c0_61 = arith.constant 0 : index
    %c0_62 = arith.constant 0 : index
    %156 = vector.load %arg4[%c0_61, %c0_62] : memref<8x1xf32, #tpu.memory_space<vmem>>, vector<8x1xf32>
    %157 = vector.broadcast %156 : vector<8x1xf32> to vector<8x256xf32>
    %158 = arith.addf %155, %157 : vector<8x256xf32>
    %cst_63 = arith.constant 0.000000e+00 : f32
    %159 = vector.broadcast %cst_63 : f32 to vector<8x256xf32>
    %160 = arith.maximumf %158, %159 : vector<8x256xf32>
    %c0_64 = arith.constant 0 : index
    %c17_65 = arith.constant 17 : index
    %161 = vector.load %arg30[%c0_64, %c17_65] : memref<24x290xf32, #tpu.memory_space<vmem>>, vector<8x256xf32>
    tpu.vector_store %arg30[%c0_64, %c17_65], %160 {strides = array<i32>} : memref<24x290xf32, #tpu.memory_space<vmem>>, vector<8x256xf32>,
    %c0_66 = arith.constant 0 : index
    %c0_67 = arith.constant 0 : index
    %162 = vector.load %arg30[%c0_66, %c0_67] : memref<24x290xf32, #tpu.memory_space<vmem>>, vector<8x290xf32>
    %cst_68 = arith.constant 0.000000e+00 : f32
    %163 = vector.broadcast %cst_68 : f32 to vector<8x256xf32>
    %164 = vector.extract_strided_slice %162 {offsets = [0, 0], sizes = [8, 256], strides = [1, 1]} : vector<8x290xf32> to vector<8x256xf32>
    %165 = vector.broadcast %29 : vector<1x256xf32> to vector<8x256xf32>
    %166 = arith.mulf %164, %165 : vector<8x256xf32>
    %c0_69 = arith.constant 0 : index
    %c0_70 = arith.constant 0 : index
    %c0_71 = arith.constant 0 : index
    %167 = vector.load %arg5[%c0_69, %c0_70, %c0_71] : memref<9x8x8xbf16, #tpu.memory_space<vmem>>, vector<1x8x8xbf16>
    %168 = vector.shape_cast %167 : vector<1x8x8xbf16> to vector<8x8xbf16>
    %169 = arith.truncf %166 : vector<8x256xf32> to vector<8x256xbf16>
    %cst_72 = arith.constant dense<0.000000e+00> : vector<8x256xf32>
    %170 = tpu.matmul %168, %169, %cst_72 {dimension_numbers = #tpu.dot_dimension_numbers<[1], [0], [0], [1], [0, 0, 1, 1], [], []>} : vector<8x8xbf16>, vector<8x256xbf16>, vector<8x256xf32> -> vector<8x256xf32>
    %171 = arith.addf %163, %170 : vector<8x256xf32>
    %172 = vector.extract_strided_slice %162 {offsets = [0, 1], sizes = [8, 256], strides = [1, 1]} : vector<8x290xf32> to vector<8x256xf32>
    %c1_73 = arith.constant 1 : index
    %c0_74 = arith.constant 0 : index
    %c0_75 = arith.constant 0 : index
    %173 = vector.load %arg5[%c1_73, %c0_74, %c0_75] : memref<9x8x8xbf16, #tpu.memory_space<vmem>>, vector<1x8x8xbf16>
    %174 = vector.shape_cast %173 : vector<1x8x8xbf16> to vector<8x8xbf16>
    %175 = arith.truncf %172 : vector<8x256xf32> to vector<8x256xbf16>
    %cst_76 = arith.constant dense<0.000000e+00> : vector<8x256xf32>
    %176 = tpu.matmul %174, %175, %cst_76 {dimension_numbers = #tpu.dot_dimension_numbers<[1], [0], [0], [1], [0, 0, 1, 1], [], []>} : vector<8x8xbf16>, vector<8x256xbf16>, vector<8x256xf32> -> vector<8x256xf32>
    %177 = arith.addf %171, %176 : vector<8x256xf32>
    %178 = vector.extract_strided_slice %162 {offsets = [0, 2], sizes = [8, 256], strides = [1, 1]} : vector<8x290xf32> to vector<8x256xf32>
    %179 = vector.broadcast %33 : vector<1x256xf32> to vector<8x256xf32>
    %180 = arith.mulf %178, %179 : vector<8x256xf32>
    %c2_77 = arith.constant 2 : index
    %c0_78 = arith.constant 0 : index
    %c0_79 = arith.constant 0 : index
    %181 = vector.load %arg5[%c2_77, %c0_78, %c0_79] : memref<9x8x8xbf16, #tpu.memory_space<vmem>>, vector<1x8x8xbf16>
    %182 = vector.shape_cast %181 : vector<1x8x8xbf16> to vector<8x8xbf16>
    %183 = arith.truncf %180 : vector<8x256xf32> to vector<8x256xbf16>
    %cst_80 = arith.constant dense<0.000000e+00> : vector<8x256xf32>
    %184 = tpu.matmul %182, %183, %cst_80 {dimension_numbers = #tpu.dot_dimension_numbers<[1], [0], [0], [1], [0, 0, 1, 1], [], []>} : vector<8x8xbf16>, vector<8x256xbf16>, vector<8x256xf32> -> vector<8x256xf32>
    %185 = arith.addf %177, %184 : vector<8x256xf32>
    %186 = vector.extract_strided_slice %162 {offsets = [0, 16], sizes = [8, 256], strides = [1, 1]} : vector<8x290xf32> to vector<8x256xf32>
    %187 = vector.broadcast %29 : vector<1x256xf32> to vector<8x256xf32>
    %188 = arith.mulf %186, %187 : vector<8x256xf32>
    %c3_81 = arith.constant 3 : index
    %c0_82 = arith.constant 0 : index
    %c0_83 = arith.constant 0 : index
    %189 = vector.load %arg5[%c3_81, %c0_82, %c0_83] : memref<9x8x8xbf16, #tpu.memory_space<vmem>>, vector<1x8x8xbf16>
    %190 = vector.shape_cast %189 : vector<1x8x8xbf16> to vector<8x8xbf16>
    %191 = arith.truncf %188 : vector<8x256xf32> to vector<8x256xbf16>
    %cst_84 = arith.constant dense<0.000000e+00> : vector<8x256xf32>
    %192 = tpu.matmul %190, %191, %cst_84 {dimension_numbers = #tpu.dot_dimension_numbers<[1], [0], [0], [1], [0, 0, 1, 1], [], []>} : vector<8x8xbf16>, vector<8x256xbf16>, vector<8x256xf32> -> vector<8x256xf32>
    %193 = arith.addf %185, %192 : vector<8x256xf32>
    %194 = vector.extract_strided_slice %162 {offsets = [0, 17], sizes = [8, 256], strides = [1, 1]} : vector<8x290xf32> to vector<8x256xf32>
    %c4_85 = arith.constant 4 : index
    %c0_86 = arith.constant 0 : index
    %c0_87 = arith.constant 0 : index
    %195 = vector.load %arg5[%c4_85, %c0_86, %c0_87] : memref<9x8x8xbf16, #tpu.memory_space<vmem>>, vector<1x8x8xbf16>
    %196 = vector.shape_cast %195 : vector<1x8x8xbf16> to vector<8x8xbf16>
    %197 = arith.truncf %194 : vector<8x256xf32> to vector<8x256xbf16>
    %cst_88 = arith.constant dense<0.000000e+00> : vector<8x256xf32>
    %198 = tpu.matmul %196, %197, %cst_88 {dimension_numbers = #tpu.dot_dimension_numbers<[1], [0], [0], [1], [0, 0, 1, 1], [], []>} : vector<8x8xbf16>, vector<8x256xbf16>, vector<8x256xf32> -> vector<8x256xf32>
    %199 = arith.addf %193, %198 : vector<8x256xf32>
    %200 = vector.extract_strided_slice %162 {offsets = [0, 18], sizes = [8, 256], strides = [1, 1]} : vector<8x290xf32> to vector<8x256xf32>
    %201 = vector.broadcast %33 : vector<1x256xf32> to vector<8x256xf32>
    %202 = arith.mulf %200, %201 : vector<8x256xf32>
    %c5_89 = arith.constant 5 : index
    %c0_90 = arith.constant 0 : index
    %c0_91 = arith.constant 0 : index
    %203 = vector.load %arg5[%c5_89, %c0_90, %c0_91] : memref<9x8x8xbf16, #tpu.memory_space<vmem>>, vector<1x8x8xbf16>
    %204 = vector.shape_cast %203 : vector<1x8x8xbf16> to vector<8x8xbf16>
    %205 = arith.truncf %202 : vector<8x256xf32> to vector<8x256xbf16>
    %cst_92 = arith.constant dense<0.000000e+00> : vector<8x256xf32>
    %206 = tpu.matmul %204, %205, %cst_92 {dimension_numbers = #tpu.dot_dimension_numbers<[1], [0], [0], [1], [0, 0, 1, 1], [], []>} : vector<8x8xbf16>, vector<8x256xbf16>, vector<8x256xf32> -> vector<8x256xf32>
    %207 = arith.addf %199, %206 : vector<8x256xf32>
    %208 = vector.extract_strided_slice %162 {offsets = [0, 32], sizes = [8, 256], strides = [1, 1]} : vector<8x290xf32> to vector<8x256xf32>
    %209 = vector.broadcast %29 : vector<1x256xf32> to vector<8x256xf32>
    %210 = arith.mulf %208, %209 : vector<8x256xf32>
    %c6_93 = arith.constant 6 : index
    %c0_94 = arith.constant 0 : index
    %c0_95 = arith.constant 0 : index
    %211 = vector.load %arg5[%c6_93, %c0_94, %c0_95] : memref<9x8x8xbf16, #tpu.memory_space<vmem>>, vector<1x8x8xbf16>
    %212 = vector.shape_cast %211 : vector<1x8x8xbf16> to vector<8x8xbf16>
    %213 = arith.truncf %210 : vector<8x256xf32> to vector<8x256xbf16>
    %cst_96 = arith.constant dense<0.000000e+00> : vector<8x256xf32>
    %214 = tpu.matmul %212, %213, %cst_96 {dimension_numbers = #tpu.dot_dimension_numbers<[1], [0], [0], [1], [0, 0, 1, 1], [], []>} : vector<8x8xbf16>, vector<8x256xbf16>, vector<8x256xf32> -> vector<8x256xf32>
    %215 = arith.addf %207, %214 : vector<8x256xf32>
    %216 = vector.extract_strided_slice %162 {offsets = [0, 33], sizes = [8, 256], strides = [1, 1]} : vector<8x290xf32> to vector<8x256xf32>
    %c7_97 = arith.constant 7 : index
    %c0_98 = arith.constant 0 : index
    %c0_99 = arith.constant 0 : index
    %217 = vector.load %arg5[%c7_97, %c0_98, %c0_99] : memref<9x8x8xbf16, #tpu.memory_space<vmem>>, vector<1x8x8xbf16>
    %218 = vector.shape_cast %217 : vector<1x8x8xbf16> to vector<8x8xbf16>
    %219 = arith.truncf %216 : vector<8x256xf32> to vector<8x256xbf16>
    %cst_100 = arith.constant dense<0.000000e+00> : vector<8x256xf32>
    %220 = tpu.matmul %218, %219, %cst_100 {dimension_numbers = #tpu.dot_dimension_numbers<[1], [0], [0], [1], [0, 0, 1, 1], [], []>} : vector<8x8xbf16>, vector<8x256xbf16>, vector<8x256xf32> -> vector<8x256xf32>
    %221 = arith.addf %215, %220 : vector<8x256xf32>
    %222 = vector.extract_strided_slice %162 {offsets = [0, 34], sizes = [8, 256], strides = [1, 1]} : vector<8x290xf32> to vector<8x256xf32>
    %223 = vector.broadcast %33 : vector<1x256xf32> to vector<8x256xf32>
    %224 = arith.mulf %222, %223 : vector<8x256xf32>
    %c8_101 = arith.constant 8 : index
    %c0_102 = arith.constant 0 : index
    %c0_103 = arith.constant 0 : index
    %225 = vector.load %arg5[%c8_101, %c0_102, %c0_103] : memref<9x8x8xbf16, #tpu.memory_space<vmem>>, vector<1x8x8xbf16>
    %226 = vector.shape_cast %225 : vector<1x8x8xbf16> to vector<8x8xbf16>
    %227 = arith.truncf %224 : vector<8x256xf32> to vector<8x256xbf16>
    %cst_104 = arith.constant dense<0.000000e+00> : vector<8x256xf32>
    %228 = tpu.matmul %226, %227, %cst_104 {dimension_numbers = #tpu.dot_dimension_numbers<[1], [0], [0], [1], [0, 0, 1, 1], [], []>} : vector<8x8xbf16>, vector<8x256xbf16>, vector<8x256xf32> -> vector<8x256xf32>
    %229 = arith.addf %221, %228 : vector<8x256xf32>
    %c0_105 = arith.constant 0 : index
    %c0_106 = arith.constant 0 : index
    %230 = vector.load %arg6[%c0_105, %c0_106] : memref<8x1xf32, #tpu.memory_space<vmem>>, vector<8x1xf32>
    %231 = vector.broadcast %230 : vector<8x1xf32> to vector<8x256xf32>
    %232 = arith.addf %229, %231 : vector<8x256xf32>
    %cst_107 = arith.constant 0.000000e+00 : f32
    %233 = vector.broadcast %cst_107 : f32 to vector<8x256xf32>
    %234 = arith.maximumf %232, %233 : vector<8x256xf32>
    %c0_108 = arith.constant 0 : index
    %c17_109 = arith.constant 17 : index
    %235 = vector.load %arg30[%c0_108, %c17_109] : memref<24x290xf32, #tpu.memory_space<vmem>>, vector<8x256xf32>
    tpu.vector_store %arg30[%c0_108, %c17_109], %234 {strides = array<i32>} : memref<24x290xf32, #tpu.memory_space<vmem>>, vector<8x256xf32>,
    %c0_110 = arith.constant 0 : index
    %c0_111 = arith.constant 0 : index
    %236 = vector.load %arg30[%c0_110, %c0_111] : memref<24x290xf32, #tpu.memory_space<vmem>>, vector<8x290xf32>
    %237 = vector.extract_strided_slice %236 {offsets = [0, 17], sizes = [8, 256], strides = [1, 1]} : vector<8x290xf32> to vector<8x256xf32>
    %238 = vector.extract_strided_slice %236 {offsets = [0, 18], sizes = [8, 256], strides = [1, 1]} : vector<8x290xf32> to vector<8x256xf32>
    %239 = arith.maximumf %237, %238 : vector<8x256xf32>
    %240 = vector.extract_strided_slice %236 {offsets = [0, 33], sizes = [8, 256], strides = [1, 1]} : vector<8x290xf32> to vector<8x256xf32>
    %241 = vector.extract_strided_slice %236 {offsets = [0, 34], sizes = [8, 256], strides = [1, 1]} : vector<8x290xf32> to vector<8x256xf32>
    %242 = arith.maximumf %240, %241 : vector<8x256xf32>
    %243 = arith.maximumf %239, %242 : vector<8x256xf32>
    %244 = arith.truncf %243 : vector<8x256xf32> to vector<8x256xbf16>
    %c0_112 = arith.constant 0 : index
    %c0_113 = arith.constant 0 : index
    %245 = vector.load %arg25[%c0_112, %c0_113] : memref<256x64xbf16, #tpu.memory_space<vmem>>, vector<256x64xbf16>
    %cst_114 = arith.constant dense<0.000000e+00> : vector<8x64xf32>
    %246 = tpu.matmul %244, %245, %cst_114 {dimension_numbers = #tpu.dot_dimension_numbers<[1], [0], [0], [1], [0, 0, 1, 1], [], []>} : vector<8x256xbf16>, vector<256x64xbf16>, vector<8x64xf32> -> vector<8x64xf32>
    %c0_115 = arith.constant 0 : index
    %c9 = arith.constant 9 : index
    %247 = vector.load %arg31[%c0_115, %c9] : memref<48x82xf32, #tpu.memory_space<vmem>>, vector<8x64xf32>
    tpu.vector_store %arg31[%c0_115, %c9], %246 {strides = array<i32>} : memref<48x82xf32, #tpu.memory_space<vmem>>, vector<8x64xf32>,
    %c0_116 = arith.constant 0 : index
    %c0_117 = arith.constant 0 : index
    %248 = vector.load %arg31[%c0_116, %c0_117] : memref<48x82xf32, #tpu.memory_space<vmem>>, vector<8x82xf32>
    %cst_118 = arith.constant 0.000000e+00 : f32
    %249 = vector.broadcast %cst_118 : f32 to vector<16x64xf32>
    %250 = vector.extract_strided_slice %248 {offsets = [0, 0], sizes = [8, 64], strides = [1, 1]} : vector<8x82xf32> to vector<8x64xf32>
    %251 = vector.broadcast %54 : vector<1x64xf32> to vector<8x64xf32>
    %252 = arith.mulf %250, %251 : vector<8x64xf32>
    %c0_119 = arith.constant 0 : index
    %c0_120 = arith.constant 0 : index
    %c0_121 = arith.constant 0 : index
    %253 = vector.load %arg7[%c0_119, %c0_120, %c0_121] : memref<9x16x8xbf16, #tpu.memory_space<vmem>>, vector<1x16x8xbf16>
    %254 = vector.shape_cast %253 : vector<1x16x8xbf16> to vector<16x8xbf16>
    %255 = arith.truncf %252 : vector<8x64xf32> to vector<8x64xbf16>
    %cst_122 = arith.constant dense<0.000000e+00> : vector<16x64xf32>
    %256 = tpu.matmul %254, %255, %cst_122 {dimension_numbers = #tpu.dot_dimension_numbers<[1], [0], [0], [1], [0, 0, 1, 1], [], []>} : vector<16x8xbf16>, vector<8x64xbf16>, vector<16x64xf32> -> vector<16x64xf32>
    %257 = arith.addf %249, %256 : vector<16x64xf32>
    %258 = vector.extract_strided_slice %248 {offsets = [0, 1], sizes = [8, 64], strides = [1, 1]} : vector<8x82xf32> to vector<8x64xf32>
    %c1_123 = arith.constant 1 : index
    %c0_124 = arith.constant 0 : index
    %c0_125 = arith.constant 0 : index
    %259 = vector.load %arg7[%c1_123, %c0_124, %c0_125] : memref<9x16x8xbf16, #tpu.memory_space<vmem>>, vector<1x16x8xbf16>
    %260 = vector.shape_cast %259 : vector<1x16x8xbf16> to vector<16x8xbf16>
    %261 = arith.truncf %258 : vector<8x64xf32> to vector<8x64xbf16>
    %cst_126 = arith.constant dense<0.000000e+00> : vector<16x64xf32>
    %262 = tpu.matmul %260, %261, %cst_126 {dimension_numbers = #tpu.dot_dimension_numbers<[1], [0], [0], [1], [0, 0, 1, 1], [], []>} : vector<16x8xbf16>, vector<8x64xbf16>, vector<16x64xf32> -> vector<16x64xf32>
    %263 = arith.addf %257, %262 : vector<16x64xf32>
    %264 = vector.extract_strided_slice %248 {offsets = [0, 2], sizes = [8, 64], strides = [1, 1]} : vector<8x82xf32> to vector<8x64xf32>
    %265 = vector.broadcast %58 : vector<1x64xf32> to vector<8x64xf32>
    %266 = arith.mulf %264, %265 : vector<8x64xf32>
    %c2_127 = arith.constant 2 : index
    %c0_128 = arith.constant 0 : index
    %c0_129 = arith.constant 0 : index
    %267 = vector.load %arg7[%c2_127, %c0_128, %c0_129] : memref<9x16x8xbf16, #tpu.memory_space<vmem>>, vector<1x16x8xbf16>
    %268 = vector.shape_cast %267 : vector<1x16x8xbf16> to vector<16x8xbf16>
    %269 = arith.truncf %266 : vector<8x64xf32> to vector<8x64xbf16>
    %cst_130 = arith.constant dense<0.000000e+00> : vector<16x64xf32>
    %270 = tpu.matmul %268, %269, %cst_130 {dimension_numbers = #tpu.dot_dimension_numbers<[1], [0], [0], [1], [0, 0, 1, 1], [], []>} : vector<16x8xbf16>, vector<8x64xbf16>, vector<16x64xf32> -> vector<16x64xf32>
    %271 = arith.addf %263, %270 : vector<16x64xf32>
    %272 = vector.extract_strided_slice %248 {offsets = [0, 8], sizes = [8, 64], strides = [1, 1]} : vector<8x82xf32> to vector<8x64xf32>
    %273 = vector.broadcast %54 : vector<1x64xf32> to vector<8x64xf32>
    %274 = arith.mulf %272, %273 : vector<8x64xf32>
    %c3_131 = arith.constant 3 : index
    %c0_132 = arith.constant 0 : index
    %c0_133 = arith.constant 0 : index
    %275 = vector.load %arg7[%c3_131, %c0_132, %c0_133] : memref<9x16x8xbf16, #tpu.memory_space<vmem>>, vector<1x16x8xbf16>
    %276 = vector.shape_cast %275 : vector<1x16x8xbf16> to vector<16x8xbf16>
    %277 = arith.truncf %274 : vector<8x64xf32> to vector<8x64xbf16>
    %cst_134 = arith.constant dense<0.000000e+00> : vector<16x64xf32>
    %278 = tpu.matmul %276, %277, %cst_134 {dimension_numbers = #tpu.dot_dimension_numbers<[1], [0], [0], [1], [0, 0, 1, 1], [], []>} : vector<16x8xbf16>, vector<8x64xbf16>, vector<16x64xf32> -> vector<16x64xf32>
    %279 = arith.addf %271, %278 : vector<16x64xf32>
    %280 = vector.extract_strided_slice %248 {offsets = [0, 9], sizes = [8, 64], strides = [1, 1]} : vector<8x82xf32> to vector<8x64xf32>
    %c4_135 = arith.constant 4 : index
    %c0_136 = arith.constant 0 : index
    %c0_137 = arith.constant 0 : index
    %281 = vector.load %arg7[%c4_135, %c0_136, %c0_137] : memref<9x16x8xbf16, #tpu.memory_space<vmem>>, vector<1x16x8xbf16>
    %282 = vector.shape_cast %281 : vector<1x16x8xbf16> to vector<16x8xbf16>
    %283 = arith.truncf %280 : vector<8x64xf32> to vector<8x64xbf16>
    %cst_138 = arith.constant dense<0.000000e+00> : vector<16x64xf32>
    %284 = tpu.matmul %282, %283, %cst_138 {dimension_numbers = #tpu.dot_dimension_numbers<[1], [0], [0], [1], [0, 0, 1, 1], [], []>} : vector<16x8xbf16>, vector<8x64xbf16>, vector<16x64xf32> -> vector<16x64xf32>
    %285 = arith.addf %279, %284 : vector<16x64xf32>
    %286 = vector.extract_strided_slice %248 {offsets = [0, 10], sizes = [8, 64], strides = [1, 1]} : vector<8x82xf32> to vector<8x64xf32>
    %287 = vector.broadcast %58 : vector<1x64xf32> to vector<8x64xf32>
    %288 = arith.mulf %286, %287 : vector<8x64xf32>
    %c5_139 = arith.constant 5 : index
    %c0_140 = arith.constant 0 : index
    %c0_141 = arith.constant 0 : index
    %289 = vector.load %arg7[%c5_139, %c0_140, %c0_141] : memref<9x16x8xbf16, #tpu.memory_space<vmem>>, vector<1x16x8xbf16>
    %290 = vector.shape_cast %289 : vector<1x16x8xbf16> to vector<16x8xbf16>
    %291 = arith.truncf %288 : vector<8x64xf32> to vector<8x64xbf16>
    %cst_142 = arith.constant dense<0.000000e+00> : vector<16x64xf32>
    %292 = tpu.matmul %290, %291, %cst_142 {dimension_numbers = #tpu.dot_dimension_numbers<[1], [0], [0], [1], [0, 0, 1, 1], [], []>} : vector<16x8xbf16>, vector<8x64xbf16>, vector<16x64xf32> -> vector<16x64xf32>
    %293 = arith.addf %285, %292 : vector<16x64xf32>
    %294 = vector.extract_strided_slice %248 {offsets = [0, 16], sizes = [8, 64], strides = [1, 1]} : vector<8x82xf32> to vector<8x64xf32>
    %295 = vector.broadcast %54 : vector<1x64xf32> to vector<8x64xf32>
    %296 = arith.mulf %294, %295 : vector<8x64xf32>
    %c6_143 = arith.constant 6 : index
    %c0_144 = arith.constant 0 : index
    %c0_145 = arith.constant 0 : index
    %297 = vector.load %arg7[%c6_143, %c0_144, %c0_145] : memref<9x16x8xbf16, #tpu.memory_space<vmem>>, vector<1x16x8xbf16>
    %298 = vector.shape_cast %297 : vector<1x16x8xbf16> to vector<16x8xbf16>
    %299 = arith.truncf %296 : vector<8x64xf32> to vector<8x64xbf16>
    %cst_146 = arith.constant dense<0.000000e+00> : vector<16x64xf32>
    %300 = tpu.matmul %298, %299, %cst_146 {dimension_numbers = #tpu.dot_dimension_numbers<[1], [0], [0], [1], [0, 0, 1, 1], [], []>} : vector<16x8xbf16>, vector<8x64xbf16>, vector<16x64xf32> -> vector<16x64xf32>
    %301 = arith.addf %293, %300 : vector<16x64xf32>
    %302 = vector.extract_strided_slice %248 {offsets = [0, 17], sizes = [8, 64], strides = [1, 1]} : vector<8x82xf32> to vector<8x64xf32>
    %c7_147 = arith.constant 7 : index
    %c0_148 = arith.constant 0 : index
    %c0_149 = arith.constant 0 : index
    %303 = vector.load %arg7[%c7_147, %c0_148, %c0_149] : memref<9x16x8xbf16, #tpu.memory_space<vmem>>, vector<1x16x8xbf16>
    %304 = vector.shape_cast %303 : vector<1x16x8xbf16> to vector<16x8xbf16>
    %305 = arith.truncf %302 : vector<8x64xf32> to vector<8x64xbf16>
    %cst_150 = arith.constant dense<0.000000e+00> : vector<16x64xf32>
    %306 = tpu.matmul %304, %305, %cst_150 {dimension_numbers = #tpu.dot_dimension_numbers<[1], [0], [0], [1], [0, 0, 1, 1], [], []>} : vector<16x8xbf16>, vector<8x64xbf16>, vector<16x64xf32> -> vector<16x64xf32>
    %307 = arith.addf %301, %306 : vector<16x64xf32>
    %308 = vector.extract_strided_slice %248 {offsets = [0, 18], sizes = [8, 64], strides = [1, 1]} : vector<8x82xf32> to vector<8x64xf32>
    %309 = vector.broadcast %58 : vector<1x64xf32> to vector<8x64xf32>
    %310 = arith.mulf %308, %309 : vector<8x64xf32>
    %c8_151 = arith.constant 8 : index
    %c0_152 = arith.constant 0 : index
    %c0_153 = arith.constant 0 : index
    %311 = vector.load %arg7[%c8_151, %c0_152, %c0_153] : memref<9x16x8xbf16, #tpu.memory_space<vmem>>, vector<1x16x8xbf16>
    %312 = vector.shape_cast %311 : vector<1x16x8xbf16> to vector<16x8xbf16>
    %313 = arith.truncf %310 : vector<8x64xf32> to vector<8x64xbf16>
    %cst_154 = arith.constant dense<0.000000e+00> : vector<16x64xf32>
    %314 = tpu.matmul %312, %313, %cst_154 {dimension_numbers = #tpu.dot_dimension_numbers<[1], [0], [0], [1], [0, 0, 1, 1], [], []>} : vector<16x8xbf16>, vector<8x64xbf16>, vector<16x64xf32> -> vector<16x64xf32>
    %315 = arith.addf %307, %314 : vector<16x64xf32>
    %c0_155 = arith.constant 0 : index
    %c0_156 = arith.constant 0 : index
    %316 = vector.load %arg8[%c0_155, %c0_156] : memref<16x1xf32, #tpu.memory_space<vmem>>, vector<16x1xf32>
    %317 = vector.broadcast %316 : vector<16x1xf32> to vector<16x64xf32>
    %318 = arith.addf %315, %317 : vector<16x64xf32>
    %cst_157 = arith.constant 0.000000e+00 : f32
    %319 = vector.broadcast %cst_157 : f32 to vector<16x64xf32>
    %320 = arith.maximumf %318, %319 : vector<16x64xf32>
    %c0_158 = arith.constant 0 : index
    %c9_159 = arith.constant 9 : index
    %321 = vector.load %arg31[%c0_158, %c9_159] : memref<48x82xf32, #tpu.memory_space<vmem>>, vector<16x64xf32>
    tpu.vector_store %arg31[%c0_158, %c9_159], %320 {strides = array<i32>} : memref<48x82xf32, #tpu.memory_space<vmem>>, vector<16x64xf32>,
    %c0_160 = arith.constant 0 : index
    %c0_161 = arith.constant 0 : index
    %322 = vector.load %arg31[%c0_160, %c0_161] : memref<48x82xf32, #tpu.memory_space<vmem>>, vector<16x82xf32>
    %cst_162 = arith.constant 0.000000e+00 : f32
    %323 = vector.broadcast %cst_162 : f32 to vector<16x64xf32>
    %324 = vector.extract_strided_slice %322 {offsets = [0, 0], sizes = [16, 64], strides = [1, 1]} : vector<16x82xf32> to vector<16x64xf32>
    %325 = vector.broadcast %54 : vector<1x64xf32> to vector<16x64xf32>
    %326 = arith.mulf %324, %325 : vector<16x64xf32>
    %c0_163 = arith.constant 0 : index
    %c0_164 = arith.constant 0 : index
    %c0_165 = arith.constant 0 : index
    %327 = vector.load %arg9[%c0_163, %c0_164, %c0_165] : memref<9x16x16xbf16, #tpu.memory_space<vmem>>, vector<1x16x16xbf16>
    %328 = vector.shape_cast %327 : vector<1x16x16xbf16> to vector<16x16xbf16>
    %329 = arith.truncf %326 : vector<16x64xf32> to vector<16x64xbf16>
    %cst_166 = arith.constant dense<0.000000e+00> : vector<16x64xf32>
    %330 = tpu.matmul %328, %329, %cst_166 {dimension_numbers = #tpu.dot_dimension_numbers<[1], [0], [0], [1], [0, 0, 1, 1], [], []>} : vector<16x16xbf16>, vector<16x64xbf16>, vector<16x64xf32> -> vector<16x64xf32>
    %331 = arith.addf %323, %330 : vector<16x64xf32>
    %332 = vector.extract_strided_slice %322 {offsets = [0, 1], sizes = [16, 64], strides = [1, 1]} : vector<16x82xf32> to vector<16x64xf32>
    %c1_167 = arith.constant 1 : index
    %c0_168 = arith.constant 0 : index
    %c0_169 = arith.constant 0 : index
    %333 = vector.load %arg9[%c1_167, %c0_168, %c0_169] : memref<9x16x16xbf16, #tpu.memory_space<vmem>>, vector<1x16x16xbf16>
    %334 = vector.shape_cast %333 : vector<1x16x16xbf16> to vector<16x16xbf16>
    %335 = arith.truncf %332 : vector<16x64xf32> to vector<16x64xbf16>
    %cst_170 = arith.constant dense<0.000000e+00> : vector<16x64xf32>
    %336 = tpu.matmul %334, %335, %cst_170 {dimension_numbers = #tpu.dot_dimension_numbers<[1], [0], [0], [1], [0, 0, 1, 1], [], []>} : vector<16x16xbf16>, vector<16x64xbf16>, vector<16x64xf32> -> vector<16x64xf32>
    %337 = arith.addf %331, %336 : vector<16x64xf32>
    %338 = vector.extract_strided_slice %322 {offsets = [0, 2], sizes = [16, 64], strides = [1, 1]} : vector<16x82xf32> to vector<16x64xf32>
    %339 = vector.broadcast %58 : vector<1x64xf32> to vector<16x64xf32>
    %340 = arith.mulf %338, %339 : vector<16x64xf32>
    %c2_171 = arith.constant 2 : index
    %c0_172 = arith.constant 0 : index
    %c0_173 = arith.constant 0 : index
    %341 = vector.load %arg9[%c2_171, %c0_172, %c0_173] : memref<9x16x16xbf16, #tpu.memory_space<vmem>>, vector<1x16x16xbf16>
    %342 = vector.shape_cast %341 : vector<1x16x16xbf16> to vector<16x16xbf16>
    %343 = arith.truncf %340 : vector<16x64xf32> to vector<16x64xbf16>
    %cst_174 = arith.constant dense<0.000000e+00> : vector<16x64xf32>
    %344 = tpu.matmul %342, %343, %cst_174 {dimension_numbers = #tpu.dot_dimension_numbers<[1], [0], [0], [1], [0, 0, 1, 1], [], []>} : vector<16x16xbf16>, vector<16x64xbf16>, vector<16x64xf32> -> vector<16x64xf32>
    %345 = arith.addf %337, %344 : vector<16x64xf32>
    %346 = vector.extract_strided_slice %322 {offsets = [0, 8], sizes = [16, 64], strides = [1, 1]} : vector<16x82xf32> to vector<16x64xf32>
    %347 = vector.broadcast %54 : vector<1x64xf32> to vector<16x64xf32>
    %348 = arith.mulf %346, %347 : vector<16x64xf32>
    %c3_175 = arith.constant 3 : index
    %c0_176 = arith.constant 0 : index
    %c0_177 = arith.constant 0 : index
    %349 = vector.load %arg9[%c3_175, %c0_176, %c0_177] : memref<9x16x16xbf16, #tpu.memory_space<vmem>>, vector<1x16x16xbf16>
    %350 = vector.shape_cast %349 : vector<1x16x16xbf16> to vector<16x16xbf16>
    %351 = arith.truncf %348 : vector<16x64xf32> to vector<16x64xbf16>
    %cst_178 = arith.constant dense<0.000000e+00> : vector<16x64xf32>
    %352 = tpu.matmul %350, %351, %cst_178 {dimension_numbers = #tpu.dot_dimension_numbers<[1], [0], [0], [1], [0, 0, 1, 1], [], []>} : vector<16x16xbf16>, vector<16x64xbf16>, vector<16x64xf32> -> vector<16x64xf32>
    %353 = arith.addf %345, %352 : vector<16x64xf32>
    %354 = vector.extract_strided_slice %322 {offsets = [0, 9], sizes = [16, 64], strides = [1, 1]} : vector<16x82xf32> to vector<16x64xf32>
    %c4_179 = arith.constant 4 : index
    %c0_180 = arith.constant 0 : index
    %c0_181 = arith.constant 0 : index
    %355 = vector.load %arg9[%c4_179, %c0_180, %c0_181] : memref<9x16x16xbf16, #tpu.memory_space<vmem>>, vector<1x16x16xbf16>
    %356 = vector.shape_cast %355 : vector<1x16x16xbf16> to vector<16x16xbf16>
    %357 = arith.truncf %354 : vector<16x64xf32> to vector<16x64xbf16>
    %cst_182 = arith.constant dense<0.000000e+00> : vector<16x64xf32>
    %358 = tpu.matmul %356, %357, %cst_182 {dimension_numbers = #tpu.dot_dimension_numbers<[1], [0], [0], [1], [0, 0, 1, 1], [], []>} : vector<16x16xbf16>, vector<16x64xbf16>, vector<16x64xf32> -> vector<16x64xf32>
    %359 = arith.addf %353, %358 : vector<16x64xf32>
    %360 = vector.extract_strided_slice %322 {offsets = [0, 10], sizes = [16, 64], strides = [1, 1]} : vector<16x82xf32> to vector<16x64xf32>
    %361 = vector.broadcast %58 : vector<1x64xf32> to vector<16x64xf32>
    %362 = arith.mulf %360, %361 : vector<16x64xf32>
    %c5_183 = arith.constant 5 : index
    %c0_184 = arith.constant 0 : index
    %c0_185 = arith.constant 0 : index
    %363 = vector.load %arg9[%c5_183, %c0_184, %c0_185] : memref<9x16x16xbf16, #tpu.memory_space<vmem>>, vector<1x16x16xbf16>
    %364 = vector.shape_cast %363 : vector<1x16x16xbf16> to vector<16x16xbf16>
    %365 = arith.truncf %362 : vector<16x64xf32> to vector<16x64xbf16>
    %cst_186 = arith.constant dense<0.000000e+00> : vector<16x64xf32>
    %366 = tpu.matmul %364, %365, %cst_186 {dimension_numbers = #tpu.dot_dimension_numbers<[1], [0], [0], [1], [0, 0, 1, 1], [], []>} : vector<16x16xbf16>, vector<16x64xbf16>, vector<16x64xf32> -> vector<16x64xf32>
    %367 = arith.addf %359, %366 : vector<16x64xf32>
    %368 = vector.extract_strided_slice %322 {offsets = [0, 16], sizes = [16, 64], strides = [1, 1]} : vector<16x82xf32> to vector<16x64xf32>
    %369 = vector.broadcast %54 : vector<1x64xf32> to vector<16x64xf32>
    %370 = arith.mulf %368, %369 : vector<16x64xf32>
    %c6_187 = arith.constant 6 : index
    %c0_188 = arith.constant 0 : index
    %c0_189 = arith.constant 0 : index
    %371 = vector.load %arg9[%c6_187, %c0_188, %c0_189] : memref<9x16x16xbf16, #tpu.memory_space<vmem>>, vector<1x16x16xbf16>
    %372 = vector.shape_cast %371 : vector<1x16x16xbf16> to vector<16x16xbf16>
    %373 = arith.truncf %370 : vector<16x64xf32> to vector<16x64xbf16>
    %cst_190 = arith.constant dense<0.000000e+00> : vector<16x64xf32>
    %374 = tpu.matmul %372, %373, %cst_190 {dimension_numbers = #tpu.dot_dimension_numbers<[1], [0], [0], [1], [0, 0, 1, 1], [], []>} : vector<16x16xbf16>, vector<16x64xbf16>, vector<16x64xf32> -> vector<16x64xf32>
    %375 = arith.addf %367, %374 : vector<16x64xf32>
    %376 = vector.extract_strided_slice %322 {offsets = [0, 17], sizes = [16, 64], strides = [1, 1]} : vector<16x82xf32> to vector<16x64xf32>
    %c7_191 = arith.constant 7 : index
    %c0_192 = arith.constant 0 : index
    %c0_193 = arith.constant 0 : index
    %377 = vector.load %arg9[%c7_191, %c0_192, %c0_193] : memref<9x16x16xbf16, #tpu.memory_space<vmem>>, vector<1x16x16xbf16>
    %378 = vector.shape_cast %377 : vector<1x16x16xbf16> to vector<16x16xbf16>
    %379 = arith.truncf %376 : vector<16x64xf32> to vector<16x64xbf16>
    %cst_194 = arith.constant dense<0.000000e+00> : vector<16x64xf32>
    %380 = tpu.matmul %378, %379, %cst_194 {dimension_numbers = #tpu.dot_dimension_numbers<[1], [0], [0], [1], [0, 0, 1, 1], [], []>} : vector<16x16xbf16>, vector<16x64xbf16>, vector<16x64xf32> -> vector<16x64xf32>
    %381 = arith.addf %375, %380 : vector<16x64xf32>
    %382 = vector.extract_strided_slice %322 {offsets = [0, 18], sizes = [16, 64], strides = [1, 1]} : vector<16x82xf32> to vector<16x64xf32>
    %383 = vector.broadcast %58 : vector<1x64xf32> to vector<16x64xf32>
    %384 = arith.mulf %382, %383 : vector<16x64xf32>
    %c8_195 = arith.constant 8 : index
    %c0_196 = arith.constant 0 : index
    %c0_197 = arith.constant 0 : index
    %385 = vector.load %arg9[%c8_195, %c0_196, %c0_197] : memref<9x16x16xbf16, #tpu.memory_space<vmem>>, vector<1x16x16xbf16>
    %386 = vector.shape_cast %385 : vector<1x16x16xbf16> to vector<16x16xbf16>
    %387 = arith.truncf %384 : vector<16x64xf32> to vector<16x64xbf16>
    %cst_198 = arith.constant dense<0.000000e+00> : vector<16x64xf32>
    %388 = tpu.matmul %386, %387, %cst_198 {dimension_numbers = #tpu.dot_dimension_numbers<[1], [0], [0], [1], [0, 0, 1, 1], [], []>} : vector<16x16xbf16>, vector<16x64xbf16>, vector<16x64xf32> -> vector<16x64xf32>
    %389 = arith.addf %381, %388 : vector<16x64xf32>
    %c0_199 = arith.constant 0 : index
    %c0_200 = arith.constant 0 : index
    %390 = vector.load %arg10[%c0_199, %c0_200] : memref<16x1xf32, #tpu.memory_space<vmem>>, vector<16x1xf32>
    %391 = vector.broadcast %390 : vector<16x1xf32> to vector<16x64xf32>
    %392 = arith.addf %389, %391 : vector<16x64xf32>
    %cst_201 = arith.constant 0.000000e+00 : f32
    %393 = vector.broadcast %cst_201 : f32 to vector<16x64xf32>
    %394 = arith.maximumf %392, %393 : vector<16x64xf32>
    %c0_202 = arith.constant 0 : index
    %c9_203 = arith.constant 9 : index
    %395 = vector.load %arg31[%c0_202, %c9_203] : memref<48x82xf32, #tpu.memory_space<vmem>>, vector<16x64xf32>
    tpu.vector_store %arg31[%c0_202, %c9_203], %394 {strides = array<i32>} : memref<48x82xf32, #tpu.memory_space<vmem>>, vector<16x64xf32>,
    %c0_204 = arith.constant 0 : index
    %c0_205 = arith.constant 0 : index
    %396 = vector.load %arg31[%c0_204, %c0_205] : memref<48x82xf32, #tpu.memory_space<vmem>>, vector<16x82xf32>
    %397 = vector.extract_strided_slice %396 {offsets = [0, 9], sizes = [16, 64], strides = [1, 1]} : vector<16x82xf32> to vector<16x64xf32>
    %398 = vector.extract_strided_slice %396 {offsets = [0, 10], sizes = [16, 64], strides = [1, 1]} : vector<16x82xf32> to vector<16x64xf32>
    %399 = arith.maximumf %397, %398 : vector<16x64xf32>
    %400 = vector.extract_strided_slice %396 {offsets = [0, 17], sizes = [16, 64], strides = [1, 1]} : vector<16x82xf32> to vector<16x64xf32>
    %401 = vector.extract_strided_slice %396 {offsets = [0, 18], sizes = [16, 64], strides = [1, 1]} : vector<16x82xf32> to vector<16x64xf32>
    %402 = arith.maximumf %400, %401 : vector<16x64xf32>
    %403 = arith.maximumf %399, %402 : vector<16x64xf32>
    %404 = arith.truncf %403 : vector<16x64xf32> to vector<16x64xbf16>
    %c0_206 = arith.constant 0 : index
    %c0_207 = arith.constant 0 : index
    %405 = vector.load %arg26[%c0_206, %c0_207] : memref<64x16xbf16, #tpu.memory_space<vmem>>, vector<64x16xbf16>
    %cst_208 = arith.constant dense<0.000000e+00> : vector<16x16xf32>
    %406 = tpu.matmul %404, %405, %cst_208 {dimension_numbers = #tpu.dot_dimension_numbers<[1], [0], [0], [1], [0, 0, 1, 1], [], []>} : vector<16x64xbf16>, vector<64x16xbf16>, vector<16x16xf32> -> vector<16x16xf32>
    %c0_209 = arith.constant 0 : index
    %c5_210 = arith.constant 5 : index
    %407 = vector.load %arg32[%c0_209, %c5_210] : memref<32x26xf32, #tpu.memory_space<vmem>>, vector<16x16xf32>
    tpu.vector_store %arg32[%c0_209, %c5_210], %406 {strides = array<i32>} : memref<32x26xf32, #tpu.memory_space<vmem>>, vector<16x16xf32>,
    %c0_211 = arith.constant 0 : index
    %c0_212 = arith.constant 0 : index
    %408 = vector.load %arg32[%c0_211, %c0_212] : memref<32x26xf32, #tpu.memory_space<vmem>>, vector<16x26xf32>
    %cst_213 = arith.constant 0.000000e+00 : f32
    %409 = vector.broadcast %cst_213 : f32 to vector<32x16xf32>
    %410 = vector.extract_strided_slice %408 {offsets = [0, 0], sizes = [16, 16], strides = [1, 1]} : vector<16x26xf32> to vector<16x16xf32>
    %411 = vector.broadcast %79 : vector<1x16xf32> to vector<16x16xf32>
    %412 = arith.mulf %410, %411 : vector<16x16xf32>
    %c0_214 = arith.constant 0 : index
    %c0_215 = arith.constant 0 : index
    %c0_216 = arith.constant 0 : index
    %413 = vector.load %arg11[%c0_214, %c0_215, %c0_216] : memref<9x32x16xbf16, #tpu.memory_space<vmem>>, vector<1x32x16xbf16>
    %414 = vector.shape_cast %413 : vector<1x32x16xbf16> to vector<32x16xbf16>
    %415 = arith.truncf %412 : vector<16x16xf32> to vector<16x16xbf16>
    %cst_217 = arith.constant dense<0.000000e+00> : vector<32x16xf32>
    %416 = tpu.matmul %414, %415, %cst_217 {dimension_numbers = #tpu.dot_dimension_numbers<[1], [0], [0], [1], [0, 0, 1, 1], [], []>} : vector<32x16xbf16>, vector<16x16xbf16>, vector<32x16xf32> -> vector<32x16xf32>
    %417 = arith.addf %409, %416 : vector<32x16xf32>
    %418 = vector.extract_strided_slice %408 {offsets = [0, 1], sizes = [16, 16], strides = [1, 1]} : vector<16x26xf32> to vector<16x16xf32>
    %c1_218 = arith.constant 1 : index
    %c0_219 = arith.constant 0 : index
    %c0_220 = arith.constant 0 : index
    %419 = vector.load %arg11[%c1_218, %c0_219, %c0_220] : memref<9x32x16xbf16, #tpu.memory_space<vmem>>, vector<1x32x16xbf16>
    %420 = vector.shape_cast %419 : vector<1x32x16xbf16> to vector<32x16xbf16>
    %421 = arith.truncf %418 : vector<16x16xf32> to vector<16x16xbf16>
    %cst_221 = arith.constant dense<0.000000e+00> : vector<32x16xf32>
    %422 = tpu.matmul %420, %421, %cst_221 {dimension_numbers = #tpu.dot_dimension_numbers<[1], [0], [0], [1], [0, 0, 1, 1], [], []>} : vector<32x16xbf16>, vector<16x16xbf16>, vector<32x16xf32> -> vector<32x16xf32>
    %423 = arith.addf %417, %422 : vector<32x16xf32>
    %424 = vector.extract_strided_slice %408 {offsets = [0, 2], sizes = [16, 16], strides = [1, 1]} : vector<16x26xf32> to vector<16x16xf32>
    %425 = vector.broadcast %83 : vector<1x16xf32> to vector<16x16xf32>
    %426 = arith.mulf %424, %425 : vector<16x16xf32>
    %c2_222 = arith.constant 2 : index
    %c0_223 = arith.constant 0 : index
    %c0_224 = arith.constant 0 : index
    %427 = vector.load %arg11[%c2_222, %c0_223, %c0_224] : memref<9x32x16xbf16, #tpu.memory_space<vmem>>, vector<1x32x16xbf16>
    %428 = vector.shape_cast %427 : vector<1x32x16xbf16> to vector<32x16xbf16>
    %429 = arith.truncf %426 : vector<16x16xf32> to vector<16x16xbf16>
    %cst_225 = arith.constant dense<0.000000e+00> : vector<32x16xf32>
    %430 = tpu.matmul %428, %429, %cst_225 {dimension_numbers = #tpu.dot_dimension_numbers<[1], [0], [0], [1], [0, 0, 1, 1], [], []>} : vector<32x16xbf16>, vector<16x16xbf16>, vector<32x16xf32> -> vector<32x16xf32>
    %431 = arith.addf %423, %430 : vector<32x16xf32>
    %432 = vector.extract_strided_slice %408 {offsets = [0, 4], sizes = [16, 16], strides = [1, 1]} : vector<16x26xf32> to vector<16x16xf32>
    %433 = vector.broadcast %79 : vector<1x16xf32> to vector<16x16xf32>
    %434 = arith.mulf %432, %433 : vector<16x16xf32>
    %c3_226 = arith.constant 3 : index
    %c0_227 = arith.constant 0 : index
    %c0_228 = arith.constant 0 : index
    %435 = vector.load %arg11[%c3_226, %c0_227, %c0_228] : memref<9x32x16xbf16, #tpu.memory_space<vmem>>, vector<1x32x16xbf16>
    %436 = vector.shape_cast %435 : vector<1x32x16xbf16> to vector<32x16xbf16>
    %437 = arith.truncf %434 : vector<16x16xf32> to vector<16x16xbf16>
    %cst_229 = arith.constant dense<0.000000e+00> : vector<32x16xf32>
    %438 = tpu.matmul %436, %437, %cst_229 {dimension_numbers = #tpu.dot_dimension_numbers<[1], [0], [0], [1], [0, 0, 1, 1], [], []>} : vector<32x16xbf16>, vector<16x16xbf16>, vector<32x16xf32> -> vector<32x16xf32>
    %439 = arith.addf %431, %438 : vector<32x16xf32>
    %440 = vector.extract_strided_slice %408 {offsets = [0, 5], sizes = [16, 16], strides = [1, 1]} : vector<16x26xf32> to vector<16x16xf32>
    %c4_230 = arith.constant 4 : index
    %c0_231 = arith.constant 0 : index
    %c0_232 = arith.constant 0 : index
    %441 = vector.load %arg11[%c4_230, %c0_231, %c0_232] : memref<9x32x16xbf16, #tpu.memory_space<vmem>>, vector<1x32x16xbf16>
    %442 = vector.shape_cast %441 : vector<1x32x16xbf16> to vector<32x16xbf16>
    %443 = arith.truncf %440 : vector<16x16xf32> to vector<16x16xbf16>
    %cst_233 = arith.constant dense<0.000000e+00> : vector<32x16xf32>
    %444 = tpu.matmul %442, %443, %cst_233 {dimension_numbers = #tpu.dot_dimension_numbers<[1], [0], [0], [1], [0, 0, 1, 1], [], []>} : vector<32x16xbf16>, vector<16x16xbf16>, vector<32x16xf32> -> vector<32x16xf32>
    %445 = arith.addf %439, %444 : vector<32x16xf32>
    %446 = vector.extract_strided_slice %408 {offsets = [0, 6], sizes = [16, 16], strides = [1, 1]} : vector<16x26xf32> to vector<16x16xf32>
    %447 = vector.broadcast %83 : vector<1x16xf32> to vector<16x16xf32>
    %448 = arith.mulf %446, %447 : vector<16x16xf32>
    %c5_234 = arith.constant 5 : index
    %c0_235 = arith.constant 0 : index
    %c0_236 = arith.constant 0 : index
    %449 = vector.load %arg11[%c5_234, %c0_235, %c0_236] : memref<9x32x16xbf16, #tpu.memory_space<vmem>>, vector<1x32x16xbf16>
    %450 = vector.shape_cast %449 : vector<1x32x16xbf16> to vector<32x16xbf16>
    %451 = arith.truncf %448 : vector<16x16xf32> to vector<16x16xbf16>
    %cst_237 = arith.constant dense<0.000000e+00> : vector<32x16xf32>
    %452 = tpu.matmul %450, %451, %cst_237 {dimension_numbers = #tpu.dot_dimension_numbers<[1], [0], [0], [1], [0, 0, 1, 1], [], []>} : vector<32x16xbf16>, vector<16x16xbf16>, vector<32x16xf32> -> vector<32x16xf32>
    %453 = arith.addf %445, %452 : vector<32x16xf32>
    %454 = vector.extract_strided_slice %408 {offsets = [0, 8], sizes = [16, 16], strides = [1, 1]} : vector<16x26xf32> to vector<16x16xf32>
    %455 = vector.broadcast %79 : vector<1x16xf32> to vector<16x16xf32>
    %456 = arith.mulf %454, %455 : vector<16x16xf32>
    %c6_238 = arith.constant 6 : index
    %c0_239 = arith.constant 0 : index
    %c0_240 = arith.constant 0 : index
    %457 = vector.load %arg11[%c6_238, %c0_239, %c0_240] : memref<9x32x16xbf16, #tpu.memory_space<vmem>>, vector<1x32x16xbf16>
    %458 = vector.shape_cast %457 : vector<1x32x16xbf16> to vector<32x16xbf16>
    %459 = arith.truncf %456 : vector<16x16xf32> to vector<16x16xbf16>
    %cst_241 = arith.constant dense<0.000000e+00> : vector<32x16xf32>
    %460 = tpu.matmul %458, %459, %cst_241 {dimension_numbers = #tpu.dot_dimension_numbers<[1], [0], [0], [1], [0, 0, 1, 1], [], []>} : vector<32x16xbf16>, vector<16x16xbf16>, vector<32x16xf32> -> vector<32x16xf32>
    %461 = arith.addf %453, %460 : vector<32x16xf32>
    %462 = vector.extract_strided_slice %408 {offsets = [0, 9], sizes = [16, 16], strides = [1, 1]} : vector<16x26xf32> to vector<16x16xf32>
    %c7_242 = arith.constant 7 : index
    %c0_243 = arith.constant 0 : index
    %c0_244 = arith.constant 0 : index
    %463 = vector.load %arg11[%c7_242, %c0_243, %c0_244] : memref<9x32x16xbf16, #tpu.memory_space<vmem>>, vector<1x32x16xbf16>
    %464 = vector.shape_cast %463 : vector<1x32x16xbf16> to vector<32x16xbf16>
    %465 = arith.truncf %462 : vector<16x16xf32> to vector<16x16xbf16>
    %cst_245 = arith.constant dense<0.000000e+00> : vector<32x16xf32>
    %466 = tpu.matmul %464, %465, %cst_245 {dimension_numbers = #tpu.dot_dimension_numbers<[1], [0], [0], [1], [0, 0, 1, 1], [], []>} : vector<32x16xbf16>, vector<16x16xbf16>, vector<32x16xf32> -> vector<32x16xf32>
    %467 = arith.addf %461, %466 : vector<32x16xf32>
    %468 = vector.extract_strided_slice %408 {offsets = [0, 10], sizes = [16, 16], strides = [1, 1]} : vector<16x26xf32> to vector<16x16xf32>
    %469 = vector.broadcast %83 : vector<1x16xf32> to vector<16x16xf32>
    %470 = arith.mulf %468, %469 : vector<16x16xf32>
    %c8_246 = arith.constant 8 : index
    %c0_247 = arith.constant 0 : index
    %c0_248 = arith.constant 0 : index
    %471 = vector.load %arg11[%c8_246, %c0_247, %c0_248] : memref<9x32x16xbf16, #tpu.memory_space<vmem>>, vector<1x32x16xbf16>
    %472 = vector.shape_cast %471 : vector<1x32x16xbf16> to vector<32x16xbf16>
    %473 = arith.truncf %470 : vector<16x16xf32> to vector<16x16xbf16>
    %cst_249 = arith.constant dense<0.000000e+00> : vector<32x16xf32>
    %474 = tpu.matmul %472, %473, %cst_249 {dimension_numbers = #tpu.dot_dimension_numbers<[1], [0], [0], [1], [0, 0, 1, 1], [], []>} : vector<32x16xbf16>, vector<16x16xbf16>, vector<32x16xf32> -> vector<32x16xf32>
    %475 = arith.addf %467, %474 : vector<32x16xf32>
    %c0_250 = arith.constant 0 : index
    %c0_251 = arith.constant 0 : index
    %476 = vector.load %arg12[%c0_250, %c0_251] : memref<32x1xf32, #tpu.memory_space<vmem>>, vector<32x1xf32>
    %477 = vector.broadcast %476 : vector<32x1xf32> to vector<32x16xf32>
    %478 = arith.addf %475, %477 : vector<32x16xf32>
    %cst_252 = arith.constant 0.000000e+00 : f32
    %479 = vector.broadcast %cst_252 : f32 to vector<32x16xf32>
    %480 = arith.maximumf %478, %479 : vector<32x16xf32>
    %c0_253 = arith.constant 0 : index
    %c0_254 = arith.constant 0 : index
    %c0_255 = arith.constant 0 : index
    %481 = vector.load %arg2[%c0_253, %c0_254, %c0_255] : memref<1x32x1xf32, #tpu.memory_space<vmem>>, vector<1x32x1xf32>
    %482 = vector.shape_cast %481 : vector<1x32x1xf32> to vector<32x1xf32>
    %483 = vector.broadcast %482 : vector<32x1xf32> to vector<32x16xf32>
    %484 = arith.addf %480, %483 : vector<32x16xf32>
    %c0_256 = arith.constant 0 : index
    %c5_257 = arith.constant 5 : index
    %485 = vector.load %arg32[%c0_256, %c5_257] : memref<32x26xf32, #tpu.memory_space<vmem>>, vector<32x16xf32>
    tpu.vector_store %arg32[%c0_256, %c5_257], %484 {strides = array<i32>} : memref<32x26xf32, #tpu.memory_space<vmem>>, vector<32x16xf32>,
    %c0_258 = arith.constant 0 : index
    %c0_259 = arith.constant 0 : index
    %486 = vector.load %arg32[%c0_258, %c0_259] : memref<32x26xf32, #tpu.memory_space<vmem>>, vector<32x26xf32>
    %cst_260 = arith.constant 0.000000e+00 : f32
    %487 = vector.broadcast %cst_260 : f32 to vector<32x16xf32>
    %488 = vector.extract_strided_slice %486 {offsets = [0, 0], sizes = [32, 16], strides = [1, 1]} : vector<32x26xf32> to vector<32x16xf32>
    %489 = vector.broadcast %79 : vector<1x16xf32> to vector<32x16xf32>
    %490 = arith.mulf %488, %489 : vector<32x16xf32>
    %c0_261 = arith.constant 0 : index
    %c0_262 = arith.constant 0 : index
    %c0_263 = arith.constant 0 : index
    %491 = vector.load %arg13[%c0_261, %c0_262, %c0_263] : memref<9x32x32xbf16, #tpu.memory_space<vmem>>, vector<1x32x32xbf16>
    %492 = vector.shape_cast %491 : vector<1x32x32xbf16> to vector<32x32xbf16>
    %493 = arith.truncf %490 : vector<32x16xf32> to vector<32x16xbf16>
    %cst_264 = arith.constant dense<0.000000e+00> : vector<32x16xf32>
    %494 = tpu.matmul %492, %493, %cst_264 {dimension_numbers = #tpu.dot_dimension_numbers<[1], [0], [0], [1], [0, 0, 1, 1], [], []>} : vector<32x32xbf16>, vector<32x16xbf16>, vector<32x16xf32> -> vector<32x16xf32>
    %495 = arith.addf %487, %494 : vector<32x16xf32>
    %496 = vector.extract_strided_slice %486 {offsets = [0, 1], sizes = [32, 16], strides = [1, 1]} : vector<32x26xf32> to vector<32x16xf32>
    %c1_265 = arith.constant 1 : index
    %c0_266 = arith.constant 0 : index
    %c0_267 = arith.constant 0 : index
    %497 = vector.load %arg13[%c1_265, %c0_266, %c0_267] : memref<9x32x32xbf16, #tpu.memory_space<vmem>>, vector<1x32x32xbf16>
    %498 = vector.shape_cast %497 : vector<1x32x32xbf16> to vector<32x32xbf16>
    %499 = arith.truncf %496 : vector<32x16xf32> to vector<32x16xbf16>
    %cst_268 = arith.constant dense<0.000000e+00> : vector<32x16xf32>
    %500 = tpu.matmul %498, %499, %cst_268 {dimension_numbers = #tpu.dot_dimension_numbers<[1], [0], [0], [1], [0, 0, 1, 1], [], []>} : vector<32x32xbf16>, vector<32x16xbf16>, vector<32x16xf32> -> vector<32x16xf32>
    %501 = arith.addf %495, %500 : vector<32x16xf32>
    %502 = vector.extract_strided_slice %486 {offsets = [0, 2], sizes = [32, 16], strides = [1, 1]} : vector<32x26xf32> to vector<32x16xf32>
    %503 = vector.broadcast %83 : vector<1x16xf32> to vector<32x16xf32>
    %504 = arith.mulf %502, %503 : vector<32x16xf32>
    %c2_269 = arith.constant 2 : index
    %c0_270 = arith.constant 0 : index
    %c0_271 = arith.constant 0 : index
    %505 = vector.load %arg13[%c2_269, %c0_270, %c0_271] : memref<9x32x32xbf16, #tpu.memory_space<vmem>>, vector<1x32x32xbf16>
    %506 = vector.shape_cast %505 : vector<1x32x32xbf16> to vector<32x32xbf16>
    %507 = arith.truncf %504 : vector<32x16xf32> to vector<32x16xbf16>
    %cst_272 = arith.constant dense<0.000000e+00> : vector<32x16xf32>
    %508 = tpu.matmul %506, %507, %cst_272 {dimension_numbers = #tpu.dot_dimension_numbers<[1], [0], [0], [1], [0, 0, 1, 1], [], []>} : vector<32x32xbf16>, vector<32x16xbf16>, vector<32x16xf32> -> vector<32x16xf32>
    %509 = arith.addf %501, %508 : vector<32x16xf32>
    %510 = vector.extract_strided_slice %486 {offsets = [0, 4], sizes = [32, 16], strides = [1, 1]} : vector<32x26xf32> to vector<32x16xf32>
    %511 = vector.broadcast %79 : vector<1x16xf32> to vector<32x16xf32>
    %512 = arith.mulf %510, %511 : vector<32x16xf32>
    %c3_273 = arith.constant 3 : index
    %c0_274 = arith.constant 0 : index
    %c0_275 = arith.constant 0 : index
    %513 = vector.load %arg13[%c3_273, %c0_274, %c0_275] : memref<9x32x32xbf16, #tpu.memory_space<vmem>>, vector<1x32x32xbf16>
    %514 = vector.shape_cast %513 : vector<1x32x32xbf16> to vector<32x32xbf16>
    %515 = arith.truncf %512 : vector<32x16xf32> to vector<32x16xbf16>
    %cst_276 = arith.constant dense<0.000000e+00> : vector<32x16xf32>
    %516 = tpu.matmul %514, %515, %cst_276 {dimension_numbers = #tpu.dot_dimension_numbers<[1], [0], [0], [1], [0, 0, 1, 1], [], []>} : vector<32x32xbf16>, vector<32x16xbf16>, vector<32x16xf32> -> vector<32x16xf32>
    %517 = arith.addf %509, %516 : vector<32x16xf32>
    %518 = vector.extract_strided_slice %486 {offsets = [0, 5], sizes = [32, 16], strides = [1, 1]} : vector<32x26xf32> to vector<32x16xf32>
    %c4_277 = arith.constant 4 : index
    %c0_278 = arith.constant 0 : index
    %c0_279 = arith.constant 0 : index
    %519 = vector.load %arg13[%c4_277, %c0_278, %c0_279] : memref<9x32x32xbf16, #tpu.memory_space<vmem>>, vector<1x32x32xbf16>
    %520 = vector.shape_cast %519 : vector<1x32x32xbf16> to vector<32x32xbf16>
    %521 = arith.truncf %518 : vector<32x16xf32> to vector<32x16xbf16>
    %cst_280 = arith.constant dense<0.000000e+00> : vector<32x16xf32>
    %522 = tpu.matmul %520, %521, %cst_280 {dimension_numbers = #tpu.dot_dimension_numbers<[1], [0], [0], [1], [0, 0, 1, 1], [], []>} : vector<32x32xbf16>, vector<32x16xbf16>, vector<32x16xf32> -> vector<32x16xf32>
    %523 = arith.addf %517, %522 : vector<32x16xf32>
    %524 = vector.extract_strided_slice %486 {offsets = [0, 6], sizes = [32, 16], strides = [1, 1]} : vector<32x26xf32> to vector<32x16xf32>
    %525 = vector.broadcast %83 : vector<1x16xf32> to vector<32x16xf32>
    %526 = arith.mulf %524, %525 : vector<32x16xf32>
    %c5_281 = arith.constant 5 : index
    %c0_282 = arith.constant 0 : index
    %c0_283 = arith.constant 0 : index
    %527 = vector.load %arg13[%c5_281, %c0_282, %c0_283] : memref<9x32x32xbf16, #tpu.memory_space<vmem>>, vector<1x32x32xbf16>
    %528 = vector.shape_cast %527 : vector<1x32x32xbf16> to vector<32x32xbf16>
    %529 = arith.truncf %526 : vector<32x16xf32> to vector<32x16xbf16>
    %cst_284 = arith.constant dense<0.000000e+00> : vector<32x16xf32>
    %530 = tpu.matmul %528, %529, %cst_284 {dimension_numbers = #tpu.dot_dimension_numbers<[1], [0], [0], [1], [0, 0, 1, 1], [], []>} : vector<32x32xbf16>, vector<32x16xbf16>, vector<32x16xf32> -> vector<32x16xf32>
    %531 = arith.addf %523, %530 : vector<32x16xf32>
    %532 = vector.extract_strided_slice %486 {offsets = [0, 8], sizes = [32, 16], strides = [1, 1]} : vector<32x26xf32> to vector<32x16xf32>
    %533 = vector.broadcast %79 : vector<1x16xf32> to vector<32x16xf32>
    %534 = arith.mulf %532, %533 : vector<32x16xf32>
    %c6_285 = arith.constant 6 : index
    %c0_286 = arith.constant 0 : index
    %c0_287 = arith.constant 0 : index
    %535 = vector.load %arg13[%c6_285, %c0_286, %c0_287] : memref<9x32x32xbf16, #tpu.memory_space<vmem>>, vector<1x32x32xbf16>
    %536 = vector.shape_cast %535 : vector<1x32x32xbf16> to vector<32x32xbf16>
    %537 = arith.truncf %534 : vector<32x16xf32> to vector<32x16xbf16>
    %cst_288 = arith.constant dense<0.000000e+00> : vector<32x16xf32>
    %538 = tpu.matmul %536, %537, %cst_288 {dimension_numbers = #tpu.dot_dimension_numbers<[1], [0], [0], [1], [0, 0, 1, 1], [], []>} : vector<32x32xbf16>, vector<32x16xbf16>, vector<32x16xf32> -> vector<32x16xf32>
    %539 = arith.addf %531, %538 : vector<32x16xf32>
    %540 = vector.extract_strided_slice %486 {offsets = [0, 9], sizes = [32, 16], strides = [1, 1]} : vector<32x26xf32> to vector<32x16xf32>
    %c7_289 = arith.constant 7 : index
    %c0_290 = arith.constant 0 : index
    %c0_291 = arith.constant 0 : index
    %541 = vector.load %arg13[%c7_289, %c0_290, %c0_291] : memref<9x32x32xbf16, #tpu.memory_space<vmem>>, vector<1x32x32xbf16>
    %542 = vector.shape_cast %541 : vector<1x32x32xbf16> to vector<32x32xbf16>
    %543 = arith.truncf %540 : vector<32x16xf32> to vector<32x16xbf16>
    %cst_292 = arith.constant dense<0.000000e+00> : vector<32x16xf32>
    %544 = tpu.matmul %542, %543, %cst_292 {dimension_numbers = #tpu.dot_dimension_numbers<[1], [0], [0], [1], [0, 0, 1, 1], [], []>} : vector<32x32xbf16>, vector<32x16xbf16>, vector<32x16xf32> -> vector<32x16xf32>
    %545 = arith.addf %539, %544 : vector<32x16xf32>
    %546 = vector.extract_strided_slice %486 {offsets = [0, 10], sizes = [32, 16], strides = [1, 1]} : vector<32x26xf32> to vector<32x16xf32>
    %547 = vector.broadcast %83 : vector<1x16xf32> to vector<32x16xf32>
    %548 = arith.mulf %546, %547 : vector<32x16xf32>
    %c8_293 = arith.constant 8 : index
    %c0_294 = arith.constant 0 : index
    %c0_295 = arith.constant 0 : index
    %549 = vector.load %arg13[%c8_293, %c0_294, %c0_295] : memref<9x32x32xbf16, #tpu.memory_space<vmem>>, vector<1x32x32xbf16>
    %550 = vector.shape_cast %549 : vector<1x32x32xbf16> to vector<32x32xbf16>
    %551 = arith.truncf %548 : vector<32x16xf32> to vector<32x16xbf16>
    %cst_296 = arith.constant dense<0.000000e+00> : vector<32x16xf32>
    %552 = tpu.matmul %550, %551, %cst_296 {dimension_numbers = #tpu.dot_dimension_numbers<[1], [0], [0], [1], [0, 0, 1, 1], [], []>} : vector<32x32xbf16>, vector<32x16xbf16>, vector<32x16xf32> -> vector<32x16xf32>
    %553 = arith.addf %545, %552 : vector<32x16xf32>
    %c0_297 = arith.constant 0 : index
    %c0_298 = arith.constant 0 : index
    %554 = vector.load %arg14[%c0_297, %c0_298] : memref<32x1xf32, #tpu.memory_space<vmem>>, vector<32x1xf32>
    %555 = vector.broadcast %554 : vector<32x1xf32> to vector<32x16xf32>
    %556 = arith.addf %553, %555 : vector<32x16xf32>
    %cst_299 = arith.constant 0.000000e+00 : f32
    %557 = vector.broadcast %cst_299 : f32 to vector<32x16xf32>
    %558 = arith.maximumf %556, %557 : vector<32x16xf32>
    %559 = arith.truncf %558 : vector<32x16xf32> to vector<32x16xbf16>
    %c0_300 = arith.constant 0 : index
    %c0_301 = arith.constant 0 : index
    %560 = vector.load %arg27[%c0_300, %c0_301] : memref<16x64xbf16, #tpu.memory_space<vmem>>, vector<16x64xbf16>
    %cst_302 = arith.constant dense<0.000000e+00> : vector<32x64xf32>
    %561 = tpu.matmul %559, %560, %cst_302 {dimension_numbers = #tpu.dot_dimension_numbers<[1], [0], [0], [1], [0, 0, 1, 1], [], []>} : vector<32x16xbf16>, vector<16x64xbf16>, vector<32x64xf32> -> vector<32x64xf32>
    %562 = tpu.concatenate %561, %394 in 0 : vector<32x64xf32>, vector<16x64xf32> -> vector<48x64xf32>
    %c0_303 = arith.constant 0 : index
    %c9_304 = arith.constant 9 : index
    %563 = vector.load %arg31[%c0_303, %c9_304] : memref<48x82xf32, #tpu.memory_space<vmem>>, vector<48x64xf32>
    tpu.vector_store %arg31[%c0_303, %c9_304], %562 {strides = array<i32>} : memref<48x82xf32, #tpu.memory_space<vmem>>, vector<48x64xf32>,
    %c0_305 = arith.constant 0 : index
    %c0_306 = arith.constant 0 : index
    %564 = vector.load %arg31[%c0_305, %c0_306] : memref<48x82xf32, #tpu.memory_space<vmem>>, vector<48x82xf32>
    %cst_307 = arith.constant 0.000000e+00 : f32
    %565 = vector.broadcast %cst_307 : f32 to vector<16x64xf32>
    %566 = vector.extract_strided_slice %564 {offsets = [0, 0], sizes = [48, 64], strides = [1, 1]} : vector<48x82xf32> to vector<48x64xf32>
    %567 = vector.broadcast %54 : vector<1x64xf32> to vector<48x64xf32>
    %568 = arith.mulf %566, %567 : vector<48x64xf32>
    %c0_308 = arith.constant 0 : index
    %c0_309 = arith.constant 0 : index
    %c0_310 = arith.constant 0 : index
    %569 = vector.load %arg15[%c0_308, %c0_309, %c0_310] : memref<9x16x48xbf16, #tpu.memory_space<vmem>>, vector<1x16x48xbf16>
    %570 = vector.shape_cast %569 : vector<1x16x48xbf16> to vector<16x48xbf16>
    %571 = arith.truncf %568 : vector<48x64xf32> to vector<48x64xbf16>
    %cst_311 = arith.constant dense<0.000000e+00> : vector<16x64xf32>
    %572 = tpu.matmul %570, %571, %cst_311 {dimension_numbers = #tpu.dot_dimension_numbers<[1], [0], [0], [1], [0, 0, 1, 1], [], []>} : vector<16x48xbf16>, vector<48x64xbf16>, vector<16x64xf32> -> vector<16x64xf32>
    %573 = arith.addf %565, %572 : vector<16x64xf32>
    %574 = vector.extract_strided_slice %564 {offsets = [0, 1], sizes = [48, 64], strides = [1, 1]} : vector<48x82xf32> to vector<48x64xf32>
    %c1_312 = arith.constant 1 : index
    %c0_313 = arith.constant 0 : index
    %c0_314 = arith.constant 0 : index
    %575 = vector.load %arg15[%c1_312, %c0_313, %c0_314] : memref<9x16x48xbf16, #tpu.memory_space<vmem>>, vector<1x16x48xbf16>
    %576 = vector.shape_cast %575 : vector<1x16x48xbf16> to vector<16x48xbf16>
    %577 = arith.truncf %574 : vector<48x64xf32> to vector<48x64xbf16>
    %cst_315 = arith.constant dense<0.000000e+00> : vector<16x64xf32>
    %578 = tpu.matmul %576, %577, %cst_315 {dimension_numbers = #tpu.dot_dimension_numbers<[1], [0], [0], [1], [0, 0, 1, 1], [], []>} : vector<16x48xbf16>, vector<48x64xbf16>, vector<16x64xf32> -> vector<16x64xf32>
    %579 = arith.addf %573, %578 : vector<16x64xf32>
    %580 = vector.extract_strided_slice %564 {offsets = [0, 2], sizes = [48, 64], strides = [1, 1]} : vector<48x82xf32> to vector<48x64xf32>
    %581 = vector.broadcast %58 : vector<1x64xf32> to vector<48x64xf32>
    %582 = arith.mulf %580, %581 : vector<48x64xf32>
    %c2_316 = arith.constant 2 : index
    %c0_317 = arith.constant 0 : index
    %c0_318 = arith.constant 0 : index
    %583 = vector.load %arg15[%c2_316, %c0_317, %c0_318] : memref<9x16x48xbf16, #tpu.memory_space<vmem>>, vector<1x16x48xbf16>
    %584 = vector.shape_cast %583 : vector<1x16x48xbf16> to vector<16x48xbf16>
    %585 = arith.truncf %582 : vector<48x64xf32> to vector<48x64xbf16>
    %cst_319 = arith.constant dense<0.000000e+00> : vector<16x64xf32>
    %586 = tpu.matmul %584, %585, %cst_319 {dimension_numbers = #tpu.dot_dimension_numbers<[1], [0], [0], [1], [0, 0, 1, 1], [], []>} : vector<16x48xbf16>, vector<48x64xbf16>, vector<16x64xf32> -> vector<16x64xf32>
    %587 = arith.addf %579, %586 : vector<16x64xf32>
    %588 = vector.extract_strided_slice %564 {offsets = [0, 8], sizes = [48, 64], strides = [1, 1]} : vector<48x82xf32> to vector<48x64xf32>
    %589 = vector.broadcast %54 : vector<1x64xf32> to vector<48x64xf32>
    %590 = arith.mulf %588, %589 : vector<48x64xf32>
    %c3_320 = arith.constant 3 : index
    %c0_321 = arith.constant 0 : index
    %c0_322 = arith.constant 0 : index
    %591 = vector.load %arg15[%c3_320, %c0_321, %c0_322] : memref<9x16x48xbf16, #tpu.memory_space<vmem>>, vector<1x16x48xbf16>
    %592 = vector.shape_cast %591 : vector<1x16x48xbf16> to vector<16x48xbf16>
    %593 = arith.truncf %590 : vector<48x64xf32> to vector<48x64xbf16>
    %cst_323 = arith.constant dense<0.000000e+00> : vector<16x64xf32>
    %594 = tpu.matmul %592, %593, %cst_323 {dimension_numbers = #tpu.dot_dimension_numbers<[1], [0], [0], [1], [0, 0, 1, 1], [], []>} : vector<16x48xbf16>, vector<48x64xbf16>, vector<16x64xf32> -> vector<16x64xf32>
    %595 = arith.addf %587, %594 : vector<16x64xf32>
    %596 = vector.extract_strided_slice %564 {offsets = [0, 9], sizes = [48, 64], strides = [1, 1]} : vector<48x82xf32> to vector<48x64xf32>
    %c4_324 = arith.constant 4 : index
    %c0_325 = arith.constant 0 : index
    %c0_326 = arith.constant 0 : index
    %597 = vector.load %arg15[%c4_324, %c0_325, %c0_326] : memref<9x16x48xbf16, #tpu.memory_space<vmem>>, vector<1x16x48xbf16>
    %598 = vector.shape_cast %597 : vector<1x16x48xbf16> to vector<16x48xbf16>
    %599 = arith.truncf %596 : vector<48x64xf32> to vector<48x64xbf16>
    %cst_327 = arith.constant dense<0.000000e+00> : vector<16x64xf32>
    %600 = tpu.matmul %598, %599, %cst_327 {dimension_numbers = #tpu.dot_dimension_numbers<[1], [0], [0], [1], [0, 0, 1, 1], [], []>} : vector<16x48xbf16>, vector<48x64xbf16>, vector<16x64xf32> -> vector<16x64xf32>
    %601 = arith.addf %595, %600 : vector<16x64xf32>
    %602 = vector.extract_strided_slice %564 {offsets = [0, 10], sizes = [48, 64], strides = [1, 1]} : vector<48x82xf32> to vector<48x64xf32>
    %603 = vector.broadcast %58 : vector<1x64xf32> to vector<48x64xf32>
    %604 = arith.mulf %602, %603 : vector<48x64xf32>
    %c5_328 = arith.constant 5 : index
    %c0_329 = arith.constant 0 : index
    %c0_330 = arith.constant 0 : index
    %605 = vector.load %arg15[%c5_328, %c0_329, %c0_330] : memref<9x16x48xbf16, #tpu.memory_space<vmem>>, vector<1x16x48xbf16>
    %606 = vector.shape_cast %605 : vector<1x16x48xbf16> to vector<16x48xbf16>
    %607 = arith.truncf %604 : vector<48x64xf32> to vector<48x64xbf16>
    %cst_331 = arith.constant dense<0.000000e+00> : vector<16x64xf32>
    %608 = tpu.matmul %606, %607, %cst_331 {dimension_numbers = #tpu.dot_dimension_numbers<[1], [0], [0], [1], [0, 0, 1, 1], [], []>} : vector<16x48xbf16>, vector<48x64xbf16>, vector<16x64xf32> -> vector<16x64xf32>
    %609 = arith.addf %601, %608 : vector<16x64xf32>
    %610 = vector.extract_strided_slice %564 {offsets = [0, 16], sizes = [48, 64], strides = [1, 1]} : vector<48x82xf32> to vector<48x64xf32>
    %611 = vector.broadcast %54 : vector<1x64xf32> to vector<48x64xf32>
    %612 = arith.mulf %610, %611 : vector<48x64xf32>
    %c6_332 = arith.constant 6 : index
    %c0_333 = arith.constant 0 : index
    %c0_334 = arith.constant 0 : index
    %613 = vector.load %arg15[%c6_332, %c0_333, %c0_334] : memref<9x16x48xbf16, #tpu.memory_space<vmem>>, vector<1x16x48xbf16>
    %614 = vector.shape_cast %613 : vector<1x16x48xbf16> to vector<16x48xbf16>
    %615 = arith.truncf %612 : vector<48x64xf32> to vector<48x64xbf16>
    %cst_335 = arith.constant dense<0.000000e+00> : vector<16x64xf32>
    %616 = tpu.matmul %614, %615, %cst_335 {dimension_numbers = #tpu.dot_dimension_numbers<[1], [0], [0], [1], [0, 0, 1, 1], [], []>} : vector<16x48xbf16>, vector<48x64xbf16>, vector<16x64xf32> -> vector<16x64xf32>
    %617 = arith.addf %609, %616 : vector<16x64xf32>
    %618 = vector.extract_strided_slice %564 {offsets = [0, 17], sizes = [48, 64], strides = [1, 1]} : vector<48x82xf32> to vector<48x64xf32>
    %c7_336 = arith.constant 7 : index
    %c0_337 = arith.constant 0 : index
    %c0_338 = arith.constant 0 : index
    %619 = vector.load %arg15[%c7_336, %c0_337, %c0_338] : memref<9x16x48xbf16, #tpu.memory_space<vmem>>, vector<1x16x48xbf16>
    %620 = vector.shape_cast %619 : vector<1x16x48xbf16> to vector<16x48xbf16>
    %621 = arith.truncf %618 : vector<48x64xf32> to vector<48x64xbf16>
    %cst_339 = arith.constant dense<0.000000e+00> : vector<16x64xf32>
    %622 = tpu.matmul %620, %621, %cst_339 {dimension_numbers = #tpu.dot_dimension_numbers<[1], [0], [0], [1], [0, 0, 1, 1], [], []>} : vector<16x48xbf16>, vector<48x64xbf16>, vector<16x64xf32> -> vector<16x64xf32>
    %623 = arith.addf %617, %622 : vector<16x64xf32>
    %624 = vector.extract_strided_slice %564 {offsets = [0, 18], sizes = [48, 64], strides = [1, 1]} : vector<48x82xf32> to vector<48x64xf32>
    %625 = vector.broadcast %58 : vector<1x64xf32> to vector<48x64xf32>
    %626 = arith.mulf %624, %625 : vector<48x64xf32>
    %c8_340 = arith.constant 8 : index
    %c0_341 = arith.constant 0 : index
    %c0_342 = arith.constant 0 : index
    %627 = vector.load %arg15[%c8_340, %c0_341, %c0_342] : memref<9x16x48xbf16, #tpu.memory_space<vmem>>, vector<1x16x48xbf16>
    %628 = vector.shape_cast %627 : vector<1x16x48xbf16> to vector<16x48xbf16>
    %629 = arith.truncf %626 : vector<48x64xf32> to vector<48x64xbf16>
    %cst_343 = arith.constant dense<0.000000e+00> : vector<16x64xf32>
    %630 = tpu.matmul %628, %629, %cst_343 {dimension_numbers = #tpu.dot_dimension_numbers<[1], [0], [0], [1], [0, 0, 1, 1], [], []>} : vector<16x48xbf16>, vector<48x64xbf16>, vector<16x64xf32> -> vector<16x64xf32>
    %631 = arith.addf %623, %630 : vector<16x64xf32>
    %c0_344 = arith.constant 0 : index
    %c0_345 = arith.constant 0 : index
    %632 = vector.load %arg16[%c0_344, %c0_345] : memref<16x1xf32, #tpu.memory_space<vmem>>, vector<16x1xf32>
    %633 = vector.broadcast %632 : vector<16x1xf32> to vector<16x64xf32>
    %634 = arith.addf %631, %633 : vector<16x64xf32>
    %cst_346 = arith.constant 0.000000e+00 : f32
    %635 = vector.broadcast %cst_346 : f32 to vector<16x64xf32>
    %636 = arith.maximumf %634, %635 : vector<16x64xf32>
    %c0_347 = arith.constant 0 : index
    %c9_348 = arith.constant 9 : index
    %637 = vector.load %arg31[%c0_347, %c9_348] : memref<48x82xf32, #tpu.memory_space<vmem>>, vector<16x64xf32>
    tpu.vector_store %arg31[%c0_347, %c9_348], %636 {strides = array<i32>} : memref<48x82xf32, #tpu.memory_space<vmem>>, vector<16x64xf32>,
    %c0_349 = arith.constant 0 : index
    %c0_350 = arith.constant 0 : index
    %638 = vector.load %arg31[%c0_349, %c0_350] : memref<48x82xf32, #tpu.memory_space<vmem>>, vector<16x82xf32>
    %cst_351 = arith.constant 0.000000e+00 : f32
    %639 = vector.broadcast %cst_351 : f32 to vector<16x64xf32>
    %640 = vector.extract_strided_slice %638 {offsets = [0, 0], sizes = [16, 64], strides = [1, 1]} : vector<16x82xf32> to vector<16x64xf32>
    %641 = vector.broadcast %54 : vector<1x64xf32> to vector<16x64xf32>
    %642 = arith.mulf %640, %641 : vector<16x64xf32>
    %c0_352 = arith.constant 0 : index
    %c0_353 = arith.constant 0 : index
    %c0_354 = arith.constant 0 : index
    %643 = vector.load %arg17[%c0_352, %c0_353, %c0_354] : memref<9x16x16xbf16, #tpu.memory_space<vmem>>, vector<1x16x16xbf16>
    %644 = vector.shape_cast %643 : vector<1x16x16xbf16> to vector<16x16xbf16>
    %645 = arith.truncf %642 : vector<16x64xf32> to vector<16x64xbf16>
    %cst_355 = arith.constant dense<0.000000e+00> : vector<16x64xf32>
    %646 = tpu.matmul %644, %645, %cst_355 {dimension_numbers = #tpu.dot_dimension_numbers<[1], [0], [0], [1], [0, 0, 1, 1], [], []>} : vector<16x16xbf16>, vector<16x64xbf16>, vector<16x64xf32> -> vector<16x64xf32>
    %647 = arith.addf %639, %646 : vector<16x64xf32>
    %648 = vector.extract_strided_slice %638 {offsets = [0, 1], sizes = [16, 64], strides = [1, 1]} : vector<16x82xf32> to vector<16x64xf32>
    %c1_356 = arith.constant 1 : index
    %c0_357 = arith.constant 0 : index
    %c0_358 = arith.constant 0 : index
    %649 = vector.load %arg17[%c1_356, %c0_357, %c0_358] : memref<9x16x16xbf16, #tpu.memory_space<vmem>>, vector<1x16x16xbf16>
    %650 = vector.shape_cast %649 : vector<1x16x16xbf16> to vector<16x16xbf16>
    %651 = arith.truncf %648 : vector<16x64xf32> to vector<16x64xbf16>
    %cst_359 = arith.constant dense<0.000000e+00> : vector<16x64xf32>
    %652 = tpu.matmul %650, %651, %cst_359 {dimension_numbers = #tpu.dot_dimension_numbers<[1], [0], [0], [1], [0, 0, 1, 1], [], []>} : vector<16x16xbf16>, vector<16x64xbf16>, vector<16x64xf32> -> vector<16x64xf32>
    %653 = arith.addf %647, %652 : vector<16x64xf32>
    %654 = vector.extract_strided_slice %638 {offsets = [0, 2], sizes = [16, 64], strides = [1, 1]} : vector<16x82xf32> to vector<16x64xf32>
    %655 = vector.broadcast %58 : vector<1x64xf32> to vector<16x64xf32>
    %656 = arith.mulf %654, %655 : vector<16x64xf32>
    %c2_360 = arith.constant 2 : index
    %c0_361 = arith.constant 0 : index
    %c0_362 = arith.constant 0 : index
    %657 = vector.load %arg17[%c2_360, %c0_361, %c0_362] : memref<9x16x16xbf16, #tpu.memory_space<vmem>>, vector<1x16x16xbf16>
    %658 = vector.shape_cast %657 : vector<1x16x16xbf16> to vector<16x16xbf16>
    %659 = arith.truncf %656 : vector<16x64xf32> to vector<16x64xbf16>
    %cst_363 = arith.constant dense<0.000000e+00> : vector<16x64xf32>
    %660 = tpu.matmul %658, %659, %cst_363 {dimension_numbers = #tpu.dot_dimension_numbers<[1], [0], [0], [1], [0, 0, 1, 1], [], []>} : vector<16x16xbf16>, vector<16x64xbf16>, vector<16x64xf32> -> vector<16x64xf32>
    %661 = arith.addf %653, %660 : vector<16x64xf32>
    %662 = vector.extract_strided_slice %638 {offsets = [0, 8], sizes = [16, 64], strides = [1, 1]} : vector<16x82xf32> to vector<16x64xf32>
    %663 = vector.broadcast %54 : vector<1x64xf32> to vector<16x64xf32>
    %664 = arith.mulf %662, %663 : vector<16x64xf32>
    %c3_364 = arith.constant 3 : index
    %c0_365 = arith.constant 0 : index
    %c0_366 = arith.constant 0 : index
    %665 = vector.load %arg17[%c3_364, %c0_365, %c0_366] : memref<9x16x16xbf16, #tpu.memory_space<vmem>>, vector<1x16x16xbf16>
    %666 = vector.shape_cast %665 : vector<1x16x16xbf16> to vector<16x16xbf16>
    %667 = arith.truncf %664 : vector<16x64xf32> to vector<16x64xbf16>
    %cst_367 = arith.constant dense<0.000000e+00> : vector<16x64xf32>
    %668 = tpu.matmul %666, %667, %cst_367 {dimension_numbers = #tpu.dot_dimension_numbers<[1], [0], [0], [1], [0, 0, 1, 1], [], []>} : vector<16x16xbf16>, vector<16x64xbf16>, vector<16x64xf32> -> vector<16x64xf32>
    %669 = arith.addf %661, %668 : vector<16x64xf32>
    %670 = vector.extract_strided_slice %638 {offsets = [0, 9], sizes = [16, 64], strides = [1, 1]} : vector<16x82xf32> to vector<16x64xf32>
    %c4_368 = arith.constant 4 : index
    %c0_369 = arith.constant 0 : index
    %c0_370 = arith.constant 0 : index
    %671 = vector.load %arg17[%c4_368, %c0_369, %c0_370] : memref<9x16x16xbf16, #tpu.memory_space<vmem>>, vector<1x16x16xbf16>
    %672 = vector.shape_cast %671 : vector<1x16x16xbf16> to vector<16x16xbf16>
    %673 = arith.truncf %670 : vector<16x64xf32> to vector<16x64xbf16>
    %cst_371 = arith.constant dense<0.000000e+00> : vector<16x64xf32>
    %674 = tpu.matmul %672, %673, %cst_371 {dimension_numbers = #tpu.dot_dimension_numbers<[1], [0], [0], [1], [0, 0, 1, 1], [], []>} : vector<16x16xbf16>, vector<16x64xbf16>, vector<16x64xf32> -> vector<16x64xf32>
    %675 = arith.addf %669, %674 : vector<16x64xf32>
    %676 = vector.extract_strided_slice %638 {offsets = [0, 10], sizes = [16, 64], strides = [1, 1]} : vector<16x82xf32> to vector<16x64xf32>
    %677 = vector.broadcast %58 : vector<1x64xf32> to vector<16x64xf32>
    %678 = arith.mulf %676, %677 : vector<16x64xf32>
    %c5_372 = arith.constant 5 : index
    %c0_373 = arith.constant 0 : index
    %c0_374 = arith.constant 0 : index
    %679 = vector.load %arg17[%c5_372, %c0_373, %c0_374] : memref<9x16x16xbf16, #tpu.memory_space<vmem>>, vector<1x16x16xbf16>
    %680 = vector.shape_cast %679 : vector<1x16x16xbf16> to vector<16x16xbf16>
    %681 = arith.truncf %678 : vector<16x64xf32> to vector<16x64xbf16>
    %cst_375 = arith.constant dense<0.000000e+00> : vector<16x64xf32>
    %682 = tpu.matmul %680, %681, %cst_375 {dimension_numbers = #tpu.dot_dimension_numbers<[1], [0], [0], [1], [0, 0, 1, 1], [], []>} : vector<16x16xbf16>, vector<16x64xbf16>, vector<16x64xf32> -> vector<16x64xf32>
    %683 = arith.addf %675, %682 : vector<16x64xf32>
    %684 = vector.extract_strided_slice %638 {offsets = [0, 16], sizes = [16, 64], strides = [1, 1]} : vector<16x82xf32> to vector<16x64xf32>
    %685 = vector.broadcast %54 : vector<1x64xf32> to vector<16x64xf32>
    %686 = arith.mulf %684, %685 : vector<16x64xf32>
    %c6_376 = arith.constant 6 : index
    %c0_377 = arith.constant 0 : index
    %c0_378 = arith.constant 0 : index
    %687 = vector.load %arg17[%c6_376, %c0_377, %c0_378] : memref<9x16x16xbf16, #tpu.memory_space<vmem>>, vector<1x16x16xbf16>
    %688 = vector.shape_cast %687 : vector<1x16x16xbf16> to vector<16x16xbf16>
    %689 = arith.truncf %686 : vector<16x64xf32> to vector<16x64xbf16>
    %cst_379 = arith.constant dense<0.000000e+00> : vector<16x64xf32>
    %690 = tpu.matmul %688, %689, %cst_379 {dimension_numbers = #tpu.dot_dimension_numbers<[1], [0], [0], [1], [0, 0, 1, 1], [], []>} : vector<16x16xbf16>, vector<16x64xbf16>, vector<16x64xf32> -> vector<16x64xf32>
    %691 = arith.addf %683, %690 : vector<16x64xf32>
    %692 = vector.extract_strided_slice %638 {offsets = [0, 17], sizes = [16, 64], strides = [1, 1]} : vector<16x82xf32> to vector<16x64xf32>
    %c7_380 = arith.constant 7 : index
    %c0_381 = arith.constant 0 : index
    %c0_382 = arith.constant 0 : index
    %693 = vector.load %arg17[%c7_380, %c0_381, %c0_382] : memref<9x16x16xbf16, #tpu.memory_space<vmem>>, vector<1x16x16xbf16>
    %694 = vector.shape_cast %693 : vector<1x16x16xbf16> to vector<16x16xbf16>
    %695 = arith.truncf %692 : vector<16x64xf32> to vector<16x64xbf16>
    %cst_383 = arith.constant dense<0.000000e+00> : vector<16x64xf32>
    %696 = tpu.matmul %694, %695, %cst_383 {dimension_numbers = #tpu.dot_dimension_numbers<[1], [0], [0], [1], [0, 0, 1, 1], [], []>} : vector<16x16xbf16>, vector<16x64xbf16>, vector<16x64xf32> -> vector<16x64xf32>
    %697 = arith.addf %691, %696 : vector<16x64xf32>
    %698 = vector.extract_strided_slice %638 {offsets = [0, 18], sizes = [16, 64], strides = [1, 1]} : vector<16x82xf32> to vector<16x64xf32>
    %699 = vector.broadcast %58 : vector<1x64xf32> to vector<16x64xf32>
    %700 = arith.mulf %698, %699 : vector<16x64xf32>
    %c8_384 = arith.constant 8 : index
    %c0_385 = arith.constant 0 : index
    %c0_386 = arith.constant 0 : index
    %701 = vector.load %arg17[%c8_384, %c0_385, %c0_386] : memref<9x16x16xbf16, #tpu.memory_space<vmem>>, vector<1x16x16xbf16>
    %702 = vector.shape_cast %701 : vector<1x16x16xbf16> to vector<16x16xbf16>
    %703 = arith.truncf %700 : vector<16x64xf32> to vector<16x64xbf16>
    %cst_387 = arith.constant dense<0.000000e+00> : vector<16x64xf32>
    %704 = tpu.matmul %702, %703, %cst_387 {dimension_numbers = #tpu.dot_dimension_numbers<[1], [0], [0], [1], [0, 0, 1, 1], [], []>} : vector<16x16xbf16>, vector<16x64xbf16>, vector<16x64xf32> -> vector<16x64xf32>
    %705 = arith.addf %697, %704 : vector<16x64xf32>
    %c0_388 = arith.constant 0 : index
    %c0_389 = arith.constant 0 : index
    %706 = vector.load %arg18[%c0_388, %c0_389] : memref<16x1xf32, #tpu.memory_space<vmem>>, vector<16x1xf32>
    %707 = vector.broadcast %706 : vector<16x1xf32> to vector<16x64xf32>
    %708 = arith.addf %705, %707 : vector<16x64xf32>
    %cst_390 = arith.constant 0.000000e+00 : f32
    %709 = vector.broadcast %cst_390 : f32 to vector<16x64xf32>
    %710 = arith.maximumf %708, %709 : vector<16x64xf32>
    %711 = arith.truncf %710 : vector<16x64xf32> to vector<16x64xbf16>
    %c0_391 = arith.constant 0 : index
    %c0_392 = arith.constant 0 : index
    %712 = vector.load %arg28[%c0_391, %c0_392] : memref<64x256xbf16, #tpu.memory_space<vmem>>, vector<64x256xbf16>
    %cst_393 = arith.constant dense<0.000000e+00> : vector<16x256xf32>
    %713 = tpu.matmul %711, %712, %cst_393 {dimension_numbers = #tpu.dot_dimension_numbers<[1], [0], [0], [1], [0, 0, 1, 1], [], []>} : vector<16x64xbf16>, vector<64x256xbf16>, vector<16x256xf32> -> vector<16x256xf32>
    %714 = tpu.concatenate %713, %234 in 0 : vector<16x256xf32>, vector<8x256xf32> -> vector<24x256xf32>
    %c0_394 = arith.constant 0 : index
    %c17_395 = arith.constant 17 : index
    %715 = vector.load %arg30[%c0_394, %c17_395] : memref<24x290xf32, #tpu.memory_space<vmem>>, vector<24x256xf32>
    tpu.vector_store %arg30[%c0_394, %c17_395], %714 {strides = array<i32>} : memref<24x290xf32, #tpu.memory_space<vmem>>, vector<24x256xf32>,
    %c0_396 = arith.constant 0 : index
    %c0_397 = arith.constant 0 : index
    %716 = vector.load %arg30[%c0_396, %c0_397] : memref<24x290xf32, #tpu.memory_space<vmem>>, vector<24x290xf32>
    %cst_398 = arith.constant 0.000000e+00 : f32
    %717 = vector.broadcast %cst_398 : f32 to vector<8x256xf32>
    %718 = vector.extract_strided_slice %716 {offsets = [0, 0], sizes = [24, 256], strides = [1, 1]} : vector<24x290xf32> to vector<24x256xf32>
    %719 = vector.broadcast %29 : vector<1x256xf32> to vector<24x256xf32>
    %720 = arith.mulf %718, %719 : vector<24x256xf32>
    %c0_399 = arith.constant 0 : index
    %c0_400 = arith.constant 0 : index
    %c0_401 = arith.constant 0 : index
    %721 = vector.load %arg19[%c0_399, %c0_400, %c0_401] : memref<9x8x24xbf16, #tpu.memory_space<vmem>>, vector<1x8x24xbf16>
    %722 = vector.shape_cast %721 : vector<1x8x24xbf16> to vector<8x24xbf16>
    %723 = arith.truncf %720 : vector<24x256xf32> to vector<24x256xbf16>
    %cst_402 = arith.constant dense<0.000000e+00> : vector<8x256xf32>
    %724 = tpu.matmul %722, %723, %cst_402 {dimension_numbers = #tpu.dot_dimension_numbers<[1], [0], [0], [1], [0, 0, 1, 1], [], []>} : vector<8x24xbf16>, vector<24x256xbf16>, vector<8x256xf32> -> vector<8x256xf32>
    %725 = arith.addf %717, %724 : vector<8x256xf32>
    %726 = vector.extract_strided_slice %716 {offsets = [0, 1], sizes = [24, 256], strides = [1, 1]} : vector<24x290xf32> to vector<24x256xf32>
    %c1_403 = arith.constant 1 : index
    %c0_404 = arith.constant 0 : index
    %c0_405 = arith.constant 0 : index
    %727 = vector.load %arg19[%c1_403, %c0_404, %c0_405] : memref<9x8x24xbf16, #tpu.memory_space<vmem>>, vector<1x8x24xbf16>
    %728 = vector.shape_cast %727 : vector<1x8x24xbf16> to vector<8x24xbf16>
    %729 = arith.truncf %726 : vector<24x256xf32> to vector<24x256xbf16>
    %cst_406 = arith.constant dense<0.000000e+00> : vector<8x256xf32>
    %730 = tpu.matmul %728, %729, %cst_406 {dimension_numbers = #tpu.dot_dimension_numbers<[1], [0], [0], [1], [0, 0, 1, 1], [], []>} : vector<8x24xbf16>, vector<24x256xbf16>, vector<8x256xf32> -> vector<8x256xf32>
    %731 = arith.addf %725, %730 : vector<8x256xf32>
    %732 = vector.extract_strided_slice %716 {offsets = [0, 2], sizes = [24, 256], strides = [1, 1]} : vector<24x290xf32> to vector<24x256xf32>
    %733 = vector.broadcast %33 : vector<1x256xf32> to vector<24x256xf32>
    %734 = arith.mulf %732, %733 : vector<24x256xf32>
    %c2_407 = arith.constant 2 : index
    %c0_408 = arith.constant 0 : index
    %c0_409 = arith.constant 0 : index
    %735 = vector.load %arg19[%c2_407, %c0_408, %c0_409] : memref<9x8x24xbf16, #tpu.memory_space<vmem>>, vector<1x8x24xbf16>
    %736 = vector.shape_cast %735 : vector<1x8x24xbf16> to vector<8x24xbf16>
    %737 = arith.truncf %734 : vector<24x256xf32> to vector<24x256xbf16>
    %cst_410 = arith.constant dense<0.000000e+00> : vector<8x256xf32>
    %738 = tpu.matmul %736, %737, %cst_410 {dimension_numbers = #tpu.dot_dimension_numbers<[1], [0], [0], [1], [0, 0, 1, 1], [], []>} : vector<8x24xbf16>, vector<24x256xbf16>, vector<8x256xf32> -> vector<8x256xf32>
    %739 = arith.addf %731, %738 : vector<8x256xf32>
    %740 = vector.extract_strided_slice %716 {offsets = [0, 16], sizes = [24, 256], strides = [1, 1]} : vector<24x290xf32> to vector<24x256xf32>
    %741 = vector.broadcast %29 : vector<1x256xf32> to vector<24x256xf32>
    %742 = arith.mulf %740, %741 : vector<24x256xf32>
    %c3_411 = arith.constant 3 : index
    %c0_412 = arith.constant 0 : index
    %c0_413 = arith.constant 0 : index
    %743 = vector.load %arg19[%c3_411, %c0_412, %c0_413] : memref<9x8x24xbf16, #tpu.memory_space<vmem>>, vector<1x8x24xbf16>
    %744 = vector.shape_cast %743 : vector<1x8x24xbf16> to vector<8x24xbf16>
    %745 = arith.truncf %742 : vector<24x256xf32> to vector<24x256xbf16>
    %cst_414 = arith.constant dense<0.000000e+00> : vector<8x256xf32>
    %746 = tpu.matmul %744, %745, %cst_414 {dimension_numbers = #tpu.dot_dimension_numbers<[1], [0], [0], [1], [0, 0, 1, 1], [], []>} : vector<8x24xbf16>, vector<24x256xbf16>, vector<8x256xf32> -> vector<8x256xf32>
    %747 = arith.addf %739, %746 : vector<8x256xf32>
    %748 = vector.extract_strided_slice %716 {offsets = [0, 17], sizes = [24, 256], strides = [1, 1]} : vector<24x290xf32> to vector<24x256xf32>
    %c4_415 = arith.constant 4 : index
    %c0_416 = arith.constant 0 : index
    %c0_417 = arith.constant 0 : index
    %749 = vector.load %arg19[%c4_415, %c0_416, %c0_417] : memref<9x8x24xbf16, #tpu.memory_space<vmem>>, vector<1x8x24xbf16>
    %750 = vector.shape_cast %749 : vector<1x8x24xbf16> to vector<8x24xbf16>
    %751 = arith.truncf %748 : vector<24x256xf32> to vector<24x256xbf16>
    %cst_418 = arith.constant dense<0.000000e+00> : vector<8x256xf32>
    %752 = tpu.matmul %750, %751, %cst_418 {dimension_numbers = #tpu.dot_dimension_numbers<[1], [0], [0], [1], [0, 0, 1, 1], [], []>} : vector<8x24xbf16>, vector<24x256xbf16>, vector<8x256xf32> -> vector<8x256xf32>
    %753 = arith.addf %747, %752 : vector<8x256xf32>
    %754 = vector.extract_strided_slice %716 {offsets = [0, 18], sizes = [24, 256], strides = [1, 1]} : vector<24x290xf32> to vector<24x256xf32>
    %755 = vector.broadcast %33 : vector<1x256xf32> to vector<24x256xf32>
    %756 = arith.mulf %754, %755 : vector<24x256xf32>
    %c5_419 = arith.constant 5 : index
    %c0_420 = arith.constant 0 : index
    %c0_421 = arith.constant 0 : index
    %757 = vector.load %arg19[%c5_419, %c0_420, %c0_421] : memref<9x8x24xbf16, #tpu.memory_space<vmem>>, vector<1x8x24xbf16>
    %758 = vector.shape_cast %757 : vector<1x8x24xbf16> to vector<8x24xbf16>
    %759 = arith.truncf %756 : vector<24x256xf32> to vector<24x256xbf16>
    %cst_422 = arith.constant dense<0.000000e+00> : vector<8x256xf32>
    %760 = tpu.matmul %758, %759, %cst_422 {dimension_numbers = #tpu.dot_dimension_numbers<[1], [0], [0], [1], [0, 0, 1, 1], [], []>} : vector<8x24xbf16>, vector<24x256xbf16>, vector<8x256xf32> -> vector<8x256xf32>
    %761 = arith.addf %753, %760 : vector<8x256xf32>
    %762 = vector.extract_strided_slice %716 {offsets = [0, 32], sizes = [24, 256], strides = [1, 1]} : vector<24x290xf32> to vector<24x256xf32>
    %763 = vector.broadcast %29 : vector<1x256xf32> to vector<24x256xf32>
    %764 = arith.mulf %762, %763 : vector<24x256xf32>
    %c6_423 = arith.constant 6 : index
    %c0_424 = arith.constant 0 : index
    %c0_425 = arith.constant 0 : index
    %765 = vector.load %arg19[%c6_423, %c0_424, %c0_425] : memref<9x8x24xbf16, #tpu.memory_space<vmem>>, vector<1x8x24xbf16>
    %766 = vector.shape_cast %765 : vector<1x8x24xbf16> to vector<8x24xbf16>
    %767 = arith.truncf %764 : vector<24x256xf32> to vector<24x256xbf16>
    %cst_426 = arith.constant dense<0.000000e+00> : vector<8x256xf32>
    %768 = tpu.matmul %766, %767, %cst_426 {dimension_numbers = #tpu.dot_dimension_numbers<[1], [0], [0], [1], [0, 0, 1, 1], [], []>} : vector<8x24xbf16>, vector<24x256xbf16>, vector<8x256xf32> -> vector<8x256xf32>
    %769 = arith.addf %761, %768 : vector<8x256xf32>
    %770 = vector.extract_strided_slice %716 {offsets = [0, 33], sizes = [24, 256], strides = [1, 1]} : vector<24x290xf32> to vector<24x256xf32>
    %c7_427 = arith.constant 7 : index
    %c0_428 = arith.constant 0 : index
    %c0_429 = arith.constant 0 : index
    %771 = vector.load %arg19[%c7_427, %c0_428, %c0_429] : memref<9x8x24xbf16, #tpu.memory_space<vmem>>, vector<1x8x24xbf16>
    %772 = vector.shape_cast %771 : vector<1x8x24xbf16> to vector<8x24xbf16>
    %773 = arith.truncf %770 : vector<24x256xf32> to vector<24x256xbf16>
    %cst_430 = arith.constant dense<0.000000e+00> : vector<8x256xf32>
    %774 = tpu.matmul %772, %773, %cst_430 {dimension_numbers = #tpu.dot_dimension_numbers<[1], [0], [0], [1], [0, 0, 1, 1], [], []>} : vector<8x24xbf16>, vector<24x256xbf16>, vector<8x256xf32> -> vector<8x256xf32>
    %775 = arith.addf %769, %774 : vector<8x256xf32>
    %776 = vector.extract_strided_slice %716 {offsets = [0, 34], sizes = [24, 256], strides = [1, 1]} : vector<24x290xf32> to vector<24x256xf32>
    %777 = vector.broadcast %33 : vector<1x256xf32> to vector<24x256xf32>
    %778 = arith.mulf %776, %777 : vector<24x256xf32>
    %c8_431 = arith.constant 8 : index
    %c0_432 = arith.constant 0 : index
    %c0_433 = arith.constant 0 : index
    %779 = vector.load %arg19[%c8_431, %c0_432, %c0_433] : memref<9x8x24xbf16, #tpu.memory_space<vmem>>, vector<1x8x24xbf16>
    %780 = vector.shape_cast %779 : vector<1x8x24xbf16> to vector<8x24xbf16>
    %781 = arith.truncf %778 : vector<24x256xf32> to vector<24x256xbf16>
    %cst_434 = arith.constant dense<0.000000e+00> : vector<8x256xf32>
    %782 = tpu.matmul %780, %781, %cst_434 {dimension_numbers = #tpu.dot_dimension_numbers<[1], [0], [0], [1], [0, 0, 1, 1], [], []>} : vector<8x24xbf16>, vector<24x256xbf16>, vector<8x256xf32> -> vector<8x256xf32>
    %783 = arith.addf %775, %782 : vector<8x256xf32>
    %c0_435 = arith.constant 0 : index
    %c0_436 = arith.constant 0 : index
    %784 = vector.load %arg20[%c0_435, %c0_436] : memref<8x1xf32, #tpu.memory_space<vmem>>, vector<8x1xf32>
    %785 = vector.broadcast %784 : vector<8x1xf32> to vector<8x256xf32>
    %786 = arith.addf %783, %785 : vector<8x256xf32>
    %cst_437 = arith.constant 0.000000e+00 : f32
    %787 = vector.broadcast %cst_437 : f32 to vector<8x256xf32>
    %788 = arith.maximumf %786, %787 : vector<8x256xf32>
    %c0_438 = arith.constant 0 : index
    %c17_439 = arith.constant 17 : index
    %789 = vector.load %arg30[%c0_438, %c17_439] : memref<24x290xf32, #tpu.memory_space<vmem>>, vector<8x256xf32>
    tpu.vector_store %arg30[%c0_438, %c17_439], %788 {strides = array<i32>} : memref<24x290xf32, #tpu.memory_space<vmem>>, vector<8x256xf32>,
    %c0_440 = arith.constant 0 : index
    %c0_441 = arith.constant 0 : index
    %790 = vector.load %arg30[%c0_440, %c0_441] : memref<24x290xf32, #tpu.memory_space<vmem>>, vector<8x290xf32>
    %cst_442 = arith.constant 0.000000e+00 : f32
    %791 = vector.broadcast %cst_442 : f32 to vector<8x256xf32>
    %792 = vector.extract_strided_slice %790 {offsets = [0, 0], sizes = [8, 256], strides = [1, 1]} : vector<8x290xf32> to vector<8x256xf32>
    %793 = vector.broadcast %29 : vector<1x256xf32> to vector<8x256xf32>
    %794 = arith.mulf %792, %793 : vector<8x256xf32>
    %c0_443 = arith.constant 0 : index
    %c0_444 = arith.constant 0 : index
    %c0_445 = arith.constant 0 : index
    %795 = vector.load %arg21[%c0_443, %c0_444, %c0_445] : memref<9x8x8xbf16, #tpu.memory_space<vmem>>, vector<1x8x8xbf16>
    %796 = vector.shape_cast %795 : vector<1x8x8xbf16> to vector<8x8xbf16>
    %797 = arith.truncf %794 : vector<8x256xf32> to vector<8x256xbf16>
    %cst_446 = arith.constant dense<0.000000e+00> : vector<8x256xf32>
    %798 = tpu.matmul %796, %797, %cst_446 {dimension_numbers = #tpu.dot_dimension_numbers<[1], [0], [0], [1], [0, 0, 1, 1], [], []>} : vector<8x8xbf16>, vector<8x256xbf16>, vector<8x256xf32> -> vector<8x256xf32>
    %799 = arith.addf %791, %798 : vector<8x256xf32>
    %800 = vector.extract_strided_slice %790 {offsets = [0, 1], sizes = [8, 256], strides = [1, 1]} : vector<8x290xf32> to vector<8x256xf32>
    %c1_447 = arith.constant 1 : index
    %c0_448 = arith.constant 0 : index
    %c0_449 = arith.constant 0 : index
    %801 = vector.load %arg21[%c1_447, %c0_448, %c0_449] : memref<9x8x8xbf16, #tpu.memory_space<vmem>>, vector<1x8x8xbf16>
    %802 = vector.shape_cast %801 : vector<1x8x8xbf16> to vector<8x8xbf16>
    %803 = arith.truncf %800 : vector<8x256xf32> to vector<8x256xbf16>
    %cst_450 = arith.constant dense<0.000000e+00> : vector<8x256xf32>
    %804 = tpu.matmul %802, %803, %cst_450 {dimension_numbers = #tpu.dot_dimension_numbers<[1], [0], [0], [1], [0, 0, 1, 1], [], []>} : vector<8x8xbf16>, vector<8x256xbf16>, vector<8x256xf32> -> vector<8x256xf32>
    %805 = arith.addf %799, %804 : vector<8x256xf32>
    %806 = vector.extract_strided_slice %790 {offsets = [0, 2], sizes = [8, 256], strides = [1, 1]} : vector<8x290xf32> to vector<8x256xf32>
    %807 = vector.broadcast %33 : vector<1x256xf32> to vector<8x256xf32>
    %808 = arith.mulf %806, %807 : vector<8x256xf32>
    %c2_451 = arith.constant 2 : index
    %c0_452 = arith.constant 0 : index
    %c0_453 = arith.constant 0 : index
    %809 = vector.load %arg21[%c2_451, %c0_452, %c0_453] : memref<9x8x8xbf16, #tpu.memory_space<vmem>>, vector<1x8x8xbf16>
    %810 = vector.shape_cast %809 : vector<1x8x8xbf16> to vector<8x8xbf16>
    %811 = arith.truncf %808 : vector<8x256xf32> to vector<8x256xbf16>
    %cst_454 = arith.constant dense<0.000000e+00> : vector<8x256xf32>
    %812 = tpu.matmul %810, %811, %cst_454 {dimension_numbers = #tpu.dot_dimension_numbers<[1], [0], [0], [1], [0, 0, 1, 1], [], []>} : vector<8x8xbf16>, vector<8x256xbf16>, vector<8x256xf32> -> vector<8x256xf32>
    %813 = arith.addf %805, %812 : vector<8x256xf32>
    %814 = vector.extract_strided_slice %790 {offsets = [0, 16], sizes = [8, 256], strides = [1, 1]} : vector<8x290xf32> to vector<8x256xf32>
    %815 = vector.broadcast %29 : vector<1x256xf32> to vector<8x256xf32>
    %816 = arith.mulf %814, %815 : vector<8x256xf32>
    %c3_455 = arith.constant 3 : index
    %c0_456 = arith.constant 0 : index
    %c0_457 = arith.constant 0 : index
    %817 = vector.load %arg21[%c3_455, %c0_456, %c0_457] : memref<9x8x8xbf16, #tpu.memory_space<vmem>>, vector<1x8x8xbf16>
    %818 = vector.shape_cast %817 : vector<1x8x8xbf16> to vector<8x8xbf16>
    %819 = arith.truncf %816 : vector<8x256xf32> to vector<8x256xbf16>
    %cst_458 = arith.constant dense<0.000000e+00> : vector<8x256xf32>
    %820 = tpu.matmul %818, %819, %cst_458 {dimension_numbers = #tpu.dot_dimension_numbers<[1], [0], [0], [1], [0, 0, 1, 1], [], []>} : vector<8x8xbf16>, vector<8x256xbf16>, vector<8x256xf32> -> vector<8x256xf32>
    %821 = arith.addf %813, %820 : vector<8x256xf32>
    %822 = vector.extract_strided_slice %790 {offsets = [0, 17], sizes = [8, 256], strides = [1, 1]} : vector<8x290xf32> to vector<8x256xf32>
    %c4_459 = arith.constant 4 : index
    %c0_460 = arith.constant 0 : index
    %c0_461 = arith.constant 0 : index
    %823 = vector.load %arg21[%c4_459, %c0_460, %c0_461] : memref<9x8x8xbf16, #tpu.memory_space<vmem>>, vector<1x8x8xbf16>
    %824 = vector.shape_cast %823 : vector<1x8x8xbf16> to vector<8x8xbf16>
    %825 = arith.truncf %822 : vector<8x256xf32> to vector<8x256xbf16>
    %cst_462 = arith.constant dense<0.000000e+00> : vector<8x256xf32>
    %826 = tpu.matmul %824, %825, %cst_462 {dimension_numbers = #tpu.dot_dimension_numbers<[1], [0], [0], [1], [0, 0, 1, 1], [], []>} : vector<8x8xbf16>, vector<8x256xbf16>, vector<8x256xf32> -> vector<8x256xf32>
    %827 = arith.addf %821, %826 : vector<8x256xf32>
    %828 = vector.extract_strided_slice %790 {offsets = [0, 18], sizes = [8, 256], strides = [1, 1]} : vector<8x290xf32> to vector<8x256xf32>
    %829 = vector.broadcast %33 : vector<1x256xf32> to vector<8x256xf32>
    %830 = arith.mulf %828, %829 : vector<8x256xf32>
    %c5_463 = arith.constant 5 : index
    %c0_464 = arith.constant 0 : index
    %c0_465 = arith.constant 0 : index
    %831 = vector.load %arg21[%c5_463, %c0_464, %c0_465] : memref<9x8x8xbf16, #tpu.memory_space<vmem>>, vector<1x8x8xbf16>
    %832 = vector.shape_cast %831 : vector<1x8x8xbf16> to vector<8x8xbf16>
    %833 = arith.truncf %830 : vector<8x256xf32> to vector<8x256xbf16>
    %cst_466 = arith.constant dense<0.000000e+00> : vector<8x256xf32>
    %834 = tpu.matmul %832, %833, %cst_466 {dimension_numbers = #tpu.dot_dimension_numbers<[1], [0], [0], [1], [0, 0, 1, 1], [], []>} : vector<8x8xbf16>, vector<8x256xbf16>, vector<8x256xf32> -> vector<8x256xf32>
    %835 = arith.addf %827, %834 : vector<8x256xf32>
    %836 = vector.extract_strided_slice %790 {offsets = [0, 32], sizes = [8, 256], strides = [1, 1]} : vector<8x290xf32> to vector<8x256xf32>
    %837 = vector.broadcast %29 : vector<1x256xf32> to vector<8x256xf32>
    %838 = arith.mulf %836, %837 : vector<8x256xf32>
    %c6_467 = arith.constant 6 : index
    %c0_468 = arith.constant 0 : index
    %c0_469 = arith.constant 0 : index
    %839 = vector.load %arg21[%c6_467, %c0_468, %c0_469] : memref<9x8x8xbf16, #tpu.memory_space<vmem>>, vector<1x8x8xbf16>
    %840 = vector.shape_cast %839 : vector<1x8x8xbf16> to vector<8x8xbf16>
    %841 = arith.truncf %838 : vector<8x256xf32> to vector<8x256xbf16>
    %cst_470 = arith.constant dense<0.000000e+00> : vector<8x256xf32>
    %842 = tpu.matmul %840, %841, %cst_470 {dimension_numbers = #tpu.dot_dimension_numbers<[1], [0], [0], [1], [0, 0, 1, 1], [], []>} : vector<8x8xbf16>, vector<8x256xbf16>, vector<8x256xf32> -> vector<8x256xf32>
    %843 = arith.addf %835, %842 : vector<8x256xf32>
    %844 = vector.extract_strided_slice %790 {offsets = [0, 33], sizes = [8, 256], strides = [1, 1]} : vector<8x290xf32> to vector<8x256xf32>
    %c7_471 = arith.constant 7 : index
    %c0_472 = arith.constant 0 : index
    %c0_473 = arith.constant 0 : index
    %845 = vector.load %arg21[%c7_471, %c0_472, %c0_473] : memref<9x8x8xbf16, #tpu.memory_space<vmem>>, vector<1x8x8xbf16>
    %846 = vector.shape_cast %845 : vector<1x8x8xbf16> to vector<8x8xbf16>
    %847 = arith.truncf %844 : vector<8x256xf32> to vector<8x256xbf16>
    %cst_474 = arith.constant dense<0.000000e+00> : vector<8x256xf32>
    %848 = tpu.matmul %846, %847, %cst_474 {dimension_numbers = #tpu.dot_dimension_numbers<[1], [0], [0], [1], [0, 0, 1, 1], [], []>} : vector<8x8xbf16>, vector<8x256xbf16>, vector<8x256xf32> -> vector<8x256xf32>
    %849 = arith.addf %843, %848 : vector<8x256xf32>
    %850 = vector.extract_strided_slice %790 {offsets = [0, 34], sizes = [8, 256], strides = [1, 1]} : vector<8x290xf32> to vector<8x256xf32>
    %851 = vector.broadcast %33 : vector<1x256xf32> to vector<8x256xf32>
    %852 = arith.mulf %850, %851 : vector<8x256xf32>
    %c8_475 = arith.constant 8 : index
    %c0_476 = arith.constant 0 : index
    %c0_477 = arith.constant 0 : index
    %853 = vector.load %arg21[%c8_475, %c0_476, %c0_477] : memref<9x8x8xbf16, #tpu.memory_space<vmem>>, vector<1x8x8xbf16>
    %854 = vector.shape_cast %853 : vector<1x8x8xbf16> to vector<8x8xbf16>
    %855 = arith.truncf %852 : vector<8x256xf32> to vector<8x256xbf16>
    %cst_478 = arith.constant dense<0.000000e+00> : vector<8x256xf32>
    %856 = tpu.matmul %854, %855, %cst_478 {dimension_numbers = #tpu.dot_dimension_numbers<[1], [0], [0], [1], [0, 0, 1, 1], [], []>} : vector<8x8xbf16>, vector<8x256xbf16>, vector<8x256xf32> -> vector<8x256xf32>
    %857 = arith.addf %849, %856 : vector<8x256xf32>
    %c0_479 = arith.constant 0 : index
    %c0_480 = arith.constant 0 : index
    %858 = vector.load %arg22[%c0_479, %c0_480] : memref<8x1xf32, #tpu.memory_space<vmem>>, vector<8x1xf32>
    %859 = vector.broadcast %858 : vector<8x1xf32> to vector<8x256xf32>
    %860 = arith.addf %857, %859 : vector<8x256xf32>
    %cst_481 = arith.constant 0.000000e+00 : f32
    %861 = vector.broadcast %cst_481 : f32 to vector<8x256xf32>
    %862 = arith.maximumf %860, %861 : vector<8x256xf32>
    %c0_482 = arith.constant 0 : index
    %c0_483 = arith.constant 0 : index
    %863 = vector.load %arg23[%c0_482, %c0_483] : memref<1x8xbf16, #tpu.memory_space<vmem>>, vector<1x8xbf16>
    %864 = arith.truncf %862 : vector<8x256xf32> to vector<8x256xbf16>
    %cst_484 = arith.constant dense<0.000000e+00> : vector<1x256xf32>
    %865 = tpu.matmul %863, %864, %cst_484 {dimension_numbers = #tpu.dot_dimension_numbers<[1], [0], [0], [1], [0, 0, 1, 1], [], []>} : vector<1x8xbf16>, vector<8x256xbf16>, vector<1x256xf32> -> vector<1x256xf32>
    %c0_485 = arith.constant 0 : index
    %c0_486 = arith.constant 0 : index
    %866 = vector.load %arg24[%c0_485, %c0_486] : memref<1x1xf32, #tpu.memory_space<vmem>>, vector<1x1xf32>
    %867 = vector.broadcast %866 : vector<1x1xf32> to vector<1x256xf32>
    %868 = arith.addf %865, %867 : vector<1x256xf32>
    %c0_487 = arith.constant 0 : index
    %c0_488 = arith.constant 0 : index
    %c0_489 = arith.constant 0 : index
    %869 = vector.load %arg29[%c0_487, %c0_488, %c0_489] : memref<1x1x256xf32, #tpu.memory_space<vmem>>, vector<1x1x256xf32>
    %870 = vector.shape_cast %869 : vector<1x1x256xf32> to vector<1x256xf32>
    %871 = vector.shape_cast %868 : vector<1x256xf32> to vector<1x1x256xf32>
    tpu.vector_store %arg29[%c0_487, %c0_488, %c0_489], %871 {strides = array<i32>} : memref<1x1x256xf32, #tpu.memory_space<vmem>>, vector<1x1x256xf32>,
    return
  }
  func.func @transform_0(%arg0: i32) -> (i32, i32, i32) {
    %c0_i32 = arith.constant 0 : i32
    %c0_i32_0 = arith.constant 0 : i32
    %c0_i32_1 = arith.constant 0 : i32
    return %arg0, %c0_i32, %c0_i32_0 : i32, i32, i32
  }
  func.func @transform_1(%arg0: i32) -> (i32, i32, i32) {
    %c0_i32 = arith.constant 0 : i32
    %c0_i32_0 = arith.constant 0 : i32
    %c0_i32_1 = arith.constant 0 : i32
    return %arg0, %c0_i32, %c0_i32_0 : i32, i32, i32
  }
  func.func @transform_2(%arg0: i32) -> (i32, i32, i32) {
    %c0_i32 = arith.constant 0 : i32
    %c0_i32_0 = arith.constant 0 : i32
    %c0_i32_1 = arith.constant 0 : i32
    %c0_i32_2 = arith.constant 0 : i32
    return %c0_i32, %c0_i32_0, %c0_i32_1 : i32, i32, i32
  }
  func.func @transform_3(%arg0: i32) -> (i32, i32) {
    %c0_i32 = arith.constant 0 : i32
    %c0_i32_0 = arith.constant 0 : i32
    %c0_i32_1 = arith.constant 0 : i32
    return %c0_i32, %c0_i32_0 : i32, i32
  }
  func.func @transform_4(%arg0: i32) -> (i32, i32, i32) {
    %c0_i32 = arith.constant 0 : i32
    %c0_i32_0 = arith.constant 0 : i32
    %c0_i32_1 = arith.constant 0 : i32
    %c0_i32_2 = arith.constant 0 : i32
    return %c0_i32, %c0_i32_0, %c0_i32_1 : i32, i32, i32
  }
  func.func @transform_5(%arg0: i32) -> (i32, i32) {
    %c0_i32 = arith.constant 0 : i32
    %c0_i32_0 = arith.constant 0 : i32
    %c0_i32_1 = arith.constant 0 : i32
    return %c0_i32, %c0_i32_0 : i32, i32
  }
  func.func @transform_6(%arg0: i32) -> (i32, i32, i32) {
    %c0_i32 = arith.constant 0 : i32
    %c0_i32_0 = arith.constant 0 : i32
    %c0_i32_1 = arith.constant 0 : i32
    %c0_i32_2 = arith.constant 0 : i32
    return %c0_i32, %c0_i32_0, %c0_i32_1 : i32, i32, i32
  }
  func.func @transform_7(%arg0: i32) -> (i32, i32) {
    %c0_i32 = arith.constant 0 : i32
    %c0_i32_0 = arith.constant 0 : i32
    %c0_i32_1 = arith.constant 0 : i32
    return %c0_i32, %c0_i32_0 : i32, i32
  }
  func.func @transform_8(%arg0: i32) -> (i32, i32, i32) {
    %c0_i32 = arith.constant 0 : i32
    %c0_i32_0 = arith.constant 0 : i32
    %c0_i32_1 = arith.constant 0 : i32
    %c0_i32_2 = arith.constant 0 : i32
    return %c0_i32, %c0_i32_0, %c0_i32_1 : i32, i32, i32
  }
  func.func @transform_9(%arg0: i32) -> (i32, i32) {
    %c0_i32 = arith.constant 0 : i32
    %c0_i32_0 = arith.constant 0 : i32
    %c0_i32_1 = arith.constant 0 : i32
    return %c0_i32, %c0_i32_0 : i32, i32
  }
  func.func @transform_10(%arg0: i32) -> (i32, i32, i32) {
    %c0_i32 = arith.constant 0 : i32
    %c0_i32_0 = arith.constant 0 : i32
    %c0_i32_1 = arith.constant 0 : i32
    %c0_i32_2 = arith.constant 0 : i32
    return %c0_i32, %c0_i32_0, %c0_i32_1 : i32, i32, i32
  }
  func.func @transform_11(%arg0: i32) -> (i32, i32) {
    %c0_i32 = arith.constant 0 : i32
    %c0_i32_0 = arith.constant 0 : i32
    %c0_i32_1 = arith.constant 0 : i32
    return %c0_i32, %c0_i32_0 : i32, i32
  }
  func.func @transform_12(%arg0: i32) -> (i32, i32, i32) {
    %c0_i32 = arith.constant 0 : i32
    %c0_i32_0 = arith.constant 0 : i32
    %c0_i32_1 = arith.constant 0 : i32
    %c0_i32_2 = arith.constant 0 : i32
    return %c0_i32, %c0_i32_0, %c0_i32_1 : i32, i32, i32
  }
  func.func @transform_13(%arg0: i32) -> (i32, i32) {
    %c0_i32 = arith.constant 0 : i32
    %c0_i32_0 = arith.constant 0 : i32
    %c0_i32_1 = arith.constant 0 : i32
    return %c0_i32, %c0_i32_0 : i32, i32
  }
  func.func @transform_14(%arg0: i32) -> (i32, i32, i32) {
    %c0_i32 = arith.constant 0 : i32
    %c0_i32_0 = arith.constant 0 : i32
    %c0_i32_1 = arith.constant 0 : i32
    %c0_i32_2 = arith.constant 0 : i32
    return %c0_i32, %c0_i32_0, %c0_i32_1 : i32, i32, i32
  }
  func.func @transform_15(%arg0: i32) -> (i32, i32) {
    %c0_i32 = arith.constant 0 : i32
    %c0_i32_0 = arith.constant 0 : i32
    %c0_i32_1 = arith.constant 0 : i32
    return %c0_i32, %c0_i32_0 : i32, i32
  }
  func.func @transform_16(%arg0: i32) -> (i32, i32, i32) {
    %c0_i32 = arith.constant 0 : i32
    %c0_i32_0 = arith.constant 0 : i32
    %c0_i32_1 = arith.constant 0 : i32
    %c0_i32_2 = arith.constant 0 : i32
    return %c0_i32, %c0_i32_0, %c0_i32_1 : i32, i32, i32
  }
  func.func @transform_17(%arg0: i32) -> (i32, i32) {
    %c0_i32 = arith.constant 0 : i32
    %c0_i32_0 = arith.constant 0 : i32
    %c0_i32_1 = arith.constant 0 : i32
    return %c0_i32, %c0_i32_0 : i32, i32
  }
  func.func @transform_18(%arg0: i32) -> (i32, i32, i32) {
    %c0_i32 = arith.constant 0 : i32
    %c0_i32_0 = arith.constant 0 : i32
    %c0_i32_1 = arith.constant 0 : i32
    %c0_i32_2 = arith.constant 0 : i32
    return %c0_i32, %c0_i32_0, %c0_i32_1 : i32, i32, i32
  }
  func.func @transform_19(%arg0: i32) -> (i32, i32) {
    %c0_i32 = arith.constant 0 : i32
    %c0_i32_0 = arith.constant 0 : i32
    %c0_i32_1 = arith.constant 0 : i32
    return %c0_i32, %c0_i32_0 : i32, i32
  }
  func.func @transform_20(%arg0: i32) -> (i32, i32, i32) {
    %c0_i32 = arith.constant 0 : i32
    %c0_i32_0 = arith.constant 0 : i32
    %c0_i32_1 = arith.constant 0 : i32
    %c0_i32_2 = arith.constant 0 : i32
    return %c0_i32, %c0_i32_0, %c0_i32_1 : i32, i32, i32
  }
  func.func @transform_21(%arg0: i32) -> (i32, i32) {
    %c0_i32 = arith.constant 0 : i32
    %c0_i32_0 = arith.constant 0 : i32
    %c0_i32_1 = arith.constant 0 : i32
    return %c0_i32, %c0_i32_0 : i32, i32
  }
  func.func @transform_22(%arg0: i32) -> (i32, i32) {
    %c0_i32 = arith.constant 0 : i32
    %c0_i32_0 = arith.constant 0 : i32
    %c0_i32_1 = arith.constant 0 : i32
    return %c0_i32, %c0_i32_0 : i32, i32
  }
  func.func @transform_23(%arg0: i32) -> (i32, i32) {
    %c0_i32 = arith.constant 0 : i32
    %c0_i32_0 = arith.constant 0 : i32
    %c0_i32_1 = arith.constant 0 : i32
    return %c0_i32, %c0_i32_0 : i32, i32
  }
  func.func @transform_24(%arg0: i32) -> (i32, i32) {
    %c0_i32 = arith.constant 0 : i32
    %c0_i32_0 = arith.constant 0 : i32
    %c0_i32_1 = arith.constant 0 : i32
    return %c0_i32, %c0_i32_0 : i32, i32
  }
  func.func @transform_25(%arg0: i32) -> (i32, i32) {
    %c0_i32 = arith.constant 0 : i32
    %c0_i32_0 = arith.constant 0 : i32
    %c0_i32_1 = arith.constant 0 : i32
    return %c0_i32, %c0_i32_0 : i32, i32
  }
  func.func @transform_26(%arg0: i32) -> (i32, i32) {
    %c0_i32 = arith.constant 0 : i32
    %c0_i32_0 = arith.constant 0 : i32
    %c0_i32_1 = arith.constant 0 : i32
    return %c0_i32, %c0_i32_0 : i32, i32
  }
  func.func @transform_27(%arg0: i32) -> (i32, i32) {
    %c0_i32 = arith.constant 0 : i32
    %c0_i32_0 = arith.constant 0 : i32
    %c0_i32_1 = arith.constant 0 : i32
    return %c0_i32, %c0_i32_0 : i32, i32
  }
  func.func @transform_28(%arg0: i32) -> (i32, i32, i32) {
    %c0_i32 = arith.constant 0 : i32
    %c0_i32_0 = arith.constant 0 : i32
    %c0_i32_1 = arith.constant 0 : i32
    return %arg0, %c0_i32, %c0_i32_0 : i32, i32, i32
  }
}

</mosaic_0001>

<bundles_post_ra>
// kernel: unet_forward_pallas.1
= control target key start
LH: loop header
LB: loop body
LE: loop exit
PB: predicated region body
PF: predicated region fallthrough
CT: control target
= control target key end

     0   :  { %s11697_s0 = inlined_call_operand.vmem [shape: bf16[2,6,256], index: 0, kind: input, shape index: {}]   ;;  %s11698_s1 = inlined_call_operand.vmem [shape: f32[2,32,1], index: 1, kind: input, shape index: {}]   ;;  %s11699_s2 = inlined_call_operand.vmem [shape: bf16[9,8,6], index: 2, kind: input, shape index: {}]   ;;  %s11700_s3 = inlined_call_operand.vmem [shape: f32[8,1], index: 3, kind: input, shape index: {}]   ;;  %s11701_s4 = inlined_call_operand.vmem [shape: bf16[9,8,8], index: 4, kind: input, shape index: {}]   ;;  %s11702_s5 = inlined_call_operand.vmem [shape: f32[8,1], index: 5, kind: input, shape index: {}]   ;;  %s11703_s6 = inlined_call_operand.vmem [shape: bf16[9,16,8], index: 6, kind: input, shape index: {}]   ;;  %s11704_s7 = inlined_call_operand.vmem [shape: f32[16,1], index: 7, kind: input, shape index: {}]   ;;  %s11705_s8 = inlined_call_operand.vmem [shape: bf16[9,16,16], index: 8, kind: input, shape index: {}]   ;;  %s11706_s9 = inlined_call_operand.vmem [shape: f32[16,1], index: 9, kind: input, shape index: {}]   ;;  %s11707_s10 = inlined_call_operand.vmem [shape: bf16[9,32,16], index: 10, kind: input, shape index: {}]   ;;  %s11708_s11 = inlined_call_operand.vmem [shape: f32[32,1], index: 11, kind: input, shape index: {}]   ;;  %s11709_s12 = inlined_call_operand.vmem [shape: bf16[9,32,32], index: 12, kind: input, shape index: {}]   ;;  %s11710_s13 = inlined_call_operand.vmem [shape: f32[32,1], index: 13, kind: input, shape index: {}]   ;;  %s11711_s14 = inlined_call_operand.vmem [shape: bf16[9,16,48], index: 14, kind: input, shape index: {}]   ;;  %s11712_s15 = inlined_call_operand.vmem [shape: f32[16,1], index: 15, kind: input, shape index: {}]   ;;  %s11713_s16 = inlined_call_operand.vmem [shape: bf16[9,16,16], index: 16, kind: input, shape index: {}]   ;;  %s11714_s17 = inlined_call_operand.vmem [shape: f32[16,1], index: 17, kind: input, shape index: {}]   ;;  %s11715_s18 = inlined_call_operand.vmem [shape: bf16[9,8,24], index: 18, kind: input, shape index: {}]   ;;  %s11716_s19 = inlined_call_operand.vmem [shape: f32[8,1], index: 19, kind: input, shape index: {}]   ;;  %s11717_s20 = inlined_call_operand.vmem [shape: bf16[9,8,8], index: 20, kind: input, shape index: {}]   ;;  %s11718_s21 = inlined_call_operand.vmem [shape: f32[8,1], index: 21, kind: input, shape index: {}]   ;;  %s11719_s22 = inlined_call_operand.vmem [shape: bf16[1,8], index: 22, kind: input, shape index: {}]   ;;  %s11720_s23 = inlined_call_operand.<no memory space> [shape: f32[1,1], index: 23, kind: input, shape index: {}]   ;;  %s11721_s24 = inlined_call_operand.vmem [shape: bf16[256,64], index: 24, kind: input, shape index: {}]   ;;  %s11722_s25 = inlined_call_operand.vmem [shape: bf16[64,16], index: 25, kind: input, shape index: {}]   ;;  %s11723_s26 = inlined_call_operand.vmem [shape: bf16[16,64], index: 26, kind: input, shape index: {}]   ;;  %s11724_s27 = inlined_call_operand.vmem [shape: bf16[64,256], index: 27, kind: input, shape index: {}]   ;;  %s11725_s28 = inlined_call_operand.vmem [shape: f32[2,1,256], index: 28, kind: output, shape index: {}]  }
   0x1   :  { %11789 = sst [smem:[#allocation8_spill]] %s11697_s0  ;;  %v33_v0 = vstv %s11720_s23 }
   0x2   :  { %11790 = sst [smem:[#allocation9_spill]] %s11698_s1  ;;  %34 = vst [vmem:[#allocation5] sm:$0x1] %v33_v0 }
   0x3   :  { %11791 = sst [smem:[#allocation10_spill]] %s11699_s2 }
   0x4   :  { %11792 = sst [smem:[#allocation11_spill]] %s11700_s3 }
   0x5   :  { %11793 = sst [smem:[#allocation12_spill]] %s11701_s4 }
   0x6   :  { %11794 = sst [smem:[#allocation13_spill]] %s11702_s5 }
   0x7   :  { %11795 = sst [smem:[#allocation14_spill]] %s11703_s6 }
   0x8   :  { %11796 = sst [smem:[#allocation15_spill]] %s11704_s7 }
   0x9   :  { %11797 = sst [smem:[#allocation16_spill]] %s11705_s8 }
   0xa   :  { %11798 = sst [smem:[#allocation17_spill]] %s11706_s9  ;;  %s9816_s9 = smov 0  }
   0xb   :  { %11799 = sst [smem:[#allocation18_spill]] %s11707_s10 }
   0xc   :  { %11800 = sst [smem:[#allocation19_spill]] %s11708_s11 }
   0xd   :  { %11801 = sst [smem:[#allocation20_spill]] %s11709_s12 }
   0xe   :  { %11802 = sst [smem:[#allocation21_spill]] %s11717_s20 }
   0xf   :  { %11803 = sst [smem:[#allocation22_spill]] %s11718_s21 }
  0x10   :  { %11804 = sst [smem:[#allocation23_spill]] %s11719_s22 }
  0x11   :  { %11805 = sst [smem:[#allocation24_spill]] %s11721_s24 }
  0x12   :  { %11806 = sst [smem:[#allocation25_spill]] %s11722_s25 }
  0x13   :  { %11807 = sst [smem:[#allocation26_spill]] %s11725_s28 }
  0x14 LB: > { %11808 = sst [smem:[#allocation6_spill]] %s9636_s9  ;;  %s8359_s30 = sadd.s32 4294967295, %s9636_s9   ;;  %s9636_s9 = sphi %s9816_s9, %s40_s9  }
  0x15   : > { %p8363_p0 = scmp.ge.s32.totalorder %s9636_s9, 1  ;;  %p774_p1 = scmp.lt.s32.totalorder %s9636_s9, 3 }
  0x17   : > { %p775_p2 = pnand %p8363_p0, %p774_p1 }
  0x19   : > { %778 = sbr.rel (%p775_p2) target bundleno = 7296 (0x1c80), region = 132 }
  0x20   : > { %p852_p3 = scmp.lt.s32.totalorder %s8359_s30, 1  ;;  %v899_v1 = vlaneseq  ;;  %vm867_vm0 = vcmask 138240   ;;  %vm871_vm1 = vcmask 277640   ;;  %v9638_v2 = vmov 0.0   ;;  %s11810_s10 = sld [smem:[#allocation8_spill]] }
  0x21   : > { %868 = vst.msk [vmem:[#allocation2] sm:$0xff] %vm867_vm0, %v9638_v2  ;;  %869 = vst.msk [vmem:[#allocation2 + $0x18] sm:$0xff] %vm867_vm0, %v9638_v2  ;;  %s11745_s11 = smov 17   ;;  %s11735_s29 = smov 16   ;;  %vm987_vm6 = vcmask 1045640   ;;  %vm990_vm7 = vcmask 136192  }
  0x22   : > { %872 = vst.msk [vmem:[#allocation2 + $0x10] sm:$0xff] %vm871_vm1, %v9638_v2  ;;  %873 = vst.msk [vmem:[#allocation2 + $0x28] sm:$0xff] %vm871_vm1, %v9638_v2  ;;  %s11886_s30 = smov (!%p852_p3, %s8359_s30), 1  ;;  %v9836_v3 = vand.u32 127, %v899_v1  ;;  %s11737_s2 = smov 2   ;;  %vm1021_vm8 = vcmask 1042432  }
  0x23   : > { %870 = vst.msk [vmem:[#allocation2 + $0x30] sm:$0xff] %vm867_vm0, %v9638_v2  ;;  %11809 = sst [smem:[#allocation7_spill]] %s11886_s30  ;;  %s8790_s23 = sshll.u32 %s11886_s30, 3  ;;  %v9647_v31 = vmov 0   ;;  %vm1125_vm9 = vcmask 15360   ;;  %vm1017_vm10 = vcmask 48128  }
  0x24   : > { %874 = vst.msk [vmem:[#allocation2 + $0x40] sm:$0xff] %vm871_vm1, %v9638_v2  ;;  %v901_v4 = vadd.s32 128, %v9836_v3  ;;  %v906_v5 = vand.u32 15, %v9836_v3  ;;  %s11736_s7 = smov 18   ;;  %s9643_s12 = smov 32   ;;  %1060 = vmatprep.mubr.bf16.mxu0 %v9647_v31  ;;  %1110 = vmatprep.mubr.bf16.mxu1 %v9647_v31  ;;  %vm1208_vm11 = vcmask 130048  }
  0x25   : > { %s9644_s1 = smov 34   ;;  %s11764_s4 = smov 111   ;;  %9503 = vset.pattern.permute.xlu0 %v9647_v31  ;;  %9514 = vset.pattern.permute.xlu1 %v9647_v31  ;;  %vm1352_vm12 = vcmask 146432   ;;  %vm1433_vm13 = vcmask 261120   ;;  %vm1577_vm14 = vcmask 277504   ;;  %vm1014_vm15 = vcmask 1039360  }
  0x26   : > { %s856_s0 = scalar_lea.vmem %s11810_s10, %s8790_s23  ;;  %v913_v7 = vand.u32 15, %v901_v4  ;;  %vm926_vm2 = vcmp.ne.s32.totalorder %v906_v5, 0  ;;  %vm932_vm3 = vcmp.ne.s32.totalorder %v906_v5, 15  ;;  %s11760_s8 = smov 127   ;;  %vm1147_vm1 = vcmask 1031168  }
  0x27   : > { %v974_v6 = vld [vmem:[%s856_s0] sm:$0x77]  ;;  %v9845_v10 = vsel %vm926_vm2, 1.0, %v9638_v2  ;;  %v8371_v11 = vsel %vm932_vm3, 1.0, %v9638_v2  ;;  %s11811_s3 = sld [smem:[#allocation10_spill]]  ;;  %s11751_s6 = smov 112  }
  0x28   : > { %v975_v8 = vunpack.c.l.bf16 %v974_v6  ;;  %v976_v9 = vunpack.c.h.bf16 %v974_v6  ;;  %vm927_vm4 = vcmp.ne.s32.totalorder %v913_v7, 0  ;;  %vm933_vm5 = vcmp.ne.s32.totalorder %v913_v7, 15  ;;  %s11749_s10 = smov 126   ;;  %s11743_s0 = smov 96  }
  0x29   : > { %v9849_v13 = vsel %vm927_vm4, 1.0, %v9638_v2  ;;  %v8372_v14 = vsel %vm933_vm5, 1.0, %v9638_v2  ;;  %s11739_s5 = smov 94   ;;  %vm1293_vm2 = vcmask 908288   ;;  %vm1230_vm3 = vcmask 916480   ;;  %s11815_s24 = sld [smem:[#allocation24_spill]] }
  0x2a   : > { %v9473_v12 = vpack.i.bf16 %v976_v9, %v975_v8  ;;  %v9483_v15 = vpack.i.bf16 %v9849_v13, %v9845_v10  ;;  %v9478_v16 = vpack.i.bf16 %v8372_v14, %v8371_v11  ;;  %vm11776_vm4 = vcmask 900096   ;;  %s11766_s23 = smov 9   ;;  %s11832_s25 = sld [smem:[#allocation25_spill]] }
  0x2b   : > { %vm11775_vm5 = vcmask 785408   ;;  %s11777_s28 = smov 5   ;;  %s9662_s9 = smov 4  }
  0x2c   : > { %9474 = vrot.lane.b32.xlu0 %v9473_v12, %s11745_s11  ;;  %9484 = vrot.lane.b32.xlu1 %v9483_v15, %s11735_s29  ;;  %s11814_s29 = sld [smem:[#allocation13_spill]]  ;;  %s11834_s22 = smov 10  }
  0x2d   : > { %v997_v42 = vld [vmem:[%s11811_s3] sm:$0xf]  ;;  %s11837_s20 = sld [smem:[#allocation9_spill]]  ;;  %s11838_s21 = smov 5  }
  0x30   : > { %9479 = vrot.lane.b32.xlu0 %v9478_v16, %s11737_s2  ;;  %9489 = vrot.lane.b32.xlu1 %v9478_v16, %s11736_s7  ;;  %s11812_s7 = sld [smem:[#allocation11_spill]]  ;;  %s11813_s2 = sld [smem:[#allocation12_spill]] }
  0x34   : > { %9494 = vrot.lane.b32.xlu0 %v9483_v15, %s9643_s12  ;;  %9499 = vrot.lane.b32.xlu1 %v9478_v16, %s9644_s1  ;;  %s11747_s12 = smov 110   ;;  %s11741_s1 = smov 95  }
  0x9e   : > { %v9475_v17 = vpop.permute.xlu0 %9474  ;;  %v9485_v29 = vpop.permute.xlu1 %9484 }
  0x9f   : > { %v9477_v18 = vunpack.i.h.bf16 %v9475_v17  ;;  %v9476_v19 = vunpack.i.l.bf16 %v9475_v17  ;;  %v9878_v32 = vunpack.i.l.bf16 %v9485_v29  ;;  %v9894_v36 = vunpack.i.h.bf16 %v9485_v29 }
  0xa1   : > { %991 = vst.msk [vmem:[#allocation2 + $0x10] sm:$0x3f] %vm990_vm7, %v9477_v18  ;;  %v983_v20 = vsel %vm867_vm0, %v9476_v19, %v9477_v18  ;;  %v9937_v55 = vsel %vm1208_vm11, %v9878_v32, %v9894_v36  ;;  %vm11753_vm7 = vcmask 769024  }
  0xa2   : > { %988 = vst.msk [vmem:[#allocation2] sm:$0x3f] %vm987_vm6, %v9476_v19  ;;  %989 = vst [vmem:[#allocation2 + $0x8] sm:$0x3f] %v983_v20  ;;  %v9480_v27 = vpop.permute.xlu0 %9479  ;;  %v9490_v49 = vpop.permute.xlu1 %9489  ;;  %vm11774_vm6 = vcmask 777216  }
  0xa3   : > { %v9880_v33 = vunpack.i.l.bf16 %v9480_v27  ;;  %v9896_v37 = vunpack.i.h.bf16 %v9480_v27  ;;  %v9928_v50 = vunpack.i.l.bf16 %v9490_v49  ;;  %v9941_v56 = vunpack.i.h.bf16 %v9490_v49  ;;  %v1654_v27 = vld [vmem:[%s11812_s7] sm:$0xff]  ;;  %s11754_s7 = smov 10  }
  0xa5   : > { %v9924_v48 = vsel %vm1125_vm9, %v9880_v33, %v9896_v37  ;;  %v9957_v5 = vsel %vm1352_vm12, %v9928_v50, %v9941_v56  ;;  %vm1706_vm9 = vcmask 1043456  }
  0xa6   : > { %v9495_v38 = vpop.permute.xlu0 %9494  ;;  %v9500_v9 = vpop.permute.xlu1 %9499 }
  0xa7   : > { %v9914_v43 = vunpack.i.l.bf16 %v9495_v38  ;;  %v9943_v57 = vunpack.i.h.bf16 %v9495_v38  ;;  %v9970_v12 = vunpack.i.l.bf16 %v9500_v9  ;;  %v9974_v16 = vunpack.i.h.bf16 %v9500_v9 }
  0xa8   : > { %v9871_v26 = vld [vmem:[#allocation2 + $0x10] sm:$0x3f] }
  0xa9   : > { %v9859_v21 = vld [vmem:[#allocation2] sm:$0x3f]  ;;  %v9865_v23 = vld [vmem:[#allocation2 + $0x8] sm:$0x3f]  ;;  %v9884_v34 = vpack.c.bf16 %v9871_v26, %v9871_v26  ;;  %v1215_v46 = vmul.f32 %v9894_v36, %v9871_v26  ;;  %v1132_v47 = vmul.f32 %v9896_v37, %v9871_v26  ;;  %v1359_v0 = vmul.f32 %v9941_v56, %v9871_v26 }
  0xaa   : > { %v9863_v22 = vpack.c.bf16 %v9859_v21, %v9859_v21  ;;  %v995_v24 = vmul.f32 %v9845_v10, %v9859_v21  ;;  %v996_v25 = vmul.f32 %v9849_v13, %v9865_v23  ;;  %v9900_v39 = vpack.c.bf16 %v9865_v23, %v9865_v23 }
  0xab   : > { %v1213_v40 = vmul.f32 %v9878_v32, %v9859_v21  ;;  %v1130_v41 = vmul.f32 %v9880_v33, %v9859_v21  ;;  %v1220_v51 = vpack.c.bf16 %v1215_v46, %v1215_v46  ;;  %v1137_v52 = vpack.c.bf16 %v1132_v47, %v1132_v47 }
  0xac   : > { %1287 = vrot.lane.b32.xlu1 %v9863_v22, %s11764_s4  ;;  %1008 = vrot.lane.b32.xlu0 %v9863_v22, %s11760_s8  ;;  %v998_v28 = vpack.c.bf16 %v995_v24, %v995_v24  ;;  %v999_v30 = vpack.c.bf16 %v996_v25, %v996_v25  ;;  %v1131_v53 = vmul.f32 %v9924_v48, %v9865_v23 }
  0xad   : > { %v1218_v44 = vpack.c.bf16 %v1213_v40, %v1213_v40  ;;  %v1135_v45 = vpack.c.bf16 %v1130_v41, %v1130_v41  ;;  %v1438_v54 = vmul.f32 %v9914_v43, %v9859_v21  ;;  %v1357_v60 = vmul.f32 %v9928_v50, %v9859_v21  ;;  %v8377_v40 = vld [vmem:[%s11811_s3 + $0x4] sm:$0xf] }
  0xae   : > { %v1073_v35 = vsel %vm1021_vm8, %v998_v28, 0  ;;  %8380 = vmatprep.subr.msk.bf16.mxu1 %vm1021_vm8, %v999_v30  ;;  %v1136_v58 = vpack.c.bf16 %v1131_v53, %v1131_v53  ;;  %v1214_v61 = vmul.f32 %v9937_v55, %v9865_v23  ;;  %v1440_v4 = vmul.f32 %v9943_v57, %v9871_v26 }
  0xaf   : > { %1079 = vmatpush1.bf16.msra.mxu1 %v1073_v35  ;;  %v1443_v59 = vpack.c.bf16 %v1438_v54, %v1438_v54  ;;  %v1362_v62 = vpack.c.bf16 %v1357_v60, %v1357_v60  ;;  %v1364_v6 = vpack.c.bf16 %v1359_v0, %v1359_v0  ;;  %v1358_v8 = vmul.f32 %v9957_v5, %v9865_v23 }
  0xb0   : > { %1291 = vrot.lane.b32.xlu1 %v9884_v34, %s11764_s4  ;;  %1012 = vrot.lane.b32.xlu0 %v9884_v34, %s11760_s8  ;;  %v1219_v63 = vpack.c.bf16 %v1214_v61, %v1214_v61  ;;  %v1445_v7 = vpack.c.bf16 %v1440_v4, %v1440_v4  ;;  %v9966_v11 = vsel %vm1433_vm13, %v9914_v43, %v9943_v57  ;;  %v8385_v4 = vld [vmem:[%s11811_s3 + $0xc] sm:$0xf] }
  0xb1   : > { %v1363_v14 = vpack.c.bf16 %v1358_v8, %v1358_v8  ;;  %v1439_v15 = vmul.f32 %v9966_v11, %v9865_v23  ;;  %v1582_v18 = vmul.f32 %v9970_v12, %v9859_v21  ;;  %v9983_v19 = vsel %vm1577_vm14, %v9970_v12, %v9974_v16  ;;  %v8388_v8 = vld [vmem:[%s11811_s3 + $0x10] sm:$0xf] }
  0xb2   : > { %8381 = vmatmul.mubr.msk.bf16.vlgmr.msra.gmra.mrb[0].mxu1 %vm1017_vm10, %v997_v42  ;;  %v1584_v24 = vmul.f32 %v9974_v16, %v9871_v26  ;;  %vm875_vm14 = vcmask 72704  }
  0xb3   : > { %1274 = vmatprep.mubr.bf16.mxu1 %v9647_v31  ;;  %v1444_v17 = vpack.c.bf16 %v1439_v15, %v1439_v15  ;;  %v1587_v20 = vpack.c.bf16 %v1582_v18, %v1582_v18  ;;  %876 = vst.msk [vmem:[#allocation3] sm:$0xff] %vm875_vm14, %v9638_v2  ;;  %877 = vst.msk [vmem:[#allocation3 + $0x8] sm:$0xff] %vm875_vm14, %v9638_v2 }
  0xb4   : > { %1289 = vrot.lane.b32.xlu0 %v9900_v39, %s11764_s4  ;;  %1010 = vrot.lane.b32.xlu1 %v9900_v39, %s11760_s8  ;;  %v1589_v25 = vpack.c.bf16 %v1584_v24, %v1584_v24  ;;  %878 = vst.msk [vmem:[#allocation3 + $0x10] sm:$0xff] %vm875_vm14, %v9638_v2  ;;  %879 = vst.msk [vmem:[#allocation3 + $0x18] sm:$0xff] %vm875_vm14, %v9638_v2 }
  0xb5   : > { %880 = vst.msk [vmem:[#allocation3 + $0x20] sm:$0xff] %vm875_vm14, %v9638_v2  ;;  %881 = vst.msk [vmem:[#allocation3 + $0x28] sm:$0xff] %vm875_vm14, %v9638_v2  ;;  %vm9657_vm14 = vmmov 0  }
  0xb8   : > { %1224 = vrot.lane.b32.xlu0 %v1218_v44, %s11751_s6  ;;  %1141 = vrot.lane.b32.xlu1 %v1135_v45, %s11749_s10 }
  0xbc   : > { %1228 = vrot.lane.b32.xlu0 %v1220_v51, %s11751_s6  ;;  %1145 = vrot.lane.b32.xlu1 %v1137_v52, %s11749_s10 }
  0xc0   : > { %1143 = vrot.lane.b32.xlu0 %v1136_v58, %s11749_s10  ;;  %1449 = vrot.lane.b32.xlu1 %v1443_v59, %s11743_s0  ;;  %v8382_v58 = vld [vmem:[%s11811_s3 + $0x8] sm:$0xf] }
  0xc4   : > { %1368 = vrot.lane.b32.xlu0 %v1362_v62, %s11747_s12  ;;  %1226 = vrot.lane.b32.xlu1 %v1219_v63, %s11751_s6 }
  0xc8   : > { %1372 = vrot.lane.b32.xlu0 %v1364_v6, %s11747_s12  ;;  %1453 = vrot.lane.b32.xlu1 %v1445_v7, %s11743_s0 }
  0xcc   : > { %1512 = vrot.lane.b32.xlu0 %v9863_v22, %s11741_s1  ;;  %1370 = vrot.lane.b32.xlu1 %v1363_v14, %s11747_s12  ;;  %v1583_v22 = vmul.f32 %v9983_v19, %v9865_v23 }
  0xce   : > { %v1588_v21 = vpack.c.bf16 %v1583_v22, %v1583_v22 }
  0xd0   : > { %1451 = vrot.lane.b32.xlu0 %v1444_v17, %s11743_s0  ;;  %1514 = vrot.lane.b32.xlu1 %v9900_v39, %s11741_s1 }
  0xd4   : > { %1516 = vrot.lane.b32.xlu0 %v9884_v34, %s11741_s1  ;;  %1593 = vrot.lane.b32.xlu1 %v1587_v20, %s11739_s5  ;;  %v8391_v20 = vld [vmem:[%s11811_s3 + $0x14] sm:$0xf] }
  0xd8   : > { %1595 = vrot.lane.b32.xlu0 %v1588_v21, %s11739_s5  ;;  %1597 = vrot.lane.b32.xlu1 %v1589_v25, %s11739_s5 }
  0xdc   : > { %1657 = vperm.xlu0 %9503, %v1654_v27  }
 0x11e   : > { %v1288_v23 = vpop.permute.xlu1 %1287  ;;  %v1009_v28 = vpop.permute.xlu0 %1008 }
 0x122   : > { %v1292_v26 = vpop.permute.xlu1 %1291  ;;  %v1013_v29 = vpop.permute.xlu0 %1012 }
 0x126   : > { %v1290_v30 = vpop.permute.xlu0 %1289  ;;  %v1011_v34 = vpop.permute.xlu1 %1010 }
 0x127   : > { %v1016_v35 = vsel %vm1014_vm15, %v1011_v34, %v1013_v29  ;;  %v1015_v38 = vsel %vm1014_vm15, %v1009_v28, %v1011_v34  ;;  %v1294_v53 = vsel %vm1293_vm2, %v1288_v23, %v1290_v30  ;;  %v1295_v54 = vsel %vm1293_vm2, %v1290_v30, %v1292_v26  ;;  %v8394_v28 = vld [vmem:[%s11811_s3 + $0x18] sm:$0xf] }
 0x128   : > { %8378 = vmatprep.subr.msk.bf16.mxu0 %vm1021_vm8, %v1016_v35  ;;  %v1023_v39 = vsel %vm1021_vm8, %v1015_v38, 0  ;;  %v1300_v0 = vsel %vm1021_vm8, %v1294_v53, 0  ;;  %v8397_v35 = vld [vmem:[%s11811_s3 + $0x1c] sm:$0xf] }
 0x129   : > { %1029 = vmatpush1.bf16.msra.mxu0 %v1023_v39 }
 0x12a   : > { %v1225_v41 = vpop.permute.xlu0 %1224  ;;  %v1142_v42 = vpop.permute.xlu1 %1141 }
 0x12c   : > { %8379 = vmatmul.mubr.msk.bf16.vlgmr.msra.gmra.mrb[0].mxu0 %vm1017_vm10, %v8377_v40 }
 0x12d   : > { %1191 = vmatprep.mubr.bf16.mxu0 %v9647_v31 }
 0x12e   : > { %v1229_v44 = vpop.permute.xlu0 %1228  ;;  %v1146_v45 = vpop.permute.xlu1 %1145 }
 0x132   : > { %v1144_v46 = vpop.permute.xlu0 %1143  ;;  %v1450_v47 = vpop.permute.xlu1 %1449 }
 0x133   : > { %v1148_v49 = vsel %vm1147_vm1, %v1142_v42, %v1144_v46  ;;  %v1149_v51 = vsel %vm1147_vm1, %v1144_v46, %v1146_v45 }
 0x134   : > { %8383 = vmatprep.subr.msk.bf16.mxu0 %vm1021_vm8, %v1149_v51  ;;  %v1154_v52 = vsel %vm1021_vm8, %v1148_v49, 0 }
 0x135   : > { %1160 = vmatpush1.bf16.msra.mxu0 %v1154_v52 }
 0x136   : > { %v1369_v59 = vpop.permute.xlu0 %1368  ;;  %8389 = vmatprep.subr.msk.bf16.mxu0 %vm1021_vm8, %v1295_v54  ;;  %v1227_v60 = vpop.permute.xlu1 %1226 }
 0x137   : > { %v1231_v61 = vsel %vm1230_vm3, %v1225_v41, %v1227_v60  ;;  %v1232_v62 = vsel %vm1230_vm3, %v1227_v60, %v1229_v44  ;;  %v8400_v44 = vld [vmem:[%s11811_s3 + $0x20] sm:$0xf]  ;;  %s9663_s3 = smov 6  }
 0x138   : > { %8384 = vmatmul.mubr.msk.bf16.vlgmr.msra.gmra.mrb[4].mxu0 %vm1017_vm10, %v8382_v58  ;;  %8386 = vmatprep.subr.msk.bf16.mxu1 %vm1021_vm8, %v1232_v62  ;;  %v1237_v63 = vsel %vm1021_vm8, %v1231_v61, 0 }
 0x139   : > { %1243 = vmatpush1.bf16.msra.mxu1 %v1237_v63  ;;  %1306 = vmatpush1.bf16.msra.mxu0 %v1300_v0 }
 0x13a   : > { %v1373_v6 = vpop.permute.xlu0 %1372  ;;  %v1454_v7 = vpop.permute.xlu1 %1453  ;;  %1337 = vmatprep.mubr.bf16.mxu0 %v9647_v31 }
 0x13c   : > { %8387 = vmatmul.mubr.msk.bf16.vlgmr.msra.gmra.mrb[4].mxu1 %vm1017_vm10, %v8385_v4 }
 0x13d   : > { %1418 = vmatprep.mubr.bf16.mxu1 %v9647_v31 }
 0x13e   : > { %v1513_v9 = vpop.permute.xlu0 %1512  ;;  %v1371_v14 = vpop.permute.xlu1 %1370 }
 0x13f   : > { %v1375_v15 = vsel %vm11776_vm4, %v1369_v59, %v1371_v14  ;;  %v1376_v17 = vsel %vm11776_vm4, %v1371_v14, %v1373_v6 }
 0x140   : > { %8390 = vmatmul.mubr.msk.bf16.vlgmr.msra.gmra.mrb[8].mxu0 %vm1017_vm10, %v8388_v8  ;;  %8392 = vmatprep.subr.msk.bf16.mxu1 %vm1021_vm8, %v1376_v17  ;;  %v1381_v18 = vsel %vm1021_vm8, %v1375_v15, 0 }
 0x141   : > { %1387 = vmatpush1.bf16.msra.mxu1 %v1381_v18  ;;  %1499 = vmatprep.mubr.bf16.mxu0 %v9647_v31 }
 0x142   : > { %v1452_v22 = vpop.permute.xlu0 %1451  ;;  %v1515_v24 = vpop.permute.xlu1 %1514 }
 0x143   : > { %v1456_v21 = vsel %vm11775_vm5, %v1450_v47, %v1452_v22  ;;  %v1457_v25 = vsel %vm11775_vm5, %v1452_v22, %v1454_v7  ;;  %v1519_v23 = vsel %vm11774_vm6, %v1513_v9, %v1515_v24 }
 0x144   : > { %8393 = vmatmul.mubr.msk.bf16.vlgmr.msra.gmra.mrb[8].mxu1 %vm1017_vm10, %v8391_v20  ;;  %8395 = vmatprep.subr.msk.bf16.mxu0 %vm1021_vm8, %v1457_v25  ;;  %v1462_v27 = vsel %vm1021_vm8, %v1456_v21, 0  ;;  %v1525_v34 = vsel %vm1021_vm8, %v1519_v23, 0 }
 0x145   : > { %1468 = vmatpush1.bf16.msra.mxu0 %v1462_v27  ;;  %1562 = vmatprep.mubr.bf16.mxu1 %v9647_v31 }
 0x146   : > { %v1517_v26 = vpop.permute.xlu0 %1516  ;;  %v1594_v29 = vpop.permute.xlu1 %1593 }
 0x147   : > { %v1520_v30 = vsel %vm11774_vm6, %v1515_v24, %v1517_v26 }
 0x148   : > { %8396 = vmatmul.mubr.msk.bf16.vlgmr.msra.gmra.mrb[12].mxu0 %vm1017_vm10, %v8394_v28  ;;  %8398 = vmatprep.subr.msk.bf16.mxu1 %vm1021_vm8, %v1520_v30 }
 0x149   : > { %1531 = vmatpush1.bf16.msra.mxu1 %v1525_v34  ;;  %1643 = vmatprep.mubr.bf16.mxu0 %v9647_v31 }
 0x14a   : > { %v1596_v38 = vpop.permute.xlu0 %1595  ;;  %v1598_v39 = vpop.permute.xlu1 %1597 }
 0x14b   : > { %v1600_v40 = vsel %vm11753_vm7, %v1594_v29, %v1596_v38  ;;  %v1601_v41 = vsel %vm11753_vm7, %v1596_v38, %v1598_v39 }
 0x14c   : > { %8399 = vmatmul.mubr.msk.bf16.vlgmr.msra.gmra.mrb[12].mxu1 %vm1017_vm10, %v8397_v35  ;;  %8401 = vmatprep.subr.msk.bf16.mxu0 %vm1021_vm8, %v1601_v41  ;;  %v1606_v42 = vsel %vm1021_vm8, %v1600_v40, 0  ;;  %vm1674_vm8 = vcmask 1047688  }
 0x14d   : > { %1612 = vmatpush1.bf16.msra.mxu0 %v1606_v42  ;;  %1745 = vmatprep.mubr.bf16.mxu1 %v9647_v31 }
 0x150   : > { %8402 = vmatmul.mubr.msk.bf16.vlgmr.msra.gmra.mrb[16].mxu0 %vm1017_vm10, %v8400_v44  ;;  %vm11773_vm10 = vcmask 64512  }
 0x151   : > { %1795 = vmatprep.mubr.bf16.mxu0 %v9647_v31 }
 0x185   : > { %v1112_v45 = vpop.f32.mrb[0].mxu1 }
 0x186   : > { %v1114_v46 = vpop.f32.mrb[1].mxu1 }
 0x187   : > { %v1116_v47 = vpop.f32.mrb[2].mxu1 }
 0x188   : > { %v1117_v49 = vpop.f32.mrb[3].mxu1 }
 0x1ff   : > { %v1062_v51 = vpop.f32.mrb[0].mxu0 }
 0x200   : > { %v1064_v52 = vpop.f32.mrb[1].mxu0  ;;  %v1113_v53 = vadd.f32 %v1112_v45, %v1062_v51  ;;  %v1658_v51 = vpop.permute.xlu0 %1657 }
 0x201   : > { %v1066_v54 = vpop.f32.mrb[2].mxu0  ;;  %v1115_v58 = vadd.f32 %v1114_v46, %v1064_v52 }
 0x202   : > { %v1067_v59 = vpop.f32.mrb[3].mxu0 }
 0x20b   : > { %v1193_v60 = vpop.f32.mrb[4].mxu0 }
 0x20c   : > { %v1200_v61 = vadd.f32 %v1193_v60, %v1113_v53  ;;  %v1195_v62 = vpop.f32.mrb[5].mxu0 }
 0x20d   : > { %v1201_v63 = vadd.f32 %v1195_v62, %v1115_v58  ;;  %v1197_v0 = vpop.f32.mrb[6].mxu0 }
 0x20e   : > { %v1198_v4 = vpop.f32.mrb[7].mxu0 }
 0x20f   : > { %v1276_v6 = vpop.f32.mrb[4].mxu1 }
 0x210   : > { %v1283_v7 = vadd.f32 %v1276_v6, %v1200_v61  ;;  %v1278_v8 = vpop.f32.mrb[5].mxu1 }
 0x211   : > { %v1284_v9 = vadd.f32 %v1278_v8, %v1201_v63  ;;  %v1280_v14 = vpop.f32.mrb[6].mxu1 }
 0x212   : > { %v1281_v15 = vpop.f32.mrb[7].mxu1 }
 0x213   : > { %v1339_v17 = vpop.f32.mrb[8].mxu0 }
 0x214   : > { %v1346_v18 = vadd.f32 %v1339_v17, %v1283_v7  ;;  %v1341_v20 = vpop.f32.mrb[9].mxu0 }
 0x215   : > { %v1347_v22 = vadd.f32 %v1341_v20, %v1284_v9  ;;  %v1343_v24 = vpop.f32.mrb[10].mxu0 }
 0x216   : > { %v1344_v21 = vpop.f32.mrb[11].mxu0 }
 0x217   : > { %v1420_v25 = vpop.f32.mrb[8].mxu1  ;;  %v1683_v21 = vld [vmem:[%s11813_s2] sm:$0xf] }
 0x218   : > { %v1427_v27 = vadd.f32 %v1420_v25, %v1346_v18  ;;  %v1422_v23 = vpop.f32.mrb[9].mxu1 }
 0x219   : > { %v1428_v28 = vadd.f32 %v1422_v23, %v1347_v22  ;;  %v1424_v26 = vpop.f32.mrb[10].mxu1 }
 0x21a   : > { %v1425_v29 = vpop.f32.mrb[11].mxu1 }
 0x21b   : > { %v1501_v30 = vpop.f32.mrb[12].mxu0 }
 0x21c   : > { %v1508_v34 = vadd.f32 %v1501_v30, %v1427_v27  ;;  %v1503_v35 = vpop.f32.mrb[13].mxu0 }
 0x21d   : > { %v1509_v38 = vadd.f32 %v1503_v35, %v1428_v28  ;;  %v1505_v39 = vpop.f32.mrb[14].mxu0 }
 0x21e   : > { %v1506_v40 = vpop.f32.mrb[15].mxu0 }
 0x21f   : > { %v1564_v41 = vpop.f32.mrb[12].mxu1 }
 0x220   : > { %v1571_v42 = vadd.f32 %v1564_v41, %v1508_v34  ;;  %v1566_v44 = vpop.f32.mrb[13].mxu1 }
 0x221   : > { %v1572_v45 = vadd.f32 %v1566_v44, %v1509_v38  ;;  %v1568_v46 = vpop.f32.mrb[14].mxu1 }
 0x222   : > { %v1569_v47 = vpop.f32.mrb[15].mxu1 }
 0x223   : > { %v1645_v49 = vpop.f32.mrb[16].mxu0 }
 0x224   : > { %v1652_v52 = vadd.f32 %v1645_v49, %v1571_v42  ;;  %v1647_v53 = vpop.f32.mrb[17].mxu0 }
 0x225   : > { %v1653_v54 = vadd.f32 %v1647_v53, %v1572_v45  ;;  %v1649_v58 = vpop.f32.mrb[18].mxu0 }
 0x226   : > { %v1660_v59 = vadd.f32 %v1658_v51, %v1652_v52  ;;  %v1650_v60 = vpop.f32.mrb[19].mxu0 }
 0x227   : > { %v1661_v61 = vadd.f32 %v1658_v51, %v1653_v54 }
 0x228   : > { %v1662_v62 = vmax.f32 %v1660_v59, 0.0 }
 0x229   : > { %v1663_v63 = vmax.f32 %v1661_v61, 0.0 }
 0x22a   : > { %1666 = vrot.lane.b32.xlu1 %v1662_v62, %s11745_s11 }
 0x22e   : > { %1668 = vrot.lane.b32.xlu1 %v1663_v63, %s11745_s11 }
 0x29c   : > { %v1667_v0 = vpop.permute.xlu1 %1666 }
 0x29d   : > { %1675 = vst.msk [vmem:[#allocation2] sm:$0xff] %vm1674_vm8, %v1667_v0 }
 0x2a0   : > { %v1669_v4 = vpop.permute.xlu1 %1668 }
 0x2a1   : > { %v10076_v6 = vsel %vm867_vm0, %v1667_v0, %v1669_v4  ;;  %1677 = vst.msk [vmem:[#allocation2 + $0x10] sm:$0xff] %vm867_vm0, %v1669_v4  ;;  %v2283_v4 = vld [vmem:[%s11814_s29] sm:$0xff]  ;;  %s11756_s29 = smov 120  }
 0x2a2   : > { %v1682_v7 = vmul.f32 %v9849_v13, %v10076_v6  ;;  %v1689_v27 = vpack.c.bf16 %v10076_v6, %v10076_v6  ;;  %v1805_v35 = vmul.f32 %v10076_v6, %v9924_v48  ;;  %v1876_v42 = vmul.f32 %v10076_v6, %v9937_v55 }
 0x2a3   : > { %v2009_v52 = vmul.f32 %v10076_v6, %v9957_v5  ;;  %v2080_v54 = vmul.f32 %v10076_v6, %v9966_v11  ;;  %v2213_v61 = vmul.f32 %v10076_v6, %v9983_v19 }
 0x2a4   : > { %v1678_v8 = vld [vmem:[#allocation2] sm:$0xff]  ;;  %v1685_v9 = vpack.c.bf16 %v1682_v7, %v1682_v7  ;;  %v1810_v39 = vpack.c.bf16 %v1805_v35, %v1805_v35  ;;  %v1881_v45 = vpack.c.bf16 %v1876_v42, %v1876_v42 }
 0x2a5   : > { %v1688_v14 = vpack.c.bf16 %v1678_v8, %v1678_v8  ;;  %v1681_v15 = vmul.f32 %v9845_v10, %v1678_v8  ;;  %v1875_v22 = vmul.f32 %v9878_v32, %v1678_v8  ;;  %v1804_v23 = vmul.f32 %v9880_v33, %v1678_v8 }
 0x2a6   : > { %8406 = vmatprep.subr.msk.bf16.mxu0 %vm1706_vm9, %v1685_v9  ;;  %v2079_v38 = vmul.f32 %v9914_v43, %v1678_v8  ;;  %v2008_v41 = vmul.f32 %v9928_v50, %v1678_v8  ;;  %v2014_v53 = vpack.c.bf16 %v2009_v52, %v2009_v52  ;;  %v2085_v58 = vpack.c.bf16 %v2080_v54, %v2080_v54 }
 0x2a7   : > { %1948 = vrot.lane.b32.xlu1 %v1688_v14, %s11764_s4  ;;  %1694 = vrot.lane.b32.xlu0 %v1688_v14, %s11760_s8  ;;  %v1684_v17 = vpack.c.bf16 %v1681_v15, %v1681_v15  ;;  %v1880_v25 = vpack.c.bf16 %v1875_v22, %v1875_v22  ;;  %v1809_v28 = vpack.c.bf16 %v1804_v23, %v1804_v23  ;;  %v8403_v22 = vld [vmem:[%s11813_s2 + $0x4] sm:$0xf] }
 0x2a8   : > { %v1680_v18 = vld [vmem:[#allocation2 + $0x10] sm:$0xff]  ;;  %v2084_v40 = vpack.c.bf16 %v2079_v38, %v2079_v38  ;;  %v2013_v44 = vpack.c.bf16 %v2008_v41, %v2008_v41  ;;  %v2212_v59 = vmul.f32 %v9970_v12, %v1678_v8  ;;  %v2218_v63 = vpack.c.bf16 %v2213_v61, %v2213_v61  ;;  %v8408_v38 = vld [vmem:[%s11813_s2 + $0x8] sm:$0xf] }
 0x2a9   : > { %v1690_v20 = vpack.c.bf16 %v1680_v18, %v1680_v18  ;;  %v1758_v24 = vsel %vm1706_vm9, %v1684_v17, 0  ;;  %v1877_v26 = vmul.f32 %v9894_v36, %v1680_v18  ;;  %v1806_v29 = vmul.f32 %v9896_v37, %v1680_v18 }
 0x2aa   : > { %1764 = vmatpush1.bf16.msra.mxu0 %v1758_v24  ;;  %v2010_v46 = vmul.f32 %v9941_v56, %v1680_v18  ;;  %v2081_v47 = vmul.f32 %v9943_v57, %v1680_v18  ;;  %v2217_v60 = vpack.c.bf16 %v2212_v59, %v2212_v59  ;;  %v2214_v62 = vmul.f32 %v9974_v16, %v1680_v18 }
 0x2ab   : > { %1952 = vrot.lane.b32.xlu1 %v1690_v20, %s11764_s4  ;;  %1698 = vrot.lane.b32.xlu0 %v1690_v20, %s11760_s8  ;;  %v1882_v30 = vpack.c.bf16 %v1877_v26, %v1877_v26  ;;  %v1811_v34 = vpack.c.bf16 %v1806_v29, %v1806_v29 }
 0x2ac   : > { %v2015_v49 = vpack.c.bf16 %v2010_v46, %v2010_v46  ;;  %v2086_v51 = vpack.c.bf16 %v2081_v47, %v2081_v47  ;;  %v2219_v0 = vpack.c.bf16 %v2214_v62, %v2214_v62  ;;  %v8411_v46 = vld [vmem:[%s11813_s2 + $0xc] sm:$0xf] }
 0x2ad   : > { %8407 = vmatmul.mubr.msk.bf16.vlgmr.msra.gmra.mrb[20].mxu0 %vm11773_vm10, %v1683_v21 }
 0x2ae   : > { %1935 = vmatprep.mubr.bf16.mxu0 %v9647_v31 }
 0x2af   : > { %1886 = vrot.lane.b32.xlu0 %v1880_v25, %s11751_s6  ;;  %1696 = vrot.lane.b32.xlu1 %v1689_v27, %s11760_s8 }
 0x2b3   : > { %1950 = vrot.lane.b32.xlu0 %v1689_v27, %s11764_s4  ;;  %1815 = vrot.lane.b32.xlu1 %v1809_v28, %s11749_s10 }
 0x2b7   : > { %1890 = vrot.lane.b32.xlu0 %v1882_v30, %s11751_s6  ;;  %1819 = vrot.lane.b32.xlu1 %v1811_v34, %s11749_s10 }
 0x2bb   : > { %1817 = vrot.lane.b32.xlu0 %v1810_v39, %s11749_s10  ;;  %2090 = vrot.lane.b32.xlu1 %v2084_v40, %s11743_s0  ;;  %s11819_s10 = smov 126  }
 0x2bf   : > { %2019 = vrot.lane.b32.xlu0 %v2013_v44, %s11747_s12  ;;  %1888 = vrot.lane.b32.xlu1 %v1881_v45, %s11751_s6 }
 0x2c3   : > { %2023 = vrot.lane.b32.xlu0 %v2015_v49, %s11747_s12  ;;  %2094 = vrot.lane.b32.xlu1 %v2086_v51, %s11743_s0  ;;  %v8414_v51 = vld [vmem:[%s11813_s2 + $0x10] sm:$0xf] }
 0x2c7   : > { %2152 = vrot.lane.b32.xlu0 %v1688_v14, %s11741_s1  ;;  %2021 = vrot.lane.b32.xlu1 %v2014_v53, %s11747_s12  ;;  %s11818_s12 = smov 16  }
 0x2cb   : > { %2092 = vrot.lane.b32.xlu0 %v2085_v58, %s11743_s0  ;;  %2154 = vrot.lane.b32.xlu1 %v1689_v27, %s11741_s1  ;;  %s11816_s0 = smov 2  }
 0x2cf   : > { %2156 = vrot.lane.b32.xlu0 %v1690_v20, %s11741_s1  ;;  %2223 = vrot.lane.b32.xlu1 %v2217_v60, %s11739_s5  ;;  %v8417_v60 = vld [vmem:[%s11813_s2 + $0x14] sm:$0xf]  ;;  %s11758_s1 = smov 119  }
 0x2d3   : > { %2225 = vrot.lane.b32.xlu0 %v2218_v63, %s11739_s5  ;;  %2227 = vrot.lane.b32.xlu1 %v2219_v0, %s11739_s5  ;;  %s11762_s5 = smov 118  }
 0x2d7   : > { %2286 = vperm.xlu0 %9503, %v2283_v4  }
 0x319   : > { %v1695_v7 = vpop.permute.xlu0 %1694  ;;  %v1949_v8 = vpop.permute.xlu1 %1948 }
 0x31d   : > { %v1699_v6 = vpop.permute.xlu0 %1698  ;;  %v1953_v9 = vpop.permute.xlu1 %1952 }
 0x321   : > { %v1887_v14 = vpop.permute.xlu0 %1886  ;;  %v1697_v15 = vpop.permute.xlu1 %1696 }
 0x322   : > { %v1700_v17 = vsel %vm1014_vm15, %v1695_v7, %v1697_v15  ;;  %v1701_v18 = vsel %vm1014_vm15, %v1697_v15, %v1699_v6 }
 0x323   : > { %8404 = vmatprep.subr.msk.bf16.mxu1 %vm1706_vm9, %v1701_v18  ;;  %v1708_v20 = vsel %vm1706_vm9, %v1700_v17, 0  ;;  %v8423_v17 = vld [vmem:[%s11813_s2 + $0x1c] sm:$0xf] }
 0x324   : > { %1714 = vmatpush1.bf16.msra.mxu1 %v1708_v20 }
 0x325   : > { %v1951_v24 = vpop.permute.xlu0 %1950  ;;  %v1816_v21 = vpop.permute.xlu1 %1815 }
 0x326   : > { %v1954_v34 = vsel %vm1293_vm2, %v1949_v8, %v1951_v24  ;;  %v1955_v35 = vsel %vm1293_vm2, %v1951_v24, %v1953_v9  ;;  %v8420_v8 = vld [vmem:[%s11813_s2 + $0x18] sm:$0xf] }
 0x327   : > { %8405 = vmatmul.mubr.msk.bf16.vlgmr.msra.gmra.mrb[16].mxu1 %vm11773_vm10, %v8403_v22  ;;  %v1960_v45 = vsel %vm1706_vm9, %v1954_v34, 0 }
 0x328   : > { %1864 = vmatprep.mubr.bf16.mxu1 %v9647_v31 }
 0x329   : > { %v1891_v25 = vpop.permute.xlu0 %1890  ;;  %v1820_v27 = vpop.permute.xlu1 %1819 }
 0x32d   : > { %v1818_v23 = vpop.permute.xlu0 %1817  ;;  %v2091_v28 = vpop.permute.xlu1 %2090 }
 0x32e   : > { %v1821_v26 = vsel %vm1147_vm1, %v1816_v21, %v1818_v23  ;;  %v1822_v29 = vsel %vm1147_vm1, %v1818_v23, %v1820_v27 }
 0x32f   : > { %8409 = vmatprep.subr.msk.bf16.mxu1 %vm1706_vm9, %v1822_v29  ;;  %v1827_v30 = vsel %vm1706_vm9, %v1821_v26, 0 }
 0x330   : > { %1833 = vmatpush1.bf16.msra.mxu1 %v1827_v30 }
 0x331   : > { %v2020_v39 = vpop.permute.xlu0 %2019  ;;  %8415 = vmatprep.subr.msk.bf16.mxu1 %vm1706_vm9, %v1955_v35  ;;  %v1889_v40 = vpop.permute.xlu1 %1888 }
 0x332   : > { %v1892_v41 = vsel %vm1230_vm3, %v1887_v14, %v1889_v40  ;;  %v1893_v42 = vsel %vm1230_vm3, %v1889_v40, %v1891_v25  ;;  %v8426_v25 = vld [vmem:[%s11813_s2 + $0x20] sm:$0xf]  ;;  %s11828_s2 = smov 119  }
 0x333   : > { %8410 = vmatmul.mubr.msk.bf16.vlgmr.msra.gmra.mrb[20].mxu1 %vm11773_vm10, %v8408_v38  ;;  %8412 = vmatprep.subr.msk.bf16.mxu0 %vm1706_vm9, %v1893_v42  ;;  %v1898_v44 = vsel %vm1706_vm9, %v1892_v41, 0 }
 0x334   : > { %1904 = vmatpush1.bf16.msra.mxu0 %v1898_v44  ;;  %1966 = vmatpush1.bf16.msra.mxu1 %v1960_v45 }
 0x335   : > { %v2024_v47 = vpop.permute.xlu0 %2023  ;;  %v2095_v49 = vpop.permute.xlu1 %2094  ;;  %1997 = vmatprep.mubr.bf16.mxu1 %v9647_v31 }
 0x337   : > { %8413 = vmatmul.mubr.msk.bf16.vlgmr.msra.gmra.mrb[24].mxu0 %vm11773_vm10, %v8411_v46 }
 0x338   : > { %2068 = vmatprep.mubr.bf16.mxu0 %v9647_v31 }
 0x339   : > { %v2153_v52 = vpop.permute.xlu0 %2152  ;;  %v2022_v53 = vpop.permute.xlu1 %2021 }
 0x33a   : > { %v2025_v54 = vsel %vm11776_vm4, %v2020_v39, %v2022_v53  ;;  %v2026_v58 = vsel %vm11776_vm4, %v2022_v53, %v2024_v47 }
 0x33b   : > { %8416 = vmatmul.mubr.msk.bf16.vlgmr.msra.gmra.mrb[24].mxu1 %vm11773_vm10, %v8414_v51  ;;  %8418 = vmatprep.subr.msk.bf16.mxu0 %vm1706_vm9, %v2026_v58  ;;  %v2031_v59 = vsel %vm1706_vm9, %v2025_v54, 0 }
 0x33c   : > { %2037 = vmatpush1.bf16.msra.mxu0 %v2031_v59  ;;  %2139 = vmatprep.mubr.bf16.mxu1 %v9647_v31 }
 0x33d   : > { %v2093_v61 = vpop.permute.xlu0 %2092  ;;  %v2155_v62 = vpop.permute.xlu1 %2154 }
 0x33e   : > { %v2096_v63 = vsel %vm11775_vm5, %v2091_v28, %v2093_v61  ;;  %v2097_v0 = vsel %vm11775_vm5, %v2093_v61, %v2095_v49  ;;  %v2158_v7 = vsel %vm11774_vm6, %v2153_v52, %v2155_v62 }
 0x33f   : > { %8419 = vmatmul.mubr.msk.bf16.vlgmr.msra.gmra.mrb[28].mxu0 %vm11773_vm10, %v8417_v60  ;;  %8421 = vmatprep.subr.msk.bf16.mxu1 %vm1706_vm9, %v2097_v0  ;;  %v2102_v4 = vsel %vm1706_vm9, %v2096_v63, 0  ;;  %v2164_v15 = vsel %vm1706_vm9, %v2158_v7, 0 }
 0x340   : > { %2108 = vmatpush1.bf16.msra.mxu1 %v2102_v4  ;;  %2201 = vmatprep.mubr.bf16.mxu0 %v9647_v31 }
 0x341   : > { %v2157_v6 = vpop.permute.xlu0 %2156  ;;  %v2224_v9 = vpop.permute.xlu1 %2223 }
 0x342   : > { %v2159_v14 = vsel %vm11774_vm6, %v2155_v62, %v2157_v6  ;;  %vm894_vm6 = vcmask 212136  }
 0x343   : > { %8422 = vmatmul.mubr.msk.bf16.vlgmr.msra.gmra.mrb[28].mxu1 %vm11773_vm10, %v8420_v8  ;;  %8424 = vmatprep.subr.msk.bf16.mxu0 %vm1706_vm9, %v2159_v14 }
 0x344   : > { %2170 = vmatpush1.bf16.msra.mxu0 %v2164_v15  ;;  %2272 = vmatprep.mubr.bf16.mxu1 %v9647_v31 }
 0x345   : > { %v2226_v18 = vpop.permute.xlu0 %2225  ;;  %v2228_v20 = vpop.permute.xlu1 %2227 }
 0x346   : > { %v2229_v22 = vsel %vm11753_vm7, %v2224_v9, %v2226_v18  ;;  %v2230_v24 = vsel %vm11753_vm7, %v2226_v18, %v2228_v20  ;;  %vm882_vm7 = vcmask 671304  }
 0x347   : > { %8425 = vmatmul.mubr.msk.bf16.vlgmr.msra.gmra.mrb[32].mxu0 %vm11773_vm10, %v8423_v17  ;;  %8427 = vmatprep.subr.msk.bf16.mxu1 %vm1706_vm9, %v2230_v24  ;;  %v2235_v21 = vsel %vm1706_vm9, %v2229_v22, 0  ;;  %883 = vst.msk [vmem:[#allocation3] sm:$0xff] %vm882_vm7, %v9638_v2  ;;  %884 = vst.msk [vmem:[#allocation3 + $0x8] sm:$0xff] %vm882_vm7, %v9638_v2 }
 0x348   : > { %2241 = vmatpush1.bf16.msra.mxu1 %v2235_v21  ;;  %885 = vst.msk [vmem:[#allocation3 + $0x10] sm:$0xff] %vm882_vm7, %v9638_v2  ;;  %886 = vst.msk [vmem:[#allocation3 + $0x18] sm:$0xff] %vm882_vm7, %v9638_v2 }
 0x349   : > { %8975 = vmatprep.subr.bf16.mxu1 %v9638_v2  ;;  %887 = vst.msk [vmem:[#allocation3 + $0x20] sm:$0xff] %vm882_vm7, %v9638_v2  ;;  %888 = vst.msk [vmem:[#allocation3 + $0x28] sm:$0xff] %vm882_vm7, %v9638_v2  ;;  %vm2533_vm7 = vcmask 597064  }
 0x34b   : > { %8428 = vmatmul.mubr.msk.bf16.vlgmr.msra.gmra.mrb[32].mxu1 %vm11773_vm10, %v8426_v25 }
 0x34c   : > { %8977 = vmatprep.mubr.msk.bf16.mxu1 %vm9657_vm14, %v9638_v2 }
 0x380   : > { %v1797_v27 = vpop.f32.mrb[20].mxu0 }
 0x381   : > { %v1799_v23 = vpop.f32.mrb[21].mxu0 }
 0x382   : > { %v1801_v28 = vpop.f32.mrb[22].mxu0 }
 0x383   : > { %v1802_v26 = vpop.f32.mrb[23].mxu0 }
 0x3fa   : > { %v1747_v29 = vpop.f32.mrb[16].mxu1 }
 0x3fb   : > { %v1749_v30 = vpop.f32.mrb[17].mxu1  ;;  %v1798_v34 = vadd.f32 %v1797_v27, %v1747_v29 }
 0x3fc   : > { %v1751_v35 = vpop.f32.mrb[18].mxu1  ;;  %v1800_v38 = vadd.f32 %v1799_v23, %v1749_v30 }
 0x3fd   : > { %v1752_v39 = vpop.f32.mrb[19].mxu1 }
 0x406   : > { %v1866_v40 = vpop.f32.mrb[20].mxu1 }
 0x407   : > { %v1873_v41 = vadd.f32 %v1866_v40, %v1798_v34  ;;  %v1868_v42 = vpop.f32.mrb[21].mxu1  ;;  %v2287_v34 = vpop.permute.xlu0 %2286 }
 0x408   : > { %v1874_v44 = vadd.f32 %v1868_v42, %v1800_v38  ;;  %v1870_v45 = vpop.f32.mrb[22].mxu1 }
 0x409   : > { %v1871_v46 = vpop.f32.mrb[23].mxu1 }
 0x40a   : > { %v1937_v47 = vpop.f32.mrb[24].mxu0 }
 0x40b   : > { %v1944_v49 = vadd.f32 %v1937_v47, %v1873_v41  ;;  %v1939_v51 = vpop.f32.mrb[25].mxu0 }
 0x40c   : > { %v1945_v52 = vadd.f32 %v1939_v51, %v1874_v44  ;;  %v1941_v53 = vpop.f32.mrb[26].mxu0 }
 0x40d   : > { %v1942_v54 = vpop.f32.mrb[27].mxu0 }
 0x40e   : > { %v1999_v58 = vpop.f32.mrb[24].mxu1 }
 0x40f   : > { %v2006_v59 = vadd.f32 %v1999_v58, %v1944_v49  ;;  %v2001_v60 = vpop.f32.mrb[25].mxu1 }
 0x410   : > { %v2007_v61 = vadd.f32 %v2001_v60, %v1945_v52  ;;  %v2003_v62 = vpop.f32.mrb[26].mxu1 }
 0x411   : > { %v2004_v63 = vpop.f32.mrb[27].mxu1 }
 0x412   : > { %v2070_v0 = vpop.f32.mrb[28].mxu0 }
 0x413   : > { %v2077_v4 = vadd.f32 %v2070_v0, %v2006_v59  ;;  %v2072_v7 = vpop.f32.mrb[29].mxu0 }
 0x414   : > { %v2078_v8 = vadd.f32 %v2072_v7, %v2007_v61  ;;  %v2074_v6 = vpop.f32.mrb[30].mxu0  ;;  %v9525_v7 = vld [vmem:[%s11815_s24 + $0x40] sm:$0xff]  }
 0x415   : > { %v2075_v9 = vpop.f32.mrb[31].mxu0  ;;  %v9527_v6 = vld [vmem:[%s11815_s24 + $0x48] sm:$0xff]   ;;  %8792 = vmatprep.subr.bf16.mxu0 %v9525_v7 }
 0x416   : > { %v2141_v14 = vpop.f32.mrb[28].mxu1  ;;  %v9528_v9 = vld [vmem:[%s11815_s24 + $0x8] sm:$0xff]  }
 0x417   : > { %v2148_v15 = vadd.f32 %v2141_v14, %v2077_v4  ;;  %v2143_v17 = vpop.f32.mrb[29].mxu1  ;;  %v9529_v14 = vld [vmem:[%s11815_s24 + $0x50] sm:$0xff]  }
 0x418   : > { %v2149_v18 = vadd.f32 %v2143_v17, %v2078_v8  ;;  %v2145_v20 = vpop.f32.mrb[30].mxu1  ;;  %v9526_v8 = vld [vmem:[%s11815_s24] sm:$0xff]   ;;  %v9531_v17 = vld [vmem:[%s11815_s24 + $0x58] sm:$0xff]  }
 0x419   : > { %v2146_v22 = vpop.f32.mrb[31].mxu1  ;;  %8793 = vmatpush3.bf16.msra.mxu0 %v9526_v8  ;;  %v9533_v20 = vld [vmem:[%s11815_s24 + $0x60] sm:$0xff]  }
 0x41a   : > { %v2203_v24 = vpop.f32.mrb[32].mxu0  ;;  %8794 = vmatprep.subr.bf16.mxu0 %v9527_v6  ;;  %v9534_v22 = vld [vmem:[%s11815_s24 + $0x20] sm:$0xff]  }
 0x41b   : > { %v2210_v21 = vadd.f32 %v2203_v24, %v2148_v15  ;;  %v2205_v25 = vpop.f32.mrb[33].mxu0  ;;  %v9530_v15 = vld [vmem:[%s11815_s24 + $0x10] sm:$0xff]   ;;  %v9535_v24 = vld [vmem:[%s11815_s24 + $0x68] sm:$0xff]  }
 0x41c   : > { %v2211_v27 = vadd.f32 %v2205_v25, %v2149_v18  ;;  %v2207_v23 = vpop.f32.mrb[34].mxu0  ;;  %v9532_v18 = vld [vmem:[%s11815_s24 + $0x18] sm:$0xff]   ;;  %v9537_v25 = vld [vmem:[%s11815_s24 + $0x70] sm:$0xff]  }
 0x41d   : > { %v2208_v28 = vpop.f32.mrb[35].mxu0  ;;  %8795 = vmatpush3.bf16.msra.mxu0 %v9528_v9  ;;  %v9539_v23 = vld [vmem:[%s11815_s24 + $0x78] sm:$0xff]  }
 0x41e   : > { %v2274_v26 = vpop.f32.mrb[32].mxu1  ;;  %8796 = vmatprep.subr.bf16.mxu0 %v9529_v14  ;;  %v9540_v28 = vld [vmem:[%s11815_s24 + $0x38] sm:$0xff]  }
 0x41f   : > { %v2281_v29 = vadd.f32 %v2274_v26, %v2210_v21  ;;  %v2276_v30 = vpop.f32.mrb[33].mxu1  ;;  %v9536_v21 = vld [vmem:[%s11815_s24 + $0x28] sm:$0xff]  }
 0x420   : > { %v2282_v35 = vadd.f32 %v2276_v30, %v2211_v27  ;;  %v2278_v38 = vpop.f32.mrb[34].mxu1  ;;  %v9538_v27 = vld [vmem:[%s11815_s24 + $0x30] sm:$0xff]   ;;  %s11786_s24 = smov 122  }
 0x421   : > { %v2289_v39 = vadd.f32 %v2287_v34, %v2281_v29  ;;  %v2279_v40 = vpop.f32.mrb[35].mxu1  ;;  %8797 = vmatpush3.bf16.msra.mxu0 %v9530_v15 }
 0x422   : > { %v2290_v41 = vadd.f32 %v2287_v34, %v2282_v35  ;;  %8798 = vmatprep.subr.bf16.mxu0 %v9531_v17 }
 0x423   : > { %v2291_v42 = vmax.f32 %v2289_v39, 0.0 }
 0x424   : > { %v2292_v44 = vmax.f32 %v2290_v41, 0.0 }
 0x425   : > { %2295 = vrot.lane.b32.xlu1 %v2291_v42, %s11745_s11  ;;  %8799 = vmatpush3.bf16.msra.mxu0 %v9532_v18 }
 0x426   : > { %2297 = vrot.lane.b32.xlu0 %v2292_v44, %s11745_s11  ;;  %8800 = vmatprep.subr.bf16.mxu0 %v9533_v20  ;;  %s11755_s11 = smov 8  }
 0x429   : > { %8801 = vmatpush3.bf16.msra.mxu0 %v9534_v22 }
 0x42a   : > { %8802 = vmatprep.subr.bf16.mxu0 %v9535_v24 }
 0x42d   : > { %8803 = vmatpush3.bf16.msra.mxu0 %v9536_v21 }
 0x42e   : > { %8804 = vmatprep.subr.bf16.mxu0 %v9537_v25 }
 0x431   : > { %8805 = vmatpush3.bf16.msra.mxu0 %v9538_v27 }
 0x432   : > { %8806 = vmatprep.subr.bf16.mxu0 %v9539_v23 }
 0x435   : > { %8807 = vmatpush3.bf16.msra.mxu0 %v9540_v28 }
 0x436   : > { %8999 = vmatprep.subr.bf16.mxu0 %v9638_v2 }
 0x497   : > { %v2296_v45 = vpop.permute.xlu1 %2295 }
 0x498   : > { %2303 = vst.msk [vmem:[#allocation2] sm:$0xff] %vm1674_vm8, %v2296_v45  ;;  %6807 = vst.msk [vmem:[#allocation2 + $0x30] sm:$0xff] %vm1674_vm8, %v2296_v45  ;;  %v2298_v46 = vpop.permute.xlu0 %2297 }
 0x499   : > { %v2299_v47 = vsel %vm867_vm0, %v2296_v45, %v2298_v46  ;;  %2305 = vst.msk [vmem:[#allocation2 + $0x10] sm:$0xff] %vm867_vm0, %v2298_v46  ;;  %6809 = vst.msk [vmem:[#allocation2 + $0x40] sm:$0xff] %vm867_vm0, %v2298_v46 }
 0x49a   : > { %6808 = vst [vmem:[#allocation2 + $0x38] sm:$0xff] %v2299_v47 }
 0x49f   : > { %v2306_v49 = vld [vmem:[#allocation2] sm:$0xff] }
 0x4a0   : > { %2312 = vrot.lane.b32.xlu0 %v2306_v49, %s11760_s8  ;;  %v2308_v51 = vld [vmem:[#allocation2 + $0x10] sm:$0xff] }
 0x4a1   : > { %v9504_v52 = vpack.i.bf16 %v2308_v51, %v2299_v47 }
 0x4a3   : > { %9505 = vrot.lane.b32.xlu1 %v9504_v52, %s11760_s8 }
 0x512   : > { %v2313_v59 = vpop.permute.xlu0 %2312 }
 0x515   : > { %v9506_v53 = vpop.permute.xlu1 %9505 }
 0x516   : > { %v9508_v54 = vunpack.i.h.bf16 %v9506_v53  ;;  %v9507_v58 = vunpack.i.l.bf16 %v9506_v53  ;;  %v942_v53 = vand.u32 7, %v9836_v3 }
 0x518   : > { %v2326_v60 = vmax.f32 %v2308_v51, %v9508_v54  ;;  %v2319_v61 = vsel %vm1014_vm15, %v2313_v59, %v9507_v58  ;;  %v2320_v62 = vsel %vm1014_vm15, %v9507_v58, %v9508_v54  ;;  %vm953_vm12 = vcmp.ne.s32.totalorder %v942_v53, 7 }
 0x519   : > { %v2324_v63 = vmax.f32 %v2306_v49, %v2319_v61  ;;  %v2325_v0 = vmax.f32 %v2299_v47, %v2320_v62  ;;  %v8374_v54 = vsel %vm953_vm12, 1.0, %v9638_v2  ;;  %vm950_vm12 = vcmp.ne.s32.totalorder %v942_v53, 0 }
 0x51b   : > { %2330 = vrot.lane.b32.xlu0 %v2324_v63, %s11751_s6  ;;  %v9509_v4 = vpack.i.bf16 %v2326_v60, %v2325_v0 }
 0x51d   : > { %9510 = vrot.lane.b32.xlu1 %v9509_v4, %s11751_s6  ;;  %s11817_s6 = smov 18  }
 0x58d   : > { %v2331_v34 = vpop.permute.xlu0 %2330 }
 0x58f   : > { %v9511_v26 = vpop.permute.xlu1 %9510 }
 0x590   : > { %v9513_v29 = vunpack.i.h.bf16 %v9511_v26  ;;  %v9512_v30 = vunpack.i.l.bf16 %v9511_v26 }
 0x592   : > { %v2344_v35 = vmax.f32 %v2326_v60, %v9513_v29  ;;  %v2338_v38 = vsel %vm1230_vm3, %v9512_v30, %v9513_v29  ;;  %v2337_v39 = vsel %vm1230_vm3, %v2331_v34, %v9512_v30 }
 0x593   : > { %v2343_v40 = vmax.f32 %v2325_v0, %v2338_v38  ;;  %v2342_v44 = vmax.f32 %v2324_v63, %v2337_v39  ;;  %v10297_v63 = vsel %vm950_vm12, 1.0, %v9638_v2  ;;  %vm3738_vm12 = vcmask 523264  }
 0x594   : > { %v2347_v41 = vpack.c.bf16 %v2344_v35, %v2344_v35 }
 0x595   : > { %v2346_v42 = vpack.c.bf16 %v2343_v40, %v2343_v40  ;;  %v2345_v45 = vpack.c.bf16 %v2342_v44, %v2342_v44 }
 0x596   : > { %2387 = vrot.lane.b32.xlu0 %v2347_v41, %s11764_s4 }
 0x597   : > { %2385 = vrot.lane.b32.xlu1 %v2346_v42, %s11764_s4 }
 0x59b   : > { %2383 = vrot.lane.b32.xlu1 %v2345_v45, %s11764_s4 }
 0x59f   : > { %2652 = vrot.lane.b32.xlu1 %v8374_v54, %s11816_s0 }
 0x5a3   : > { %2842 = vrot.lane.b32.xlu1 %v8374_v54, %s11754_s7  ;;  %s11830_s7 = smov 111  }
 0x5a7   : > { %3031 = vrot.lane.b32.xlu1 %v8374_v54, %s11817_s6  ;;  %s11820_s6 = smov 112  }
 0x608   : > { %v2388_v46 = vpop.permute.xlu0 %2387 }
 0x609   : > { %v2386_v47 = vpop.permute.xlu1 %2385 }
 0x60a   : > { %v2390_v49 = vsel %vm1293_vm2, %v2386_v47, %v2388_v46 }
 0x60b   : > { %2521 = vmatprep.mubr.bf16.mxu0 %v2390_v49 }
 0x60d   : > { %v2384_v51 = vpop.permute.xlu1 %2383 }
 0x60e   : > { %v2389_v52 = vsel %vm1293_vm2, %v2384_v51, %v2386_v47 }
 0x60f   : > { %2522 = vmatmul.mubr.bf16.vlgmr.msra.gmra.mrb[36].mxu0 %v2389_v52 }
 0x610   : > { %9001 = vmatprep.mubr.msk.bf16.mxu0 %vm9657_vm14, %v9638_v2 }
 0x611   : > { %v10308_v4 = vpop.permute.xlu1 %2652 }
 0x615   : > { %v10314_v15 = vpop.permute.xlu1 %2842 }
 0x619   : > { %v10323_v21 = vpop.permute.xlu1 %3031 }
 0x6e2   : > { %v8808_v58 = vpop.f32.mrb[36].mxu0 }
 0x6e3   : > { %v8809_v59 = vpop.f32.mrb[37].mxu0 }
 0x6e4   : > { %v8810_v60 = vadd.f32 %v8809_v59, %v8808_v58  ;;  %v8811_v61 = vpop.f32.mrb[38].mxu0 }
 0x6e5   : > { %v8812_v62 = vpop.f32.mrb[39].mxu0 }
 0x6e6   : > { %2530 = vrot.lane.b32.xlu0 %v8810_v60, %s11766_s23  ;;  %s11823_s23 = sld [smem:[#allocation14_spill]] }
 0x6ea   : > { %2718 = vrot.lane.b32.xlu0 %v10297_v63, %s11755_s11  ;;  %s11821_s11 = sld [smem:[#allocation15_spill]] }
 0x6ec   : > { %v9541_v38 = vld [vmem:[%s11823_s23 + $0x8] sm:$0xff]   ;;  %v9542_v45 = vld [vmem:[%s11823_s23 + $0x20] sm:$0xff]   ;;  %v9544_v52 = vld [vmem:[%s11823_s23 + $0x30] sm:$0xff]  }
 0x6ed   : > { %v9543_v46 = vld [vmem:[%s11823_s23] sm:$0xff]   ;;  %v9545_v54 = vld [vmem:[%s11823_s23 + $0x10] sm:$0xff]   ;;  %v9546_v62 = vld [vmem:[%s11823_s23 + $0x18] sm:$0xff]  }
 0x6ee   : > { %2907 = vrot.lane.b32.xlu0 %v10297_v63, %s11818_s12  ;;  %v9548_v61 = vld [vmem:[%s11823_s23 + $0x40] sm:$0xff]   ;;  %s11825_s12 = smov 127  }
 0x6f0   : > { %v3096_v26 = vld [vmem:[%s11821_s11] sm:$0xff]  ;;  %v3097_v29 = vld [vmem:[%s11821_s11 + $0x8] sm:$0xff]  ;;  %s11833_s11 = smov 8  }
 0x758   : > { %v2531_v0 = vpop.permute.xlu0 %2530 }
 0x759   : > { %2534 = vst.msk [vmem:[#allocation3] sm:$0xff] %vm2533_vm7, %v2531_v0 }
 0x75c   : > { %v10310_v7 = vpop.permute.xlu0 %2718 }
 0x760   : > { %v2535_v8 = vld [vmem:[#allocation3] sm:$0xff]  ;;  %v10317_v18 = vpop.permute.xlu0 %2907 }
 0x761   : > { %v2543_v6 = vpack.c.bf16 %v2535_v8, %v2535_v8  ;;  %v2655_v9 = vmul.f32 %v10308_v4, %v2535_v8  ;;  %v2721_v14 = vmul.f32 %v10310_v7, %v2535_v8  ;;  %v2845_v22 = vmul.f32 %v10314_v15, %v2535_v8 }
 0x762   : > { %v2910_v24 = vmul.f32 %v10317_v18, %v2535_v8  ;;  %v3034_v23 = vmul.f32 %v10323_v21, %v2535_v8  ;;  %v2536_v30 = vmul.f32 %v10297_v63, %v2535_v8 }
 0x763   : > { %2550 = vrot.lane.b32.xlu0 %v2543_v6, %s11760_s8  ;;  %v2659_v17 = vpack.c.bf16 %v2655_v9, %v2655_v9  ;;  %v2725_v20 = vpack.c.bf16 %v2721_v14, %v2721_v14  ;;  %v2849_v25 = vpack.c.bf16 %v2845_v22, %v2845_v22  ;;  %s11829_s8 = smov 118  }
 0x764   : > { %v2914_v27 = vpack.c.bf16 %v2910_v24, %v2910_v24  ;;  %v3038_v28 = vpack.c.bf16 %v3034_v23, %v3034_v23  ;;  %v2539_v39 = vpack.c.bf16 %v2536_v30, %v2536_v30 }
 0x765   : > { %2666 = vrot.lane.b32.xlu1 %v2659_v17, %s11819_s10  ;;  %v9549_v17 = vld [vmem:[%s11823_s23 + $0x38] sm:$0xff]  }
 0x766   : > { %v2608_v41 = vsel %vm1706_vm9, %v2539_v39, 0 }
 0x767   : > { %2732 = vrot.lane.b32.xlu0 %v2725_v20, %s11756_s29  ;;  %s11822_s29 = smov 110  }
 0x769   : > { %2791 = vrot.lane.b32.xlu1 %v2543_v6, %s11758_s1  ;;  %s11827_s1 = smov 120  }
 0x76b   : > { %2856 = vrot.lane.b32.xlu0 %v2849_v25, %s11762_s5  ;;  %s11824_s5 = smov 9  }
 0x76d   : > { %2921 = vrot.lane.b32.xlu1 %v2914_v27, %s11820_s6 }
 0x76f   : > { %2980 = vrot.lane.b32.xlu0 %v2543_v6, %s11764_s4  ;;  %v9547_v6 = vld [vmem:[%s11823_s23 + $0x28] sm:$0xff]   ;;  %s11826_s4 = sld [smem:[#allocation16_spill]]  ;;  %s11831_s23 = sld [smem:[#allocation17_spill]] }
 0x771   : > { %3045 = vrot.lane.b32.xlu1 %v3038_v28, %s11822_s29 }
 0x773   : > { %3100 = vperm.xlu0 %9503, %v3096_v26  }
 0x775   : > { %3105 = vperm.xlu1 %9514, %v3097_v29  }
 0x7d5   : > { %v2551_v34 = vpop.permute.xlu0 %2550 }
 0x7d6   : > { %v2556_v35 = vsel %vm1706_vm9, %v2551_v34, 0 }
 0x7d7   : > { %v2667_v40 = vpop.permute.xlu1 %2666  ;;  %8976 = vmatpush3.bf16.msra.mxu1 %v2556_v35 }
 0x7d8   : > { %8981 = vmatprep.subr.bf16.mxu1 %v9638_v2  ;;  %v2672_v51 = vsel %vm1706_vm9, %v2667_v40, 0 }
 0x7d9   : > { %v2733_v58 = vpop.permute.xlu0 %2732 }
 0x7da   : > { %8978 = vmatmul.mubr.msk.bf16.vlgmr.msra.gmra.mrb[36].mxu1 %vm11773_vm10, %v9541_v38  ;;  %v2738_v60 = vsel %vm1706_vm9, %v2733_v58, 0 }
 0x7db   : > { %v2792_v42 = vpop.permute.xlu1 %2791  ;;  %8982 = vmatpush3.bf16.msra.mxu1 %v2608_v41  ;;  %8983 = vmatprep.mubr.msk.bf16.mxu1 %vm9657_vm14, %v9638_v2 }
 0x7dc   : > { %v2797_v44 = vsel %vm1706_vm9, %v2792_v42, 0  ;;  %8987 = vmatprep.subr.bf16.mxu1 %v9638_v2 }
 0x7dd   : > { %9000 = vmatpush3.bf16.msra.mxu0 %v2797_v44  ;;  %v2857_v0 = vpop.permute.xlu0 %2856 }
 0x7de   : > { %9011 = vmatprep.subr.bf16.mxu0 %v9638_v2  ;;  %v2862_v8 = vsel %vm1706_vm9, %v2857_v0, 0 }
 0x7df   : > { %v2922_v47 = vpop.permute.xlu1 %2921 }
 0x7e0   : > { %v2927_v49 = vsel %vm1706_vm9, %v2922_v47, 0  ;;  %9002 = vmatmul.mubr.msk.bf16.vlgmr.msra.gmra.mrb[40].mxu0 %vm11773_vm10, %v9542_v45 }
 0x7e1   : > { %9012 = vmatpush3.bf16.msra.mxu0 %v2927_v49  ;;  %9013 = vmatprep.mubr.msk.bf16.mxu0 %vm9657_vm14, %v9638_v2  ;;  %v2981_v9 = vpop.permute.xlu0 %2980 }
 0x7e2   : > { %8984 = vmatmul.mubr.msk.bf16.vlgmr.msra.gmra.mrb[40].mxu1 %vm11773_vm10, %v9543_v46  ;;  %9023 = vmatprep.subr.bf16.mxu0 %v9638_v2  ;;  %v2986_v14 = vsel %vm1706_vm9, %v2981_v9, 0 }
 0x7e3   : > { %8988 = vmatpush3.bf16.msra.mxu1 %v2672_v51  ;;  %8989 = vmatprep.mubr.msk.bf16.mxu1 %vm9657_vm14, %v9638_v2  ;;  %v3046_v53 = vpop.permute.xlu1 %3045 }
 0x7e4   : > { %8993 = vmatprep.subr.bf16.mxu1 %v9638_v2  ;;  %v3051_v59 = vsel %vm1706_vm9, %v3046_v53, 0 }
 0x7e8   : > { %9014 = vmatmul.mubr.msk.bf16.vlgmr.msra.gmra.mrb[44].mxu0 %vm11773_vm10, %v9544_v52 }
 0x7e9   : > { %9024 = vmatpush3.bf16.msra.mxu0 %v3051_v59  ;;  %9025 = vmatprep.mubr.msk.bf16.mxu0 %vm9657_vm14, %v9638_v2 }
 0x7ea   : > { %8990 = vmatmul.mubr.msk.bf16.vlgmr.msra.gmra.mrb[44].mxu1 %vm11773_vm10, %v9545_v54  ;;  %9035 = vmatprep.subr.bf16.mxu0 %v9638_v2 }
 0x7eb   : > { %8994 = vmatpush3.bf16.msra.mxu1 %v2738_v60  ;;  %8995 = vmatprep.mubr.msk.bf16.mxu1 %vm9657_vm14, %v9638_v2 }
 0x7ec   : > { %9005 = vmatprep.subr.bf16.mxu1 %v9638_v2 }
 0x7f0   : > { %9026 = vmatmul.mubr.msk.bf16.vlgmr.msra.gmra.mrb[48].mxu0 %vm11773_vm10, %v9548_v61 }
 0x7f1   : > { %9037 = vmatprep.mubr.msk.bf16.mxu0 %vm9657_vm14, %v9638_v2 }
 0x7f2   : > { %8996 = vmatmul.mubr.msk.bf16.vlgmr.msra.gmra.mrb[48].mxu1 %vm11773_vm10, %v9546_v62 }
 0x7f3   : > { %9006 = vmatpush3.bf16.msra.mxu1 %v2862_v8  ;;  %9007 = vmatprep.mubr.msk.bf16.mxu1 %vm9657_vm14, %v9638_v2 }
 0x7f4   : > { %9017 = vmatprep.subr.bf16.mxu1 %v9638_v2 }
 0x7fa   : > { %9008 = vmatmul.mubr.msk.bf16.vlgmr.msra.gmra.mrb[52].mxu1 %vm11773_vm10, %v9547_v6 }
 0x7fb   : > { %9018 = vmatpush3.bf16.msra.mxu1 %v2986_v14  ;;  %9019 = vmatprep.mubr.msk.bf16.mxu1 %vm9657_vm14, %v9638_v2 }
 0x7fc   : > { %9029 = vmatprep.subr.bf16.mxu1 %v9638_v2 }
 0x802   : > { %9020 = vmatmul.mubr.msk.bf16.vlgmr.msra.gmra.mrb[56].mxu1 %vm11773_vm10, %v9549_v17  ;;  %vm889_vm10 = vcmask 39936  }
 0x803   : > { %9031 = vmatprep.mubr.msk.bf16.mxu1 %vm9657_vm14, %v9638_v2  ;;  %890 = vst.msk [vmem:[#allocation4] sm:$0xff] %vm889_vm10, %v9638_v2  ;;  %891 = vst.msk [vmem:[#allocation4 + $0x8] sm:$0xff] %vm889_vm10, %v9638_v2 }
 0x804   : > { %892 = vst.msk [vmem:[#allocation4 + $0x10] sm:$0xff] %vm889_vm10, %v9638_v2  ;;  %893 = vst.msk [vmem:[#allocation4 + $0x18] sm:$0xff] %vm889_vm10, %v9638_v2 }
 0x805   : > { %895 = vst.msk [vmem:[#allocation4] sm:$0xff] %vm894_vm6, %v9638_v2  ;;  %896 = vst.msk [vmem:[#allocation4 + $0x8] sm:$0xff] %vm894_vm6, %v9638_v2 }
 0x806   : > { %897 = vst.msk [vmem:[#allocation4 + $0x10] sm:$0xff] %vm894_vm6, %v9638_v2  ;;  %898 = vst.msk [vmem:[#allocation4 + $0x18] sm:$0xff] %vm894_vm6, %v9638_v2  ;;  %vm3791_vm6 = vcmask 171048  }
 0x8ad   : > { %v2592_v20 = vpop.f32.mrb[36].mxu1 }
 0x8ae   : > { %v8979_v22 = vpop.f32.mrb[37].mxu1 }
 0x8af   : > { %v2595_v24 = vpop.f32.mrb[38].mxu1 }
 0x8b0   : > { %v8980_v25 = vpop.f32.mrb[39].mxu1 }
 0x8b3   : > { %v2833_v27 = vpop.f32.mrb[40].mxu0 }
 0x8b4   : > { %v9003_v23 = vpop.f32.mrb[41].mxu0 }
 0x8b5   : > { %v2644_v28 = vpop.f32.mrb[40].mxu1  ;;  %v2836_v26 = vpop.f32.mrb[42].mxu0 }
 0x8b6   : > { %v2645_v29 = vadd.f32 %v2644_v28, %v2592_v20  ;;  %v8985_v30 = vpop.f32.mrb[41].mxu1  ;;  %v9004_v34 = vpop.f32.mrb[43].mxu0 }
 0x8b7   : > { %v2647_v35 = vpop.f32.mrb[42].mxu1 }
 0x8b8   : > { %v2648_v38 = vadd.f32 %v2647_v35, %v2595_v24  ;;  %v8986_v39 = vpop.f32.mrb[43].mxu1 }
 0x8bb   : > { %v2963_v40 = vpop.f32.mrb[44].mxu0 }
 0x8bc   : > { %v9015_v41 = vpop.f32.mrb[45].mxu0 }
 0x8bd   : > { %v2708_v42 = vpop.f32.mrb[44].mxu1  ;;  %v2966_v44 = vpop.f32.mrb[46].mxu0 }
 0x8be   : > { %v2715_v45 = vadd.f32 %v2708_v42, %v2645_v29  ;;  %v8991_v46 = vpop.f32.mrb[45].mxu1  ;;  %v9016_v47 = vpop.f32.mrb[47].mxu0 }
 0x8bf   : > { %v2711_v49 = vpop.f32.mrb[46].mxu1  ;;  %v3106_v46 = vpop.permute.xlu1 %3105 }
 0x8c0   : > { %v2716_v51 = vadd.f32 %v2711_v49, %v2648_v38  ;;  %v8992_v52 = vpop.f32.mrb[47].mxu1 }
 0x8c3   : > { %v3087_v53 = vpop.f32.mrb[48].mxu0 }
 0x8c4   : > { %v9027_v54 = vpop.f32.mrb[49].mxu0 }
 0x8c5   : > { %v2774_v58 = vpop.f32.mrb[48].mxu1  ;;  %v3090_v59 = vpop.f32.mrb[50].mxu0 }
 0x8c6   : > { %v2781_v60 = vadd.f32 %v2774_v58, %v2715_v45  ;;  %v8997_v61 = vpop.f32.mrb[49].mxu1  ;;  %v9028_v62 = vpop.f32.mrb[51].mxu0 }
 0x8c7   : > { %v2777_v0 = vpop.f32.mrb[50].mxu1  ;;  %v3101_v45 = vpop.permute.xlu0 %3100 }
 0x8c8   : > { %v2782_v8 = vadd.f32 %v2777_v0, %v2716_v51  ;;  %v8998_v6 = vpop.f32.mrb[51].mxu1  ;;  %v2840_v9 = vadd.f32 %v2833_v27, %v2781_v60 }
 0x8ca   : > { %v2841_v14 = vadd.f32 %v2836_v26, %v2782_v8 }
 0x8cd   : > { %v2898_v17 = vpop.f32.mrb[52].mxu1 }
 0x8ce   : > { %v2905_v20 = vadd.f32 %v2898_v17, %v2840_v9  ;;  %v9009_v22 = vpop.f32.mrb[53].mxu1  ;;  %v9550_v9 = vld [vmem:[%s11826_s4] sm:$0xff]  }
 0x8cf   : > { %v2901_v24 = vpop.f32.mrb[54].mxu1 }
 0x8d0   : > { %v2906_v25 = vadd.f32 %v2901_v24, %v2841_v14  ;;  %v9010_v23 = vpop.f32.mrb[55].mxu1  ;;  %v2970_v28 = vadd.f32 %v2963_v40, %v2905_v20 }
 0x8d2   : > { %v2971_v29 = vadd.f32 %v2966_v44, %v2906_v25 }
 0x8d5   : > { %v3022_v30 = vpop.f32.mrb[56].mxu1 }
 0x8d6   : > { %v3029_v34 = vadd.f32 %v3022_v30, %v2970_v28  ;;  %v9021_v35 = vpop.f32.mrb[57].mxu1 }
 0x8d7   : > { %v3025_v38 = vpop.f32.mrb[58].mxu1  ;;  %v3655_v35 = vld [vmem:[%s11831_s23 + $0x8] sm:$0xff] }
 0x8d8   : > { %v3094_v39 = vadd.f32 %v3087_v53, %v3029_v34  ;;  %v3030_v41 = vadd.f32 %v3025_v38, %v2971_v29  ;;  %v9022_v42 = vpop.f32.mrb[59].mxu1  ;;  %v3654_v34 = vld [vmem:[%s11831_s23] sm:$0xff]  ;;  %s11839_s23 = sld [smem:[#allocation20_spill]] }
 0x8da   : > { %v3095_v47 = vadd.f32 %v3090_v59, %v3030_v41  ;;  %v3108_v27 = vadd.f32 %v3101_v45, %v3094_v39  ;;  %v9551_v39 = vld [vmem:[%s11826_s4 + $0x8] sm:$0xff]   ;;  %v9552_v45 = vld [vmem:[%s11826_s4 + $0x18] sm:$0xff]  }
 0x8dc   : > { %v3109_v26 = vadd.f32 %v3106_v46, %v3095_v47  ;;  %v3110_v49 = vmax.f32 %v3108_v27, 0.0  ;;  %v9553_v47 = vld [vmem:[%s11826_s4 + $0x10] sm:$0xff]  }
 0x8de   : > { %v3111_v51 = vmax.f32 %v3109_v26, 0.0  ;;  %3114 = vrot.lane.b32.xlu0 %v3110_v49, %s11824_s5  ;;  %v9554_v26 = vld [vmem:[%s11826_s4 + $0x28] sm:$0xff]  }
 0x8e0   : > { %3116 = vrot.lane.b32.xlu1 %v3111_v51, %s11824_s5  ;;  %v9555_v51 = vld [vmem:[%s11826_s4 + $0x20] sm:$0xff]  }
 0x950   : > { %v3115_v40 = vpop.permute.xlu0 %3114 }
 0x951   : > { %3120 = vst.msk [vmem:[#allocation3] sm:$0xff] %vm2533_vm7, %v3115_v40 }
 0x952   : > { %v3117_v44 = vpop.permute.xlu1 %3116 }
 0x953   : > { %3121 = vst.msk [vmem:[#allocation3 + $0x8] sm:$0xff] %vm2533_vm7, %v3117_v44  ;;  %v9557_v44 = vld [vmem:[%s11826_s4 + $0x38] sm:$0xff]  }
 0x958   : > { %v3122_v52 = vld [vmem:[#allocation3] sm:$0xff] }
 0x959   : > { %v3235_v54 = vmul.f32 %v3122_v52, %v10308_v4  ;;  %v3124_v58 = vmul.f32 %v10297_v63, %v3122_v52  ;;  %v3296_v6 = vmul.f32 %v3122_v52, %v10310_v7  ;;  %v3414_v20 = vmul.f32 %v3122_v52, %v10314_v15 }
 0x95a   : > { %v3123_v53 = vld [vmem:[#allocation3 + $0x8] sm:$0xff]  ;;  %v3475_v25 = vmul.f32 %v3122_v52, %v10317_v18  ;;  %v3593_v29 = vmul.f32 %v3122_v52, %v10323_v21 }
 0x95b   : > { %v3132_v59 = vpack.c.bf16 %v3123_v53, %v3122_v52  ;;  %v3236_v60 = vmul.f32 %v3123_v53, %v10308_v4  ;;  %v3125_v61 = vmul.f32 %v10297_v63, %v3123_v53  ;;  %v3297_v62 = vmul.f32 %v3123_v53, %v10310_v7  ;;  %v9556_v52 = vld [vmem:[%s11826_s4 + $0x30] sm:$0xff]  }
 0x95c   : > { %v3415_v17 = vmul.f32 %v3123_v53, %v10314_v15  ;;  %v3476_v22 = vmul.f32 %v3123_v53, %v10317_v18  ;;  %v3594_v28 = vmul.f32 %v3123_v53, %v10323_v21 }
 0x95d   : > { %3139 = vrot.lane.b32.xlu0 %v3132_v59, %s11825_s12  ;;  %v3240_v0 = vpack.c.bf16 %v3236_v60, %v3235_v54  ;;  %v3128_v8 = vpack.c.bf16 %v3125_v61, %v3124_v58  ;;  %v3301_v14 = vpack.c.bf16 %v3297_v62, %v3296_v6  ;;  %v9558_v54 = vld [vmem:[%s11826_s4 + $0x40] sm:$0xff]   ;;  %s11835_s4 = sld [smem:[#allocation18_spill]] }
 0x95e   : > { %v3419_v24 = vpack.c.bf16 %v3415_v17, %v3414_v20  ;;  %v3480_v23 = vpack.c.bf16 %v3476_v22, %v3475_v25  ;;  %v3598_v30 = vpack.c.bf16 %v3594_v28, %v3593_v29 }
 0x95f   : > { %3247 = vrot.lane.b32.xlu1 %v3240_v0, %s11819_s10  ;;  %9036 = vmatpush3.bf16.msra.mxu0 %v3128_v8 }
 0x960   : > { %9047 = vmatprep.subr.bf16.mxu0 %v9638_v2 }
 0x961   : > { %3308 = vrot.lane.b32.xlu0 %v3301_v14, %s11827_s1 }
 0x962   : > { %9038 = vmatmul.mubr.msk.bf16.vlgmr.msra.gmra.mrb[52].mxu0 %vm1208_vm11, %v9550_v9 }
 0x963   : > { %3365 = vrot.lane.b32.xlu1 %v3132_v59, %s11828_s2  ;;  %9049 = vmatprep.mubr.msk.bf16.mxu0 %vm9657_vm14, %v9638_v2 }
 0x965   : > { %3426 = vrot.lane.b32.xlu0 %v3419_v24, %s11829_s8 }
 0x967   : > { %3487 = vrot.lane.b32.xlu1 %v3480_v23, %s11820_s6 }
 0x969   : > { %3544 = vrot.lane.b32.xlu0 %v3132_v59, %s11830_s7 }
 0x96b   : > { %3605 = vrot.lane.b32.xlu1 %v3598_v30, %s11822_s29 }
 0x96d   : > { %3658 = vperm.xlu0 %9503, %v3654_v34  }
 0x96f   : > { %3663 = vperm.xlu1 %9514, %v3655_v35  }
 0x9cf   : > { %v3140_v38 = vpop.permute.xlu0 %3139 }
 0x9d0   : > { %9030 = vmatpush3.bf16.msra.mxu1 %v3140_v38 }
 0x9d1   : > { %9041 = vmatprep.subr.bf16.mxu1 %v9638_v2  ;;  %v3248_v41 = vpop.permute.xlu1 %3247 }
 0x9d3   : > { %9032 = vmatmul.mubr.msk.bf16.vlgmr.msra.gmra.mrb[60].mxu1 %vm1208_vm11, %v9551_v39  ;;  %v3309_v42 = vpop.permute.xlu0 %3308 }
 0x9d4   : > { %9042 = vmatpush3.bf16.msra.mxu1 %v3248_v41  ;;  %9048 = vmatpush3.bf16.msra.mxu0 %v3309_v42 }
 0x9d5   : > { %9059 = vmatprep.subr.bf16.mxu0 %v9638_v2  ;;  %9043 = vmatprep.mubr.msk.bf16.mxu1 %vm9657_vm14, %v9638_v2  ;;  %v3366_v27 = vpop.permute.xlu1 %3365 }
 0x9d6   : > { %9053 = vmatprep.subr.bf16.mxu1 %v9638_v2 }
 0x9d7   : > { %v3427_v46 = vpop.permute.xlu0 %3426  ;;  %9050 = vmatmul.mubr.msk.bf16.vlgmr.msra.gmra.mrb[56].mxu0 %vm1208_vm11, %v9552_v45 }
 0x9d8   : > { %9060 = vmatpush3.bf16.msra.mxu0 %v3427_v46  ;;  %9061 = vmatprep.mubr.msk.bf16.mxu0 %vm9657_vm14, %v9638_v2 }
 0x9d9   : > { %9071 = vmatprep.subr.bf16.mxu0 %v9638_v2  ;;  %v3488_v40 = vpop.permute.xlu1 %3487 }
 0x9db   : > { %9044 = vmatmul.mubr.msk.bf16.vlgmr.msra.gmra.mrb[64].mxu1 %vm1208_vm11, %v9553_v47  ;;  %v3545_v49 = vpop.permute.xlu0 %3544 }
 0x9dc   : > { %9054 = vmatpush3.bf16.msra.mxu1 %v3366_v27  ;;  %9055 = vmatprep.mubr.msk.bf16.mxu1 %vm9657_vm14, %v9638_v2 }
 0x9dd   : > { %9065 = vmatprep.subr.bf16.mxu1 %v9638_v2  ;;  %v3606_v53 = vpop.permute.xlu1 %3605 }
 0x9df   : > { %9062 = vmatmul.mubr.msk.bf16.vlgmr.msra.gmra.mrb[60].mxu0 %vm1208_vm11, %v9554_v26 }
 0x9e0   : > { %9072 = vmatpush3.bf16.msra.mxu0 %v3545_v49  ;;  %9073 = vmatprep.mubr.msk.bf16.mxu0 %vm9657_vm14, %v9638_v2 }
 0x9e1   : > { %9083 = vmatprep.subr.bf16.mxu0 %v9638_v2 }
 0x9e3   : > { %9056 = vmatmul.mubr.msk.bf16.vlgmr.msra.gmra.mrb[68].mxu1 %vm1208_vm11, %v9555_v51 }
 0x9e4   : > { %9066 = vmatpush3.bf16.msra.mxu1 %v3488_v40  ;;  %9067 = vmatprep.mubr.msk.bf16.mxu1 %vm9657_vm14, %v9638_v2 }
 0x9e5   : > { %9077 = vmatprep.subr.bf16.mxu1 %v9638_v2 }
 0x9e7   : > { %9074 = vmatmul.mubr.msk.bf16.vlgmr.msra.gmra.mrb[64].mxu0 %vm1208_vm11, %v9557_v44 }
 0x9e8   : > { %9091 = vmatprep.mubr.msk.bf16.mxu0 %vm9657_vm14, %v9638_v2 }
 0x9eb   : > { %9068 = vmatmul.mubr.msk.bf16.vlgmr.msra.gmra.mrb[72].mxu1 %vm1208_vm11, %v9556_v52 }
 0x9ec   : > { %9078 = vmatpush3.bf16.msra.mxu1 %v3606_v53  ;;  %9079 = vmatprep.mubr.msk.bf16.mxu1 %vm9657_vm14, %v9638_v2 }
 0x9f3   : > { %9080 = vmatmul.mubr.msk.bf16.vlgmr.msra.gmra.mrb[76].mxu1 %vm1208_vm11, %v9558_v54 }
 0xa35   : > { %v3228_v58 = vpop.f32.mrb[52].mxu0 }
 0xa36   : > { %v9039_v59 = vpop.f32.mrb[53].mxu0 }
 0xa37   : > { %v3231_v60 = vpop.f32.mrb[54].mxu0 }
 0xa38   : > { %v9040_v61 = vpop.f32.mrb[55].mxu0 }
 0xaa6   : > { %v3179_v62 = vpop.f32.mrb[60].mxu1 }
 0xaa7   : > { %v3229_v0 = vadd.f32 %v3228_v58, %v3179_v62  ;;  %v9033_v8 = vpop.f32.mrb[61].mxu1 }
 0xaa8   : > { %v3182_v6 = vpop.f32.mrb[62].mxu1 }
 0xaa9   : > { %v3232_v9 = vadd.f32 %v3231_v60, %v3182_v6  ;;  %v9034_v14 = vpop.f32.mrb[63].mxu1 }
 0xaaa   : > { %v3348_v17 = vpop.f32.mrb[56].mxu0 }
 0xaab   : > { %v9051_v20 = vpop.f32.mrb[57].mxu0 }
 0xaac   : > { %v3351_v22 = vpop.f32.mrb[58].mxu0 }
 0xaad   : > { %v9052_v24 = vpop.f32.mrb[59].mxu0 }
 0xaae   : > { %v3287_v25 = vpop.f32.mrb[64].mxu1 }
 0xaaf   : > { %v3294_v23 = vadd.f32 %v3287_v25, %v3229_v0  ;;  %v9045_v28 = vpop.f32.mrb[65].mxu1 }
 0xab0   : > { %v3290_v29 = vpop.f32.mrb[66].mxu1 }
 0xab1   : > { %v3295_v30 = vadd.f32 %v3290_v29, %v3232_v9  ;;  %v3355_v34 = vadd.f32 %v3348_v17, %v3294_v23  ;;  %v9046_v35 = vpop.f32.mrb[67].mxu1  ;;  %v3664_v29 = vpop.permute.xlu1 %3663 }
 0xab2   : > { %v3466_v38 = vpop.f32.mrb[60].mxu0 }
 0xab3   : > { %v3356_v39 = vadd.f32 %v3351_v22, %v3295_v30  ;;  %v9063_v41 = vpop.f32.mrb[61].mxu0  ;;  %v3659_v22 = vpop.permute.xlu0 %3658 }
 0xab4   : > { %v3469_v42 = vpop.f32.mrb[62].mxu0 }
 0xab5   : > { %v9064_v45 = vpop.f32.mrb[63].mxu0 }
 0xab6   : > { %v3405_v46 = vpop.f32.mrb[68].mxu1 }
 0xab7   : > { %v3412_v47 = vadd.f32 %v3405_v46, %v3355_v34  ;;  %v9057_v27 = vpop.f32.mrb[69].mxu1 }
 0xab8   : > { %v3408_v26 = vpop.f32.mrb[70].mxu1 }
 0xab9   : > { %v3413_v49 = vadd.f32 %v3408_v26, %v3356_v39  ;;  %v3473_v51 = vadd.f32 %v3466_v38, %v3412_v47  ;;  %v9058_v40 = vpop.f32.mrb[71].mxu1  ;;  %v9559_v47 = vld [vmem:[%s11832_s25] sm:$0xff]  }
 0xaba   : > { %v3584_v44 = vpop.f32.mrb[64].mxu0  ;;  %9084 = vmatpush3.bf16.msra.mxu0 %v9559_v47 }
 0xabb   : > { %v3474_v52 = vadd.f32 %v3469_v42, %v3413_v49  ;;  %v9075_v53 = vpop.f32.mrb[65].mxu0  ;;  %v9560_v49 = vld [vmem:[%s11832_s25 + $0x8] sm:$0xff]   ;;  %9085 = vmatprep.subr.bf16.mxu0 %v9638_v2 }
 0xabc   : > { %v3587_v54 = vpop.f32.mrb[66].mxu0  ;;  %v9562_v53 = vld [vmem:[%s11832_s25 + $0x18] sm:$0xff]  }
 0xabd   : > { %v9076_v58 = vpop.f32.mrb[67].mxu0 }
 0xabe   : > { %v3527_v59 = vpop.f32.mrb[72].mxu1  ;;  %9086 = vmatpush3.bf16.msra.mxu0 %v9560_v49 }
 0xabf   : > { %v3534_v60 = vadd.f32 %v3527_v59, %v3473_v51  ;;  %v9069_v61 = vpop.f32.mrb[73].mxu1  ;;  %9087 = vmatprep.subr.bf16.mxu0 %v9638_v2 }
 0xac0   : > { %v3530_v62 = vpop.f32.mrb[74].mxu1 }
 0xac1   : > { %v3535_v0 = vadd.f32 %v3530_v62, %v3474_v52  ;;  %v3591_v8 = vadd.f32 %v3584_v44, %v3534_v60  ;;  %v9070_v6 = vpop.f32.mrb[75].mxu1  ;;  %v9561_v52 = vld [vmem:[%s11832_s25 + $0x10] sm:$0xff]   ;;  %s11846_s25 = smov 94  }
 0xac2   : > { %9088 = vmatpush3.bf16.msra.mxu0 %v9561_v52 }
 0xac3   : > { %v3592_v9 = vadd.f32 %v3587_v54, %v3535_v0  ;;  %9089 = vmatprep.subr.bf16.mxu0 %v9638_v2 }
 0xac6   : > { %v3645_v14 = vpop.f32.mrb[76].mxu1  ;;  %9090 = vmatpush3.bf16.msra.mxu0 %v9562_v53 }
 0xac7   : > { %v3652_v17 = vadd.f32 %v3645_v14, %v3591_v8  ;;  %v9081_v20 = vpop.f32.mrb[77].mxu1  ;;  %v960_v8 = vand.u32 3, %v9836_v3 }
 0xac8   : > { %v3648_v24 = vpop.f32.mrb[78].mxu1 }
 0xac9   : > { %v3666_v25 = vadd.f32 %v3659_v22, %v3652_v17  ;;  %v3653_v23 = vadd.f32 %v3648_v24, %v3592_v9  ;;  %v9082_v28 = vpop.f32.mrb[79].mxu1  ;;  %vm971_vm5 = vcmp.ne.s32.totalorder %v960_v8, 3  ;;  %vm968_vm4 = vcmp.ne.s32.totalorder %v960_v8, 0 }
 0xaca   : > { %v8376_v17 = vsel %vm971_vm5, 1.0, %v9638_v2  ;;  %v10538_v22 = vsel %vm968_vm4, 1.0, %v9638_v2  ;;  %vm11847_vm4 = vcmask 900096  }
 0xacb   : > { %v3668_v30 = vmax.f32 %v3666_v25, 0.0  ;;  %v3667_v34 = vadd.f32 %v3664_v29, %v3653_v23  ;;  %v9563_v25 = vld [vmem:[%s11835_s4 + $0x10] sm:$0xff]   ;;  %vm11848_vm5 = vmmov %vm11847_vm4 }
 0xacc   : > { %9097 = vmatprep.mubr.msk.bf16.mxu1 %vm1208_vm11, %v9563_v25  ;;  %v9565_v25 = vld [vmem:[%s11835_s4] sm:$0xff]   ;;  %vm11849_vm10 = vmmov %vm11847_vm4 }
 0xacd   : > { %v3669_v35 = vmax.f32 %v3667_v34, 0.0  ;;  %3672 = vrot.lane.b32.xlu0 %v3668_v30, %s11824_s5 }
 0xacf   : > { %3674 = vrot.lane.b32.xlu1 %v3669_v35, %s11824_s5 }
 0xb3f   : > { %v3673_v38 = vpop.permute.xlu0 %3672 }
 0xb40   : > { %3678 = vst.msk [vmem:[#allocation3] sm:$0xff] %vm2533_vm7, %v3673_v38  ;;  %5475 = vst.msk [vmem:[#allocation3 + $0x20] sm:$0xff] %vm2533_vm7, %v3673_v38 }
 0xb41   : > { %v3675_v39 = vpop.permute.xlu1 %3674 }
 0xb42   : > { %3679 = vst.msk [vmem:[#allocation3 + $0x8] sm:$0xff] %vm2533_vm7, %v3675_v39  ;;  %5476 = vst.msk [vmem:[#allocation3 + $0x28] sm:$0xff] %vm2533_vm7, %v3675_v39 }
 0xb47   : > { %v3680_v41 = vld [vmem:[#allocation3] sm:$0xff] }
 0xb49   : > { %v3681_v42 = vld [vmem:[#allocation3 + $0x8] sm:$0xff] }
 0xb4a   : > { %v9515_v45 = vpack.i.bf16 %v3681_v42, %v3680_v41 }
 0xb4c   : > { %9516 = vrot.lane.b32.xlu0 %v9515_v45, %s11825_s12 }
 0xbbe   : > { %v9517_v46 = vpop.permute.xlu0 %9516 }
 0xbbf   : > { %v9519_v27 = vunpack.i.h.bf16 %v9517_v46  ;;  %v9518_v26 = vunpack.i.l.bf16 %v9517_v46 }
 0xbc1   : > { %v3691_v51 = vmax.f32 %v3681_v42, %v9519_v27  ;;  %v3690_v40 = vmax.f32 %v3680_v41, %v9518_v26 }
 0xbc3   : > { %v9520_v44 = vpack.i.bf16 %v3691_v51, %v3690_v40 }
 0xbc5   : > { %9521 = vrot.lane.b32.xlu1 %v9520_v44, %s11827_s1 }
 0xc37   : > { %v9522_v54 = vpop.permute.xlu1 %9521 }
 0xc38   : > { %v9524_v58 = vunpack.i.h.bf16 %v9522_v54  ;;  %v9523_v59 = vunpack.i.l.bf16 %v9522_v54 }
 0xc3a   : > { %v3701_v60 = vmax.f32 %v3691_v51, %v9524_v58  ;;  %v3700_v61 = vmax.f32 %v3690_v40, %v9523_v59 }
 0xc3c   : > { %v3702_v62 = vpack.c.bf16 %v3701_v60, %v3700_v61 }
 0xc3e   : > { %3712 = vrot.lane.b32.xlu0 %v3702_v62, %s11828_s2 }
 0xcb0   : > { %v3713_v0 = vpop.permute.xlu0 %3712 }
 0xcb1   : > { %9092 = vmatmul.mubr.msk.bf16.vlgmr.msra.gmra.mrb[68].mxu0 %vm3738_vm12, %v3713_v0 }
 0xd84   : > { %v3776_v6 = vpop.f32.mrb[68].mxu0 }
 0xd85   : > { %3785 = vrot.lane.b32.xlu1 %v3776_v6, %s11777_s28  ;;  %v9093_v9 = vpop.f32.mrb[69].mxu0 }
 0xd86   : > { %v3779_v14 = vpop.f32.mrb[70].mxu0 }
 0xd87   : > { %3787 = vrot.lane.b32.xlu0 %v3779_v14, %s11777_s28  ;;  %v9094_v20 = vpop.f32.mrb[71].mxu0  ;;  %s11784_s28 = smov 124  }
 0xd89   : > { %3944 = vrot.lane.b32.xlu1 %v8376_v17, %s11816_s0  ;;  %s11780_s0 = smov 123  }
 0xd8b   : > { %4029 = vrot.lane.b32.xlu0 %v10538_v22, %s9662_s9 }
 0xd8d   : > { %4190 = vrot.lane.b32.xlu1 %v8376_v17, %s9663_s3  ;;  %s11843_s3 = smov 17  }
 0xd91   : > { %4274 = vrot.lane.b32.xlu1 %v10538_v22, %s11833_s11  ;;  %s11836_s11 = sld [smem:[#allocation19_spill]] }
 0xd95   : > { %4435 = vrot.lane.b32.xlu1 %v8376_v17, %s11834_s22  ;;  %s8791_s22 = sshll.u32 %s11886_s30, 5  ;;  %s11863_s30 = sld [smem:[#allocation21_spill]] }
 0xd97   : > { %v4520_v58 = vld [vmem:[%s11836_s11 + $0x8] sm:$0xff]  ;;  %v4522_v60 = vld [vmem:[%s11836_s11 + $0x18] sm:$0xff]  ;;  %v4519_v62 = vld [vmem:[%s11836_s11] sm:$0xff] }
 0xd98   : > { %v4521_v8 = vld [vmem:[%s11836_s11 + $0x10] sm:$0xff] }
 0xdf7   : > { %v3786_v3 = vpop.permute.xlu1 %3785 }
 0xdf8   : > { %3792 = vst.msk [vmem:[#allocation4] sm:$0xff] %vm3791_vm6, %v3786_v3 }
 0xdf9   : > { %v3788_v24 = vpop.permute.xlu0 %3787 }
 0xdfa   : > { %3793 = vst.msk [vmem:[#allocation4 + $0x8] sm:$0xff] %vm3791_vm6, %v3788_v24  ;;  %v9564_v24 = vld [vmem:[%s11835_s4 + $0x18] sm:$0xff]  }
 0xdfb   : > { %v10550_v23 = vpop.permute.xlu1 %3944 }
 0xdfd   : > { %v10563_v45 = vpop.permute.xlu0 %4029 }
 0xdff   : > { %v10553_v28 = vpop.permute.xlu1 %4190  ;;  %v3794_v29 = vld [vmem:[#allocation4] sm:$0xff] }
 0xe00   : > { %v3947_v42 = vmul.f32 %v10550_v23, %v3794_v29  ;;  %v4032_v40 = vmul.f32 %v10563_v45, %v3794_v29  ;;  %v4193_v54 = vmul.f32 %v10553_v28, %v3794_v29  ;;  %v3796_v17 = vmul.f32 %v10538_v22, %v3794_v29 }
 0xe01   : > { %v3795_v30 = vld [vmem:[#allocation4 + $0x8] sm:$0xff] }
 0xe02   : > { %v3808_v34 = vpack.c.bf16 %v3795_v30, %v3794_v29  ;;  %v3948_v35 = vmul.f32 %v10550_v23, %v3795_v30  ;;  %v4033_v27 = vmul.f32 %v10563_v45, %v3795_v30  ;;  %v4194_v53 = vmul.f32 %v10553_v28, %v3795_v30 }
 0xe03   : > { %v10556_v38 = vpop.permute.xlu1 %4274  ;;  %v3797_v14 = vmul.f32 %v10538_v22, %v3795_v30 }
 0xe04   : > { %4128 = vrot.lane.b32.xlu1 %v3808_v34, %s11780_s0  ;;  %3820 = vrot.lane.b32.xlu0 %v3808_v34, %s11825_s12  ;;  %v4277_v39 = vmul.f32 %v10556_v38, %v3794_v29  ;;  %v4278_v41 = vmul.f32 %v10556_v38, %v3795_v30  ;;  %v3954_v47 = vpack.c.bf16 %v3948_v35, %v3947_v42  ;;  %s11840_s0 = smov 124  }
 0xe05   : > { %v4039_v52 = vpack.c.bf16 %v4033_v27, %v4032_v40  ;;  %v4200_v59 = vpack.c.bf16 %v4194_v53, %v4193_v54  ;;  %v3802_v3 = vpack.c.bf16 %v3797_v14, %v3796_v17  ;;  %v9576_v54 = vld [vmem:[%s11835_s4 + $0x68] sm:$0xff]  }
 0xe06   : > { %v4284_v46 = vpack.c.bf16 %v4278_v41, %v4277_v39  ;;  %v9568_v39 = vld [vmem:[%s11835_s4 + $0x28] sm:$0xff]   ;;  %v9569_v41 = vld [vmem:[%s11835_s4 + $0x30] sm:$0xff]  }
 0xe07   : > { %v10566_v26 = vpop.permute.xlu1 %4435 }
 0xe08   : > { %4296 = vrot.lane.b32.xlu1 %v4284_v46, %s11827_s1  ;;  %3966 = vrot.lane.b32.xlu0 %v3954_v47, %s11819_s10  ;;  %v4438_v49 = vmul.f32 %v10566_v26, %v3794_v29  ;;  %v4439_v51 = vmul.f32 %v10566_v26, %v3795_v30  ;;  %v9566_v29 = vld [vmem:[%s11835_s4 + $0x8] sm:$0xff]   ;;  %v9567_v30 = vld [vmem:[%s11835_s4 + $0x20] sm:$0xff]  }
 0xe09   : > { %v9570_v46 = vld [vmem:[%s11835_s4 + $0x38] sm:$0xff]   ;;  %v9571_v47 = vld [vmem:[%s11835_s4 + $0x40] sm:$0xff]  }
 0xe0a   : > { %v4445_v44 = vpack.c.bf16 %v4439_v51, %v4438_v49  ;;  %v9572_v49 = vld [vmem:[%s11835_s4 + $0x48] sm:$0xff]   ;;  %v9573_v51 = vld [vmem:[%s11835_s4 + $0x50] sm:$0xff]  }
 0xe0c   : > { %4457 = vrot.lane.b32.xlu1 %v4445_v44, %s11829_s8  ;;  %4051 = vrot.lane.b32.xlu0 %v4039_v52, %s11784_s28  ;;  %s861_s28 = scalar_lea.vmem %s11837_s20, %s8791_s22  ;;  %v9574_v44 = vld [vmem:[%s11835_s4 + $0x58] sm:$0xff]   ;;  %v9575_v52 = vld [vmem:[%s11835_s4 + $0x60] sm:$0xff]   ;;  %s11842_s22 = smov 122  }
 0xe0d   : > { %v4552_v61 = vld [vmem:[%s861_s28 + $0x8] sm:$0xff]  ;;  %v4554_v0 = vld [vmem:[%s861_s28 + $0x18] sm:$0xff]  ;;  %v4551_v6 = vld [vmem:[%s861_s28] sm:$0xff]  ;;  %s11844_s20 = smov 96  }
 0xe0e   : > { %v4553_v9 = vld [vmem:[%s861_s28 + $0x10] sm:$0xff]  ;;  %s11841_s28 = smov 123  }
 0xe10   : > { %4530 = vperm.xlu1 %9514, %v4520_v58   ;;  %4212 = vrot.lane.b32.xlu0 %v4200_v59, %s11786_s24  ;;  %v9577_v58 = vld [vmem:[%s11835_s4 + $0x70] sm:$0xff]  }
 0xe14   : > { %4540 = vperm.xlu1 %9514, %v4522_v60   ;;  %4373 = vrot.lane.b32.xlu0 %v3808_v34, %s11828_s2  ;;  %v9578_v60 = vld [vmem:[%s11835_s4 + $0x78] sm:$0xff]  }
 0xe18   : > { %4562 = vperm.xlu1 %9514, %v4552_v61   ;;  %4525 = vperm.xlu0 %9503, %v4519_v62   ;;  %v9579_v61 = vld [vmem:[%s11835_s4 + $0x80] sm:$0xff]   ;;  %v9580_v62 = vld [vmem:[%s11835_s4 + $0x88] sm:$0xff]  }
 0xe1c   : > { %4572 = vperm.xlu1 %9514, %v4554_v0   ;;  %4535 = vperm.xlu0 %9503, %v4521_v8  }
 0xe20   : > { %4557 = vperm.xlu0 %9503, %v4551_v6  }
 0xe24   : > { %4567 = vperm.xlu0 %9503, %v4553_v9  }
 0xe76   : > { %v3821_v20 = vpop.permute.xlu0 %3820  ;;  %v4129_v42 = vpop.permute.xlu1 %4128 }
 0xe77   : > { %9095 = vmatprep.subr.bf16.mxu1 %v3821_v20 }
 0xe78   : > { %9096 = vmatpush3.bf16.msra.mxu1 %v3821_v20 }
 0xe79   : > { %9101 = vmatprep.subr.bf16.mxu1 %v3802_v3 }
 0xe7a   : > { %v3967_v34 = vpop.permute.xlu0 %3966  ;;  %v4297_v40 = vpop.permute.xlu1 %4296 }
 0xe7b   : > { %9098 = vmatmul.mubr.msk.bf16.vlgmr.msra.gmra.mrb[80].mxu1 %vm1208_vm11, %v9564_v24 }
 0xe7c   : > { %9102 = vmatpush3.bf16.msra.mxu1 %v3802_v3  ;;  %9103 = vmatprep.mubr.msk.bf16.mxu1 %vm1208_vm11, %v9565_v25 }
 0xe7d   : > { %9107 = vmatprep.subr.bf16.mxu1 %v3967_v34 }
 0xe7e   : > { %v4052_v35 = vpop.permute.xlu0 %4051  ;;  %v4458_v59 = vpop.permute.xlu1 %4457 }
 0xe82   : > { %v4213_v27 = vpop.permute.xlu0 %4212 }
 0xe86   : > { %v4374_v53 = vpop.permute.xlu0 %4373 }
 0xe87   : > { %9104 = vmatmul.mubr.msk.bf16.vlgmr.msra.gmra.mrb[80].mxu1 %vm1208_vm11, %v9566_v29 }
 0xe88   : > { %9108 = vmatpush3.bf16.msra.mxu1 %v3967_v34  ;;  %9109 = vmatprep.mubr.msk.bf16.mxu1 %vm1208_vm11, %v9567_v30 }
 0xe89   : > { %9113 = vmatprep.subr.bf16.mxu1 %v4052_v35 }
 0xe8f   : > { %v4531_v8 = vpop.permute.xlu1 %4530 }
 0xe93   : > { %9110 = vmatmul.mubr.msk.bf16.vlgmr.msra.gmra.mrb[80].mxu1 %vm1208_vm11, %v9568_v39  ;;  %v4541_v9 = vpop.permute.xlu1 %4540 }
 0xe94   : > { %9114 = vmatpush3.bf16.msra.mxu1 %v4052_v35  ;;  %9115 = vmatprep.mubr.msk.bf16.mxu1 %vm1208_vm11, %v9569_v41 }
 0xe95   : > { %9119 = vmatprep.subr.bf16.mxu1 %v4129_v42 }
 0xe97   : > { %v4526_v0 = vpop.permute.xlu0 %4525  ;;  %v4563_v39 = vpop.permute.xlu1 %4562 }
 0xe9b   : > { %v4536_v6 = vpop.permute.xlu0 %4535 }
 0xe9f   : > { %9116 = vmatmul.mubr.msk.bf16.vlgmr.msra.gmra.mrb[80].mxu1 %vm1208_vm11, %v9570_v46  ;;  %v4558_v25 = vpop.permute.xlu0 %4557 }
 0xea0   : > { %9120 = vmatpush3.bf16.msra.mxu1 %v4129_v42  ;;  %9121 = vmatprep.mubr.msk.bf16.mxu1 %vm1208_vm11, %v9571_v47 }
 0xea1   : > { %9125 = vmatprep.subr.bf16.mxu1 %v4213_v27 }
 0xeab   : > { %9122 = vmatmul.mubr.msk.bf16.vlgmr.msra.gmra.mrb[80].mxu1 %vm1208_vm11, %v9572_v49  ;;  %v4568_v49 = vpop.permute.xlu0 %4567 }
 0xeac   : > { %9126 = vmatpush3.bf16.msra.mxu1 %v4213_v27  ;;  %9127 = vmatprep.mubr.msk.bf16.mxu1 %vm1208_vm11, %v9573_v51 }
 0xead   : > { %9131 = vmatprep.subr.bf16.mxu1 %v4297_v40 }
 0xeb7   : > { %9128 = vmatmul.mubr.msk.bf16.vlgmr.msra.gmra.mrb[80].mxu1 %vm1208_vm11, %v9574_v44 }
 0xeb8   : > { %9132 = vmatpush3.bf16.msra.mxu1 %v4297_v40  ;;  %9133 = vmatprep.mubr.msk.bf16.mxu1 %vm1208_vm11, %v9575_v52  ;;  %v4573_v40 = vpop.permute.xlu1 %4572 }
 0xeb9   : > { %9137 = vmatprep.subr.bf16.mxu1 %v4374_v53 }
 0xec3   : > { %9134 = vmatmul.mubr.msk.bf16.vlgmr.msra.gmra.mrb[80].mxu1 %vm1208_vm11, %v9576_v54 }
 0xec4   : > { %9138 = vmatpush3.bf16.msra.mxu1 %v4374_v53  ;;  %9139 = vmatprep.mubr.msk.bf16.mxu1 %vm1208_vm11, %v9577_v58 }
 0xec5   : > { %9143 = vmatprep.subr.bf16.mxu1 %v4458_v59 }
 0xecf   : > { %9140 = vmatmul.mubr.msk.bf16.vlgmr.msra.gmra.mrb[80].mxu1 %vm1208_vm11, %v9578_v60 }
 0xed0   : > { %9144 = vmatpush3.bf16.msra.mxu1 %v4458_v59  ;;  %9145 = vmatprep.mubr.msk.bf16.mxu1 %vm1208_vm11, %v9579_v61  ;;  %v9581_v59 = vld [vmem:[%s11839_s23 + $0x10] sm:$0xff]  }
 0xed1   : > { %9153 = vmatprep.mubr.msk.bf16.mxu0 %vm1433_vm13, %v9581_v59 }
 0xedb   : > { %9146 = vmatmul.mubr.msk.bf16.vlgmr.msra.gmra.mrb[80].mxu1 %vm1208_vm11, %v9580_v62 }
 0xfae   : > { %v9147_v14 = vpop.f32.mrb[80].mxu1 }
 0xfaf   : > { %v4500_v17 = vpop.f32.mrb[81].mxu1  ;;  %v4545_v20 = vadd.f32 %v9147_v14, %v4536_v6 }
 0xfb0   : > { %v4543_v3 = vadd.f32 %v4526_v0, %v4500_v17  ;;  %v9148_v24 = vpop.f32.mrb[82].mxu1 }
 0xfb1   : > { %v4503_v34 = vpop.f32.mrb[83].mxu1  ;;  %v4546_v30 = vadd.f32 %v9148_v24, %v4541_v9  ;;  %v4549_v41 = vmax.f32 %v4545_v20, 0.0 }
 0xfb2   : > { %v4547_v29 = vmax.f32 %v4543_v3, 0.0  ;;  %v4544_v35 = vadd.f32 %v4531_v8, %v4503_v34 }
 0xfb3   : > { %v4550_v47 = vmax.f32 %v4546_v30, 0.0  ;;  %v4577_v51 = vadd.f32 %v4568_v49, %v4549_v41 }
 0xfb4   : > { %v4575_v42 = vadd.f32 %v4558_v25, %v4547_v29  ;;  %v4548_v46 = vmax.f32 %v4544_v35, 0.0 }
 0xfb5   : > { %v4578_v44 = vadd.f32 %v4573_v40, %v4550_v47 }
 0xfb6   : > { %v4576_v27 = vadd.f32 %v4563_v39, %v4548_v46  ;;  %4583 = vrot.lane.b32.xlu0 %v4575_v42, %s11838_s21 }
 0xfb8   : > { %4585 = vrot.lane.b32.xlu1 %v4576_v27, %s11838_s21 }
 0xfba   : > { %4587 = vrot.lane.b32.xlu0 %v4577_v51, %s11838_s21 }
 0xfbc   : > { %4589 = vrot.lane.b32.xlu1 %v4578_v44, %s11838_s21  ;;  %s11845_s21 = smov 95  }
0x1028   : > { %v4584_v52 = vpop.permute.xlu0 %4583 }
0x1029   : > { %4595 = vst.msk [vmem:[#allocation4] sm:$0xff] %vm3791_vm6, %v4584_v52 }
0x102a   : > { %v4586_v53 = vpop.permute.xlu1 %4585 }
0x102b   : > { %4596 = vst.msk [vmem:[#allocation4 + $0x8] sm:$0xff] %vm3791_vm6, %v4586_v53 }
0x102c   : > { %v4588_v54 = vpop.permute.xlu0 %4587 }
0x102d   : > { %4597 = vst.msk [vmem:[#allocation4 + $0x10] sm:$0xff] %vm3791_vm6, %v4588_v54 }
0x102e   : > { %v4590_v58 = vpop.permute.xlu1 %4589 }
0x102f   : > { %4598 = vst.msk [vmem:[#allocation4 + $0x18] sm:$0xff] %vm3791_vm6, %v4590_v58 }
0x1030   : > { %v4599_v60 = vld [vmem:[#allocation4] sm:$0xff] }
0x1031   : > { %v4758_v8 = vmul.f32 %v4599_v60, %v10550_v23  ;;  %v4846_v25 = vmul.f32 %v4599_v60, %v10563_v45  ;;  %v4603_v34 = vmul.f32 %v10538_v22, %v4599_v60 }
0x1032   : > { %v4600_v61 = vld [vmem:[#allocation4 + $0x8] sm:$0xff] }
0x1033   : > { %v4618_v62 = vpack.c.bf16 %v4600_v61, %v4599_v60  ;;  %v4759_v0 = vmul.f32 %v4600_v61, %v10550_v23  ;;  %v4847_v14 = vmul.f32 %v4600_v61, %v10563_v45  ;;  %v4604_v17 = vmul.f32 %v10538_v22, %v4600_v61 }
0x1034   : > { %v4601_v6 = vld [vmem:[#allocation4 + $0x10] sm:$0xff]  ;;  %v5015_v51 = vmul.f32 %v4600_v61, %v10553_v28  ;;  %v5103_v44 = vmul.f32 %v4600_v61, %v10556_v38 }
0x1035   : > { %4632 = vrot.lane.b32.xlu0 %v4618_v62, %s11825_s12  ;;  %v4767_v20 = vpack.c.bf16 %v4759_v0, %v4758_v8  ;;  %v4760_v29 = vmul.f32 %v4601_v6, %v10550_v23  ;;  %v4855_v30 = vpack.c.bf16 %v4847_v14, %v4846_v25  ;;  %v4611_v35 = vpack.c.bf16 %v4604_v17, %v4603_v34  ;;  %v9584_v34 = vld [vmem:[%s11839_s23 + $0x8] sm:$0xff]  }
0x1036   : > { %v4602_v9 = vld [vmem:[#allocation4 + $0x18] sm:$0xff]  ;;  %v4605_v42 = vmul.f32 %v10538_v22, %v4601_v6  ;;  %v4848_v47 = vmul.f32 %v4601_v6, %v10563_v45  ;;  %v5016_v52 = vmul.f32 %v4601_v6, %v10553_v28  ;;  %v5104_v59 = vmul.f32 %v4601_v6, %v10556_v38 }
0x1037   : > { %v4619_v3 = vpack.c.bf16 %v4602_v9, %v4601_v6  ;;  %v4761_v24 = vmul.f32 %v4602_v9, %v10550_v23  ;;  %v4849_v41 = vmul.f32 %v4602_v9, %v10563_v45  ;;  %v4606_v46 = vmul.f32 %v10538_v22, %v4602_v9 }
0x1038   : > { %v5014_v23 = vmul.f32 %v4599_v60, %v10553_v28  ;;  %v5017_v22 = vmul.f32 %v4602_v9, %v10553_v28  ;;  %v5102_v45 = vmul.f32 %v4599_v60, %v10556_v38  ;;  %v5105_v58 = vmul.f32 %v4602_v9, %v10556_v38  ;;  %v5358_v38 = vld [vmem:[%s11710_s13] sm:$0xff] }
0x1039   : > { %4781 = vrot.lane.b32.xlu0 %v4767_v20, %s11819_s10  ;;  %4634 = vrot.lane.b32.xlu1 %v4619_v3, %s11825_s12  ;;  %v4768_v39 = vpack.c.bf16 %v4761_v24, %v4760_v29  ;;  %v4612_v27 = vpack.c.bf16 %v4606_v46, %v4605_v42  ;;  %v4856_v49 = vpack.c.bf16 %v4849_v41, %v4848_v47  ;;  %v9583_v24 = vld [vmem:[%s11839_s23] sm:$0xff]   ;;  %v9587_v41 = vld [vmem:[%s11839_s23 + $0x30] sm:$0xff]  }
0x103a   : > { %v5023_v40 = vpack.c.bf16 %v5015_v51, %v5014_v23  ;;  %v5111_v53 = vpack.c.bf16 %v5103_v44, %v5102_v45  ;;  %v5024_v54 = vpack.c.bf16 %v5017_v22, %v5016_v52  ;;  %v5112_v0 = vpack.c.bf16 %v5105_v58, %v5104_v59  ;;  %v9585_v29 = vld [vmem:[%s11839_s23 + $0x20] sm:$0xff]   ;;  %v9588_v47 = vld [vmem:[%s11839_s23 + $0x38] sm:$0xff]   ;;  %v9590_v23 = vld [vmem:[%s11839_s23 + $0x48] sm:$0xff]  }
0x103b   : > { %v5271_v8 = vmul.f32 %v4600_v61, %v10566_v26  ;;  %v5270_v14 = vmul.f32 %v4599_v60, %v10566_v26  ;;  %v5273_v17 = vmul.f32 %v4602_v9, %v10566_v26  ;;  %v5272_v20 = vmul.f32 %v4601_v6, %v10566_v26  ;;  %v5360_v60 = vld [vmem:[%s11710_s13 + $0x10] sm:$0xff]  ;;  %v5361_v26 = vld [vmem:[%s11710_s13 + $0x18] sm:$0xff]  ;;  %v9593_v52 = vld [vmem:[%s11839_s23 + $0x60] sm:$0xff]  }
0x103c   : > { %v9592_v45 = vld [vmem:[%s11839_s23 + $0x58] sm:$0xff]   ;;  %v9594_v58 = vld [vmem:[%s11839_s23 + $0x68] sm:$0xff]   ;;  %v9595_v59 = vld [vmem:[%s11839_s23 + $0x70] sm:$0xff]  }
0x103d   : > { %4869 = vrot.lane.b32.xlu0 %v4855_v30, %s11840_s0  ;;  %4783 = vrot.lane.b32.xlu1 %v4768_v39, %s11819_s10  ;;  %v5279_v28 = vpack.c.bf16 %v5271_v8, %v5270_v14  ;;  %v5280_v61 = vpack.c.bf16 %v5273_v17, %v5272_v20  ;;  %v9586_v39 = vld [vmem:[%s11839_s23 + $0x28] sm:$0xff]   ;;  %v9596_v14 = vld [vmem:[%s11839_s23 + $0x78] sm:$0xff]  }
0x103e   : > { %v9598_v20 = vld [vmem:[%s11839_s23 + $0x88] sm:$0xff]  }
0x1041   : > { %4949 = vrot.lane.b32.xlu0 %v4618_v62, %s11841_s28  ;;  %4871 = vrot.lane.b32.xlu1 %v4856_v49, %s11840_s0 }
0x1045   : > { %5037 = vrot.lane.b32.xlu0 %v5023_v40, %s11842_s22  ;;  %4951 = vrot.lane.b32.xlu1 %v4619_v3, %s11841_s28  ;;  %v9591_v40 = vld [vmem:[%s11839_s23 + $0x50] sm:$0xff]  }
0x1049   : > { %5125 = vrot.lane.b32.xlu0 %v5111_v53, %s11827_s1  ;;  %5039 = vrot.lane.b32.xlu1 %v5024_v54, %s11842_s22 }
0x104d   : > { %5205 = vrot.lane.b32.xlu0 %v4618_v62, %s11828_s2  ;;  %5127 = vrot.lane.b32.xlu1 %v5112_v0, %s11827_s1  ;;  %v5359_v62 = vld [vmem:[%s11710_s13 + $0x8] sm:$0xff] }
0x1051   : > { %5293 = vrot.lane.b32.xlu0 %v5279_v28, %s11829_s8  ;;  %5207 = vrot.lane.b32.xlu1 %v4619_v3, %s11828_s2  ;;  %v9582_v3 = vld [vmem:[%s11839_s23 + $0x18] sm:$0xff]   ;;  %v9597_v28 = vld [vmem:[%s11839_s23 + $0x80] sm:$0xff]  }
0x1055   : > { %5364 = vperm.xlu0 %9503, %v5358_v38   ;;  %5295 = vrot.lane.b32.xlu1 %v5280_v61, %s11829_s8  ;;  %v9599_v38 = vld [vmem:[%s11723_s26] sm:$0xff]  }
0x1056   : > { %9221 = vmatprep.subr.bf16.mxu1 %v9599_v38 }
0x1057   : > { %9222 = vmatpush3.bf16.msra.mxu1 %v9599_v38 }
0x1058   : > { %9227 = vmatprep.subr.bf16.mxu1 %v9638_v2 }
0x1059   : > { %5374 = vperm.xlu0 %9503, %v5360_v60   ;;  %5369 = vperm.xlu1 %9514, %v5359_v62  }
0x105d   : > { %5379 = vperm.xlu1 %9514, %v5361_v26  }
0x10a7   : > { %v4633_v6 = vpop.permute.xlu0 %4632 }
0x10a8   : > { %9149 = vmatprep.subr.bf16.mxu0 %v4633_v6 }
0x10a9   : > { %9150 = vmatpush3.bf16.msra.mxu0 %v4633_v6 }
0x10ab   : > { %v4635_v9 = vpop.permute.xlu1 %4634  ;;  %v4782_v25 = vpop.permute.xlu0 %4781 }
0x10ac   : > { %9151 = vmatprep.subr.bf16.mxu0 %v4635_v9 }
0x10ad   : > { %9152 = vmatpush3.bf16.msra.mxu0 %v4635_v9 }
0x10ae   : > { %9157 = vmatprep.subr.bf16.mxu0 %v4611_v35 }
0x10af   : > { %v4784_v30 = vpop.permute.xlu1 %4783 }
0x10b0   : > { %9154 = vmatmul.mubr.msk.bf16.vlgmr.msra.gmra.mrb[72].mxu0 %vm1433_vm13, %v9582_v3 }
0x10b1   : > { %9158 = vmatpush3.bf16.msra.mxu0 %v4611_v35  ;;  %9161 = vmatprep.mubr.msk.bf16.mxu0 %vm1433_vm13, %v9583_v24  ;;  %v4870_v35 = vpop.permute.xlu0 %4869 }
0x10b2   : > { %9159 = vmatprep.subr.bf16.mxu0 %v4612_v27 }
0x10b3   : > { %v4872_v42 = vpop.permute.xlu1 %4871 }
0x10b5   : > { %9160 = vmatpush3.bf16.msra.mxu0 %v4612_v27  ;;  %v4950_v46 = vpop.permute.xlu0 %4949  ;;  %v9589_v27 = vld [vmem:[%s11839_s23 + $0x40] sm:$0xff]  }
0x10b6   : > { %9165 = vmatprep.subr.bf16.mxu0 %v4782_v25 }
0x10b7   : > { %v4952_v49 = vpop.permute.xlu1 %4951 }
0x10b9   : > { %v5038_v51 = vpop.permute.xlu0 %5037 }
0x10bb   : > { %v5040_v44 = vpop.permute.xlu1 %5039 }
0x10bc   : > { %9162 = vmatmul.mubr.msk.bf16.vlgmr.msra.gmra.mrb[72].mxu0 %vm1433_vm13, %v9584_v34 }
0x10bd   : > { %9166 = vmatpush3.bf16.msra.mxu0 %v4782_v25  ;;  %9169 = vmatprep.mubr.msk.bf16.mxu0 %vm1433_vm13, %v9585_v29  ;;  %v5126_v22 = vpop.permute.xlu0 %5125 }
0x10be   : > { %9167 = vmatprep.subr.bf16.mxu0 %v4784_v30 }
0x10bf   : > { %v5128_v53 = vpop.permute.xlu1 %5127 }
0x10c1   : > { %9168 = vmatpush3.bf16.msra.mxu0 %v4784_v30  ;;  %v5206_v54 = vpop.permute.xlu0 %5205 }
0x10c2   : > { %9173 = vmatprep.subr.bf16.mxu0 %v4870_v35 }
0x10c3   : > { %v5208_v0 = vpop.permute.xlu1 %5207 }
0x10c5   : > { %v5294_v8 = vpop.permute.xlu0 %5293 }
0x10c7   : > { %v5296_v17 = vpop.permute.xlu1 %5295 }
0x10c8   : > { %9170 = vmatmul.mubr.msk.bf16.vlgmr.msra.gmra.mrb[72].mxu0 %vm1433_vm13, %v9586_v39 }
0x10c9   : > { %9174 = vmatpush3.bf16.msra.mxu0 %v4870_v35  ;;  %9177 = vmatprep.mubr.msk.bf16.mxu0 %vm1433_vm13, %v9587_v41 }
0x10ca   : > { %9175 = vmatprep.subr.bf16.mxu0 %v4872_v42 }
0x10cd   : > { %9176 = vmatpush3.bf16.msra.mxu0 %v4872_v42 }
0x10ce   : > { %9181 = vmatprep.subr.bf16.mxu0 %v4950_v46 }
0x10d4   : > { %9178 = vmatmul.mubr.msk.bf16.vlgmr.msra.gmra.mrb[72].mxu0 %vm1433_vm13, %v9588_v47  ;;  %v5365_v61 = vpop.permute.xlu0 %5364 }
0x10d5   : > { %9182 = vmatpush3.bf16.msra.mxu0 %v4950_v46  ;;  %9185 = vmatprep.mubr.msk.bf16.mxu0 %vm1433_vm13, %v9589_v27 }
0x10d6   : > { %9183 = vmatprep.subr.bf16.mxu0 %v4952_v49 }
0x10d8   : > { %v5370_v60 = vpop.permute.xlu1 %5369  ;;  %v5375_v62 = vpop.permute.xlu0 %5374 }
0x10d9   : > { %9184 = vmatpush3.bf16.msra.mxu0 %v4952_v49 }
0x10da   : > { %9189 = vmatprep.subr.bf16.mxu0 %v5038_v51 }
0x10dc   : > { %v5380_v3 = vpop.permute.xlu1 %5379 }
0x10e0   : > { %9186 = vmatmul.mubr.msk.bf16.vlgmr.msra.gmra.mrb[72].mxu0 %vm1433_vm13, %v9590_v23 }
0x10e1   : > { %9190 = vmatpush3.bf16.msra.mxu0 %v5038_v51  ;;  %9193 = vmatprep.mubr.msk.bf16.mxu0 %vm1433_vm13, %v9591_v40 }
0x10e2   : > { %9191 = vmatprep.subr.bf16.mxu0 %v5040_v44 }
0x10e5   : > { %9192 = vmatpush3.bf16.msra.mxu0 %v5040_v44 }
0x10e6   : > { %9197 = vmatprep.subr.bf16.mxu0 %v5126_v22 }
0x10ec   : > { %9194 = vmatmul.mubr.msk.bf16.vlgmr.msra.gmra.mrb[72].mxu0 %vm1433_vm13, %v9592_v45 }
0x10ed   : > { %9198 = vmatpush3.bf16.msra.mxu0 %v5126_v22  ;;  %9201 = vmatprep.mubr.msk.bf16.mxu0 %vm1433_vm13, %v9593_v52 }
0x10ee   : > { %9199 = vmatprep.subr.bf16.mxu0 %v5128_v53 }
0x10f1   : > { %9200 = vmatpush3.bf16.msra.mxu0 %v5128_v53 }
0x10f2   : > { %9205 = vmatprep.subr.bf16.mxu0 %v5206_v54 }
0x10f8   : > { %9202 = vmatmul.mubr.msk.bf16.vlgmr.msra.gmra.mrb[72].mxu0 %vm1433_vm13, %v9594_v58 }
0x10f9   : > { %9206 = vmatpush3.bf16.msra.mxu0 %v5206_v54  ;;  %9209 = vmatprep.mubr.msk.bf16.mxu0 %vm1433_vm13, %v9595_v59 }
0x10fa   : > { %9207 = vmatprep.subr.bf16.mxu0 %v5208_v0 }
0x10fd   : > { %9208 = vmatpush3.bf16.msra.mxu0 %v5208_v0  ;;  %v10828_v0 = vld [vmem:[#allocation3 + $0x28] sm:$0xff] }
0x10fe   : > { %9213 = vmatprep.subr.bf16.mxu0 %v5294_v8 }
0x1104   : > { %9210 = vmatmul.mubr.msk.bf16.vlgmr.msra.gmra.mrb[72].mxu0 %vm1433_vm13, %v9596_v14 }
0x1105   : > { %9214 = vmatpush3.bf16.msra.mxu0 %v5294_v8  ;;  %9217 = vmatprep.mubr.msk.bf16.mxu0 %vm1433_vm13, %v9597_v28  ;;  %v10834_v28 = vld [vmem:[#allocation3 + $0x20] sm:$0xff] }
0x1106   : > { %9215 = vmatprep.subr.bf16.mxu0 %v5296_v17 }
0x1109   : > { %9216 = vmatpush3.bf16.msra.mxu0 %v5296_v17  ;;  %v10838_v17 = vpack.c.bf16 %v10828_v0, %v10834_v28 }
0x110a   : > { %9237 = vmatprep.subr.bf16.mxu0 %v9638_v2 }
0x1110   : > { %9218 = vmatmul.mubr.msk.bf16.vlgmr.msra.gmra.mrb[72].mxu0 %vm1433_vm13, %v9598_v20  ;;  %vm5517_vm13 = vcmask 392192  }
0x1111   : > { %9243 = vmatprep.mubr.msk.bf16.mxu0 %vm9657_vm14, %v9638_v2 }
0x11e3   : > { %v9219_v26 = vpop.f32.mrb[72].mxu0 }
0x11e4   : > { %v5384_v6 = vadd.f32 %v9219_v26, %v5375_v62  ;;  %v5339_v9 = vpop.f32.mrb[73].mxu0 }
0x11e5   : > { %v5382_v24 = vadd.f32 %v5365_v61, %v5339_v9  ;;  %v9220_v25 = vpop.f32.mrb[74].mxu0 }
0x11e6   : > { %v5385_v34 = vadd.f32 %v9220_v25, %v5380_v3  ;;  %v5342_v29 = vpop.f32.mrb[75].mxu0  ;;  %v5388_v35 = vmax.f32 %v5384_v6, 0.0  ;;  %v5488_v6 = vmul.f32 %v10297_v63, %v10828_v0  ;;  %v5487_v25 = vmul.f32 %v10297_v63, %v10834_v28 }
0x11e7   : > { %v5383_v30 = vadd.f32 %v5370_v60, %v5342_v29  ;;  %v5386_v41 = vmax.f32 %v5382_v24, 0.0 }
0x11e8   : > { %v5389_v39 = vmax.f32 %v5385_v34, 0.0 }
0x11e9   : > { %v5387_v42 = vmax.f32 %v5383_v30, 0.0 }
0x11ea   : > { %v5391_v46 = vpack.c.bf16 %v5389_v39, %v5388_v35  ;;  %v5616_v35 = vmul.f32 %v10828_v0, %v10308_v4  ;;  %v5493_v39 = vpack.c.bf16 %v5488_v6, %v5487_v25 }
0x11eb   : > { %v5390_v47 = vpack.c.bf16 %v5387_v42, %v5386_v41  ;;  %v5615_v42 = vmul.f32 %v10834_v28, %v10308_v4 }
0x11ed   : > { %9223 = vmatprep.mubr.msk.bf16.mxu1 %vm1208_vm11, %v5390_v47 }
0x11ee   : > { %9224 = vmatmul.mubr.msk.bf16.vlgmr.msra.gmra.mrb[84].mxu1 %vm1208_vm11, %v5391_v46  ;;  %v9601_v46 = vld [vmem:[%s11711_s14] sm:$0xff]  }
0x11ef   : > { %9233 = vmatprep.mubr.msk.bf16.mxu1 %vm9657_vm14, %v9638_v2 }
0x12c1   : > { %v9225_v27 = vpop.f32.mrb[84].mxu1 }
0x12c2   : > { %v5440_v49 = vpop.f32.mrb[85].mxu1 }
0x12c3   : > { %5459 = vrot.lane.b32.xlu0 %v5440_v49, %s11824_s5  ;;  %v9226_v51 = vpop.f32.mrb[86].mxu1 }
0x12c4   : > { %v5443_v23 = vpop.f32.mrb[87].mxu1 }
0x12c5   : > { %5461 = vrot.lane.b32.xlu1 %v5443_v23, %s11824_s5 }
0x12c7   : > { %5463 = vrot.lane.b32.xlu0 %v9225_v27, %s11824_s5  ;;  %v5622_v27 = vpack.c.bf16 %v5616_v35, %v5615_v42  ;;  %v5903_v35 = vmul.f32 %v10834_v28, %v10317_v18 }
0x12c9   : > { %5465 = vrot.lane.b32.xlu1 %v9226_v51, %s11824_s5 }
0x1335   : > { %v5460_v40 = vpop.permute.xlu0 %5459 }
0x1336   : > { %5471 = vst.msk [vmem:[#allocation3] sm:$0xff] %vm2533_vm7, %v5460_v40  ;;  %v5691_v40 = vmul.f32 %v10828_v0, %v10310_v7 }
0x1337   : > { %v5462_v44 = vpop.permute.xlu1 %5461 }
0x1338   : > { %5472 = vst.msk [vmem:[#allocation3 + $0x8] sm:$0xff] %vm2533_vm7, %v5462_v44  ;;  %v5690_v44 = vmul.f32 %v10834_v28, %v10310_v7 }
0x1339   : > { %v5464_v22 = vpop.permute.xlu0 %5463 }
0x133a   : > { %5473 = vst.msk [vmem:[#allocation3 + $0x10] sm:$0xff] %vm2533_vm7, %v5464_v22  ;;  %v5697_v22 = vpack.c.bf16 %v5691_v40, %v5690_v44 }
0x133b   : > { %v5466_v45 = vpop.permute.xlu1 %5465 }
0x133c   : > { %5474 = vst.msk [vmem:[#allocation3 + $0x18] sm:$0xff] %vm2533_vm7, %v5466_v45 }
0x133d   : > { %v10816_v52 = vld [vmem:[#allocation3] sm:$0xff] }
0x133e   : > { %v5483_v58 = vmul.f32 %v10297_v63, %v10816_v52  ;;  %v5611_v24 = vmul.f32 %v10816_v52, %v10308_v4  ;;  %v5686_v41 = vmul.f32 %v10816_v52, %v10310_v7  ;;  %v6037_v42 = vmul.f32 %v10816_v52, %v10323_v21 }
0x133f   : > { %v10818_v53 = vld [vmem:[#allocation3 + $0x8] sm:$0xff] }
0x1340   : > { %v10822_v54 = vpack.c.bf16 %v10818_v53, %v10816_v52  ;;  %v5484_v59 = vmul.f32 %v10297_v63, %v10818_v53  ;;  %v5612_v38 = vmul.f32 %v10818_v53, %v10308_v4  ;;  %v5687_v30 = vmul.f32 %v10818_v53, %v10310_v7 }
0x1341   : > { %v10830_v8 = vld [vmem:[#allocation3 + $0x10] sm:$0xff]  ;;  %v5825_v45 = vmul.f32 %v10818_v53, %v10314_v15 }
0x1342   : > { %5508 = vrot.lane.b32.xlu0 %v10822_v54, %s11825_s12  ;;  %v5491_v14 = vpack.c.bf16 %v5484_v59, %v5483_v58  ;;  %v5485_v60 = vmul.f32 %v10297_v63, %v10830_v8  ;;  %v5613_v3 = vmul.f32 %v10830_v8, %v10308_v4  ;;  %v5620_v29 = vpack.c.bf16 %v5612_v38, %v5611_v24 }
0x1343   : > { %v10840_v20 = vld [vmem:[#allocation3 + $0x18] sm:$0xff]  ;;  %v5695_v47 = vpack.c.bf16 %v5687_v30, %v5686_v41  ;;  %v5688_v51 = vmul.f32 %v10830_v8, %v10310_v7  ;;  %v5824_v58 = vmul.f32 %v10816_v52, %v10314_v15  ;;  %v5900_v38 = vmul.f32 %v10818_v53, %v10317_v18 }
0x1344   : > { %9238 = vmatpush3.bf16.msra.mxu0 %v5491_v14  ;;  %v10846_v61 = vpack.c.bf16 %v10840_v20, %v10830_v8  ;;  %v5486_v62 = vmul.f32 %v10297_v63, %v10840_v20  ;;  %v5614_v26 = vmul.f32 %v10840_v20, %v10308_v4  ;;  %v5689_v49 = vmul.f32 %v10840_v20, %v10310_v7 }
0x1345   : > { %9239 = vmatprep.subr.bf16.mxu0 %v9638_v2  ;;  %v5833_v59 = vpack.c.bf16 %v5825_v45, %v5824_v58  ;;  %v5827_v14 = vmul.f32 %v10840_v20, %v10314_v15  ;;  %v5828_v24 = vmul.f32 %v10834_v28, %v10314_v15  ;;  %v5901_v25 = vmul.f32 %v10830_v8, %v10317_v18 }
0x1346   : > { %5512 = vrot.lane.b32.xlu0 %v10838_v17, %s11825_s12  ;;  %5510 = vrot.lane.b32.xlu1 %v10846_v61, %s11825_s12  ;;  %v5492_v9 = vpack.c.bf16 %v5486_v62, %v5485_v60  ;;  %v5621_v34 = vpack.c.bf16 %v5614_v26, %v5613_v3  ;;  %v5696_v23 = vpack.c.bf16 %v5689_v49, %v5688_v51 }
0x1347   : > { %v5826_v60 = vmul.f32 %v10830_v8, %v10314_v15  ;;  %v5899_v62 = vmul.f32 %v10816_v52, %v10317_v18  ;;  %v5902_v3 = vmul.f32 %v10840_v20, %v10317_v18  ;;  %v5904_v30 = vmul.f32 %v10828_v0, %v10317_v18 }
0x1348   : > { %9240 = vmatpush3.bf16.msra.mxu0 %v5492_v9  ;;  %v5829_v9 = vmul.f32 %v10828_v0, %v10314_v15  ;;  %v6038_v41 = vmul.f32 %v10818_v53, %v10323_v21  ;;  %v6039_v53 = vmul.f32 %v10830_v8, %v10323_v21  ;;  %v6041_v52 = vmul.f32 %v10834_v28, %v10323_v21 }
0x1349   : > { %9241 = vmatprep.subr.bf16.mxu0 %v9638_v2  ;;  %v5834_v26 = vpack.c.bf16 %v5827_v14, %v5826_v60  ;;  %v5908_v6 = vpack.c.bf16 %v5900_v38, %v5899_v62  ;;  %v9602_v14 = vld [vmem:[%s11711_s14 + $0x10] sm:$0xff]   ;;  %v9603_v38 = vld [vmem:[%s11711_s14 + $0x18] sm:$0xff]  }
0x134a   : > { %5633 = vrot.lane.b32.xlu0 %v5621_v34, %s11819_s10  ;;  %5631 = vrot.lane.b32.xlu1 %v5620_v29, %s11819_s10  ;;  %v5835_v34 = vpack.c.bf16 %v5829_v9, %v5828_v24  ;;  %v5909_v29 = vpack.c.bf16 %v5902_v3, %v5901_v25  ;;  %v9604_v24 = vld [vmem:[%s11711_s14 + $0x20] sm:$0xff]   ;;  %v9605_v25 = vld [vmem:[%s11711_s14 + $0x28] sm:$0xff]  }
0x134c   : > { %9242 = vmatpush3.bf16.msra.mxu0 %v5493_v39  ;;  %v5910_v39 = vpack.c.bf16 %v5904_v30, %v5903_v35 }
0x134d   : > { %9257 = vmatprep.subr.bf16.mxu0 %v9638_v2 }
0x134e   : > { %5706 = vrot.lane.b32.xlu0 %v5695_v47, %s11827_s1  ;;  %5635 = vrot.lane.b32.xlu1 %v5622_v27, %s11819_s10  ;;  %v6040_v47 = vmul.f32 %v10840_v20, %v10323_v21  ;;  %v6112_v20 = vld [vmem:[%s11712_s15] sm:$0xff] }
0x134f   : > { %9244 = vmatmul.mubr.msk.bf16.vlgmr.msra.gmra.mrb[76].mxu0 %vm5517_vm13, %v9601_v46  ;;  %v6046_v46 = vpack.c.bf16 %v6038_v41, %v6037_v42  ;;  %v9606_v41 = vld [vmem:[%s11711_s14 + $0x30] sm:$0xff]   ;;  %v9607_v42 = vld [vmem:[%s11711_s14 + $0x38] sm:$0xff]  }
0x1350   : > { %9263 = vmatprep.mubr.msk.bf16.mxu0 %vm9657_vm14, %v9638_v2  ;;  %v6047_v27 = vpack.c.bf16 %v6040_v47, %v6039_v53  ;;  %v9608_v53 = vld [vmem:[%s11711_s14 + $0x40] sm:$0xff]  }
0x1352   : > { %5708 = vrot.lane.b32.xlu0 %v5696_v23, %s11827_s1  ;;  %5769 = vrot.lane.b32.xlu1 %v10822_v54, %s11828_s2  ;;  %v9600_v23 = vld [vmem:[%s11711_s14 + $0x8] sm:$0xff]  }
0x1356   : > { %5710 = vrot.lane.b32.xlu0 %v5697_v22, %s11827_s1  ;;  %5771 = vrot.lane.b32.xlu1 %v10846_v61, %s11828_s2 }
0x135a   : > { %5844 = vrot.lane.b32.xlu0 %v5833_v59, %s11829_s8  ;;  %5773 = vrot.lane.b32.xlu1 %v10838_v17, %s11828_s2 }
0x135e   : > { %5846 = vrot.lane.b32.xlu0 %v5834_v26, %s11829_s8  ;;  %5919 = vrot.lane.b32.xlu1 %v5908_v6, %s11820_s6 }
0x1362   : > { %5848 = vrot.lane.b32.xlu0 %v5835_v34, %s11829_s8  ;;  %5921 = vrot.lane.b32.xlu1 %v5909_v29, %s11820_s6 }
0x1366   : > { %5982 = vrot.lane.b32.xlu0 %v10822_v54, %s11830_s7  ;;  %5923 = vrot.lane.b32.xlu1 %v5910_v39, %s11820_s6  ;;  %v6042_v54 = vmul.f32 %v10828_v0, %v10323_v21  ;;  %v6113_v0 = vld [vmem:[%s11712_s15 + $0x8] sm:$0xff] }
0x136a   : > { %5984 = vrot.lane.b32.xlu0 %v10846_v61, %s11830_s7  ;;  %6057 = vrot.lane.b32.xlu1 %v6046_v46, %s11822_s29  ;;  %v6048_v61 = vpack.c.bf16 %v6042_v54, %v6041_v52 }
0x136e   : > { %5986 = vrot.lane.b32.xlu0 %v10838_v17, %s11830_s7  ;;  %6059 = vrot.lane.b32.xlu1 %v6047_v27, %s11822_s29 }
0x1372   : > { %6116 = vperm.xlu0 %9503, %v6112_v20   ;;  %6061 = vrot.lane.b32.xlu1 %v6048_v61, %s11822_s29 }
0x1376   : > { %6121 = vperm.xlu1 %9514, %v6113_v0  }
0x13b4   : > { %v5509_v8 = vpop.permute.xlu0 %5508 }
0x13b5   : > { %9228 = vmatpush3.bf16.msra.mxu1 %v5509_v8 }
0x13b6   : > { %9229 = vmatprep.subr.bf16.mxu1 %v9638_v2 }
0x13b8   : > { %v5513_v17 = vpop.permute.xlu0 %5512  ;;  %v5511_v49 = vpop.permute.xlu1 %5510 }
0x13b9   : > { %9230 = vmatpush3.bf16.msra.mxu1 %v5511_v49 }
0x13ba   : > { %9231 = vmatprep.subr.bf16.mxu1 %v9638_v2 }
0x13bc   : > { %v5634_v28 = vpop.permute.xlu0 %5633  ;;  %v5632_v51 = vpop.permute.xlu1 %5631 }
0x13bd   : > { %9232 = vmatpush3.bf16.msra.mxu1 %v5513_v17 }
0x13be   : > { %9247 = vmatprep.subr.bf16.mxu1 %v9638_v2 }
0x13c0   : > { %v5707_v40 = vpop.permute.xlu0 %5706  ;;  %9234 = vmatmul.mubr.msk.bf16.vlgmr.msra.gmra.mrb[88].mxu1 %vm5517_vm13, %v9600_v23  ;;  %v5636_v44 = vpop.permute.xlu1 %5635 }
0x13c1   : > { %9248 = vmatpush3.bf16.msra.mxu1 %v5632_v51  ;;  %9258 = vmatpush3.bf16.msra.mxu0 %v5707_v40 }
0x13c2   : > { %9249 = vmatprep.subr.bf16.mxu1 %v9638_v2  ;;  %9259 = vmatprep.subr.bf16.mxu0 %v9638_v2 }
0x13c3   : > { %9253 = vmatprep.mubr.msk.bf16.mxu1 %vm9657_vm14, %v9638_v2 }
0x13c4   : > { %v5709_v22 = vpop.permute.xlu0 %5708  ;;  %v5770_v45 = vpop.permute.xlu1 %5769 }
0x13c5   : > { %9250 = vmatpush3.bf16.msra.mxu1 %v5634_v28  ;;  %9260 = vmatpush3.bf16.msra.mxu0 %v5709_v22 }
0x13c6   : > { %9251 = vmatprep.subr.bf16.mxu1 %v9638_v2  ;;  %9261 = vmatprep.subr.bf16.mxu0 %v9638_v2 }
0x13c8   : > { %v5711_v58 = vpop.permute.xlu0 %5710  ;;  %v5772_v59 = vpop.permute.xlu1 %5771 }
0x13c9   : > { %9252 = vmatpush3.bf16.msra.mxu1 %v5636_v44  ;;  %9262 = vmatpush3.bf16.msra.mxu0 %v5711_v58 }
0x13ca   : > { %9267 = vmatprep.subr.bf16.mxu1 %v9638_v2  ;;  %9277 = vmatprep.subr.bf16.mxu0 %v9638_v2 }
0x13cc   : > { %v5845_v60 = vpop.permute.xlu0 %5844  ;;  %9254 = vmatmul.mubr.msk.bf16.vlgmr.msra.gmra.mrb[92].mxu1 %vm5517_vm13, %v9602_v14  ;;  %v5774_v62 = vpop.permute.xlu1 %5773  ;;  %9264 = vmatmul.mubr.msk.bf16.vlgmr.msra.gmra.mrb[80].mxu0 %vm5517_vm13, %v9603_v38 }
0x13cd   : > { %9268 = vmatpush3.bf16.msra.mxu1 %v5770_v45  ;;  %9278 = vmatpush3.bf16.msra.mxu0 %v5845_v60 }
0x13ce   : > { %9269 = vmatprep.subr.bf16.mxu1 %v9638_v2  ;;  %9279 = vmatprep.subr.bf16.mxu0 %v9638_v2 }
0x13cf   : > { %9273 = vmatprep.mubr.msk.bf16.mxu1 %vm9657_vm14, %v9638_v2  ;;  %9283 = vmatprep.mubr.msk.bf16.mxu0 %vm9657_vm14, %v9638_v2 }
0x13d0   : > { %v5847_v26 = vpop.permute.xlu0 %5846  ;;  %v5920_v6 = vpop.permute.xlu1 %5919 }
0x13d1   : > { %9270 = vmatpush3.bf16.msra.mxu1 %v5772_v59  ;;  %9280 = vmatpush3.bf16.msra.mxu0 %v5847_v26 }
0x13d2   : > { %9271 = vmatprep.subr.bf16.mxu1 %v9638_v2  ;;  %9281 = vmatprep.subr.bf16.mxu0 %v9638_v2 }
0x13d4   : > { %v5849_v9 = vpop.permute.xlu0 %5848  ;;  %v5922_v3 = vpop.permute.xlu1 %5921 }
0x13d5   : > { %9272 = vmatpush3.bf16.msra.mxu1 %v5774_v62  ;;  %9282 = vmatpush3.bf16.msra.mxu0 %v5849_v9 }
0x13d6   : > { %9287 = vmatprep.subr.bf16.mxu1 %v9638_v2  ;;  %9297 = vmatprep.subr.bf16.mxu0 %v9638_v2 }
0x13d8   : > { %v5983_v34 = vpop.permute.xlu0 %5982  ;;  %9274 = vmatmul.mubr.msk.bf16.vlgmr.msra.gmra.mrb[96].mxu1 %vm5517_vm13, %v9604_v24  ;;  %9284 = vmatmul.mubr.msk.bf16.vlgmr.msra.gmra.mrb[84].mxu0 %vm5517_vm13, %v9605_v25  ;;  %v5924_v29 = vpop.permute.xlu1 %5923 }
0x13d9   : > { %9288 = vmatpush3.bf16.msra.mxu1 %v5920_v6  ;;  %9298 = vmatpush3.bf16.msra.mxu0 %v5983_v34 }
0x13da   : > { %9289 = vmatprep.subr.bf16.mxu1 %v9638_v2  ;;  %9299 = vmatprep.subr.bf16.mxu0 %v9638_v2 }
0x13db   : > { %9293 = vmatprep.mubr.msk.bf16.mxu1 %vm9657_vm14, %v9638_v2  ;;  %9303 = vmatprep.mubr.msk.bf16.mxu0 %vm9657_vm14, %v9638_v2 }
0x13dc   : > { %v5985_v30 = vpop.permute.xlu0 %5984  ;;  %v6058_v35 = vpop.permute.xlu1 %6057 }
0x13dd   : > { %9290 = vmatpush3.bf16.msra.mxu1 %v5922_v3  ;;  %9300 = vmatpush3.bf16.msra.mxu0 %v5985_v30 }
0x13de   : > { %9291 = vmatprep.subr.bf16.mxu1 %v9638_v2  ;;  %9301 = vmatprep.subr.bf16.mxu0 %v9638_v2 }
0x13e0   : > { %v5987_v39 = vpop.permute.xlu0 %5986  ;;  %v6060_v46 = vpop.permute.xlu1 %6059 }
0x13e1   : > { %9292 = vmatpush3.bf16.msra.mxu1 %v5924_v29  ;;  %9302 = vmatpush3.bf16.msra.mxu0 %v5987_v39 }
0x13e2   : > { %9307 = vmatprep.subr.bf16.mxu1 %v9638_v2  ;;  %9317 = vmatprep.subr.bf16.mxu0 %v9638_v2 }
0x13e4   : > { %9294 = vmatmul.mubr.msk.bf16.vlgmr.msra.gmra.mrb[100].mxu1 %vm5517_vm13, %v9606_v41  ;;  %9304 = vmatmul.mubr.msk.bf16.vlgmr.msra.gmra.mrb[88].mxu0 %vm5517_vm13, %v9607_v42  ;;  %v6062_v47 = vpop.permute.xlu1 %6061 }
0x13e5   : > { %9308 = vmatpush3.bf16.msra.mxu1 %v6058_v35  ;;  %9313 = vmatprep.mubr.msk.bf16.mxu1 %vm9657_vm14, %v9638_v2 }
0x13e6   : > { %9309 = vmatprep.subr.bf16.mxu1 %v9638_v2  ;;  %9319 = vmatprep.mubr.msk.bf16.mxu0 %vm9657_vm14, %v9638_v2 }
0x13e9   : > { %9310 = vmatpush3.bf16.msra.mxu1 %v6060_v46 }
0x13ea   : > { %9311 = vmatprep.subr.bf16.mxu1 %v9638_v2 }
0x13ed   : > { %9312 = vmatpush3.bf16.msra.mxu1 %v6062_v47 }
0x13ee   : > { %9323 = vmatprep.subr.bf16.mxu1 %v9638_v2 }
0x13f0   : > { %9314 = vmatmul.mubr.msk.bf16.vlgmr.msra.gmra.mrb[104].mxu1 %vm5517_vm13, %v9608_v53 }
0x13f1   : > { %9325 = vmatprep.mubr.msk.bf16.mxu1 %vm9657_vm14, %v9638_v2 }
0x1422   : > { %v5604_v27 = vpop.f32.mrb[76].mxu0 }
0x1423   : > { %v9245_v54 = vpop.f32.mrb[77].mxu0 }
0x1424   : > { %v5607_v52 = vpop.f32.mrb[78].mxu0 }
0x1425   : > { %v9246_v20 = vpop.f32.mrb[79].mxu0 }
0x1493   : > { %v5555_v61 = vpop.f32.mrb[88].mxu1 }
0x1494   : > { %v5605_v0 = vadd.f32 %v5604_v27, %v5555_v61  ;;  %v9235_v8 = vpop.f32.mrb[89].mxu1 }
0x1495   : > { %v5558_v17 = vpop.f32.mrb[90].mxu1 }
0x1496   : > { %v5608_v49 = vadd.f32 %v5607_v52, %v5558_v17  ;;  %v9236_v28 = vpop.f32.mrb[91].mxu1 }
0x149f   : > { %v5677_v51 = vpop.f32.mrb[92].mxu1  ;;  %v5752_v23 = vpop.f32.mrb[80].mxu0 }
0x14a0   : > { %v5684_v40 = vadd.f32 %v5677_v51, %v5605_v0  ;;  %v9255_v44 = vpop.f32.mrb[93].mxu1  ;;  %v9265_v22 = vpop.f32.mrb[81].mxu0 }
0x14a1   : > { %v5680_v45 = vpop.f32.mrb[94].mxu1  ;;  %v5755_v58 = vpop.f32.mrb[82].mxu0 }
0x14a2   : > { %v5685_v59 = vadd.f32 %v5680_v45, %v5608_v49  ;;  %v5759_v14 = vadd.f32 %v5752_v23, %v5684_v40  ;;  %v9256_v38 = vpop.f32.mrb[95].mxu1  ;;  %v9266_v60 = vpop.f32.mrb[83].mxu0 }
0x14a3   : > { %v6117_v23 = vpop.permute.xlu0 %6116 }
0x14a4   : > { %v5760_v62 = vadd.f32 %v5755_v58, %v5685_v59  ;;  %v6122_v58 = vpop.permute.xlu1 %6121 }
0x14ab   : > { %v5815_v26 = vpop.f32.mrb[96].mxu1  ;;  %v5890_v6 = vpop.f32.mrb[84].mxu0 }
0x14ac   : > { %v5822_v9 = vadd.f32 %v5815_v26, %v5759_v14  ;;  %v9275_v3 = vpop.f32.mrb[97].mxu1  ;;  %v9285_v24 = vpop.f32.mrb[85].mxu0 }
0x14ad   : > { %v5818_v25 = vpop.f32.mrb[98].mxu1  ;;  %v5893_v34 = vpop.f32.mrb[86].mxu0 }
0x14ae   : > { %v5823_v29 = vadd.f32 %v5818_v25, %v5760_v62  ;;  %v5897_v30 = vadd.f32 %v5890_v6, %v5822_v9  ;;  %v9276_v35 = vpop.f32.mrb[99].mxu1  ;;  %v9286_v39 = vpop.f32.mrb[87].mxu0 }
0x14b0   : > { %v5898_v41 = vadd.f32 %v5893_v34, %v5823_v29 }
0x14b7   : > { %v5965_v42 = vpop.f32.mrb[100].mxu1  ;;  %v6028_v46 = vpop.f32.mrb[88].mxu0 }
0x14b8   : > { %v5972_v47 = vadd.f32 %v5965_v42, %v5897_v30  ;;  %v9295_v53 = vpop.f32.mrb[101].mxu1  ;;  %v9305_v27 = vpop.f32.mrb[89].mxu0 }
0x14b9   : > { %v5968_v54 = vpop.f32.mrb[102].mxu1  ;;  %v6031_v52 = vpop.f32.mrb[90].mxu0 }
0x14ba   : > { %v5973_v20 = vadd.f32 %v5968_v54, %v5898_v41  ;;  %v6035_v61 = vadd.f32 %v6028_v46, %v5972_v47  ;;  %v9296_v0 = vpop.f32.mrb[103].mxu1  ;;  %v9306_v8 = vpop.f32.mrb[91].mxu0  ;;  %v9609_v41 = vld [vmem:[%s11713_s16] sm:$0xff]  }
0x14bb   : > { %v9611_v8 = vld [vmem:[%s11713_s16 + $0x18] sm:$0xff]  }
0x14bc   : > { %v6036_v17 = vadd.f32 %v6031_v52, %v5973_v20  ;;  %v6670_v52 = vld [vmem:[%s11714_s17] sm:$0xff] }
0x14c3   : > { %v6103_v49 = vpop.f32.mrb[104].mxu1 }
0x14c4   : > { %v6110_v28 = vadd.f32 %v6103_v49, %v6035_v61  ;;  %v9315_v51 = vpop.f32.mrb[105].mxu1  ;;  %v9612_v49 = vld [vmem:[%s11713_s16 + $0x10] sm:$0xff]  }
0x14c5   : > { %v6106_v40 = vpop.f32.mrb[106].mxu1  ;;  %v9613_v51 = vld [vmem:[%s11713_s16 + $0x28] sm:$0xff]  }
0x14c6   : > { %v6124_v44 = vadd.f32 %v6117_v23, %v6110_v28  ;;  %v6111_v22 = vadd.f32 %v6106_v40, %v6036_v17  ;;  %v9316_v45 = vpop.f32.mrb[107].mxu1  ;;  %v9614_v40 = vld [vmem:[%s11713_s16 + $0x20] sm:$0xff]  }
0x14c7   : > { %v9615_v45 = vld [vmem:[%s11713_s16 + $0x30] sm:$0xff]  }
0x14c8   : > { %v6126_v59 = vmax.f32 %v6124_v44, 0.0  ;;  %v6125_v14 = vadd.f32 %v6122_v58, %v6111_v22  ;;  %v9616_v22 = vld [vmem:[%s11713_s16 + $0x38] sm:$0xff]  }
0x14ca   : > { %v6127_v38 = vmax.f32 %v6125_v14, 0.0  ;;  %6130 = vrot.lane.b32.xlu0 %v6126_v59, %s11824_s5  ;;  %v9617_v59 = vld [vmem:[%s11713_s16 + $0x40] sm:$0xff]  }
0x14cc   : > { %6132 = vrot.lane.b32.xlu1 %v6127_v38, %s11824_s5 }
0x153c   : > { %v6131_v60 = vpop.permute.xlu0 %6130 }
0x153d   : > { %6136 = vst.msk [vmem:[#allocation3] sm:$0xff] %vm2533_vm7, %v6131_v60 }
0x153e   : > { %v6133_v62 = vpop.permute.xlu1 %6132 }
0x153f   : > { %6137 = vst.msk [vmem:[#allocation3 + $0x8] sm:$0xff] %vm2533_vm7, %v6133_v62  ;;  %vm11850_vm7 = vmmov %vm11847_vm4 }
0x1544   : > { %v6138_v26 = vld [vmem:[#allocation3] sm:$0xff] }
0x1545   : > { %v6251_v9 = vmul.f32 %v6138_v26, %v10308_v4  ;;  %v6140_v3 = vmul.f32 %v10297_v63, %v6138_v26  ;;  %v6312_v39 = vmul.f32 %v6138_v26, %v10310_v7  ;;  %v6491_v47 = vmul.f32 %v6138_v26, %v10317_v18 }
0x1546   : > { %v6139_v6 = vld [vmem:[#allocation3 + $0x8] sm:$0xff] }
0x1547   : > { %v6148_v24 = vpack.c.bf16 %v6139_v6, %v6138_v26  ;;  %v6252_v25 = vmul.f32 %v6139_v6, %v10308_v4  ;;  %v6141_v34 = vmul.f32 %v10297_v63, %v6139_v6  ;;  %v6313_v29 = vmul.f32 %v6139_v6, %v10310_v7 }
0x1548   : > { %v6431_v4 = vmul.f32 %v6139_v6, %v10314_v15  ;;  %v6430_v63 = vmul.f32 %v6138_v26, %v10314_v15  ;;  %v6492_v46 = vmul.f32 %v6139_v6, %v10317_v18  ;;  %v6610_v27 = vmul.f32 %v6139_v6, %v10323_v21  ;;  %v6671_v18 = vld [vmem:[%s11714_s17 + $0x8] sm:$0xff]  ;;  %v9623_v6 = vld [vmem:[%s11724_s27 + $0x14] ss:$8 sps:$4 sm:$0xff]  }
0x1549   : > { %6155 = vrot.lane.b32.xlu0 %v6148_v24, %s11825_s12  ;;  %v6256_v30 = vpack.c.bf16 %v6252_v25, %v6251_v9  ;;  %v6144_v35 = vpack.c.bf16 %v6141_v34, %v6140_v3  ;;  %v6317_v42 = vpack.c.bf16 %v6313_v29, %v6312_v39  ;;  %v6609_v15 = vmul.f32 %v6138_v26, %v10323_v21  ;;  %v9610_v21 = vld [vmem:[%s11713_s16 + $0x8] sm:$0xff]   ;;  %v9621_v9 = vld [vmem:[%s11724_s27 + $0x10] ss:$8 sps:$4 sm:$0xff]   ;;  %v9629_v25 = vld [vmem:[%s11724_s27 + $0x34] ss:$8 sps:$4 sm:$0xff]  }
0x154a   : > { %v6435_v7 = vpack.c.bf16 %v6431_v4, %v6430_v63  ;;  %v6496_v53 = vpack.c.bf16 %v6492_v46, %v6491_v47  ;;  %v9618_v26 = vld [vmem:[%s11724_s27] ss:$8 sps:$4 sm:$0xff]   ;;  %v9627_v34 = vld [vmem:[%s11724_s27 + $0x30] ss:$8 sps:$4 sm:$0xff]  }
0x154b   : > { %6263 = vrot.lane.b32.xlu1 %v6256_v30, %s11819_s10  ;;  %9324 = vmatpush3.bf16.msra.mxu1 %v6144_v35  ;;  %v6614_v54 = vpack.c.bf16 %v6610_v27, %v6609_v15  ;;  %v9624_v3 = vld [vmem:[%s11724_s27 + $0x20] ss:$8 sps:$4 sm:$0xff]  }
0x154c   : > { %9335 = vmatprep.subr.bf16.mxu1 %v9638_v2 }
0x154d   : > { %6324 = vrot.lane.b32.xlu0 %v6317_v42, %s11827_s1  ;;  %s11883_s1 = sld [smem:[#allocation26_spill]] }
0x154e   : > { %9326 = vmatmul.mubr.msk.bf16.vlgmr.msra.gmra.mrb[108].mxu1 %vm1208_vm11, %v9609_v41 }
0x154f   : > { %6381 = vrot.lane.b32.xlu1 %v6148_v24, %s11828_s2  ;;  %9337 = vmatprep.mubr.msk.bf16.mxu1 %vm9657_vm14, %v9638_v2 }
0x1551   : > { %6442 = vrot.lane.b32.xlu0 %v6435_v7, %s11829_s8 }
0x1553   : > { %6503 = vrot.lane.b32.xlu1 %v6496_v53, %s11820_s6 }
0x1555   : > { %6560 = vrot.lane.b32.xlu0 %v6148_v24, %s11830_s7  ;;  %v9626_v24 = vld [vmem:[%s11724_s27 + $0x24] ss:$8 sps:$4 sm:$0xff]  }
0x1557   : > { %6621 = vrot.lane.b32.xlu1 %v6614_v54, %s11822_s29 }
0x1559   : > { %6674 = vperm.xlu0 %9503, %v6670_v52  }
0x155b   : > { %6679 = vperm.xlu1 %9514, %v6671_v18  }
0x15bb   : > { %v6156_v20 = vpop.permute.xlu0 %6155 }
0x15bc   : > { %9318 = vmatpush3.bf16.msra.mxu0 %v6156_v20 }
0x15bd   : > { %9329 = vmatprep.subr.bf16.mxu0 %v9638_v2  ;;  %v6264_v61 = vpop.permute.xlu1 %6263 }
0x15bf   : > { %9320 = vmatmul.mubr.msk.bf16.vlgmr.msra.gmra.mrb[92].mxu0 %vm1208_vm11, %v9610_v21  ;;  %v6325_v0 = vpop.permute.xlu0 %6324 }
0x15c0   : > { %9330 = vmatpush3.bf16.msra.mxu0 %v6264_v61  ;;  %9336 = vmatpush3.bf16.msra.mxu1 %v6325_v0 }
0x15c1   : > { %9347 = vmatprep.subr.bf16.mxu1 %v9638_v2  ;;  %9331 = vmatprep.mubr.msk.bf16.mxu0 %vm9657_vm14, %v9638_v2  ;;  %v6382_v28 = vpop.permute.xlu1 %6381 }
0x15c2   : > { %9341 = vmatprep.subr.bf16.mxu0 %v9638_v2 }
0x15c3   : > { %v6443_v17 = vpop.permute.xlu0 %6442  ;;  %9338 = vmatmul.mubr.msk.bf16.vlgmr.msra.gmra.mrb[112].mxu1 %vm1208_vm11, %v9611_v8 }
0x15c4   : > { %9348 = vmatpush3.bf16.msra.mxu1 %v6443_v17  ;;  %9349 = vmatprep.mubr.msk.bf16.mxu1 %vm9657_vm14, %v9638_v2 }
0x15c5   : > { %9359 = vmatprep.subr.bf16.mxu1 %v9638_v2  ;;  %v6504_v44 = vpop.permute.xlu1 %6503 }
0x15c7   : > { %9332 = vmatmul.mubr.msk.bf16.vlgmr.msra.gmra.mrb[96].mxu0 %vm1208_vm11, %v9612_v49  ;;  %v6561_v23 = vpop.permute.xlu0 %6560 }
0x15c8   : > { %9342 = vmatpush3.bf16.msra.mxu0 %v6382_v28  ;;  %9343 = vmatprep.mubr.msk.bf16.mxu0 %vm9657_vm14, %v9638_v2 }
0x15c9   : > { %9353 = vmatprep.subr.bf16.mxu0 %v9638_v2  ;;  %v6622_v58 = vpop.permute.xlu1 %6621 }
0x15cb   : > { %9350 = vmatmul.mubr.msk.bf16.vlgmr.msra.gmra.mrb[116].mxu1 %vm1208_vm11, %v9613_v51 }
0x15cc   : > { %9360 = vmatpush3.bf16.msra.mxu1 %v6561_v23  ;;  %9361 = vmatprep.mubr.msk.bf16.mxu1 %vm9657_vm14, %v9638_v2 }
0x15cf   : > { %9344 = vmatmul.mubr.msk.bf16.vlgmr.msra.gmra.mrb[100].mxu0 %vm1208_vm11, %v9614_v40 }
0x15d0   : > { %9354 = vmatpush3.bf16.msra.mxu0 %v6504_v44  ;;  %9355 = vmatprep.mubr.msk.bf16.mxu0 %vm9657_vm14, %v9638_v2 }
0x15d1   : > { %9365 = vmatprep.subr.bf16.mxu0 %v9638_v2 }
0x15d3   : > { %9362 = vmatmul.mubr.msk.bf16.vlgmr.msra.gmra.mrb[120].mxu1 %vm1208_vm11, %v9616_v22 }
0x15d4   : > { %6770 = vmatprep.mubr.bf16.mxu1 %v9647_v31 }
0x15d7   : > { %9356 = vmatmul.mubr.msk.bf16.vlgmr.msra.gmra.mrb[104].mxu0 %vm1208_vm11, %v9615_v45 }
0x15d8   : > { %9366 = vmatpush3.bf16.msra.mxu0 %v6622_v58  ;;  %9367 = vmatprep.mubr.msk.bf16.mxu0 %vm9657_vm14, %v9638_v2  ;;  %v9620_v2 = vld [vmem:[%s11724_s27 + $0x4] ss:$8 sps:$4 sm:$0xff]   ;;  %vm11851_vm14 = vcmask 785408  }
0x15d9   : > { %6738 = vmatprep.subr.bf16.mxu1 %v9620_v2 }
0x15da   : > { %6739 = vmatpush1.bf16.msra.mxu1 %v9618_v26 }
0x15db   : > { %6740 = vmatprep.subr.bf16.mxu1 %v9623_v6 }
0x15de   : > { %6741 = vmatpush1.bf16.msra.mxu1 %v9621_v9 }
0x15df   : > { %9368 = vmatmul.mubr.msk.bf16.vlgmr.msra.gmra.mrb[108].mxu0 %vm1208_vm11, %v9617_v59  ;;  %6742 = vmatprep.subr.bf16.mxu1 %v9626_v24  ;;  %vm6862_vm11 = vcmask 195584  }
0x15e0   : > { %6904 = vmatprep.mubr.bf16.mxu0 %v9647_v31 }
0x15e2   : > { %6743 = vmatpush1.bf16.msra.mxu1 %v9624_v3 }
0x15e3   : > { %6744 = vmatprep.subr.bf16.mxu1 %v9629_v25 }
0x15e6   : > { %6745 = vmatpush1.bf16.msra.mxu1 %v9627_v34 }
0x1621   : > { %v6244_v14 = vpop.f32.mrb[108].mxu1 }
0x1622   : > { %v9327_v38 = vpop.f32.mrb[109].mxu1 }
0x1623   : > { %v6247_v60 = vpop.f32.mrb[110].mxu1 }
0x1624   : > { %v9328_v62 = vpop.f32.mrb[111].mxu1 }
0x1692   : > { %v6195_v29 = vpop.f32.mrb[92].mxu0 }
0x1693   : > { %v6245_v30 = vadd.f32 %v6244_v14, %v6195_v29  ;;  %v9321_v35 = vpop.f32.mrb[93].mxu0  ;;  %v6675_v29 = vpop.permute.xlu0 %6674 }
0x1694   : > { %v6198_v39 = vpop.f32.mrb[94].mxu0 }
0x1695   : > { %v6248_v41 = vadd.f32 %v6247_v60, %v6198_v39  ;;  %v9322_v42 = vpop.f32.mrb[95].mxu0 }
0x1696   : > { %v6364_v4 = vpop.f32.mrb[112].mxu1  ;;  %v6680_v42 = vpop.permute.xlu1 %6679 }
0x1697   : > { %v9339_v63 = vpop.f32.mrb[113].mxu1 }
0x1698   : > { %v6367_v46 = vpop.f32.mrb[114].mxu1 }
0x1699   : > { %v9340_v7 = vpop.f32.mrb[115].mxu1 }
0x169a   : > { %v6303_v47 = vpop.f32.mrb[96].mxu0 }
0x169b   : > { %v6310_v53 = vadd.f32 %v6303_v47, %v6245_v30  ;;  %v9333_v27 = vpop.f32.mrb[97].mxu0 }
0x169c   : > { %v6306_v15 = vpop.f32.mrb[98].mxu0 }
0x169d   : > { %v6311_v54 = vadd.f32 %v6306_v15, %v6248_v41  ;;  %v6371_v52 = vadd.f32 %v6364_v4, %v6310_v53  ;;  %v9334_v18 = vpop.f32.mrb[99].mxu0 }
0x169e   : > { %v6482_v20 = vpop.f32.mrb[116].mxu1 }
0x169f   : > { %v6372_v21 = vadd.f32 %v6367_v46, %v6311_v54  ;;  %v9351_v61 = vpop.f32.mrb[117].mxu1  ;;  %v11149_v54 = vld [vmem:[#allocation2 + $0x38] sm:$0xff] }
0x16a0   : > { %v6485_v0 = vpop.f32.mrb[118].mxu1  ;;  %v11157_v18 = vpack.c.bf16 %v11149_v54, %v11149_v54  ;;  %v11167_v61 = vld [vmem:[#allocation2 + $0x40] sm:$0xff] }
0x16a1   : > { %v9352_v8 = vpop.f32.mrb[119].mxu1 }
0x16a2   : > { %v6421_v17 = vpop.f32.mrb[100].mxu0 }
0x16a3   : > { %v6428_v49 = vadd.f32 %v6421_v17, %v6371_v52  ;;  %v9345_v28 = vpop.f32.mrb[101].mxu0  ;;  %v11152_v52 = vld [vmem:[#allocation2 + $0x30] sm:$0xff]  ;;  %v11175_v17 = vpack.c.bf16 %v11167_v61, %v11167_v61 }
0x16a4   : > { %v6424_v51 = vpop.f32.mrb[102].mxu0  ;;  %v7062_v8 = vmul.f32 %v9878_v32, %v11152_v52 }
0x16a5   : > { %v6429_v23 = vadd.f32 %v6424_v51, %v6372_v21  ;;  %v6489_v40 = vadd.f32 %v6482_v20, %v6428_v49  ;;  %v9346_v44 = vpop.f32.mrb[103].mxu0  ;;  %v6970_v20 = vmul.f32 %v11149_v54, %v9924_v48  ;;  %v11163_v21 = vpack.c.bf16 %v11152_v52, %v11152_v52 }
0x16a6   : > { %v6600_v22 = vpop.f32.mrb[120].mxu1  ;;  %v6969_v49 = vmul.f32 %v9880_v33, %v11152_v52  ;;  %v7070_v28 = vpack.c.bf16 %v7062_v8, %v7062_v8  ;;  %v7064_v51 = vmul.f32 %v9894_v36, %v11167_v61 }
0x16a7   : > { %v6490_v45 = vadd.f32 %v6485_v0, %v6429_v23  ;;  %v9363_v58 = vpop.f32.mrb[121].mxu1  ;;  %v6978_v0 = vpack.c.bf16 %v6970_v20, %v6970_v20 }
0x16a8   : > { %v6603_v59 = vpop.f32.mrb[122].mxu1  ;;  %v6977_v23 = vpack.c.bf16 %v6969_v49, %v6969_v49  ;;  %v7072_v44 = vpack.c.bf16 %v7064_v51, %v7064_v51  ;;  %v7227_v58 = vmul.f32 %v9928_v50, %v11152_v52 }
0x16a9   : > { %v9364_v14 = vpop.f32.mrb[123].mxu1 }
0x16aa   : > { %v6543_v38 = vpop.f32.mrb[104].mxu0  ;;  %v7235_v14 = vpack.c.bf16 %v7227_v58, %v7227_v58 }
0x16ab   : > { %v6550_v60 = vadd.f32 %v6543_v38, %v6489_v40  ;;  %v9357_v62 = vpop.f32.mrb[105].mxu0  ;;  %v6971_v40 = vmul.f32 %v9896_v37, %v11167_v61  ;;  %v7229_v38 = vmul.f32 %v9941_v56, %v11167_v61 }
0x16ac   : > { %v6546_v26 = vpop.f32.mrb[106].mxu0  ;;  %v7321_v62 = vmul.f32 %v11149_v54, %v9966_v11 }
0x16ad   : > { %v6551_v2 = vadd.f32 %v6546_v26, %v6490_v45  ;;  %v6607_v6 = vadd.f32 %v6600_v22, %v6550_v60  ;;  %v9358_v9 = vpop.f32.mrb[107].mxu0  ;;  %v6979_v22 = vpack.c.bf16 %v6971_v40, %v6971_v40  ;;  %v7063_v45 = vmul.f32 %v11149_v54, %v9937_v55 }
0x16ae   : > { %v7237_v60 = vpack.c.bf16 %v7229_v38, %v7229_v38  ;;  %v7228_v26 = vmul.f32 %v11149_v54, %v9957_v5  ;;  %v7320_v9 = vmul.f32 %v9914_v43, %v11152_v52 }
0x16af   : > { %v6608_v3 = vadd.f32 %v6603_v59, %v6551_v2  ;;  %v7071_v59 = vpack.c.bf16 %v7063_v45, %v7063_v45  ;;  %v7329_v2 = vpack.c.bf16 %v7321_v62, %v7321_v62 }
0x16b2   : > { %v6661_v24 = vpop.f32.mrb[108].mxu0 }
0x16b3   : > { %v6668_v25 = vadd.f32 %v6661_v24, %v6607_v6  ;;  %v9369_v34 = vpop.f32.mrb[109].mxu0  ;;  %v7236_v6 = vpack.c.bf16 %v7228_v26, %v7228_v26  ;;  %v7322_v24 = vmul.f32 %v9943_v57, %v11167_v61 }
0x16b4   : > { %v6664_v30 = vpop.f32.mrb[110].mxu0 }
0x16b5   : > { %v6682_v35 = vadd.f32 %v6675_v29, %v6668_v25  ;;  %v6669_v39 = vadd.f32 %v6664_v30, %v6608_v3  ;;  %v9370_v41 = vpop.f32.mrb[111].mxu0  ;;  %v7328_v3 = vpack.c.bf16 %v7320_v9, %v7320_v9  ;;  %v7330_v25 = vpack.c.bf16 %v7322_v24, %v7322_v24 }
0x16b7   : > { %v6683_v4 = vadd.f32 %v6680_v42, %v6669_v39  ;;  %v6684_v63 = vmax.f32 %v6682_v35, 0.0 }
0x16b9   : > { %v6685_v46 = vmax.f32 %v6683_v4, 0.0 }
0x16bb   : > { %v6686_v7 = vpack.c.bf16 %v6685_v46, %v6684_v63 }
0x16bd   : > { %8733 = vmatmul.mubr.msk.bf16.vlgmr.msra.gmra.mrb[124].mxu1 %vm3738_vm12, %v6686_v7  ;;  %vm11852_vm12 = vmmov %vm11851_vm14 }
0x16be   : > { %7045 = vmatprep.mubr.bf16.mxu1 %v9647_v31  ;;  %vm11853_vm6 = vmmov %vm11852_vm12 }
0x16bf   : > { %vm11854_vm13 = vmmov %vm11853_vm6 }
0x1790   : > { %v6772_v47 = vpop.f32.mrb[124].mxu1 }
0x1791   : > { %6785 = vrot.lane.b32.xlu0 %v6772_v47, %s11843_s3  ;;  %v6774_v53 = vpop.f32.mrb[125].mxu1 }
0x1792   : > { %6787 = vrot.lane.b32.xlu1 %v6774_v53, %s11843_s3  ;;  %v6776_v27 = vpop.f32.mrb[126].mxu1 }
0x1793   : > { %v6778_v15 = vpop.f32.mrb[127].mxu1 }
0x1795   : > { %6789 = vrot.lane.b32.xlu0 %v6776_v27, %s11843_s3 }
0x1796   : > { %6791 = vrot.lane.b32.xlu1 %v6778_v15, %s11843_s3 }
0x1799   : > { %6852 = vrot.lane.b32.xlu0 %v11157_v18, %s11825_s12 }
0x179a   : > { %6850 = vrot.lane.b32.xlu1 %v11163_v21, %s11825_s12 }
0x179d   : > { %6994 = vrot.lane.b32.xlu0 %v6978_v0, %s11819_s10 }
0x179e   : > { %6854 = vrot.lane.b32.xlu1 %v11175_v17, %s11825_s12 }
0x17a1   : > { %7085 = vrot.lane.b32.xlu0 %v7070_v28, %s11820_s6 }
0x17a2   : > { %6992 = vrot.lane.b32.xlu1 %v6977_v23, %s11819_s10 }
0x17a5   : > { %7089 = vrot.lane.b32.xlu0 %v7072_v44, %s11820_s6 }
0x17a6   : > { %6996 = vrot.lane.b32.xlu1 %v6979_v22, %s11819_s10 }
0x17a9   : > { %7159 = vrot.lane.b32.xlu0 %v11157_v18, %s11830_s7 }
0x17aa   : > { %7087 = vrot.lane.b32.xlu1 %v7071_v59, %s11820_s6 }
0x17ad   : > { %7250 = vrot.lane.b32.xlu0 %v7235_v14, %s11822_s29 }
0x17ae   : > { %7157 = vrot.lane.b32.xlu1 %v11163_v21, %s11830_s7 }
0x17b1   : > { %7254 = vrot.lane.b32.xlu0 %v7237_v60, %s11822_s29 }
0x17b2   : > { %7161 = vrot.lane.b32.xlu1 %v11175_v17, %s11830_s7 }
0x17b5   : > { %7345 = vrot.lane.b32.xlu0 %v7329_v2, %s11844_s20 }
0x17b6   : > { %7252 = vrot.lane.b32.xlu1 %v7236_v6, %s11822_s29 }
0x17ba   : > { %7343 = vrot.lane.b32.xlu1 %v7328_v3, %s11844_s20 }
0x17be   : > { %7347 = vrot.lane.b32.xlu1 %v7330_v25, %s11844_s20 }
0x1803   : > { %v6786_v34 = vpop.permute.xlu0 %6785 }
0x1804   : > { %6801 = vst.msk [vmem:[#allocation2] sm:$0xff] %vm1674_vm8, %v6786_v34  ;;  %v6788_v29 = vpop.permute.xlu1 %6787 }
0x1805   : > { %6803 = vst.msk [vmem:[#allocation2 + $0x10] sm:$0xff] %vm867_vm0, %v6788_v29  ;;  %v11233_v46 = vsel %vm867_vm0, %v6786_v34, %v6788_v29 }
0x1806   : > { %v11255_v20 = vmul.f32 %v9849_v13, %v11233_v46 }
0x1807   : > { %v6790_v30 = vpop.permute.xlu0 %6789 }
0x1808   : > { %6804 = vst.msk [vmem:[#allocation2 + $0x18] sm:$0xff] %vm1674_vm8, %v6790_v30  ;;  %v6792_v35 = vpop.permute.xlu1 %6791 }
0x1809   : > { %v11221_v39 = vsel %vm867_vm0, %v6790_v30, %v6792_v35  ;;  %6806 = vst.msk [vmem:[#allocation2 + $0x28] sm:$0xff] %vm867_vm0, %v6792_v35 }
0x180a   : > { %v11245_v27 = vmul.f32 %v9849_v13, %v11221_v39  ;;  %v6833_v23 = vpack.c.bf16 %v11221_v39, %v11233_v46 }
0x180b   : > { %v11226_v42 = vpop.permute.xlu0 %6852  ;;  %v11228_v4 = vld [vmem:[#allocation2] sm:$0xff] }
0x180c   : > { %v11224_v41 = vpop.permute.xlu1 %6850  ;;  %v11251_v15 = vld [vmem:[#allocation2 + $0x10] sm:$0xff]  ;;  %v6827_v51 = vpack.c.bf16 %v11245_v27, %v11255_v20  ;;  %v6963_v44 = vmul.f32 %v9880_v33, %v11228_v4  ;;  %v7314_v59 = vmul.f32 %v9914_v43, %v11228_v4  ;;  %v7056_v14 = vmul.f32 %v9878_v32, %v11228_v4  ;;  %v6825_v27 = vld [vmem:[%s11715_s18] sm:$0xf] }
0x180d   : > { %v6965_v2 = vmul.f32 %v9896_v37, %v11251_v15  ;;  %v7221_v6 = vmul.f32 %v9928_v50, %v11228_v4  ;;  %v7058_v25 = vmul.f32 %v9894_v36, %v11251_v15  ;;  %v7223_v35 = vmul.f32 %v9941_v56, %v11251_v15 }
0x180f   : > { %v11230_v63 = vld [vmem:[#allocation2 + $0x18] sm:$0xff]  ;;  %v11257_v0 = vpop.permute.xlu0 %6994 }
0x1810   : > { %v11235_v7 = vpop.permute.xlu1 %6854  ;;  %v11239_v47 = vpack.c.bf16 %v11230_v63, %v11228_v4  ;;  %v11241_v53 = vld [vmem:[#allocation2 + $0x28] sm:$0xff]  ;;  %v6966_v40 = vmul.f32 %v9880_v33, %v11230_v63  ;;  %v7317_v45 = vmul.f32 %v9914_v43, %v11230_v63  ;;  %v7059_v58 = vmul.f32 %v9878_v32, %v11230_v63 }
0x1811   : > { %v6834_v49 = vpack.c.bf16 %v11241_v53, %v11251_v15  ;;  %v6968_v62 = vmul.f32 %v9896_v37, %v11241_v53  ;;  %v7224_v26 = vmul.f32 %v9928_v50, %v11230_v63  ;;  %v7061_v24 = vmul.f32 %v9894_v36, %v11241_v53 }
0x1812   : > { %6844 = vrot.lane.b32.xlu0 %v11239_v47, %s11825_s12  ;;  %7151 = vrot.lane.b32.xlu1 %v11239_v47, %s11830_s7  ;;  %v6974_v22 = vpack.c.bf16 %v6966_v40, %v6963_v44  ;;  %v7325_v38 = vpack.c.bf16 %v7317_v45, %v7314_v59  ;;  %v7067_v60 = vpack.c.bf16 %v7059_v58, %v7056_v14 }
0x1813   : > { %v6976_v9 = vpack.c.bf16 %v6968_v62, %v6965_v2  ;;  %v7232_v3 = vpack.c.bf16 %v7224_v26, %v7221_v6  ;;  %v7069_v34 = vpack.c.bf16 %v7061_v24, %v7058_v25  ;;  %v7226_v29 = vmul.f32 %v9941_v56, %v11241_v53 }
0x1814   : > { %v6993_v8 = vpop.permute.xlu1 %6992  ;;  %v7319_v30 = vmul.f32 %v9943_v57, %v11241_v53  ;;  %v7482_v44 = vmul.f32 %v9970_v12, %v11230_v63  ;;  %v6964_v45 = vmul.f32 %v11233_v46, %v9924_v48  ;;  %v7060_v14 = vmul.f32 %v11221_v39, %v9937_v55 }
0x1815   : > { %v11263_v28 = vsel %vm1147_vm1, %v6993_v8, %v11257_v0  ;;  %v7316_v8 = vmul.f32 %v9943_v57, %v11251_v15  ;;  %v7318_v62 = vmul.f32 %v11221_v39, %v9966_v11  ;;  %v7315_v26 = vmul.f32 %v11233_v46, %v9966_v11 }
0x1816   : > { %7155 = vrot.lane.b32.xlu0 %v6834_v49, %s11830_s7  ;;  %6848 = vrot.lane.b32.xlu1 %v6834_v49, %s11825_s12  ;;  %v7485_v6 = vmul.f32 %v9970_v12, %v11152_v52  ;;  %v7483_v25 = vmul.f32 %v11221_v39, %v9983_v19 }
0x1817   : > { %v7327_v40 = vpack.c.bf16 %v7319_v30, %v7316_v8  ;;  %v7326_v2 = vpack.c.bf16 %v7318_v62, %v7315_v26  ;;  %v7487_v8 = vmul.f32 %v9974_v16, %v11167_v61  ;;  %v7572_v61 = vld [vmem:[%s11716_s19] sm:$0xff] }
0x181a   : > { %7413 = vrot.lane.b32.xlu1 %v6834_v49, %s11845_s21  ;;  %6846 = vrot.lane.b32.xlu0 %v6833_v23, %s11825_s12  ;;  %v7234_v49 = vpack.c.bf16 %v7226_v29, %v7223_v35  ;;  %v7480_v29 = vmul.f32 %v11233_v46, %v9983_v19 }
0x181c   : > { %v7491_v30 = vpack.c.bf16 %v7483_v25, %v7480_v29  ;;  %v6859_v25 = vsel %vm1014_vm15, %v11226_v42, %v11235_v7  ;;  %v6819_v7 = vmul.f32 %v9845_v10, %v11228_v4 }
0x181e   : > { %7153 = vrot.lane.b32.xlu1 %v6833_v23, %s11830_s7  ;;  %6986 = vrot.lane.b32.xlu0 %v6974_v22, %s11819_s10  ;;  %v6967_v22 = vmul.f32 %v11221_v39, %v9924_v48 }
0x1820   : > { %v6975_v59 = vpack.c.bf16 %v6967_v22, %v6964_v45 }
0x1822   : > { %7337 = vrot.lane.b32.xlu1 %v7325_v38, %s11844_s20  ;;  %7079 = vrot.lane.b32.xlu0 %v7067_v60, %s11820_s6  ;;  %v7057_v38 = vmul.f32 %v11233_v46, %v9937_v55 }
0x1824   : > { %v7068_v60 = vpack.c.bf16 %v7060_v14, %v7057_v38 }
0x1826   : > { %6990 = vrot.lane.b32.xlu1 %v6976_v9, %s11819_s10  ;;  %7244 = vrot.lane.b32.xlu0 %v7232_v3, %s11822_s29  ;;  %v7225_v9 = vmul.f32 %v11221_v39, %v9957_v5  ;;  %v7493_v3 = vpack.c.bf16 %v7485_v6, %v7485_v6  ;;  %v7495_v39 = vpack.c.bf16 %v7487_v8, %v7487_v8 }
0x182a   : > { %7083 = vrot.lane.b32.xlu1 %v7069_v34, %s11820_s6  ;;  %7411 = vrot.lane.b32.xlu0 %v6833_v23, %s11845_s21  ;;  %v7479_v23 = vmul.f32 %v9970_v12, %v11228_v4  ;;  %v7484_v34 = vmul.f32 %v9974_v16, %v11241_v53 }
0x182c   : > { %v7490_v58 = vpack.c.bf16 %v7482_v44, %v7479_v23 }
0x182e   : > { %7248 = vrot.lane.b32.xlu1 %v7234_v49, %s11822_s29  ;;  %7341 = vrot.lane.b32.xlu0 %v7327_v40, %s11844_s20  ;;  %v11372_v49 = vpop.permute.xlu0 %7085 }
0x1832   : > { %7502 = vrot.lane.b32.xlu1 %v7490_v58, %s11846_s25  ;;  %6988 = vrot.lane.b32.xlu0 %v6975_v59, %s11819_s10 }
0x1836   : > { %7417 = vrot.lane.b32.xlu1 %v11157_v18, %s11845_s21  ;;  %7081 = vrot.lane.b32.xlu0 %v7068_v60, %s11820_s6  ;;  %v7222_v18 = vmul.f32 %v11233_v46, %v9957_v5  ;;  %v7486_v46 = vmul.f32 %v11149_v54, %v9983_v19 }
0x1838   : > { %v7233_v24 = vpack.c.bf16 %v7225_v9, %v7222_v18  ;;  %v7494_v53 = vpack.c.bf16 %v7486_v46, %v7486_v46 }
0x183a   : > { %7339 = vrot.lane.b32.xlu1 %v7326_v2, %s11844_s20  ;;  %7409 = vrot.lane.b32.xlu0 %v11239_v47, %s11845_s21  ;;  %v7481_v47 = vmul.f32 %v9974_v16, %v11251_v15  ;;  %v11370_v15 = vpop.permute.xlu1 %6996 }
0x183c   : > { %v7492_v35 = vpack.c.bf16 %v7484_v34, %v7481_v47  ;;  %v6821_v47 = vmul.f32 %v9845_v10, %v11230_v63 }
0x183e   : > { %7508 = vrot.lane.b32.xlu1 %v7493_v3, %s11846_s25  ;;  %7246 = vrot.lane.b32.xlu0 %v7233_v24, %s11822_s29  ;;  %v11374_v40 = vpop.permute.xlu1 %7087  ;;  %v6858_v24 = vsel %vm1014_vm15, %v11224_v41, %v11226_v42  ;;  %v6823_v41 = vmul.f32 %v9845_v10, %v11152_v52  ;;  %v8734_v42 = vld [vmem:[%s11715_s18 + $0x4] sm:$0xf] }
0x1842   : > { %7504 = vrot.lane.b32.xlu1 %v7491_v30, %s11846_s25  ;;  %7506 = vrot.lane.b32.xlu0 %v7492_v35, %s11846_s25  ;;  %v11378_v44 = vpop.permute.xlu1 %7157  ;;  %v6867_v30 = vsel %vm1706_vm9, %v6858_v24, 0  ;;  %v6824_v35 = vmul.f32 %v9849_v13, %v11149_v54  ;;  %v6826_v54 = vpack.c.bf16 %v6821_v47, %v6819_v7  ;;  %v7001_v24 = vsel %vm1147_vm1, %v11257_v0, %v11370_v15 }
0x1844   : > { %v6829_v52 = vpack.c.bf16 %v6824_v35, %v6824_v35 }
0x1846   : > { %7512 = vrot.lane.b32.xlu1 %v7495_v39, %s11846_s25  ;;  %7415 = vrot.lane.b32.xlu0 %v11163_v21, %s11845_s21  ;;  %v11376_v21 = vpop.permute.xlu0 %7089  ;;  %v6828_v39 = vpack.c.bf16 %v6823_v41, %v6823_v41  ;;  %v7093_v41 = vsel %vm1230_vm3, %v11372_v49, %v11374_v40 }
0x1847   : > { %v7094_v0 = vsel %vm1230_vm3, %v11374_v40, %v11376_v21 }
0x1848   : > { %v6917_v4 = vsel %vm1706_vm9, %v6828_v39, 0 }
0x184a   : > { %7419 = vrot.lane.b32.xlu0 %v11175_v17, %s11845_s21  ;;  %v11380_v22 = vpop.permute.xlu0 %7159  ;;  %v11382_v17 = vpop.permute.xlu1 %7161 }
0x184b   : > { %v7165_v40 = vsel %vm1293_vm2, %v11378_v44, %v11380_v22  ;;  %v7166_v21 = vsel %vm1293_vm2, %v11380_v22, %v11382_v17 }
0x184c   : > { %v7173_v44 = vsel %vm1706_vm9, %v7165_v40, 0 }
0x184e   : > { %7510 = vrot.lane.b32.xlu0 %v7494_v53, %s11846_s25  ;;  %v11384_v23 = vpop.permute.xlu0 %7250  ;;  %v11386_v45 = vpop.permute.xlu1 %7252 }
0x184f   : > { %v7258_v22 = vsel %vm11849_vm10, %v11384_v23, %v11386_v45 }
0x1850   : > { %v7266_v23 = vsel %vm1706_vm9, %v7258_v22, 0 }
0x1852   : > { %7575 = vperm.xlu0 %9503, %v7572_v61   ;;  %v11388_v58 = vpop.permute.xlu0 %7254  ;;  %v11390_v59 = vpop.permute.xlu1 %7343 }
0x1853   : > { %v7259_v17 = vsel %vm11850_vm7, %v11386_v45, %v11388_v58  ;;  %vm11858_vm7 = vcmask 769024  }
0x1856   : > { %v11392_v14 = vpop.permute.xlu0 %7345  ;;  %v11394_v38 = vpop.permute.xlu1 %7347 }
0x1857   : > { %v7351_v45 = vsel %vm11853_vm6, %v11390_v59, %v11392_v14  ;;  %v7352_v58 = vsel %vm11854_vm13, %v11392_v14, %v11394_v38  ;;  %vm11861_vm6 = vmmov %vm11858_vm7 }
0x1858   : > { %v7359_v59 = vsel %vm1706_vm9, %v7351_v45, 0  ;;  %vm11862_vm13 = vmmov %vm11861_vm6 }
0x1884   : > { %v6845_v60 = vpop.permute.xlu0 %6844  ;;  %v11396_v62 = vpop.permute.xlu1 %7151 }
0x1888   : > { %v7156_v26 = vpop.permute.xlu0 %7155  ;;  %v6849_v2 = vpop.permute.xlu1 %6848 }
0x188c   : > { %v6847_v6 = vpop.permute.xlu0 %6846  ;;  %v11398_v9 = vpop.permute.xlu1 %7413 }
0x188d   : > { %v6856_v18 = vsel %vm1014_vm15, %v6845_v60, %v6847_v6  ;;  %v6857_v3 = vsel %vm1014_vm15, %v6847_v6, %v6849_v2 }
0x188e   : > { %6872 = vmatprep.subr.bf16.mxu0 %v6857_v3 }
0x188f   : > { %6873 = vmatpush1.bf16.msra.mxu0 %v6856_v18 }
0x1890   : > { %v6987_v34 = vpop.permute.xlu0 %6986  ;;  %8735 = vmatprep.subr.msk.bf16.mxu0 %vm1706_vm9, %v6859_v25  ;;  %v7154_v29 = vpop.permute.xlu1 %7153 }
0x1891   : > { %v7164_v15 = vsel %vm1293_vm2, %v7154_v29, %v7156_v26  ;;  %v7163_v49 = vsel %vm1293_vm2, %v11396_v62, %v7154_v29  ;;  %v8742_v26 = vld [vmem:[%s11715_s18 + $0xc] sm:$0xf] }
0x1893   : > { %6875 = vmatpush1.bf16.msra.mxu0 %v6867_v30 }
0x1894   : > { %v7080_v8 = vpop.permute.xlu0 %7079  ;;  %6922 = vmatprep.subr.bf16.mxu0 %v6827_v51  ;;  %v11424_v63 = vpop.permute.xlu1 %7337 }
0x1896   : > { %8736 = vmatmul.mubr.msk.bf16.vlgmr.msra.gmra.mrb[112].mxu0 %vm6862_vm11, %v8734_v42  ;;  %v8739_v42 = vld [vmem:[%s11715_s18 + $0x8] sm:$0xf] }
0x1897   : > { %6923 = vmatpush1.bf16.msra.mxu0 %v6826_v54  ;;  %6954 = vmatprep.mubr.bf16.mxu0 %v9647_v31 }
0x1898   : > { %v7245_v46 = vpop.permute.xlu0 %7244  ;;  %8737 = vmatprep.subr.msk.bf16.mxu0 %vm1706_vm9, %v6829_v52  ;;  %v6991_v53 = vpop.permute.xlu1 %6990 }
0x189b   : > { %6925 = vmatpush1.bf16.msra.mxu0 %v6917_v4 }
0x189c   : > { %v11433_v20 = vpop.permute.xlu0 %7411  ;;  %v7084_v51 = vpop.permute.xlu1 %7083 }
0x189e   : > { %8738 = vmatmul.mubr.msk.bf16.vlgmr.msra.gmra.mrb[116].mxu0 %vm6862_vm11, %v6825_v27 }
0x189f   : > { %7138 = vmatprep.mubr.bf16.mxu0 %v9647_v31 }
0x18a0   : > { %v7342_v61 = vpop.permute.xlu0 %7341  ;;  %v7249_v60 = vpop.permute.xlu1 %7248 }
0x18a4   : > { %v6989_v2 = vpop.permute.xlu0 %6988  ;;  %v11437_v6 = vpop.permute.xlu1 %7502 }
0x18a5   : > { %v6998_v18 = vsel %vm1147_vm1, %v6987_v34, %v6989_v2  ;;  %v6999_v3 = vsel %vm1147_vm1, %v6989_v2, %v6991_v53  ;;  %v7008_v34 = vsel %vm1706_vm9, %v11263_v28, 0 }
0x18a6   : > { %7013 = vmatprep.subr.bf16.mxu1 %v6999_v3 }
0x18a7   : > { %7014 = vmatpush1.bf16.msra.mxu1 %v6998_v18 }
0x18a8   : > { %v7082_v25 = vpop.permute.xlu0 %7081  ;;  %8740 = vmatprep.subr.msk.bf16.mxu1 %vm1706_vm9, %v7001_v24  ;;  %v11445_v47 = vpop.permute.xlu1 %7417  ;;  %v8754_v24 = vld [vmem:[%s11715_s18 + $0x1c] sm:$0xf] }
0x18a9   : > { %v7091_v30 = vsel %vm1230_vm3, %v7080_v8, %v7082_v25  ;;  %v7092_v35 = vsel %vm1230_vm3, %v7082_v25, %v7084_v51  ;;  %v7101_v8 = vsel %vm1706_vm9, %v7093_v41, 0 }
0x18aa   : > { %7106 = vmatprep.subr.bf16.mxu0 %v7092_v35 }
0x18ab   : > { %7016 = vmatpush1.bf16.msra.mxu1 %v7008_v34  ;;  %7107 = vmatpush1.bf16.msra.mxu0 %v7091_v30  ;;  %v8757_v34 = vld [vmem:[%s11715_s18 + $0x20] sm:$0xf] }
0x18ac   : > { %v7410_v7 = vpop.permute.xlu0 %7409  ;;  %8743 = vmatprep.subr.msk.bf16.mxu0 %vm1706_vm9, %v7094_v0  ;;  %7178 = vmatprep.subr.bf16.mxu1 %v7164_v15  ;;  %v7340_v28 = vpop.permute.xlu1 %7339 }
0x18ad   : > { %v7350_v39 = vsel %vm11851_vm14, %v7340_v28, %v7342_v61  ;;  %v7349_v4 = vsel %vm11852_vm12, %v11424_v63, %v7340_v28  ;;  %v8748_v63 = vld [vmem:[%s11715_s18 + $0x14] sm:$0xf]  ;;  %vm11860_vm12 = vmmov %vm11858_vm7 }
0x18ae   : > { %8741 = vmatmul.mubr.msk.bf16.vlgmr.msra.gmra.mrb[128].mxu1 %vm6862_vm11, %v8739_v42 }
0x18af   : > { %7109 = vmatpush1.bf16.msra.mxu0 %v7101_v8  ;;  %7179 = vmatpush1.bf16.msra.mxu1 %v7163_v49 }
0x18b0   : > { %v7247_v54 = vpop.permute.xlu0 %7246  ;;  %8746 = vmatprep.subr.msk.bf16.mxu1 %vm1706_vm9, %v7166_v21  ;;  %7210 = vmatprep.mubr.bf16.mxu1 %v9647_v31  ;;  %v7509_v52 = vpop.permute.xlu1 %7508 }
0x18b1   : > { %v7256_v62 = vsel %vm11847_vm4, %v7245_v46, %v7247_v54  ;;  %v7257_v29 = vsel %vm11848_vm5, %v7247_v54, %v7249_v60  ;;  %v8745_v46 = vld [vmem:[%s11715_s18 + $0x10] sm:$0xf]  ;;  %vm11855_vm4 = vcmask 777216   ;;  %v8751_v60 = vld [vmem:[%s11715_s18 + $0x18] sm:$0xf] }
0x18b2   : > { %8744 = vmatmul.mubr.msk.bf16.vlgmr.msra.gmra.mrb[120].mxu0 %vm6862_vm11, %v8742_v26  ;;  %7271 = vmatprep.subr.bf16.mxu0 %v7257_v29  ;;  %v7422_v27 = vsel %vm11855_vm4, %v11433_v20, %v11398_v9  ;;  %vm11856_vm5 = vmmov %vm11855_vm4 }
0x18b3   : > { %7181 = vmatpush1.bf16.msra.mxu1 %v7173_v44  ;;  %7272 = vmatpush1.bf16.msra.mxu0 %v7256_v62  ;;  %v7421_v14 = vsel %vm11856_vm5, %v7410_v7, %v11433_v20  ;;  %vm11857_vm10 = vmmov %vm11855_vm4 }
0x18b4   : > { %v7507_v53 = vpop.permute.xlu0 %7506  ;;  %8749 = vmatprep.subr.msk.bf16.mxu0 %vm1706_vm9, %v7259_v17  ;;  %7364 = vmatprep.subr.bf16.mxu1 %v7350_v39  ;;  %v7505_v51 = vpop.permute.xlu1 %7504  ;;  %vm11859_vm14 = vmmov %vm11855_vm4  ;;  %vm11872_vm4 = vcmask 785408  }
0x18b5   : > { %7303 = vmatprep.mubr.bf16.mxu0 %v9647_v31  ;;  %v7515_v9 = vsel %vm11858_vm7, %v7505_v51, %v7507_v53  ;;  %v7514_v18 = vsel %vm11860_vm12, %v11437_v6, %v7505_v51  ;;  %vm11873_vm5 = vmmov %vm11872_vm4 }
0x18b6   : > { %8747 = vmatmul.mubr.msk.bf16.vlgmr.msra.gmra.mrb[132].mxu1 %vm6862_vm11, %v8745_v46  ;;  %vm11875_vm7 = vmmov %vm11859_vm14 }
0x18b7   : > { %7274 = vmatpush1.bf16.msra.mxu0 %v7266_v23  ;;  %7365 = vmatpush1.bf16.msra.mxu1 %v7349_v4 }
0x18b8   : > { %v7416_v61 = vpop.permute.xlu0 %7415  ;;  %8752 = vmatprep.subr.msk.bf16.mxu1 %vm1706_vm9, %v7352_v58  ;;  %7436 = vmatprep.subr.bf16.mxu0 %v7422_v27  ;;  %v7513_v25 = vpop.permute.xlu1 %7512 }
0x18b9   : > { %7396 = vmatprep.mubr.bf16.mxu1 %v9647_v31  ;;  %v7423_v38 = vsel %vm11857_vm10, %v7416_v61, %v11445_v47 }
0x18ba   : > { %8750 = vmatmul.mubr.msk.bf16.vlgmr.msra.gmra.mrb[124].mxu0 %vm6862_vm11, %v8748_v63  ;;  %v7431_v3 = vsel %vm1706_vm9, %v7423_v38, 0 }
0x18bb   : > { %7367 = vmatpush1.bf16.msra.mxu1 %v7359_v59  ;;  %7437 = vmatpush1.bf16.msra.mxu0 %v7421_v14 }
0x18bc   : > { %v7420_v2 = vpop.permute.xlu0 %7419  ;;  %7529 = vmatprep.subr.bf16.mxu1 %v7515_v9  ;;  %7468 = vmatprep.mubr.bf16.mxu0 %v9647_v31 }
0x18bd   : > { %v7424_v20 = vsel %vm11859_vm14, %v11445_v47, %v7420_v2  ;;  %vm11876_vm14 = vmmov %vm11875_vm7 }
0x18be   : > { %8753 = vmatmul.mubr.msk.bf16.vlgmr.msra.gmra.mrb[136].mxu1 %vm6862_vm11, %v8751_v60  ;;  %8755 = vmatprep.subr.msk.bf16.mxu0 %vm1706_vm9, %v7424_v20 }
0x18bf   : > { %7439 = vmatpush1.bf16.msra.mxu0 %v7431_v3  ;;  %7530 = vmatpush1.bf16.msra.mxu1 %v7514_v18 }
0x18c0   : > { %v7511_v30 = vpop.permute.xlu0 %7510  ;;  %7561 = vmatprep.mubr.bf16.mxu1 %v9647_v31 }
0x18c1   : > { %v7516_v47 = vsel %vm11861_vm6, %v7509_v52, %v7511_v30  ;;  %v7517_v6 = vsel %vm11862_vm13, %v7511_v30, %v7513_v25  ;;  %vm11878_vm13 = vmmov %vm11861_vm6 }
0x18c2   : > { %v7524_v35 = vsel %vm1706_vm9, %v7516_v47, 0  ;;  %8756 = vmatmul.mubr.msk.bf16.vlgmr.msra.gmra.mrb[128].mxu0 %vm6862_vm11, %v8754_v24  ;;  %8758 = vmatprep.subr.msk.bf16.mxu1 %vm1706_vm9, %v7517_v6 }
0x18c3   : > { %7532 = vmatpush1.bf16.msra.mxu1 %v7524_v35  ;;  %7660 = vmatprep.mubr.bf16.mxu0 %v9647_v31 }
0x18c6   : > { %8759 = vmatmul.mubr.msk.bf16.vlgmr.msra.gmra.mrb[140].mxu1 %vm6862_vm11, %v8757_v34 }
0x18c7   : > { %7710 = vmatprep.mubr.bf16.mxu1 %v9647_v31 }
0x1969   : > { %v6906_v41 = vpop.f32.mrb[112].mxu0 }
0x196a   : > { %v6908_v0 = vpop.f32.mrb[113].mxu0 }
0x196b   : > { %v6910_v15 = vpop.f32.mrb[114].mxu0 }
0x196c   : > { %v6911_v42 = vpop.f32.mrb[115].mxu0 }
0x1971   : > { %v6956_v7 = vpop.f32.mrb[116].mxu0 }
0x1972   : > { %v6957_v28 = vadd.f32 %v6956_v7, %v6906_v41  ;;  %v6958_v8 = vpop.f32.mrb[117].mxu0  ;;  %v7576_v7 = vpop.permute.xlu0 %7575 }
0x1973   : > { %v6959_v49 = vadd.f32 %v6958_v8, %v6908_v0  ;;  %v6960_v40 = vpop.f32.mrb[118].mxu0 }
0x1974   : > { %v6961_v21 = vpop.f32.mrb[119].mxu0 }
0x1981   : > { %v7047_v26 = vpop.f32.mrb[128].mxu1 }
0x1982   : > { %v7054_v54 = vadd.f32 %v7047_v26, %v6957_v28  ;;  %v7049_v62 = vpop.f32.mrb[129].mxu1 }
0x1983   : > { %v7055_v29 = vadd.f32 %v7049_v62, %v6959_v49  ;;  %v7051_v44 = vpop.f32.mrb[130].mxu1 }
0x1984   : > { %v7052_v52 = vpop.f32.mrb[131].mxu1 }
0x1985   : > { %v7140_v22 = vpop.f32.mrb[120].mxu0 }
0x1986   : > { %v7147_v17 = vadd.f32 %v7140_v22, %v7054_v54  ;;  %v7142_v39 = vpop.f32.mrb[121].mxu0 }
0x1987   : > { %v7148_v46 = vadd.f32 %v7142_v39, %v7055_v29  ;;  %v7144_v53 = vpop.f32.mrb[122].mxu0 }
0x1988   : > { %v7145_v23 = vpop.f32.mrb[123].mxu0 }
0x1989   : > { %v7212_v4 = vpop.f32.mrb[132].mxu1 }
0x198a   : > { %v7219_v45 = vadd.f32 %v7212_v4, %v7147_v17  ;;  %v7214_v58 = vpop.f32.mrb[133].mxu1 }
0x198b   : > { %v7220_v27 = vadd.f32 %v7214_v58, %v7148_v46  ;;  %v7216_v63 = vpop.f32.mrb[134].mxu1 }
0x198c   : > { %v7217_v51 = vpop.f32.mrb[135].mxu1 }
0x198d   : > { %v7305_v61 = vpop.f32.mrb[124].mxu0 }
0x198e   : > { %v7312_v59 = vadd.f32 %v7305_v61, %v7219_v45  ;;  %v7307_v14 = vpop.f32.mrb[125].mxu0 }
0x198f   : > { %v7313_v38 = vadd.f32 %v7307_v14, %v7220_v27  ;;  %v7309_v9 = vpop.f32.mrb[126].mxu0 }
0x1990   : > { %v7310_v60 = vpop.f32.mrb[127].mxu0 }
0x1991   : > { %v7398_v2 = vpop.f32.mrb[136].mxu1 }
0x1992   : > { %v7405_v20 = vadd.f32 %v7398_v2, %v7312_v59  ;;  %v7400_v18 = vpop.f32.mrb[137].mxu1 }
0x1993   : > { %v7406_v3 = vadd.f32 %v7400_v18, %v7313_v38  ;;  %v7402_v24 = vpop.f32.mrb[138].mxu1 }
0x1994   : > { %v7403_v25 = vpop.f32.mrb[139].mxu1 }
0x1995   : > { %v7470_v30 = vpop.f32.mrb[128].mxu0 }
0x1996   : > { %v7477_v47 = vadd.f32 %v7470_v30, %v7405_v20  ;;  %v7472_v6 = vpop.f32.mrb[129].mxu0 }
0x1997   : > { %v7478_v35 = vadd.f32 %v7472_v6, %v7406_v3  ;;  %v7474_v34 = vpop.f32.mrb[130].mxu0  ;;  %v8211_v6 = vld [vmem:[#allocation5] sm:$0x1] }
0x1998   : > { %v7475_v41 = vpop.f32.mrb[131].mxu0 }
0x1999   : > { %v7563_v0 = vpop.f32.mrb[140].mxu1 }
0x199a   : > { %v7570_v15 = vadd.f32 %v7563_v0, %v7477_v47  ;;  %v7565_v42 = vpop.f32.mrb[141].mxu1 }
0x199b   : > { %v7571_v28 = vadd.f32 %v7565_v42, %v7478_v35  ;;  %v7567_v8 = vpop.f32.mrb[142].mxu1 }
0x199c   : > { %v7578_v49 = vadd.f32 %v7576_v7, %v7570_v15  ;;  %v7568_v40 = vpop.f32.mrb[143].mxu1 }
0x199d   : > { %v7579_v21 = vadd.f32 %v7576_v7, %v7571_v28  ;;  %v8760_v28 = vld [vmem:[%s11863_s30 + $0x4] sm:$0xf] }
0x199e   : > { %v7580_v26 = vmax.f32 %v7578_v49, 0.0 }
0x199f   : > { %v7581_v54 = vmax.f32 %v7579_v21, 0.0 }
0x19a0   : > { %7584 = vrot.lane.b32.xlu1 %v7580_v26, %s11843_s3 }
0x19a1   : > { %7586 = vrot.lane.b32.xlu0 %v7581_v54, %s11843_s3 }
0x1a12   : > { %v7585_v62 = vpop.permute.xlu1 %7584 }
0x1a13   : > { %7592 = vst.msk [vmem:[#allocation2] sm:$0xff] %vm1674_vm8, %v7585_v62  ;;  %v7587_v29 = vpop.permute.xlu0 %7586 }
0x1a14   : > { %v11548_v44 = vsel %vm867_vm0, %v7585_v62, %v7587_v29  ;;  %7594 = vst.msk [vmem:[#allocation2 + $0x10] sm:$0xff] %vm867_vm0, %v7587_v29  ;;  %vm11864_vm0 = vcmask 64512  }
0x1a15   : > { %7593 = vst [vmem:[#allocation2 + $0x8] sm:$0xff] %v11548_v44  ;;  %v7599_v52 = vmul.f32 %v9849_v13, %v11548_v44  ;;  %v7600_v13 = vld [vmem:[%s11863_s30] sm:$0xf]  ;;  %v7606_v27 = vpack.c.bf16 %v11548_v44, %v11548_v44  ;;  %v7995_v24 = vmul.f32 %v11548_v44, %v9966_v11  ;;  %v8128_v25 = vmul.f32 %v11548_v44, %v9983_v19  ;;  %vm11866_vm8 = vmmov %vm11864_vm0 }
0x1a16   : > { %vm11871_vm11 = vmmov %vm11864_vm0 }
0x1a17   : > { %v7602_v22 = vpack.c.bf16 %v7599_v52, %v7599_v52  ;;  %v8133_v11 = vpack.c.bf16 %v8128_v25, %v8128_v25  ;;  %vm11874_vm10 = vmmov %vm11864_vm0 }
0x1a18   : > { %vm11877_vm12 = vmmov %vm11864_vm0 }
0x1a19   : > { %8763 = vmatprep.subr.msk.bf16.mxu1 %vm1706_vm9, %v7602_v22 }
0x1a1a   : > { %v7595_v17 = vld [vmem:[#allocation2] sm:$0xff] }
0x1a1b   : > { %v7605_v39 = vpack.c.bf16 %v7595_v17, %v7595_v17  ;;  %v7598_v46 = vmul.f32 %v9845_v10, %v7595_v17  ;;  %v7597_v53 = vld [vmem:[#allocation2 + $0x10] sm:$0xff]  ;;  %v7790_v58 = vmul.f32 %v9878_v32, %v7595_v17  ;;  %v7719_v63 = vmul.f32 %v9880_v33, %v7595_v17 }
0x1a1c   : > { %v7607_v4 = vpack.c.bf16 %v7597_v53, %v7597_v53  ;;  %v7792_v51 = vmul.f32 %v9894_v36, %v7597_v53  ;;  %v7721_v61 = vmul.f32 %v9896_v37, %v7597_v53  ;;  %v7720_v33 = vmul.f32 %v11548_v44, %v9924_v48 }
0x1a1d   : > { %7863 = vrot.lane.b32.xlu0 %v7605_v39, %s11830_s7  ;;  %7611 = vrot.lane.b32.xlu1 %v7605_v39, %s11825_s12  ;;  %v7601_v23 = vpack.c.bf16 %v7598_v46, %v7598_v46  ;;  %v7795_v10 = vpack.c.bf16 %v7790_v58, %v7790_v58  ;;  %v7724_v32 = vpack.c.bf16 %v7719_v63, %v7719_v63  ;;  %v8768_v58 = vld [vmem:[%s11863_s30 + $0xc] sm:$0xf] }
0x1a1e   : > { %v7797_v59 = vpack.c.bf16 %v7792_v51, %v7792_v51  ;;  %v7726_v14 = vpack.c.bf16 %v7721_v61, %v7721_v61  ;;  %v7994_v38 = vmul.f32 %v9914_v43, %v7595_v17  ;;  %v7725_v9 = vpack.c.bf16 %v7720_v33, %v7720_v33 }
0x1a1f   : > { %v7673_v45 = vsel %vm1706_vm9, %v7601_v23, 0  ;;  %v7923_v36 = vmul.f32 %v9928_v50, %v7595_v17  ;;  %v7791_v37 = vmul.f32 %v11548_v44, %v9937_v55  ;;  %v7925_v48 = vmul.f32 %v9941_v56, %v7597_v53 }
0x1a20   : > { %7679 = vmatpush1.bf16.msra.mxu1 %v7673_v45  ;;  %v7999_v60 = vpack.c.bf16 %v7994_v38, %v7994_v38  ;;  %v7996_v43 = vmul.f32 %v9943_v57, %v7597_v53  ;;  %v7924_v50 = vmul.f32 %v11548_v44, %v9957_v5  ;;  %v8000_v56 = vpack.c.bf16 %v7995_v24, %v7995_v24 }
0x1a21   : > { %7867 = vrot.lane.b32.xlu0 %v7607_v4, %s11830_s7  ;;  %7615 = vrot.lane.b32.xlu1 %v7607_v4, %s11825_s12  ;;  %v7928_v2 = vpack.c.bf16 %v7923_v36, %v7923_v36  ;;  %v7796_v20 = vpack.c.bf16 %v7791_v37, %v7791_v37  ;;  %v7930_v18 = vpack.c.bf16 %v7925_v48, %v7925_v48 }
0x1a22   : > { %v8001_v3 = vpack.c.bf16 %v7996_v43, %v7996_v43  ;;  %v7929_v55 = vpack.c.bf16 %v7924_v50, %v7924_v50  ;;  %v8127_v57 = vmul.f32 %v9970_v12, %v7595_v17  ;;  %v8129_v30 = vmul.f32 %v9974_v16, %v7597_v53  ;;  %v8765_v17 = vld [vmem:[%s11863_s30 + $0x8] sm:$0xf] }
0x1a23   : > { %8764 = vmatmul.mubr.msk.bf16.vlgmr.msra.gmra.mrb[144].mxu1 %vm11864_vm0, %v7600_v13 }
0x1a24   : > { %7850 = vmatprep.mubr.bf16.mxu1 %v9647_v31  ;;  %v8132_v5 = vpack.c.bf16 %v8127_v57, %v8127_v57  ;;  %v8134_v47 = vpack.c.bf16 %v8129_v30, %v8129_v30 }
0x1a25   : > { %7801 = vrot.lane.b32.xlu1 %v7795_v10, %s11820_s6  ;;  %7613 = vrot.lane.b32.xlu0 %v7606_v27, %s11825_s12  ;;  %s11880_s12 = sld [smem:[#allocation23_spill]] }
0x1a29   : > { %7865 = vrot.lane.b32.xlu1 %v7606_v27, %s11830_s7  ;;  %7730 = vrot.lane.b32.xlu0 %v7724_v32, %s11819_s10  ;;  %s11882_s7 = sld [smem:[#allocation7_spill]] }
0x1a2d   : > { %7805 = vrot.lane.b32.xlu1 %v7797_v59, %s11820_s6  ;;  %7734 = vrot.lane.b32.xlu0 %v7726_v14, %s11819_s10  ;;  %v8774_v14 = vld [vmem:[%s11863_s30 + $0x14] sm:$0xf] }
0x1a31   : > { %7732 = vrot.lane.b32.xlu1 %v7725_v9, %s11819_s10  ;;  %8005 = vrot.lane.b32.xlu0 %v7999_v60, %s11844_s20 }
0x1a35   : > { %7934 = vrot.lane.b32.xlu1 %v7928_v2, %s11822_s29  ;;  %7803 = vrot.lane.b32.xlu0 %v7796_v20, %s11820_s6  ;;  %s11865_s6 = sld [smem:[#allocation22_spill]]  ;;  %v8777_v2 = vld [vmem:[%s11863_s30 + $0x18] sm:$0xf] }
0x1a39   : > { %7938 = vrot.lane.b32.xlu1 %v7930_v18, %s11822_s29  ;;  %8009 = vrot.lane.b32.xlu0 %v8001_v3, %s11844_s20  ;;  %v8780_v3 = vld [vmem:[%s11863_s30 + $0x1c] sm:$0xf] }
0x1a3b   : > { %v8198_v12 = vld [vmem:[%s11865_s6] sm:$0xff] }
0x1a3d   : > { %8067 = vrot.lane.b32.xlu1 %v7605_v39, %s11845_s21  ;;  %7936 = vrot.lane.b32.xlu0 %v7929_v55, %s11822_s29 }
0x1a41   : > { %8007 = vrot.lane.b32.xlu1 %v8000_v56, %s11844_s20  ;;  %8069 = vrot.lane.b32.xlu0 %v7606_v27, %s11845_s21  ;;  %v8771_v27 = vld [vmem:[%s11863_s30 + $0x10] sm:$0xf]  ;;  %s8368_s20 = sshll.u32 %s11882_s7, 1 }
0x1a42   : > { %s865_s2 = scalar_lea.vmem %s11883_s1, %s8368_s20 }
0x1a45   : > { %8071 = vrot.lane.b32.xlu1 %v7607_v4, %s11845_s21  ;;  %8138 = vrot.lane.b32.xlu0 %v8132_v5, %s11846_s25  ;;  %v8783_v5 = vld [vmem:[%s11863_s30 + $0x20] sm:$0xf] }
0x1a49   : > { %8140 = vrot.lane.b32.xlu1 %v8133_v11, %s11846_s25  ;;  %8142 = vrot.lane.b32.xlu0 %v8134_v47, %s11846_s25 }
0x1a4d   : > { %8201 = vperm.xlu1 %9514, %v8198_v12   ;;  %8214 = vperm.xlu0 %9503, %v8211_v6  }
0x1a8f   : > { %v7864_v19 = vpop.permute.xlu0 %7863  ;;  %v7612_v35 = vpop.permute.xlu1 %7611 }
0x1a93   : > { %v7868_v16 = vpop.permute.xlu0 %7867  ;;  %v7616_v34 = vpop.permute.xlu1 %7615 }
0x1a97   : > { %v7802_v41 = vpop.permute.xlu1 %7801  ;;  %v7614_v0 = vpop.permute.xlu0 %7613 }
0x1a98   : > { %v7617_v15 = vsel %vm1014_vm15, %v7612_v35, %v7614_v0  ;;  %v7618_v42 = vsel %vm1014_vm15, %v7614_v0, %v7616_v34  ;;  %vm11867_vm15 = vmmov %vm11864_vm0 }
0x1a99   : > { %v7623_v7 = vsel %vm1706_vm9, %v7617_v15, 0  ;;  %8761 = vmatprep.subr.msk.bf16.mxu0 %vm1706_vm9, %v7618_v42 }
0x1a9a   : > { %7629 = vmatpush1.bf16.msra.mxu0 %v7623_v7 }
0x1a9b   : > { %v7866_v8 = vpop.permute.xlu1 %7865  ;;  %v7731_v49 = vpop.permute.xlu0 %7730 }
0x1a9c   : > { %v7869_v52 = vsel %vm1293_vm2, %v7864_v19, %v7866_v8  ;;  %v7870_v22 = vsel %vm1293_vm2, %v7866_v8, %v7868_v16  ;;  %vm11869_vm2 = vcmask 900096  }
0x1a9d   : > { %8762 = vmatmul.mubr.msk.bf16.vlgmr.msra.gmra.mrb[132].mxu0 %vm11866_vm8, %v8760_v28  ;;  %v7875_v4 = vsel %vm1706_vm9, %v7869_v52, 0  ;;  %vm11879_vm8 = vmmov %vm11864_vm0 }
0x1a9e   : > { %7779 = vmatprep.mubr.bf16.mxu0 %v9647_v31 }
0x1a9f   : > { %v7806_v40 = vpop.permute.xlu1 %7805  ;;  %v7735_v21 = vpop.permute.xlu0 %7734 }
0x1aa3   : > { %v7733_v26 = vpop.permute.xlu1 %7732  ;;  %v8006_v54 = vpop.permute.xlu0 %8005 }
0x1aa4   : > { %v7736_v62 = vsel %vm1147_vm1, %v7731_v49, %v7733_v26  ;;  %v7737_v29 = vsel %vm1147_vm1, %v7733_v26, %v7735_v21  ;;  %vm11868_vm1 = vmmov %vm11864_vm0 }
0x1aa5   : > { %v7742_v44 = vsel %vm1706_vm9, %v7736_v62, 0  ;;  %8766 = vmatprep.subr.msk.bf16.mxu0 %vm1706_vm9, %v7737_v29 }
0x1aa6   : > { %7748 = vmatpush1.bf16.msra.mxu0 %v7742_v44 }
0x1aa7   : > { %v7935_v39 = vpop.permute.xlu1 %7934  ;;  %8772 = vmatprep.subr.msk.bf16.mxu0 %vm1706_vm9, %v7870_v22  ;;  %v7804_v46 = vpop.permute.xlu0 %7803 }
0x1aa8   : > { %v7807_v53 = vsel %vm1230_vm3, %v7802_v41, %v7804_v46  ;;  %v7808_v23 = vsel %vm1230_vm3, %v7804_v46, %v7806_v40  ;;  %vm11870_vm3 = vmmov %vm11869_vm2 }
0x1aa9   : > { %v7813_v45 = vsel %vm1706_vm9, %v7807_v53, 0  ;;  %8767 = vmatmul.mubr.msk.bf16.vlgmr.msra.gmra.mrb[136].mxu0 %vm11867_vm15, %v8765_v17  ;;  %8769 = vmatprep.subr.msk.bf16.mxu1 %vm1706_vm9, %v7808_v23  ;;  %vm11881_vm15 = vmmov %vm11864_vm0 }
0x1aaa   : > { %7819 = vmatpush1.bf16.msra.mxu1 %v7813_v45  ;;  %7881 = vmatpush1.bf16.msra.mxu0 %v7875_v4 }
0x1aab   : > { %v7939_v13 = vpop.permute.xlu1 %7938  ;;  %v8010_v10 = vpop.permute.xlu0 %8009  ;;  %7912 = vmatprep.mubr.bf16.mxu0 %v9647_v31 }
0x1aad   : > { %8770 = vmatmul.mubr.msk.bf16.vlgmr.msra.gmra.mrb[148].mxu1 %vm11868_vm1, %v8768_v58 }
0x1aae   : > { %7983 = vmatprep.mubr.bf16.mxu1 %v9647_v31 }
0x1aaf   : > { %v8068_v63 = vpop.permute.xlu1 %8067  ;;  %v7937_v32 = vpop.permute.xlu0 %7936 }
0x1ab0   : > { %v7940_v51 = vsel %vm11869_vm2, %v7935_v39, %v7937_v32  ;;  %v7941_v61 = vsel %vm11870_vm3, %v7937_v32, %v7939_v13 }
0x1ab1   : > { %v7946_v59 = vsel %vm1706_vm9, %v7940_v51, 0  ;;  %8773 = vmatmul.mubr.msk.bf16.vlgmr.msra.gmra.mrb[140].mxu0 %vm11871_vm11, %v8771_v27  ;;  %8775 = vmatprep.subr.msk.bf16.mxu1 %vm1706_vm9, %v7941_v61 }
0x1ab2   : > { %7952 = vmatpush1.bf16.msra.mxu1 %v7946_v59  ;;  %8054 = vmatprep.mubr.bf16.mxu0 %v9647_v31 }
0x1ab3   : > { %v8008_v33 = vpop.permute.xlu1 %8007  ;;  %v8070_v38 = vpop.permute.xlu0 %8069 }
0x1ab4   : > { %v8011_v9 = vsel %vm11872_vm4, %v8006_v54, %v8008_v33  ;;  %v8012_v60 = vsel %vm11873_vm5, %v8008_v33, %v8010_v10  ;;  %v8073_v37 = vsel %vm11875_vm7, %v8068_v63, %v8070_v38 }
0x1ab5   : > { %v8017_v36 = vsel %vm1706_vm9, %v8011_v9, 0  ;;  %8776 = vmatmul.mubr.msk.bf16.vlgmr.msra.gmra.mrb[152].mxu1 %vm11874_vm10, %v8774_v14  ;;  %8778 = vmatprep.subr.msk.bf16.mxu0 %vm1706_vm9, %v8012_v60  ;;  %v8079_v18 = vsel %vm1706_vm9, %v8073_v37, 0 }
0x1ab6   : > { %8023 = vmatpush1.bf16.msra.mxu0 %v8017_v36  ;;  %8116 = vmatprep.mubr.bf16.mxu1 %v9647_v31 }
0x1ab7   : > { %v8072_v20 = vpop.permute.xlu1 %8071  ;;  %v8139_v48 = vpop.permute.xlu0 %8138 }
0x1ab8   : > { %v8074_v43 = vsel %vm11876_vm14, %v8070_v38, %v8072_v20 }
0x1ab9   : > { %8779 = vmatmul.mubr.msk.bf16.vlgmr.msra.gmra.mrb[144].mxu0 %vm11877_vm12, %v8777_v2  ;;  %8781 = vmatprep.subr.msk.bf16.mxu1 %vm1706_vm9, %v8074_v43 }
0x1aba   : > { %8085 = vmatpush1.bf16.msra.mxu1 %v8079_v18  ;;  %8187 = vmatprep.mubr.bf16.mxu0 %v9647_v31 }
0x1abb   : > { %v8141_v50 = vpop.permute.xlu1 %8140  ;;  %v8143_v55 = vpop.permute.xlu0 %8142 }
0x1abc   : > { %v8144_v24 = vsel %vm11861_vm6, %v8139_v48, %v8141_v50  ;;  %v8145_v56 = vsel %vm11878_vm13, %v8141_v50, %v8143_v55 }
0x1abd   : > { %v8150_v57 = vsel %vm1706_vm9, %v8144_v24, 0  ;;  %8782 = vmatmul.mubr.msk.bf16.vlgmr.msra.gmra.mrb[156].mxu1 %vm11864_vm0, %v8780_v3  ;;  %8784 = vmatprep.subr.msk.bf16.mxu0 %vm1706_vm9, %v8145_v56  ;;  %v8208_v56 = vld [vmem:[%s11880_s12] sm:$0x1] }
0x1abe   : > { %8156 = vmatpush1.bf16.msra.mxu0 %v8150_v57  ;;  %8262 = vmatprep.mubr.bf16.mxu1 %v9647_v31  ;;  %v8218_v57 = vshrl.u32 %v899_v1, 7 }
0x1ac1   : > { %8785 = vmatmul.mubr.msk.bf16.vlgmr.msra.gmra.mrb[148].mxu0 %vm11879_vm8, %v8783_v5  ;;  %v9667_v5 = vmov 1966171168  }
0x1acc   : > { %v8202_v36 = vpop.permute.xlu1 %8201 }
0x1af6   : > { %v7712_v25 = vpop.f32.mrb[144].mxu1 }
0x1af7   : > { %v7714_v30 = vpop.f32.mrb[145].mxu1 }
0x1af8   : > { %v7716_v11 = vpop.f32.mrb[146].mxu1 }
0x1af9   : > { %v7717_v47 = vpop.f32.mrb[147].mxu1  ;;  %v8215_v11 = vpop.permute.xlu0 %8214 }
0x1b70   : > { %v7662_v12 = vpop.f32.mrb[132].mxu0 }
0x1b71   : > { %v7664_v6 = vpop.f32.mrb[133].mxu0  ;;  %v7713_v19 = vadd.f32 %v7712_v25, %v7662_v12  ;;  %v8275_v25 = vunpack.c.l.s4 %v9667_v5 }
0x1b72   : > { %v7666_v35 = vpop.f32.mrb[134].mxu0  ;;  %v7715_v16 = vadd.f32 %v7714_v30, %v7664_v6  ;;  %v8219_v30 = vsub.s32 0, %v8218_v57 }
0x1b73   : > { %v7667_v34 = vpop.f32.mrb[135].mxu0  ;;  %v8276_v47 = vunpack.c.0.s8 %v8275_v25 }
0x1b74   : > { %v8220_v12 = vrot.slane %v8215_v11, %v8219_v30 }
0x1b75   : > { %v8279_v34 = vsub.s32 %v8276_v47, %v8218_v57 }
0x1b7c   : > { %v7781_v41 = vpop.f32.mrb[136].mxu0 }
0x1b7d   : > { %v7788_v0 = vadd.f32 %v7781_v41, %v7713_v19  ;;  %v7783_v15 = vpop.f32.mrb[137].mxu0 }
0x1b7e   : > { %v7789_v42 = vadd.f32 %v7783_v15, %v7715_v16  ;;  %v7785_v7 = vpop.f32.mrb[138].mxu0 }
0x1b7f   : > { %v7786_v28 = vpop.f32.mrb[139].mxu0 }
0x1b80   : > { %v7852_v8 = vpop.f32.mrb[148].mxu1 }
0x1b81   : > { %v7859_v31 = vadd.f32 %v7852_v8, %v7788_v0  ;;  %v7854_v49 = vpop.f32.mrb[149].mxu1 }
0x1b82   : > { %v7860_v40 = vadd.f32 %v7854_v49, %v7789_v42  ;;  %v7856_v21 = vpop.f32.mrb[150].mxu1 }
0x1b83   : > { %v7857_v26 = vpop.f32.mrb[151].mxu1 }
0x1b84   : > { %v7914_v54 = vpop.f32.mrb[140].mxu0 }
0x1b85   : > { %v7921_v62 = vadd.f32 %v7914_v54, %v7859_v31  ;;  %v7916_v29 = vpop.f32.mrb[141].mxu0 }
0x1b86   : > { %v7922_v44 = vadd.f32 %v7916_v29, %v7860_v40  ;;  %v7918_v52 = vpop.f32.mrb[142].mxu0 }
0x1b87   : > { %v7919_v22 = vpop.f32.mrb[143].mxu0 }
0x1b88   : > { %v7985_v17 = vpop.f32.mrb[152].mxu1 }
0x1b89   : > { %v7992_v39 = vadd.f32 %v7985_v17, %v7921_v62  ;;  %v7987_v46 = vpop.f32.mrb[153].mxu1 }
0x1b8a   : > { %v7993_v53 = vadd.f32 %v7987_v46, %v7922_v44  ;;  %v7989_v23 = vpop.f32.mrb[154].mxu1 }
0x1b8b   : > { %v7990_v4 = vpop.f32.mrb[155].mxu1 }
0x1b8c   : > { %v8056_v45 = vpop.f32.mrb[144].mxu0 }
0x1b8d   : > { %v8063_v58 = vadd.f32 %v8056_v45, %v7992_v39  ;;  %v8058_v13 = vpop.f32.mrb[145].mxu0 }
0x1b8e   : > { %v8064_v10 = vadd.f32 %v8058_v13, %v7993_v53  ;;  %v8060_v27 = vpop.f32.mrb[146].mxu0 }
0x1b8f   : > { %v8061_v63 = vpop.f32.mrb[147].mxu0 }
0x1b90   : > { %v8118_v32 = vpop.f32.mrb[156].mxu1 }
0x1b91   : > { %v8125_v51 = vadd.f32 %v8118_v32, %v8063_v58  ;;  %v8120_v61 = vpop.f32.mrb[157].mxu1 }
0x1b92   : > { %v8126_v59 = vadd.f32 %v8120_v61, %v8064_v10  ;;  %v8122_v14 = vpop.f32.mrb[158].mxu1 }
0x1b93   : > { %v8123_v33 = vpop.f32.mrb[159].mxu1 }
0x1b94   : > { %v8189_v38 = vpop.f32.mrb[148].mxu0 }
0x1b95   : > { %v8196_v9 = vadd.f32 %v8189_v38, %v8125_v51  ;;  %v8191_v60 = vpop.f32.mrb[149].mxu0 }
0x1b96   : > { %v8197_v37 = vadd.f32 %v8191_v60, %v8126_v59  ;;  %v8193_v2 = vpop.f32.mrb[150].mxu0 }
0x1b97   : > { %v8204_v20 = vadd.f32 %v8202_v36, %v8196_v9  ;;  %v8194_v48 = vpop.f32.mrb[151].mxu0 }
0x1b98   : > { %v8205_v43 = vadd.f32 %v8202_v36, %v8197_v37 }
0x1b99   : > { %v8206_v18 = vmax.f32 %v8204_v20, 0.0 }
0x1b9a   : > { %v8207_v3 = vmax.f32 %v8205_v43, 0.0 }
0x1b9b   : > { %v8209_v50 = vpack.c.bf16 %v8206_v18, %v8206_v18 }
0x1b9c   : > { %v8210_v55 = vpack.c.bf16 %v8207_v3, %v8207_v3 }
0x1b9d   : > { %v8225_v24 = vsel %vm1706_vm9, %v8209_v50, 0 }
0x1b9e   : > { %8786 = vmatprep.subr.msk.bf16.mxu1 %vm1706_vm9, %v8210_v55  ;;  %vm8291_vm9 = vcmp.lt.s32.totalorder %v899_v1, 256 }
0x1b9f   : > { %8231 = vmatpush1.bf16.msra.mxu1 %v8225_v24 }
0x1ba2   : > { %8787 = vmatmul.mubr.msk.bf16.vlgmr.msra.gmra.mrb[160].mxu1 %vm11881_vm15, %v8208_v56 }
0x1c75   : > { %v8264_v6 = vpop.f32.mrb[160].mxu1 }
0x1c76   : > { %v8265_v19 = vadd.f32 %v8264_v6, %v8220_v12  ;;  %v8266_v35 = vpop.f32.mrb[161].mxu1 }
0x1c77   : > { %v8267_v16 = vadd.f32 %v8266_v35, %v8220_v12  ;;  %v8268_v41 = vpop.f32.mrb[162].mxu1 }
0x1c78   : > { %v8269_v0 = vpop.f32.mrb[163].mxu1 }
0x1c79   : > { %v8273_v15 = vcombine.low %v8265_v19, %v8267_v16 }
0x1c7b   : > { %v8280_v42 = vrot.slane %v8273_v15, %v8279_v34 }
0x1c7d   : > { %v8287_v7 = vrot.slane %v8280_v42, %v8279_v34 }
0x1c7f   : > { %8293 = vst.msk [vmem:[%s865_s2] sm:$0x3] %vm8291_vm9, %v8287_v7 }
0x1c80 PF: > { %s11884_s0 = sld [smem:[#allocation6_spill]] }
0x1c86   : > { %s40_s9 = sadd.s32 1, %s11884_s0  }
0x1c87   : > { %p37_p4 = scmp.ge.s32.totalorder %s40_s9, 4  }
0x1c89   :  { %39 = sbr.rel (!%p37_p4) target bundleno = 20 (0x14), region = 245 }

</bundles_post_ra>
